<compile_context>
chip_gen: v6e
topology: v6e:2x2x1
jax: 0.10.0
libtpu: 0.0.40
codegen_flags: <defaults>
</compile_context>

<pallas_src>
import numpy as np

import jax
import jax.numpy as jnp
from jax.experimental import pallas as pl
from jax.experimental.pallas import tpu as pltpu

# ---------------------------- network constants ----------------------------
K = 5                       # conv kernel size
H_IN, W_IN = 28, 28         # MNIST input (view(-1, 320) forces 28x28)
W_IN_PAD = 32               # input width padded 28 -> 32 lanes
P1_H, P1_W, C1 = 12, 12, 10  # conv1 pooled output 12x12x10
F1 = 128                    # conv1 feature lanes: 12*10 = 120 -> 128
P2_H, P2_W, C2 = 4, 4, 20    # conv2 pooled output 4x4x20
F2 = 128                    # conv2 feature lanes: 4*20 = 80 -> 128
FC1_PAD = 64                # fc1 hidden width 50 -> 64
N_CLASSES = 10

MAX_TB = 512                # upper bound on images per grid step


def _round_up(x, m):
    return -(-x // m) * m


def _pick_batch_tile(n):
    """Images per grid step + step count: divisor-aware, even number of steps
    (both v7x TensorCores stay busy), tile a multiple of 8 for (8,128) layout."""
    steps = max(2, -(-n // MAX_TB))
    if steps % 2:
        steps += 1
    tb = _round_up(-(-n // steps), 8)
    return tb, steps


def _padded_block_bytes(shape, itemsize=4):
    """VMEM bytes of one block after (8, 128) tiling of the last two dims."""
    lead = 1
    for d in shape[:-2]:
        lead *= d
    sub = _round_up(shape[-2], 8)
    lane = _round_up(shape[-1], 128)
    return lead * sub * lane * itemsize


def _vmem_limit(*block_shapes):
    """Per-call scoped-VMEM budget: double-buffered blocks + slack, <= 48 MiB
    so there is headroom on v7x's 64 MiB physical VMEM."""
    need = 2 * sum(_padded_block_bytes(s) for s in block_shapes) + (4 << 20)
    return int(min(max(need, 16 << 20), 48 << 20))


# ----------------------------- Pallas kernels ------------------------------

def _conv1_pool_relu_kernel(x_ref, m_ref, b_ref, o_ref):
    """conv1 (1->10, 5x5) + bias + 2x2 maxpool + ReLU for a block of images.

    x_ref: (28, TB, 32)   input rows (H leading), width zero-padded 28 -> 32
    m_ref: (5, 32, 256)   banded conv matrices per kernel row; lanes [0:128]
                          produce the even pooling columns, [128:256] the odd
                          ones (feature order f = jp*10 + c_out, 120 valid)
    b_ref: (1, 128)       conv1 bias replicated per pooled column (zero padded)
    o_ref: (12, TB, 128)  pooled + ReLU activations
    """
    bias = b_ref[...]
    for ip in range(P1_H):                      # pooled output row
        acc0 = acc1 = None                      # pool-row parity di = 0 / 1
        for kh in range(K):
            m_kh = m_ref[kh]
            d0 = jnp.dot(x_ref[2 * ip + kh], m_kh,
                         preferred_element_type=jnp.float32)
            d1 = jnp.dot(x_ref[2 * ip + 1 + kh], m_kh,
                         preferred_element_type=jnp.float32)
            acc0 = d0 if acc0 is None else acc0 + d0
            acc1 = d1 if acc1 is None else acc1 + d1
        # 2x2 max-pool = elementwise max over the 4 (row-parity, col-parity) quads
        pooled = jnp.maximum(jnp.maximum(acc0[:, :F1], acc0[:, F1:]),
                             jnp.maximum(acc1[:, :F1], acc1[:, F1:]))
        o_ref[ip] = jnp.maximum(pooled + bias, 0.0)


def _conv2_mlp_kernel(a_ref, m_ref, cb_ref, w1_ref, b1_ref, w2_ref, b2_ref,
                      o_ref):
    """conv2 (10->20, 5x5) + bias + 2x2 maxpool + ReLU + fc1 + ReLU + fc2
    + log_softmax, all on the VMEM-resident tile (dropouts are identity).

    a_ref:  (12, TB, 128)  conv1 stage output (f = j*10 + c_in, 120 valid lanes)
    m_ref:  (5, 128, 256)  banded conv2 matrices (even / odd pool columns)
    cb_ref: (1, 128)       conv2 bias per pooled column (f = jp*20 + c_out)
    w1_ref: (4, 128, 64)   fc1 weights, pre-permuted: chunk ip consumes pooled
                           output row ip; zero rows for the padded lanes
    b1_ref: (1, 64)        fc1 bias (50 valid)
    w2_ref: (64, 10)       fc2 weights (rows >= 50 are zero)
    b2_ref: (1, 10)        fc2 bias
    o_ref:  (TB, 10)       log-probabilities
    """
    cbias = cb_ref[...]
    h = None
    for ip in range(P2_H):
        acc0 = acc1 = None
        for kh in range(K):
            m_kh = m_ref[kh]
            d0 = jnp.dot(a_ref[2 * ip + kh], m_kh,
                         preferred_element_type=jnp.float32)
            d1 = jnp.dot(a_ref[2 * ip + 1 + kh], m_kh,
                         preferred_element_type=jnp.float32)
            acc0 = d0 if acc0 is None else acc0 + d0
            acc1 = d1 if acc1 is None else acc1 + d1
        pooled = jnp.maximum(jnp.maximum(acc0[:, :F2], acc0[:, F2:]),
                             jnp.maximum(acc1[:, :F2], acc1[:, F2:]))
        z = jnp.maximum(pooled + cbias, 0.0)                    # (TB, 128)
        part = jnp.dot(z, w1_ref[ip], preferred_element_type=jnp.float32)
        h = part if h is None else h + part                     # fc1 partials
    h = jnp.maximum(h + b1_ref[...], 0.0)                       # fc1 + ReLU
    # TODO(synk): F.dropout after fc1 is identity here (inference semantics).
    logits = jnp.dot(h, w2_ref[...],
                     preferred_element_type=jnp.float32) + b2_ref[...]
    s = logits - jnp.max(logits, axis=-1, keepdims=True)
    o_ref[...] = s - jnp.log(jnp.sum(jnp.exp(s), axis=-1, keepdims=True))


# ----------------------------- kernel wrappers ------------------------------

def conv1_pool_relu(x, m1, cb1, tb, steps):
    """x: (28, Npad, 32) -> a1: (12, Npad, 128)."""
    npad = x.shape[1]
    blocks = ((H_IN, tb, W_IN_PAD), (K, W_IN_PAD, 2 * F1), (1, F1),
              (P1_H, tb, F1))
    return pl.pallas_call(
        _conv1_pool_relu_kernel,
        out_shape=jax.ShapeDtypeStruct((P1_H, npad, F1), jnp.float32),
        grid=(steps,),
        in_specs=[
            pl.BlockSpec(blocks[0], lambda i: (0, i, 0)),
            pl.BlockSpec(blocks[1], lambda i: (0, 0, 0)),   # resident weights
            pl.BlockSpec(blocks[2], lambda i: (0, 0)),
        ],
        out_specs=pl.BlockSpec(blocks[3], lambda i: (0, i, 0)),
        compiler_params=pltpu.CompilerParams(
            dimension_semantics=("parallel",),
            vmem_limit_bytes=_vmem_limit(*blocks)),
    )(x, m1, cb1)


def conv2_mlp_head(a1, m2, cb2, fw1, fb1, fw2, fb2, tb, steps):
    """a1: (12, Npad, 128) -> (Npad, 10) log-probabilities."""
    npad = a1.shape[1]
    blocks = ((P1_H, tb, F1), (K, F1, 2 * F2), (1, F2),
              (P2_H, F2, FC1_PAD), (1, FC1_PAD), (FC1_PAD, N_CLASSES),
              (1, N_CLASSES), (tb, N_CLASSES))
    return pl.pallas_call(
        _conv2_mlp_kernel,
        out_shape=jax.ShapeDtypeStruct((npad, N_CLASSES), jnp.float32),
        grid=(steps,),
        in_specs=[
            pl.BlockSpec(blocks[0], lambda i: (0, i, 0)),
            pl.BlockSpec(blocks[1], lambda i: (0, 0, 0)),
            pl.BlockSpec(blocks[2], lambda i: (0, 0)),
            pl.BlockSpec(blocks[3], lambda i: (0, 0, 0)),
            pl.BlockSpec(blocks[4], lambda i: (0, 0)),
            pl.BlockSpec(blocks[5], lambda i: (0, 0)),
            pl.BlockSpec(blocks[6], lambda i: (0, 0)),
        ],
        out_specs=pl.BlockSpec(blocks[7], lambda i: (i, 0)),
        compiler_params=pltpu.CompilerParams(
            dimension_semantics=("parallel",),
            vmem_limit_bytes=_vmem_limit(*blocks)),
    )(a1, m2, cb2, fw1, fb1, fw2, fb2)


# ------------------------------ param packing -------------------------------

def init_params(key):
    """Deterministic synthetic parameters with the PyTorch __init__ shapes."""
    ks = jax.random.split(key, 8)

    def u(k, shape, fan_in):
        bound = 1.0 / jnp.sqrt(float(fan_in))
        return jax.random.uniform(k, shape, jnp.float32, -bound, bound)

    return {
        "conv1_w": u(ks[0], (10, 1, 5, 5), 1 * 5 * 5),    # Conv2d(1, 10, 5)
        "conv1_b": u(ks[1], (10,), 1 * 5 * 5),
        "conv2_w": u(ks[2], (20, 10, 5, 5), 10 * 5 * 5),  # Conv2d(10, 20, 5)
        "conv2_b": u(ks[3], (20,), 10 * 5 * 5),
        "fc1_w":   u(ks[4], (50, 320), 320),              # Linear(320, 50)
        "fc1_b":   u(ks[5], (50,), 320),
        "fc2_w":   u(ks[6], (10, 50), 50),                # Linear(50, 10)
        "fc2_b":   u(ks[7], (10,), 50),
    }


def _conv_band(w, n_pool, pad_rows, pad_cols):
    """Pack a (C_out, C_in, K, K) conv filter into banded width-matmul matrices.

    m[kh, (2*jp+dj+kw)*C_in + ci, dj*pad_cols + jp*C_out + co] = w[co, ci, kh, kw]
    so that  row_of_input(h=i+kh) @ m[kh]  summed over kh yields the conv output
    (minus bias) at row i for the even (dj=0) / odd (dj=1) pooling columns jp.
    """
    c_out, c_in, k, _ = w.shape
    m = np.zeros((k, pad_rows, 2 * pad_cols), np.float32)
    for kh in range(k):
        for dj in range(2):
            for jp in range(n_pool):
                for kw in range(k):
                    r0 = (2 * jp + dj + kw) * c_in
                    c0 = dj * pad_cols + jp * c_out
                    m[kh, r0:r0 + c_in, c0:c0 + c_out] = w[:, :, kh, kw].T
    return m


def prepare_params(raw):
    """One-time layout work: banded conv matrices, replicated biases, and the
    fc weights pre-permuted / zero-padded to lane-dense shapes."""
    w1 = np.asarray(raw["conv1_w"], np.float32)
    b1 = np.asarray(raw["conv1_b"], np.float32)
    w2 = np.asarray(raw["conv2_w"], np.float32)
    b2 = np.asarray(raw["conv2_b"], np.float32)
    fc1w = np.asarray(raw["fc1_w"], np.float32)   # (50, 320)
    fc1b = np.asarray(raw["fc1_b"], np.float32)
    fc2w = np.asarray(raw["fc2_w"], np.float32)   # (10, 50)
    fc2b = np.asarray(raw["fc2_b"], np.float32)

    m1 = _conv_band(w1, n_pool=P1_W, pad_rows=W_IN_PAD, pad_cols=F1)  # (5,32,256)
    m2 = _conv_band(w2, n_pool=P2_W, pad_rows=F1, pad_cols=F2)        # (5,128,256)

    cb1 = np.zeros((1, F1), np.float32)
    for jp in range(P1_W):
        cb1[0, jp * C1:(jp + 1) * C1] = b1
    cb2 = np.zeros((1, F2), np.float32)
    for jp in range(P2_W):
        cb2[0, jp * C2:(jp + 1) * C2] = b2

    # fc1 consumes pooled conv2 rows in (h, w, c) order; PyTorch's view(-1,320)
    # is (c, h, w) -> permute the weight columns once here instead of
    # transposing activations at runtime.
    fw1 = np.zeros((P2_H, F2, FC1_PAD), np.float32)
    fc1w4 = fc1w.reshape(50, C2, P2_H, P2_W)      # [k, c, h, w]
    for ip in range(P2_H):
        for jp in range(P2_W):
            fw1[ip, jp * C2:(jp + 1) * C2, :50] = fc1w4[:, :, ip, jp].T
    fb1 = np.zeros((1, FC1_PAD), np.float32)
    fb1[0, :50] = fc1b
    fw2 = np.zeros((FC1_PAD, N_CLASSES), np.float32)
    fw2[:50, :] = fc2w.T
    fb2 = fc2b.reshape(1, N_CLASSES)

    packed = dict(m1=m1, cb1=cb1, m2=m2, cb2=cb2,
                  fw1=fw1, fb1=fb1, fw2=fw2, fb2=fb2)
    return {k: jnp.asarray(v) for k, v in packed.items()}


# --------------------------------- forward ----------------------------------

def forward(params, x_nchw):
    """x_nchw: (N, 1, 28, 28) float32 -> (N, 10) log-probabilities."""
    n = x_nchw.shape[0]
    tb, steps = _pick_batch_tile(n)
    npad = tb * steps
    x = x_nchw.reshape(n, H_IN, W_IN).astype(jnp.float32)
    # (N,28,28) -> (28, Npad, 32): H leading so the kernel indexes rows on the
    # leading ref dim; width zero-padded to 32 lanes; batch padded to the tile.
    x = jnp.pad(x, ((0, npad - n), (0, 0), (0, W_IN_PAD - W_IN)))
    x = jnp.transpose(x, (1, 0, 2))

    a1 = conv1_pool_relu(x, params["m1"], params["cb1"], tb, steps)
    out = conv2_mlp_head(a1, params["m2"], params["cb2"], params["fw1"],
                         params["fb1"], params["fw2"], params["fb2"], tb, steps)
    return out[:n]


# ------------------------------ JAX reference --------------------------------

def _maxpool2x2(x):
    n, c, h, w = x.shape
    return x.reshape(n, c, h // 2, 2, w // 2, 2).max(axis=(3, 5))


def reference_forward(raw, x_nchw):
    """Pure-JAX (non-Pallas) reference of the PyTorch forward (eval mode)."""
    hi = jax.lax.Precision.HIGHEST
    dn = ("NCHW", "OIHW", "NCHW")
    x = x_nchw.astype(jnp.float32)
    y = jax.lax.conv_general_dilated(x, raw["conv1_w"], (1, 1), "VALID",
                                     dimension_numbers=dn, precision=hi)
    y = jnp.maximum(_maxpool2x2(y + raw["conv1_b"][None, :, None, None]), 0.0)
    y = jax.lax.conv_general_dilated(y, raw["conv2_w"], (1, 1), "VALID",
                                     dimension_numbers=dn, precision=hi)
    y = jnp.maximum(_maxpool2x2(y + raw["conv2_b"][None, :, None, None]), 0.0)
    feat = y.reshape(y.shape[0], -1)
    h = jnp.maximum(
        jnp.matmul(feat, raw["fc1_w"].T, precision=hi) + raw["fc1_b"], 0.0)
    logits = jnp.matmul(h, raw["fc2_w"].T, precision=hi) + raw["fc2_b"]
    return jax.nn.log_softmax(logits, axis=-1)


if __name__ == "__main__":
    key = jax.random.PRNGKey(0)
    kx, kp = jax.random.split(key)
    raw = init_params(kp)
    params = prepare_params(raw)
    # MNIST-shaped input (view(-1, 320) forces 28x28); small batch.
    x = jax.random.normal(kx, (8, 1, 28, 28), jnp.float32)

    fwd = jax.jit(forward)
    out = jax.block_until_ready(fwd(params, x))

    assert out.shape == (8, 10), out.shape
    assert bool(jnp.all(jnp.isfinite(out)))
    # log-probabilities must exponentiate-sum to 1
    assert bool(jnp.allclose(jnp.sum(jnp.exp(out), axis=-1), 1.0, atol=1e-4))
    # cross-check the fused Pallas pipeline against the pure-JAX reference
    ref = reference_forward(raw, x)
    assert bool(jnp.allclose(out, ref, atol=2e-3, rtol=2e-3)), \
        float(jnp.max(jnp.abs(out - ref)))
    print("KERNEL_OK")
</pallas_src>

<mosaic_0001>
module attributes {stable_mosaic.version = 11 : i64} {
  func.func @_conv1_pool_relu_kernel(%arg0: i32, %arg1: memref<28x8x32xf32, #tpu.memory_space<vmem>>, %arg2: memref<5x32x256xf32, #tpu.memory_space<vmem>>, %arg3: memref<1x128xf32, #tpu.memory_space<vmem>>, %arg4: memref<12x8x128xf32, #tpu.memory_space<vmem>>) attributes {dimension_semantics = [#tpu.dimension_semantics<parallel>], iteration_bounds = array<i64: 2>, scalar_prefetch = 0 : i64, scratch_operands = 0 : i64, tpu.core_type = #tpu.core_type<tc>, window_params = [{transform_indices = @transform_0, window_bounds = array<i64: 28, 8, 32>}, {pipeline_mode = #tpu.pipeline_mode<synchronous>, transform_indices = @transform_1, window_bounds = array<i64: 5, 32, 256>}, {pipeline_mode = #tpu.pipeline_mode<synchronous>, transform_indices = @transform_2, window_bounds = array<i64: 1, 128>}, {transform_indices = @transform_3, window_bounds = array<i64: 12, 8, 128>}]} {
    %c0 = arith.constant 0 : index
    %c0_0 = arith.constant 0 : index
    %0 = vector.load %arg3[%c0, %c0_0] : memref<1x128xf32, #tpu.memory_space<vmem>>, vector<1x128xf32>
    %c0_1 = arith.constant 0 : index
    %c0_2 = arith.constant 0 : index
    %c0_3 = arith.constant 0 : index
    %1 = vector.load %arg2[%c0_1, %c0_2, %c0_3] : memref<5x32x256xf32, #tpu.memory_space<vmem>>, vector<1x32x256xf32>
    %2 = vector.shape_cast %1 : vector<1x32x256xf32> to vector<32x256xf32>
    %c0_4 = arith.constant 0 : index
    %c0_5 = arith.constant 0 : index
    %c0_6 = arith.constant 0 : index
    %3 = vector.load %arg1[%c0_4, %c0_5, %c0_6] : memref<28x8x32xf32, #tpu.memory_space<vmem>>, vector<1x8x32xf32>
    %4 = vector.shape_cast %3 : vector<1x8x32xf32> to vector<8x32xf32>
    %cst = arith.constant dense<0.000000e+00> : vector<8x256xf32>
    %5 = tpu.matmul %4, %2, %cst {dimension_numbers = #tpu.dot_dimension_numbers<[1], [0], [0], [1], [0, 0, 1, 1], [], []>} : vector<8x32xf32>, vector<32x256xf32>, vector<8x256xf32> -> vector<8x256xf32>
    %c1 = arith.constant 1 : index
    %c0_7 = arith.constant 0 : index
    %c0_8 = arith.constant 0 : index
    %6 = vector.load %arg1[%c1, %c0_7, %c0_8] : memref<28x8x32xf32, #tpu.memory_space<vmem>>, vector<1x8x32xf32>
    %7 = vector.shape_cast %6 : vector<1x8x32xf32> to vector<8x32xf32>
    %cst_9 = arith.constant dense<0.000000e+00> : vector<8x256xf32>
    %8 = tpu.matmul %7, %2, %cst_9 {dimension_numbers = #tpu.dot_dimension_numbers<[1], [0], [0], [1], [0, 0, 1, 1], [], []>} : vector<8x32xf32>, vector<32x256xf32>, vector<8x256xf32> -> vector<8x256xf32>
    %c1_10 = arith.constant 1 : index
    %c0_11 = arith.constant 0 : index
    %c0_12 = arith.constant 0 : index
    %9 = vector.load %arg2[%c1_10, %c0_11, %c0_12] : memref<5x32x256xf32, #tpu.memory_space<vmem>>, vector<1x32x256xf32>
    %10 = vector.shape_cast %9 : vector<1x32x256xf32> to vector<32x256xf32>
    %c1_13 = arith.constant 1 : index
    %c0_14 = arith.constant 0 : index
    %c0_15 = arith.constant 0 : index
    %11 = vector.load %arg1[%c1_13, %c0_14, %c0_15] : memref<28x8x32xf32, #tpu.memory_space<vmem>>, vector<1x8x32xf32>
    %12 = vector.shape_cast %11 : vector<1x8x32xf32> to vector<8x32xf32>
    %cst_16 = arith.constant dense<0.000000e+00> : vector<8x256xf32>
    %13 = tpu.matmul %12, %10, %cst_16 {dimension_numbers = #tpu.dot_dimension_numbers<[1], [0], [0], [1], [0, 0, 1, 1], [], []>} : vector<8x32xf32>, vector<32x256xf32>, vector<8x256xf32> -> vector<8x256xf32>
    %c2 = arith.constant 2 : index
    %c0_17 = arith.constant 0 : index
    %c0_18 = arith.constant 0 : index
    %14 = vector.load %arg1[%c2, %c0_17, %c0_18] : memref<28x8x32xf32, #tpu.memory_space<vmem>>, vector<1x8x32xf32>
    %15 = vector.shape_cast %14 : vector<1x8x32xf32> to vector<8x32xf32>
    %cst_19 = arith.constant dense<0.000000e+00> : vector<8x256xf32>
    %16 = tpu.matmul %15, %10, %cst_19 {dimension_numbers = #tpu.dot_dimension_numbers<[1], [0], [0], [1], [0, 0, 1, 1], [], []>} : vector<8x32xf32>, vector<32x256xf32>, vector<8x256xf32> -> vector<8x256xf32>
    %17 = arith.addf %5, %13 : vector<8x256xf32>
    %18 = arith.addf %8, %16 : vector<8x256xf32>
    %c2_20 = arith.constant 2 : index
    %c0_21 = arith.constant 0 : index
    %c0_22 = arith.constant 0 : index
    %19 = vector.load %arg2[%c2_20, %c0_21, %c0_22] : memref<5x32x256xf32, #tpu.memory_space<vmem>>, vector<1x32x256xf32>
    %20 = vector.shape_cast %19 : vector<1x32x256xf32> to vector<32x256xf32>
    %c2_23 = arith.constant 2 : index
    %c0_24 = arith.constant 0 : index
    %c0_25 = arith.constant 0 : index
    %21 = vector.load %arg1[%c2_23, %c0_24, %c0_25] : memref<28x8x32xf32, #tpu.memory_space<vmem>>, vector<1x8x32xf32>
    %22 = vector.shape_cast %21 : vector<1x8x32xf32> to vector<8x32xf32>
    %cst_26 = arith.constant dense<0.000000e+00> : vector<8x256xf32>
    %23 = tpu.matmul %22, %20, %cst_26 {dimension_numbers = #tpu.dot_dimension_numbers<[1], [0], [0], [1], [0, 0, 1, 1], [], []>} : vector<8x32xf32>, vector<32x256xf32>, vector<8x256xf32> -> vector<8x256xf32>
    %c3 = arith.constant 3 : index
    %c0_27 = arith.constant 0 : index
    %c0_28 = arith.constant 0 : index
    %24 = vector.load %arg1[%c3, %c0_27, %c0_28] : memref<28x8x32xf32, #tpu.memory_space<vmem>>, vector<1x8x32xf32>
    %25 = vector.shape_cast %24 : vector<1x8x32xf32> to vector<8x32xf32>
    %cst_29 = arith.constant dense<0.000000e+00> : vector<8x256xf32>
    %26 = tpu.matmul %25, %20, %cst_29 {dimension_numbers = #tpu.dot_dimension_numbers<[1], [0], [0], [1], [0, 0, 1, 1], [], []>} : vector<8x32xf32>, vector<32x256xf32>, vector<8x256xf32> -> vector<8x256xf32>
    %27 = arith.addf %17, %23 : vector<8x256xf32>
    %28 = arith.addf %18, %26 : vector<8x256xf32>
    %c3_30 = arith.constant 3 : index
    %c0_31 = arith.constant 0 : index
    %c0_32 = arith.constant 0 : index
    %29 = vector.load %arg2[%c3_30, %c0_31, %c0_32] : memref<5x32x256xf32, #tpu.memory_space<vmem>>, vector<1x32x256xf32>
    %30 = vector.shape_cast %29 : vector<1x32x256xf32> to vector<32x256xf32>
    %c3_33 = arith.constant 3 : index
    %c0_34 = arith.constant 0 : index
    %c0_35 = arith.constant 0 : index
    %31 = vector.load %arg1[%c3_33, %c0_34, %c0_35] : memref<28x8x32xf32, #tpu.memory_space<vmem>>, vector<1x8x32xf32>
    %32 = vector.shape_cast %31 : vector<1x8x32xf32> to vector<8x32xf32>
    %cst_36 = arith.constant dense<0.000000e+00> : vector<8x256xf32>
    %33 = tpu.matmul %32, %30, %cst_36 {dimension_numbers = #tpu.dot_dimension_numbers<[1], [0], [0], [1], [0, 0, 1, 1], [], []>} : vector<8x32xf32>, vector<32x256xf32>, vector<8x256xf32> -> vector<8x256xf32>
    %c4 = arith.constant 4 : index
    %c0_37 = arith.constant 0 : index
    %c0_38 = arith.constant 0 : index
    %34 = vector.load %arg1[%c4, %c0_37, %c0_38] : memref<28x8x32xf32, #tpu.memory_space<vmem>>, vector<1x8x32xf32>
    %35 = vector.shape_cast %34 : vector<1x8x32xf32> to vector<8x32xf32>
    %cst_39 = arith.constant dense<0.000000e+00> : vector<8x256xf32>
    %36 = tpu.matmul %35, %30, %cst_39 {dimension_numbers = #tpu.dot_dimension_numbers<[1], [0], [0], [1], [0, 0, 1, 1], [], []>} : vector<8x32xf32>, vector<32x256xf32>, vector<8x256xf32> -> vector<8x256xf32>
    %37 = arith.addf %27, %33 : vector<8x256xf32>
    %38 = arith.addf %28, %36 : vector<8x256xf32>
    %c4_40 = arith.constant 4 : index
    %c0_41 = arith.constant 0 : index
    %c0_42 = arith.constant 0 : index
    %39 = vector.load %arg2[%c4_40, %c0_41, %c0_42] : memref<5x32x256xf32, #tpu.memory_space<vmem>>, vector<1x32x256xf32>
    %40 = vector.shape_cast %39 : vector<1x32x256xf32> to vector<32x256xf32>
    %c4_43 = arith.constant 4 : index
    %c0_44 = arith.constant 0 : index
    %c0_45 = arith.constant 0 : index
    %41 = vector.load %arg1[%c4_43, %c0_44, %c0_45] : memref<28x8x32xf32, #tpu.memory_space<vmem>>, vector<1x8x32xf32>
    %42 = vector.shape_cast %41 : vector<1x8x32xf32> to vector<8x32xf32>
    %cst_46 = arith.constant dense<0.000000e+00> : vector<8x256xf32>
    %43 = tpu.matmul %42, %40, %cst_46 {dimension_numbers = #tpu.dot_dimension_numbers<[1], [0], [0], [1], [0, 0, 1, 1], [], []>} : vector<8x32xf32>, vector<32x256xf32>, vector<8x256xf32> -> vector<8x256xf32>
    %c5 = arith.constant 5 : index
    %c0_47 = arith.constant 0 : index
    %c0_48 = arith.constant 0 : index
    %44 = vector.load %arg1[%c5, %c0_47, %c0_48] : memref<28x8x32xf32, #tpu.memory_space<vmem>>, vector<1x8x32xf32>
    %45 = vector.shape_cast %44 : vector<1x8x32xf32> to vector<8x32xf32>
    %cst_49 = arith.constant dense<0.000000e+00> : vector<8x256xf32>
    %46 = tpu.matmul %45, %40, %cst_49 {dimension_numbers = #tpu.dot_dimension_numbers<[1], [0], [0], [1], [0, 0, 1, 1], [], []>} : vector<8x32xf32>, vector<32x256xf32>, vector<8x256xf32> -> vector<8x256xf32>
    %47 = arith.addf %37, %43 : vector<8x256xf32>
    %48 = arith.addf %38, %46 : vector<8x256xf32>
    %49 = vector.extract_strided_slice %47 {offsets = [0, 0], sizes = [8, 128], strides = [1, 1]} : vector<8x256xf32> to vector<8x128xf32>
    %50 = vector.extract_strided_slice %47 {offsets = [0, 128], sizes = [8, 128], strides = [1, 1]} : vector<8x256xf32> to vector<8x128xf32>
    %51 = arith.maximumf %49, %50 : vector<8x128xf32>
    %52 = vector.extract_strided_slice %48 {offsets = [0, 0], sizes = [8, 128], strides = [1, 1]} : vector<8x256xf32> to vector<8x128xf32>
    %53 = vector.extract_strided_slice %48 {offsets = [0, 128], sizes = [8, 128], strides = [1, 1]} : vector<8x256xf32> to vector<8x128xf32>
    %54 = arith.maximumf %52, %53 : vector<8x128xf32>
    %55 = arith.maximumf %51, %54 : vector<8x128xf32>
    %56 = vector.broadcast %0 : vector<1x128xf32> to vector<8x128xf32>
    %57 = arith.addf %55, %56 : vector<8x128xf32>
    %cst_50 = arith.constant 0.000000e+00 : f32
    %58 = vector.broadcast %cst_50 : f32 to vector<8x128xf32>
    %59 = arith.maximumf %57, %58 : vector<8x128xf32>
    %c0_51 = arith.constant 0 : index
    %c0_52 = arith.constant 0 : index
    %c0_53 = arith.constant 0 : index
    %60 = vector.load %arg4[%c0_51, %c0_52, %c0_53] : memref<12x8x128xf32, #tpu.memory_space<vmem>>, vector<1x8x128xf32>
    %61 = vector.shape_cast %60 : vector<1x8x128xf32> to vector<8x128xf32>
    %62 = vector.shape_cast %59 : vector<8x128xf32> to vector<1x8x128xf32>
    tpu.vector_store %arg4[%c0_51, %c0_52, %c0_53], %62 {strides = array<i32>} : memref<12x8x128xf32, #tpu.memory_space<vmem>>, vector<1x8x128xf32>,
    %c0_54 = arith.constant 0 : index
    %c0_55 = arith.constant 0 : index
    %c0_56 = arith.constant 0 : index
    %63 = vector.load %arg2[%c0_54, %c0_55, %c0_56] : memref<5x32x256xf32, #tpu.memory_space<vmem>>, vector<1x32x256xf32>
    %64 = vector.shape_cast %63 : vector<1x32x256xf32> to vector<32x256xf32>
    %c2_57 = arith.constant 2 : index
    %c0_58 = arith.constant 0 : index
    %c0_59 = arith.constant 0 : index
    %65 = vector.load %arg1[%c2_57, %c0_58, %c0_59] : memref<28x8x32xf32, #tpu.memory_space<vmem>>, vector<1x8x32xf32>
    %66 = vector.shape_cast %65 : vector<1x8x32xf32> to vector<8x32xf32>
    %cst_60 = arith.constant dense<0.000000e+00> : vector<8x256xf32>
    %67 = tpu.matmul %66, %64, %cst_60 {dimension_numbers = #tpu.dot_dimension_numbers<[1], [0], [0], [1], [0, 0, 1, 1], [], []>} : vector<8x32xf32>, vector<32x256xf32>, vector<8x256xf32> -> vector<8x256xf32>
    %c3_61 = arith.constant 3 : index
    %c0_62 = arith.constant 0 : index
    %c0_63 = arith.constant 0 : index
    %68 = vector.load %arg1[%c3_61, %c0_62, %c0_63] : memref<28x8x32xf32, #tpu.memory_space<vmem>>, vector<1x8x32xf32>
    %69 = vector.shape_cast %68 : vector<1x8x32xf32> to vector<8x32xf32>
    %cst_64 = arith.constant dense<0.000000e+00> : vector<8x256xf32>
    %70 = tpu.matmul %69, %64, %cst_64 {dimension_numbers = #tpu.dot_dimension_numbers<[1], [0], [0], [1], [0, 0, 1, 1], [], []>} : vector<8x32xf32>, vector<32x256xf32>, vector<8x256xf32> -> vector<8x256xf32>
    %c1_65 = arith.constant 1 : index
    %c0_66 = arith.constant 0 : index
    %c0_67 = arith.constant 0 : index
    %71 = vector.load %arg2[%c1_65, %c0_66, %c0_67] : memref<5x32x256xf32, #tpu.memory_space<vmem>>, vector<1x32x256xf32>
    %72 = vector.shape_cast %71 : vector<1x32x256xf32> to vector<32x256xf32>
    %c3_68 = arith.constant 3 : index
    %c0_69 = arith.constant 0 : index
    %c0_70 = arith.constant 0 : index
    %73 = vector.load %arg1[%c3_68, %c0_69, %c0_70] : memref<28x8x32xf32, #tpu.memory_space<vmem>>, vector<1x8x32xf32>
    %74 = vector.shape_cast %73 : vector<1x8x32xf32> to vector<8x32xf32>
    %cst_71 = arith.constant dense<0.000000e+00> : vector<8x256xf32>
    %75 = tpu.matmul %74, %72, %cst_71 {dimension_numbers = #tpu.dot_dimension_numbers<[1], [0], [0], [1], [0, 0, 1, 1], [], []>} : vector<8x32xf32>, vector<32x256xf32>, vector<8x256xf32> -> vector<8x256xf32>
    %c4_72 = arith.constant 4 : index
    %c0_73 = arith.constant 0 : index
    %c0_74 = arith.constant 0 : index
    %76 = vector.load %arg1[%c4_72, %c0_73, %c0_74] : memref<28x8x32xf32, #tpu.memory_space<vmem>>, vector<1x8x32xf32>
    %77 = vector.shape_cast %76 : vector<1x8x32xf32> to vector<8x32xf32>
    %cst_75 = arith.constant dense<0.000000e+00> : vector<8x256xf32>
    %78 = tpu.matmul %77, %72, %cst_75 {dimension_numbers = #tpu.dot_dimension_numbers<[1], [0], [0], [1], [0, 0, 1, 1], [], []>} : vector<8x32xf32>, vector<32x256xf32>, vector<8x256xf32> -> vector<8x256xf32>
    %79 = arith.addf %67, %75 : vector<8x256xf32>
    %80 = arith.addf %70, %78 : vector<8x256xf32>
    %c2_76 = arith.constant 2 : index
    %c0_77 = arith.constant 0 : index
    %c0_78 = arith.constant 0 : index
    %81 = vector.load %arg2[%c2_76, %c0_77, %c0_78] : memref<5x32x256xf32, #tpu.memory_space<vmem>>, vector<1x32x256xf32>
    %82 = vector.shape_cast %81 : vector<1x32x256xf32> to vector<32x256xf32>
    %c4_79 = arith.constant 4 : index
    %c0_80 = arith.constant 0 : index
    %c0_81 = arith.constant 0 : index
    %83 = vector.load %arg1[%c4_79, %c0_80, %c0_81] : memref<28x8x32xf32, #tpu.memory_space<vmem>>, vector<1x8x32xf32>
    %84 = vector.shape_cast %83 : vector<1x8x32xf32> to vector<8x32xf32>
    %cst_82 = arith.constant dense<0.000000e+00> : vector<8x256xf32>
    %85 = tpu.matmul %84, %82, %cst_82 {dimension_numbers = #tpu.dot_dimension_numbers<[1], [0], [0], [1], [0, 0, 1, 1], [], []>} : vector<8x32xf32>, vector<32x256xf32>, vector<8x256xf32> -> vector<8x256xf32>
    %c5_83 = arith.constant 5 : index
    %c0_84 = arith.constant 0 : index
    %c0_85 = arith.constant 0 : index
    %86 = vector.load %arg1[%c5_83, %c0_84, %c0_85] : memref<28x8x32xf32, #tpu.memory_space<vmem>>, vector<1x8x32xf32>
    %87 = vector.shape_cast %86 : vector<1x8x32xf32> to vector<8x32xf32>
    %cst_86 = arith.constant dense<0.000000e+00> : vector<8x256xf32>
    %88 = tpu.matmul %87, %82, %cst_86 {dimension_numbers = #tpu.dot_dimension_numbers<[1], [0], [0], [1], [0, 0, 1, 1], [], []>} : vector<8x32xf32>, vector<32x256xf32>, vector<8x256xf32> -> vector<8x256xf32>
    %89 = arith.addf %79, %85 : vector<8x256xf32>
    %90 = arith.addf %80, %88 : vector<8x256xf32>
    %c3_87 = arith.constant 3 : index
    %c0_88 = arith.constant 0 : index
    %c0_89 = arith.constant 0 : index
    %91 = vector.load %arg2[%c3_87, %c0_88, %c0_89] : memref<5x32x256xf32, #tpu.memory_space<vmem>>, vector<1x32x256xf32>
    %92 = vector.shape_cast %91 : vector<1x32x256xf32> to vector<32x256xf32>
    %c5_90 = arith.constant 5 : index
    %c0_91 = arith.constant 0 : index
    %c0_92 = arith.constant 0 : index
    %93 = vector.load %arg1[%c5_90, %c0_91, %c0_92] : memref<28x8x32xf32, #tpu.memory_space<vmem>>, vector<1x8x32xf32>
    %94 = vector.shape_cast %93 : vector<1x8x32xf32> to vector<8x32xf32>
    %cst_93 = arith.constant dense<0.000000e+00> : vector<8x256xf32>
    %95 = tpu.matmul %94, %92, %cst_93 {dimension_numbers = #tpu.dot_dimension_numbers<[1], [0], [0], [1], [0, 0, 1, 1], [], []>} : vector<8x32xf32>, vector<32x256xf32>, vector<8x256xf32> -> vector<8x256xf32>
    %c6 = arith.constant 6 : index
    %c0_94 = arith.constant 0 : index
    %c0_95 = arith.constant 0 : index
    %96 = vector.load %arg1[%c6, %c0_94, %c0_95] : memref<28x8x32xf32, #tpu.memory_space<vmem>>, vector<1x8x32xf32>
    %97 = vector.shape_cast %96 : vector<1x8x32xf32> to vector<8x32xf32>
    %cst_96 = arith.constant dense<0.000000e+00> : vector<8x256xf32>
    %98 = tpu.matmul %97, %92, %cst_96 {dimension_numbers = #tpu.dot_dimension_numbers<[1], [0], [0], [1], [0, 0, 1, 1], [], []>} : vector<8x32xf32>, vector<32x256xf32>, vector<8x256xf32> -> vector<8x256xf32>
    %99 = arith.addf %89, %95 : vector<8x256xf32>
    %100 = arith.addf %90, %98 : vector<8x256xf32>
    %c4_97 = arith.constant 4 : index
    %c0_98 = arith.constant 0 : index
    %c0_99 = arith.constant 0 : index
    %101 = vector.load %arg2[%c4_97, %c0_98, %c0_99] : memref<5x32x256xf32, #tpu.memory_space<vmem>>, vector<1x32x256xf32>
    %102 = vector.shape_cast %101 : vector<1x32x256xf32> to vector<32x256xf32>
    %c6_100 = arith.constant 6 : index
    %c0_101 = arith.constant 0 : index
    %c0_102 = arith.constant 0 : index
    %103 = vector.load %arg1[%c6_100, %c0_101, %c0_102] : memref<28x8x32xf32, #tpu.memory_space<vmem>>, vector<1x8x32xf32>
    %104 = vector.shape_cast %103 : vector<1x8x32xf32> to vector<8x32xf32>
    %cst_103 = arith.constant dense<0.000000e+00> : vector<8x256xf32>
    %105 = tpu.matmul %104, %102, %cst_103 {dimension_numbers = #tpu.dot_dimension_numbers<[1], [0], [0], [1], [0, 0, 1, 1], [], []>} : vector<8x32xf32>, vector<32x256xf32>, vector<8x256xf32> -> vector<8x256xf32>
    %c7 = arith.constant 7 : index
    %c0_104 = arith.constant 0 : index
    %c0_105 = arith.constant 0 : index
    %106 = vector.load %arg1[%c7, %c0_104, %c0_105] : memref<28x8x32xf32, #tpu.memory_space<vmem>>, vector<1x8x32xf32>
    %107 = vector.shape_cast %106 : vector<1x8x32xf32> to vector<8x32xf32>
    %cst_106 = arith.constant dense<0.000000e+00> : vector<8x256xf32>
    %108 = tpu.matmul %107, %102, %cst_106 {dimension_numbers = #tpu.dot_dimension_numbers<[1], [0], [0], [1], [0, 0, 1, 1], [], []>} : vector<8x32xf32>, vector<32x256xf32>, vector<8x256xf32> -> vector<8x256xf32>
    %109 = arith.addf %99, %105 : vector<8x256xf32>
    %110 = arith.addf %100, %108 : vector<8x256xf32>
    %111 = vector.extract_strided_slice %109 {offsets = [0, 0], sizes = [8, 128], strides = [1, 1]} : vector<8x256xf32> to vector<8x128xf32>
    %112 = vector.extract_strided_slice %109 {offsets = [0, 128], sizes = [8, 128], strides = [1, 1]} : vector<8x256xf32> to vector<8x128xf32>
    %113 = arith.maximumf %111, %112 : vector<8x128xf32>
    %114 = vector.extract_strided_slice %110 {offsets = [0, 0], sizes = [8, 128], strides = [1, 1]} : vector<8x256xf32> to vector<8x128xf32>
    %115 = vector.extract_strided_slice %110 {offsets = [0, 128], sizes = [8, 128], strides = [1, 1]} : vector<8x256xf32> to vector<8x128xf32>
    %116 = arith.maximumf %114, %115 : vector<8x128xf32>
    %117 = arith.maximumf %113, %116 : vector<8x128xf32>
    %118 = vector.broadcast %0 : vector<1x128xf32> to vector<8x128xf32>
    %119 = arith.addf %117, %118 : vector<8x128xf32>
    %cst_107 = arith.constant 0.000000e+00 : f32
    %120 = vector.broadcast %cst_107 : f32 to vector<8x128xf32>
    %121 = arith.maximumf %119, %120 : vector<8x128xf32>
    %c1_108 = arith.constant 1 : index
    %c0_109 = arith.constant 0 : index
    %c0_110 = arith.constant 0 : index
    %122 = vector.load %arg4[%c1_108, %c0_109, %c0_110] : memref<12x8x128xf32, #tpu.memory_space<vmem>>, vector<1x8x128xf32>
    %123 = vector.shape_cast %122 : vector<1x8x128xf32> to vector<8x128xf32>
    %124 = vector.shape_cast %121 : vector<8x128xf32> to vector<1x8x128xf32>
    tpu.vector_store %arg4[%c1_108, %c0_109, %c0_110], %124 {strides = array<i32>} : memref<12x8x128xf32, #tpu.memory_space<vmem>>, vector<1x8x128xf32>,
    %c0_111 = arith.constant 0 : index
    %c0_112 = arith.constant 0 : index
    %c0_113 = arith.constant 0 : index
    %125 = vector.load %arg2[%c0_111, %c0_112, %c0_113] : memref<5x32x256xf32, #tpu.memory_space<vmem>>, vector<1x32x256xf32>
    %126 = vector.shape_cast %125 : vector<1x32x256xf32> to vector<32x256xf32>
    %c4_114 = arith.constant 4 : index
    %c0_115 = arith.constant 0 : index
    %c0_116 = arith.constant 0 : index
    %127 = vector.load %arg1[%c4_114, %c0_115, %c0_116] : memref<28x8x32xf32, #tpu.memory_space<vmem>>, vector<1x8x32xf32>
    %128 = vector.shape_cast %127 : vector<1x8x32xf32> to vector<8x32xf32>
    %cst_117 = arith.constant dense<0.000000e+00> : vector<8x256xf32>
    %129 = tpu.matmul %128, %126, %cst_117 {dimension_numbers = #tpu.dot_dimension_numbers<[1], [0], [0], [1], [0, 0, 1, 1], [], []>} : vector<8x32xf32>, vector<32x256xf32>, vector<8x256xf32> -> vector<8x256xf32>
    %c5_118 = arith.constant 5 : index
    %c0_119 = arith.constant 0 : index
    %c0_120 = arith.constant 0 : index
    %130 = vector.load %arg1[%c5_118, %c0_119, %c0_120] : memref<28x8x32xf32, #tpu.memory_space<vmem>>, vector<1x8x32xf32>
    %131 = vector.shape_cast %130 : vector<1x8x32xf32> to vector<8x32xf32>
    %cst_121 = arith.constant dense<0.000000e+00> : vector<8x256xf32>
    %132 = tpu.matmul %131, %126, %cst_121 {dimension_numbers = #tpu.dot_dimension_numbers<[1], [0], [0], [1], [0, 0, 1, 1], [], []>} : vector<8x32xf32>, vector<32x256xf32>, vector<8x256xf32> -> vector<8x256xf32>
    %c1_122 = arith.constant 1 : index
    %c0_123 = arith.constant 0 : index
    %c0_124 = arith.constant 0 : index
    %133 = vector.load %arg2[%c1_122, %c0_123, %c0_124] : memref<5x32x256xf32, #tpu.memory_space<vmem>>, vector<1x32x256xf32>
    %134 = vector.shape_cast %133 : vector<1x32x256xf32> to vector<32x256xf32>
    %c5_125 = arith.constant 5 : index
    %c0_126 = arith.constant 0 : index
    %c0_127 = arith.constant 0 : index
    %135 = vector.load %arg1[%c5_125, %c0_126, %c0_127] : memref<28x8x32xf32, #tpu.memory_space<vmem>>, vector<1x8x32xf32>
    %136 = vector.shape_cast %135 : vector<1x8x32xf32> to vector<8x32xf32>
    %cst_128 = arith.constant dense<0.000000e+00> : vector<8x256xf32>
    %137 = tpu.matmul %136, %134, %cst_128 {dimension_numbers = #tpu.dot_dimension_numbers<[1], [0], [0], [1], [0, 0, 1, 1], [], []>} : vector<8x32xf32>, vector<32x256xf32>, vector<8x256xf32> -> vector<8x256xf32>
    %c6_129 = arith.constant 6 : index
    %c0_130 = arith.constant 0 : index
    %c0_131 = arith.constant 0 : index
    %138 = vector.load %arg1[%c6_129, %c0_130, %c0_131] : memref<28x8x32xf32, #tpu.memory_space<vmem>>, vector<1x8x32xf32>
    %139 = vector.shape_cast %138 : vector<1x8x32xf32> to vector<8x32xf32>
    %cst_132 = arith.constant dense<0.000000e+00> : vector<8x256xf32>
    %140 = tpu.matmul %139, %134, %cst_132 {dimension_numbers = #tpu.dot_dimension_numbers<[1], [0], [0], [1], [0, 0, 1, 1], [], []>} : vector<8x32xf32>, vector<32x256xf32>, vector<8x256xf32> -> vector<8x256xf32>
    %141 = arith.addf %129, %137 : vector<8x256xf32>
    %142 = arith.addf %132, %140 : vector<8x256xf32>
    %c2_133 = arith.constant 2 : index
    %c0_134 = arith.constant 0 : index
    %c0_135 = arith.constant 0 : index
    %143 = vector.load %arg2[%c2_133, %c0_134, %c0_135] : memref<5x32x256xf32, #tpu.memory_space<vmem>>, vector<1x32x256xf32>
    %144 = vector.shape_cast %143 : vector<1x32x256xf32> to vector<32x256xf32>
    %c6_136 = arith.constant 6 : index
    %c0_137 = arith.constant 0 : index
    %c0_138 = arith.constant 0 : index
    %145 = vector.load %arg1[%c6_136, %c0_137, %c0_138] : memref<28x8x32xf32, #tpu.memory_space<vmem>>, vector<1x8x32xf32>
    %146 = vector.shape_cast %145 : vector<1x8x32xf32> to vector<8x32xf32>
    %cst_139 = arith.constant dense<0.000000e+00> : vector<8x256xf32>
    %147 = tpu.matmul %146, %144, %cst_139 {dimension_numbers = #tpu.dot_dimension_numbers<[1], [0], [0], [1], [0, 0, 1, 1], [], []>} : vector<8x32xf32>, vector<32x256xf32>, vector<8x256xf32> -> vector<8x256xf32>
    %c7_140 = arith.constant 7 : index
    %c0_141 = arith.constant 0 : index
    %c0_142 = arith.constant 0 : index
    %148 = vector.load %arg1[%c7_140, %c0_141, %c0_142] : memref<28x8x32xf32, #tpu.memory_space<vmem>>, vector<1x8x32xf32>
    %149 = vector.shape_cast %148 : vector<1x8x32xf32> to vector<8x32xf32>
    %cst_143 = arith.constant dense<0.000000e+00> : vector<8x256xf32>
    %150 = tpu.matmul %149, %144, %cst_143 {dimension_numbers = #tpu.dot_dimension_numbers<[1], [0], [0], [1], [0, 0, 1, 1], [], []>} : vector<8x32xf32>, vector<32x256xf32>, vector<8x256xf32> -> vector<8x256xf32>
    %151 = arith.addf %141, %147 : vector<8x256xf32>
    %152 = arith.addf %142, %150 : vector<8x256xf32>
    %c3_144 = arith.constant 3 : index
    %c0_145 = arith.constant 0 : index
    %c0_146 = arith.constant 0 : index
    %153 = vector.load %arg2[%c3_144, %c0_145, %c0_146] : memref<5x32x256xf32, #tpu.memory_space<vmem>>, vector<1x32x256xf32>
    %154 = vector.shape_cast %153 : vector<1x32x256xf32> to vector<32x256xf32>
    %c7_147 = arith.constant 7 : index
    %c0_148 = arith.constant 0 : index
    %c0_149 = arith.constant 0 : index
    %155 = vector.load %arg1[%c7_147, %c0_148, %c0_149] : memref<28x8x32xf32, #tpu.memory_space<vmem>>, vector<1x8x32xf32>
    %156 = vector.shape_cast %155 : vector<1x8x32xf32> to vector<8x32xf32>
    %cst_150 = arith.constant dense<0.000000e+00> : vector<8x256xf32>
    %157 = tpu.matmul %156, %154, %cst_150 {dimension_numbers = #tpu.dot_dimension_numbers<[1], [0], [0], [1], [0, 0, 1, 1], [], []>} : vector<8x32xf32>, vector<32x256xf32>, vector<8x256xf32> -> vector<8x256xf32>
    %c8 = arith.constant 8 : index
    %c0_151 = arith.constant 0 : index
    %c0_152 = arith.constant 0 : index
    %158 = vector.load %arg1[%c8, %c0_151, %c0_152] : memref<28x8x32xf32, #tpu.memory_space<vmem>>, vector<1x8x32xf32>
    %159 = vector.shape_cast %158 : vector<1x8x32xf32> to vector<8x32xf32>
    %cst_153 = arith.constant dense<0.000000e+00> : vector<8x256xf32>
    %160 = tpu.matmul %159, %154, %cst_153 {dimension_numbers = #tpu.dot_dimension_numbers<[1], [0], [0], [1], [0, 0, 1, 1], [], []>} : vector<8x32xf32>, vector<32x256xf32>, vector<8x256xf32> -> vector<8x256xf32>
    %161 = arith.addf %151, %157 : vector<8x256xf32>
    %162 = arith.addf %152, %160 : vector<8x256xf32>
    %c4_154 = arith.constant 4 : index
    %c0_155 = arith.constant 0 : index
    %c0_156 = arith.constant 0 : index
    %163 = vector.load %arg2[%c4_154, %c0_155, %c0_156] : memref<5x32x256xf32, #tpu.memory_space<vmem>>, vector<1x32x256xf32>
    %164 = vector.shape_cast %163 : vector<1x32x256xf32> to vector<32x256xf32>
    %c8_157 = arith.constant 8 : index
    %c0_158 = arith.constant 0 : index
    %c0_159 = arith.constant 0 : index
    %165 = vector.load %arg1[%c8_157, %c0_158, %c0_159] : memref<28x8x32xf32, #tpu.memory_space<vmem>>, vector<1x8x32xf32>
    %166 = vector.shape_cast %165 : vector<1x8x32xf32> to vector<8x32xf32>
    %cst_160 = arith.constant dense<0.000000e+00> : vector<8x256xf32>
    %167 = tpu.matmul %166, %164, %cst_160 {dimension_numbers = #tpu.dot_dimension_numbers<[1], [0], [0], [1], [0, 0, 1, 1], [], []>} : vector<8x32xf32>, vector<32x256xf32>, vector<8x256xf32> -> vector<8x256xf32>
    %c9 = arith.constant 9 : index
    %c0_161 = arith.constant 0 : index
    %c0_162 = arith.constant 0 : index
    %168 = vector.load %arg1[%c9, %c0_161, %c0_162] : memref<28x8x32xf32, #tpu.memory_space<vmem>>, vector<1x8x32xf32>
    %169 = vector.shape_cast %168 : vector<1x8x32xf32> to vector<8x32xf32>
    %cst_163 = arith.constant dense<0.000000e+00> : vector<8x256xf32>
    %170 = tpu.matmul %169, %164, %cst_163 {dimension_numbers = #tpu.dot_dimension_numbers<[1], [0], [0], [1], [0, 0, 1, 1], [], []>} : vector<8x32xf32>, vector<32x256xf32>, vector<8x256xf32> -> vector<8x256xf32>
    %171 = arith.addf %161, %167 : vector<8x256xf32>
    %172 = arith.addf %162, %170 : vector<8x256xf32>
    %173 = vector.extract_strided_slice %171 {offsets = [0, 0], sizes = [8, 128], strides = [1, 1]} : vector<8x256xf32> to vector<8x128xf32>
    %174 = vector.extract_strided_slice %171 {offsets = [0, 128], sizes = [8, 128], strides = [1, 1]} : vector<8x256xf32> to vector<8x128xf32>
    %175 = arith.maximumf %173, %174 : vector<8x128xf32>
    %176 = vector.extract_strided_slice %172 {offsets = [0, 0], sizes = [8, 128], strides = [1, 1]} : vector<8x256xf32> to vector<8x128xf32>
    %177 = vector.extract_strided_slice %172 {offsets = [0, 128], sizes = [8, 128], strides = [1, 1]} : vector<8x256xf32> to vector<8x128xf32>
    %178 = arith.maximumf %176, %177 : vector<8x128xf32>
    %179 = arith.maximumf %175, %178 : vector<8x128xf32>
    %180 = vector.broadcast %0 : vector<1x128xf32> to vector<8x128xf32>
    %181 = arith.addf %179, %180 : vector<8x128xf32>
    %cst_164 = arith.constant 0.000000e+00 : f32
    %182 = vector.broadcast %cst_164 : f32 to vector<8x128xf32>
    %183 = arith.maximumf %181, %182 : vector<8x128xf32>
    %c2_165 = arith.constant 2 : index
    %c0_166 = arith.constant 0 : index
    %c0_167 = arith.constant 0 : index
    %184 = vector.load %arg4[%c2_165, %c0_166, %c0_167] : memref<12x8x128xf32, #tpu.memory_space<vmem>>, vector<1x8x128xf32>
    %185 = vector.shape_cast %184 : vector<1x8x128xf32> to vector<8x128xf32>
    %186 = vector.shape_cast %183 : vector<8x128xf32> to vector<1x8x128xf32>
    tpu.vector_store %arg4[%c2_165, %c0_166, %c0_167], %186 {strides = array<i32>} : memref<12x8x128xf32, #tpu.memory_space<vmem>>, vector<1x8x128xf32>,
    %c0_168 = arith.constant 0 : index
    %c0_169 = arith.constant 0 : index
    %c0_170 = arith.constant 0 : index
    %187 = vector.load %arg2[%c0_168, %c0_169, %c0_170] : memref<5x32x256xf32, #tpu.memory_space<vmem>>, vector<1x32x256xf32>
    %188 = vector.shape_cast %187 : vector<1x32x256xf32> to vector<32x256xf32>
    %c6_171 = arith.constant 6 : index
    %c0_172 = arith.constant 0 : index
    %c0_173 = arith.constant 0 : index
    %189 = vector.load %arg1[%c6_171, %c0_172, %c0_173] : memref<28x8x32xf32, #tpu.memory_space<vmem>>, vector<1x8x32xf32>
    %190 = vector.shape_cast %189 : vector<1x8x32xf32> to vector<8x32xf32>
    %cst_174 = arith.constant dense<0.000000e+00> : vector<8x256xf32>
    %191 = tpu.matmul %190, %188, %cst_174 {dimension_numbers = #tpu.dot_dimension_numbers<[1], [0], [0], [1], [0, 0, 1, 1], [], []>} : vector<8x32xf32>, vector<32x256xf32>, vector<8x256xf32> -> vector<8x256xf32>
    %c7_175 = arith.constant 7 : index
    %c0_176 = arith.constant 0 : index
    %c0_177 = arith.constant 0 : index
    %192 = vector.load %arg1[%c7_175, %c0_176, %c0_177] : memref<28x8x32xf32, #tpu.memory_space<vmem>>, vector<1x8x32xf32>
    %193 = vector.shape_cast %192 : vector<1x8x32xf32> to vector<8x32xf32>
    %cst_178 = arith.constant dense<0.000000e+00> : vector<8x256xf32>
    %194 = tpu.matmul %193, %188, %cst_178 {dimension_numbers = #tpu.dot_dimension_numbers<[1], [0], [0], [1], [0, 0, 1, 1], [], []>} : vector<8x32xf32>, vector<32x256xf32>, vector<8x256xf32> -> vector<8x256xf32>
    %c1_179 = arith.constant 1 : index
    %c0_180 = arith.constant 0 : index
    %c0_181 = arith.constant 0 : index
    %195 = vector.load %arg2[%c1_179, %c0_180, %c0_181] : memref<5x32x256xf32, #tpu.memory_space<vmem>>, vector<1x32x256xf32>
    %196 = vector.shape_cast %195 : vector<1x32x256xf32> to vector<32x256xf32>
    %c7_182 = arith.constant 7 : index
    %c0_183 = arith.constant 0 : index
    %c0_184 = arith.constant 0 : index
    %197 = vector.load %arg1[%c7_182, %c0_183, %c0_184] : memref<28x8x32xf32, #tpu.memory_space<vmem>>, vector<1x8x32xf32>
    %198 = vector.shape_cast %197 : vector<1x8x32xf32> to vector<8x32xf32>
    %cst_185 = arith.constant dense<0.000000e+00> : vector<8x256xf32>
    %199 = tpu.matmul %198, %196, %cst_185 {dimension_numbers = #tpu.dot_dimension_numbers<[1], [0], [0], [1], [0, 0, 1, 1], [], []>} : vector<8x32xf32>, vector<32x256xf32>, vector<8x256xf32> -> vector<8x256xf32>
    %c8_186 = arith.constant 8 : index
    %c0_187 = arith.constant 0 : index
    %c0_188 = arith.constant 0 : index
    %200 = vector.load %arg1[%c8_186, %c0_187, %c0_188] : memref<28x8x32xf32, #tpu.memory_space<vmem>>, vector<1x8x32xf32>
    %201 = vector.shape_cast %200 : vector<1x8x32xf32> to vector<8x32xf32>
    %cst_189 = arith.constant dense<0.000000e+00> : vector<8x256xf32>
    %202 = tpu.matmul %201, %196, %cst_189 {dimension_numbers = #tpu.dot_dimension_numbers<[1], [0], [0], [1], [0, 0, 1, 1], [], []>} : vector<8x32xf32>, vector<32x256xf32>, vector<8x256xf32> -> vector<8x256xf32>
    %203 = arith.addf %191, %199 : vector<8x256xf32>
    %204 = arith.addf %194, %202 : vector<8x256xf32>
    %c2_190 = arith.constant 2 : index
    %c0_191 = arith.constant 0 : index
    %c0_192 = arith.constant 0 : index
    %205 = vector.load %arg2[%c2_190, %c0_191, %c0_192] : memref<5x32x256xf32, #tpu.memory_space<vmem>>, vector<1x32x256xf32>
    %206 = vector.shape_cast %205 : vector<1x32x256xf32> to vector<32x256xf32>
    %c8_193 = arith.constant 8 : index
    %c0_194 = arith.constant 0 : index
    %c0_195 = arith.constant 0 : index
    %207 = vector.load %arg1[%c8_193, %c0_194, %c0_195] : memref<28x8x32xf32, #tpu.memory_space<vmem>>, vector<1x8x32xf32>
    %208 = vector.shape_cast %207 : vector<1x8x32xf32> to vector<8x32xf32>
    %cst_196 = arith.constant dense<0.000000e+00> : vector<8x256xf32>
    %209 = tpu.matmul %208, %206, %cst_196 {dimension_numbers = #tpu.dot_dimension_numbers<[1], [0], [0], [1], [0, 0, 1, 1], [], []>} : vector<8x32xf32>, vector<32x256xf32>, vector<8x256xf32> -> vector<8x256xf32>
    %c9_197 = arith.constant 9 : index
    %c0_198 = arith.constant 0 : index
    %c0_199 = arith.constant 0 : index
    %210 = vector.load %arg1[%c9_197, %c0_198, %c0_199] : memref<28x8x32xf32, #tpu.memory_space<vmem>>, vector<1x8x32xf32>
    %211 = vector.shape_cast %210 : vector<1x8x32xf32> to vector<8x32xf32>
    %cst_200 = arith.constant dense<0.000000e+00> : vector<8x256xf32>
    %212 = tpu.matmul %211, %206, %cst_200 {dimension_numbers = #tpu.dot_dimension_numbers<[1], [0], [0], [1], [0, 0, 1, 1], [], []>} : vector<8x32xf32>, vector<32x256xf32>, vector<8x256xf32> -> vector<8x256xf32>
    %213 = arith.addf %203, %209 : vector<8x256xf32>
    %214 = arith.addf %204, %212 : vector<8x256xf32>
    %c3_201 = arith.constant 3 : index
    %c0_202 = arith.constant 0 : index
    %c0_203 = arith.constant 0 : index
    %215 = vector.load %arg2[%c3_201, %c0_202, %c0_203] : memref<5x32x256xf32, #tpu.memory_space<vmem>>, vector<1x32x256xf32>
    %216 = vector.shape_cast %215 : vector<1x32x256xf32> to vector<32x256xf32>
    %c9_204 = arith.constant 9 : index
    %c0_205 = arith.constant 0 : index
    %c0_206 = arith.constant 0 : index
    %217 = vector.load %arg1[%c9_204, %c0_205, %c0_206] : memref<28x8x32xf32, #tpu.memory_space<vmem>>, vector<1x8x32xf32>
    %218 = vector.shape_cast %217 : vector<1x8x32xf32> to vector<8x32xf32>
    %cst_207 = arith.constant dense<0.000000e+00> : vector<8x256xf32>
    %219 = tpu.matmul %218, %216, %cst_207 {dimension_numbers = #tpu.dot_dimension_numbers<[1], [0], [0], [1], [0, 0, 1, 1], [], []>} : vector<8x32xf32>, vector<32x256xf32>, vector<8x256xf32> -> vector<8x256xf32>
    %c10 = arith.constant 10 : index
    %c0_208 = arith.constant 0 : index
    %c0_209 = arith.constant 0 : index
    %220 = vector.load %arg1[%c10, %c0_208, %c0_209] : memref<28x8x32xf32, #tpu.memory_space<vmem>>, vector<1x8x32xf32>
    %221 = vector.shape_cast %220 : vector<1x8x32xf32> to vector<8x32xf32>
    %cst_210 = arith.constant dense<0.000000e+00> : vector<8x256xf32>
    %222 = tpu.matmul %221, %216, %cst_210 {dimension_numbers = #tpu.dot_dimension_numbers<[1], [0], [0], [1], [0, 0, 1, 1], [], []>} : vector<8x32xf32>, vector<32x256xf32>, vector<8x256xf32> -> vector<8x256xf32>
    %223 = arith.addf %213, %219 : vector<8x256xf32>
    %224 = arith.addf %214, %222 : vector<8x256xf32>
    %c4_211 = arith.constant 4 : index
    %c0_212 = arith.constant 0 : index
    %c0_213 = arith.constant 0 : index
    %225 = vector.load %arg2[%c4_211, %c0_212, %c0_213] : memref<5x32x256xf32, #tpu.memory_space<vmem>>, vector<1x32x256xf32>
    %226 = vector.shape_cast %225 : vector<1x32x256xf32> to vector<32x256xf32>
    %c10_214 = arith.constant 10 : index
    %c0_215 = arith.constant 0 : index
    %c0_216 = arith.constant 0 : index
    %227 = vector.load %arg1[%c10_214, %c0_215, %c0_216] : memref<28x8x32xf32, #tpu.memory_space<vmem>>, vector<1x8x32xf32>
    %228 = vector.shape_cast %227 : vector<1x8x32xf32> to vector<8x32xf32>
    %cst_217 = arith.constant dense<0.000000e+00> : vector<8x256xf32>
    %229 = tpu.matmul %228, %226, %cst_217 {dimension_numbers = #tpu.dot_dimension_numbers<[1], [0], [0], [1], [0, 0, 1, 1], [], []>} : vector<8x32xf32>, vector<32x256xf32>, vector<8x256xf32> -> vector<8x256xf32>
    %c11 = arith.constant 11 : index
    %c0_218 = arith.constant 0 : index
    %c0_219 = arith.constant 0 : index
    %230 = vector.load %arg1[%c11, %c0_218, %c0_219] : memref<28x8x32xf32, #tpu.memory_space<vmem>>, vector<1x8x32xf32>
    %231 = vector.shape_cast %230 : vector<1x8x32xf32> to vector<8x32xf32>
    %cst_220 = arith.constant dense<0.000000e+00> : vector<8x256xf32>
    %232 = tpu.matmul %231, %226, %cst_220 {dimension_numbers = #tpu.dot_dimension_numbers<[1], [0], [0], [1], [0, 0, 1, 1], [], []>} : vector<8x32xf32>, vector<32x256xf32>, vector<8x256xf32> -> vector<8x256xf32>
    %233 = arith.addf %223, %229 : vector<8x256xf32>
    %234 = arith.addf %224, %232 : vector<8x256xf32>
    %235 = vector.extract_strided_slice %233 {offsets = [0, 0], sizes = [8, 128], strides = [1, 1]} : vector<8x256xf32> to vector<8x128xf32>
    %236 = vector.extract_strided_slice %233 {offsets = [0, 128], sizes = [8, 128], strides = [1, 1]} : vector<8x256xf32> to vector<8x128xf32>
    %237 = arith.maximumf %235, %236 : vector<8x128xf32>
    %238 = vector.extract_strided_slice %234 {offsets = [0, 0], sizes = [8, 128], strides = [1, 1]} : vector<8x256xf32> to vector<8x128xf32>
    %239 = vector.extract_strided_slice %234 {offsets = [0, 128], sizes = [8, 128], strides = [1, 1]} : vector<8x256xf32> to vector<8x128xf32>
    %240 = arith.maximumf %238, %239 : vector<8x128xf32>
    %241 = arith.maximumf %237, %240 : vector<8x128xf32>
    %242 = vector.broadcast %0 : vector<1x128xf32> to vector<8x128xf32>
    %243 = arith.addf %241, %242 : vector<8x128xf32>
    %cst_221 = arith.constant 0.000000e+00 : f32
    %244 = vector.broadcast %cst_221 : f32 to vector<8x128xf32>
    %245 = arith.maximumf %243, %244 : vector<8x128xf32>
    %c3_222 = arith.constant 3 : index
    %c0_223 = arith.constant 0 : index
    %c0_224 = arith.constant 0 : index
    %246 = vector.load %arg4[%c3_222, %c0_223, %c0_224] : memref<12x8x128xf32, #tpu.memory_space<vmem>>, vector<1x8x128xf32>
    %247 = vector.shape_cast %246 : vector<1x8x128xf32> to vector<8x128xf32>
    %248 = vector.shape_cast %245 : vector<8x128xf32> to vector<1x8x128xf32>
    tpu.vector_store %arg4[%c3_222, %c0_223, %c0_224], %248 {strides = array<i32>} : memref<12x8x128xf32, #tpu.memory_space<vmem>>, vector<1x8x128xf32>,
    %c0_225 = arith.constant 0 : index
    %c0_226 = arith.constant 0 : index
    %c0_227 = arith.constant 0 : index
    %249 = vector.load %arg2[%c0_225, %c0_226, %c0_227] : memref<5x32x256xf32, #tpu.memory_space<vmem>>, vector<1x32x256xf32>
    %250 = vector.shape_cast %249 : vector<1x32x256xf32> to vector<32x256xf32>
    %c8_228 = arith.constant 8 : index
    %c0_229 = arith.constant 0 : index
    %c0_230 = arith.constant 0 : index
    %251 = vector.load %arg1[%c8_228, %c0_229, %c0_230] : memref<28x8x32xf32, #tpu.memory_space<vmem>>, vector<1x8x32xf32>
    %252 = vector.shape_cast %251 : vector<1x8x32xf32> to vector<8x32xf32>
    %cst_231 = arith.constant dense<0.000000e+00> : vector<8x256xf32>
    %253 = tpu.matmul %252, %250, %cst_231 {dimension_numbers = #tpu.dot_dimension_numbers<[1], [0], [0], [1], [0, 0, 1, 1], [], []>} : vector<8x32xf32>, vector<32x256xf32>, vector<8x256xf32> -> vector<8x256xf32>
    %c9_232 = arith.constant 9 : index
    %c0_233 = arith.constant 0 : index
    %c0_234 = arith.constant 0 : index
    %254 = vector.load %arg1[%c9_232, %c0_233, %c0_234] : memref<28x8x32xf32, #tpu.memory_space<vmem>>, vector<1x8x32xf32>
    %255 = vector.shape_cast %254 : vector<1x8x32xf32> to vector<8x32xf32>
    %cst_235 = arith.constant dense<0.000000e+00> : vector<8x256xf32>
    %256 = tpu.matmul %255, %250, %cst_235 {dimension_numbers = #tpu.dot_dimension_numbers<[1], [0], [0], [1], [0, 0, 1, 1], [], []>} : vector<8x32xf32>, vector<32x256xf32>, vector<8x256xf32> -> vector<8x256xf32>
    %c1_236 = arith.constant 1 : index
    %c0_237 = arith.constant 0 : index
    %c0_238 = arith.constant 0 : index
    %257 = vector.load %arg2[%c1_236, %c0_237, %c0_238] : memref<5x32x256xf32, #tpu.memory_space<vmem>>, vector<1x32x256xf32>
    %258 = vector.shape_cast %257 : vector<1x32x256xf32> to vector<32x256xf32>
    %c9_239 = arith.constant 9 : index
    %c0_240 = arith.constant 0 : index
    %c0_241 = arith.constant 0 : index
    %259 = vector.load %arg1[%c9_239, %c0_240, %c0_241] : memref<28x8x32xf32, #tpu.memory_space<vmem>>, vector<1x8x32xf32>
    %260 = vector.shape_cast %259 : vector<1x8x32xf32> to vector<8x32xf32>
    %cst_242 = arith.constant dense<0.000000e+00> : vector<8x256xf32>
    %261 = tpu.matmul %260, %258, %cst_242 {dimension_numbers = #tpu.dot_dimension_numbers<[1], [0], [0], [1], [0, 0, 1, 1], [], []>} : vector<8x32xf32>, vector<32x256xf32>, vector<8x256xf32> -> vector<8x256xf32>
    %c10_243 = arith.constant 10 : index
    %c0_244 = arith.constant 0 : index
    %c0_245 = arith.constant 0 : index
    %262 = vector.load %arg1[%c10_243, %c0_244, %c0_245] : memref<28x8x32xf32, #tpu.memory_space<vmem>>, vector<1x8x32xf32>
    %263 = vector.shape_cast %262 : vector<1x8x32xf32> to vector<8x32xf32>
    %cst_246 = arith.constant dense<0.000000e+00> : vector<8x256xf32>
    %264 = tpu.matmul %263, %258, %cst_246 {dimension_numbers = #tpu.dot_dimension_numbers<[1], [0], [0], [1], [0, 0, 1, 1], [], []>} : vector<8x32xf32>, vector<32x256xf32>, vector<8x256xf32> -> vector<8x256xf32>
    %265 = arith.addf %253, %261 : vector<8x256xf32>
    %266 = arith.addf %256, %264 : vector<8x256xf32>
    %c2_247 = arith.constant 2 : index
    %c0_248 = arith.constant 0 : index
    %c0_249 = arith.constant 0 : index
    %267 = vector.load %arg2[%c2_247, %c0_248, %c0_249] : memref<5x32x256xf32, #tpu.memory_space<vmem>>, vector<1x32x256xf32>
    %268 = vector.shape_cast %267 : vector<1x32x256xf32> to vector<32x256xf32>
    %c10_250 = arith.constant 10 : index
    %c0_251 = arith.constant 0 : index
    %c0_252 = arith.constant 0 : index
    %269 = vector.load %arg1[%c10_250, %c0_251, %c0_252] : memref<28x8x32xf32, #tpu.memory_space<vmem>>, vector<1x8x32xf32>
    %270 = vector.shape_cast %269 : vector<1x8x32xf32> to vector<8x32xf32>
    %cst_253 = arith.constant dense<0.000000e+00> : vector<8x256xf32>
    %271 = tpu.matmul %270, %268, %cst_253 {dimension_numbers = #tpu.dot_dimension_numbers<[1], [0], [0], [1], [0, 0, 1, 1], [], []>} : vector<8x32xf32>, vector<32x256xf32>, vector<8x256xf32> -> vector<8x256xf32>
    %c11_254 = arith.constant 11 : index
    %c0_255 = arith.constant 0 : index
    %c0_256 = arith.constant 0 : index
    %272 = vector.load %arg1[%c11_254, %c0_255, %c0_256] : memref<28x8x32xf32, #tpu.memory_space<vmem>>, vector<1x8x32xf32>
    %273 = vector.shape_cast %272 : vector<1x8x32xf32> to vector<8x32xf32>
    %cst_257 = arith.constant dense<0.000000e+00> : vector<8x256xf32>
    %274 = tpu.matmul %273, %268, %cst_257 {dimension_numbers = #tpu.dot_dimension_numbers<[1], [0], [0], [1], [0, 0, 1, 1], [], []>} : vector<8x32xf32>, vector<32x256xf32>, vector<8x256xf32> -> vector<8x256xf32>
    %275 = arith.addf %265, %271 : vector<8x256xf32>
    %276 = arith.addf %266, %274 : vector<8x256xf32>
    %c3_258 = arith.constant 3 : index
    %c0_259 = arith.constant 0 : index
    %c0_260 = arith.constant 0 : index
    %277 = vector.load %arg2[%c3_258, %c0_259, %c0_260] : memref<5x32x256xf32, #tpu.memory_space<vmem>>, vector<1x32x256xf32>
    %278 = vector.shape_cast %277 : vector<1x32x256xf32> to vector<32x256xf32>
    %c11_261 = arith.constant 11 : index
    %c0_262 = arith.constant 0 : index
    %c0_263 = arith.constant 0 : index
    %279 = vector.load %arg1[%c11_261, %c0_262, %c0_263] : memref<28x8x32xf32, #tpu.memory_space<vmem>>, vector<1x8x32xf32>
    %280 = vector.shape_cast %279 : vector<1x8x32xf32> to vector<8x32xf32>
    %cst_264 = arith.constant dense<0.000000e+00> : vector<8x256xf32>
    %281 = tpu.matmul %280, %278, %cst_264 {dimension_numbers = #tpu.dot_dimension_numbers<[1], [0], [0], [1], [0, 0, 1, 1], [], []>} : vector<8x32xf32>, vector<32x256xf32>, vector<8x256xf32> -> vector<8x256xf32>
    %c12 = arith.constant 12 : index
    %c0_265 = arith.constant 0 : index
    %c0_266 = arith.constant 0 : index
    %282 = vector.load %arg1[%c12, %c0_265, %c0_266] : memref<28x8x32xf32, #tpu.memory_space<vmem>>, vector<1x8x32xf32>
    %283 = vector.shape_cast %282 : vector<1x8x32xf32> to vector<8x32xf32>
    %cst_267 = arith.constant dense<0.000000e+00> : vector<8x256xf32>
    %284 = tpu.matmul %283, %278, %cst_267 {dimension_numbers = #tpu.dot_dimension_numbers<[1], [0], [0], [1], [0, 0, 1, 1], [], []>} : vector<8x32xf32>, vector<32x256xf32>, vector<8x256xf32> -> vector<8x256xf32>
    %285 = arith.addf %275, %281 : vector<8x256xf32>
    %286 = arith.addf %276, %284 : vector<8x256xf32>
    %c4_268 = arith.constant 4 : index
    %c0_269 = arith.constant 0 : index
    %c0_270 = arith.constant 0 : index
    %287 = vector.load %arg2[%c4_268, %c0_269, %c0_270] : memref<5x32x256xf32, #tpu.memory_space<vmem>>, vector<1x32x256xf32>
    %288 = vector.shape_cast %287 : vector<1x32x256xf32> to vector<32x256xf32>
    %c12_271 = arith.constant 12 : index
    %c0_272 = arith.constant 0 : index
    %c0_273 = arith.constant 0 : index
    %289 = vector.load %arg1[%c12_271, %c0_272, %c0_273] : memref<28x8x32xf32, #tpu.memory_space<vmem>>, vector<1x8x32xf32>
    %290 = vector.shape_cast %289 : vector<1x8x32xf32> to vector<8x32xf32>
    %cst_274 = arith.constant dense<0.000000e+00> : vector<8x256xf32>
    %291 = tpu.matmul %290, %288, %cst_274 {dimension_numbers = #tpu.dot_dimension_numbers<[1], [0], [0], [1], [0, 0, 1, 1], [], []>} : vector<8x32xf32>, vector<32x256xf32>, vector<8x256xf32> -> vector<8x256xf32>
    %c13 = arith.constant 13 : index
    %c0_275 = arith.constant 0 : index
    %c0_276 = arith.constant 0 : index
    %292 = vector.load %arg1[%c13, %c0_275, %c0_276] : memref<28x8x32xf32, #tpu.memory_space<vmem>>, vector<1x8x32xf32>
    %293 = vector.shape_cast %292 : vector<1x8x32xf32> to vector<8x32xf32>
    %cst_277 = arith.constant dense<0.000000e+00> : vector<8x256xf32>
    %294 = tpu.matmul %293, %288, %cst_277 {dimension_numbers = #tpu.dot_dimension_numbers<[1], [0], [0], [1], [0, 0, 1, 1], [], []>} : vector<8x32xf32>, vector<32x256xf32>, vector<8x256xf32> -> vector<8x256xf32>
    %295 = arith.addf %285, %291 : vector<8x256xf32>
    %296 = arith.addf %286, %294 : vector<8x256xf32>
    %297 = vector.extract_strided_slice %295 {offsets = [0, 0], sizes = [8, 128], strides = [1, 1]} : vector<8x256xf32> to vector<8x128xf32>
    %298 = vector.extract_strided_slice %295 {offsets = [0, 128], sizes = [8, 128], strides = [1, 1]} : vector<8x256xf32> to vector<8x128xf32>
    %299 = arith.maximumf %297, %298 : vector<8x128xf32>
    %300 = vector.extract_strided_slice %296 {offsets = [0, 0], sizes = [8, 128], strides = [1, 1]} : vector<8x256xf32> to vector<8x128xf32>
    %301 = vector.extract_strided_slice %296 {offsets = [0, 128], sizes = [8, 128], strides = [1, 1]} : vector<8x256xf32> to vector<8x128xf32>
    %302 = arith.maximumf %300, %301 : vector<8x128xf32>
    %303 = arith.maximumf %299, %302 : vector<8x128xf32>
    %304 = vector.broadcast %0 : vector<1x128xf32> to vector<8x128xf32>
    %305 = arith.addf %303, %304 : vector<8x128xf32>
    %cst_278 = arith.constant 0.000000e+00 : f32
    %306 = vector.broadcast %cst_278 : f32 to vector<8x128xf32>
    %307 = arith.maximumf %305, %306 : vector<8x128xf32>
    %c4_279 = arith.constant 4 : index
    %c0_280 = arith.constant 0 : index
    %c0_281 = arith.constant 0 : index
    %308 = vector.load %arg4[%c4_279, %c0_280, %c0_281] : memref<12x8x128xf32, #tpu.memory_space<vmem>>, vector<1x8x128xf32>
    %309 = vector.shape_cast %308 : vector<1x8x128xf32> to vector<8x128xf32>
    %310 = vector.shape_cast %307 : vector<8x128xf32> to vector<1x8x128xf32>
    tpu.vector_store %arg4[%c4_279, %c0_280, %c0_281], %310 {strides = array<i32>} : memref<12x8x128xf32, #tpu.memory_space<vmem>>, vector<1x8x128xf32>,
    %c0_282 = arith.constant 0 : index
    %c0_283 = arith.constant 0 : index
    %c0_284 = arith.constant 0 : index
    %311 = vector.load %arg2[%c0_282, %c0_283, %c0_284] : memref<5x32x256xf32, #tpu.memory_space<vmem>>, vector<1x32x256xf32>
    %312 = vector.shape_cast %311 : vector<1x32x256xf32> to vector<32x256xf32>
    %c10_285 = arith.constant 10 : index
    %c0_286 = arith.constant 0 : index
    %c0_287 = arith.constant 0 : index
    %313 = vector.load %arg1[%c10_285, %c0_286, %c0_287] : memref<28x8x32xf32, #tpu.memory_space<vmem>>, vector<1x8x32xf32>
    %314 = vector.shape_cast %313 : vector<1x8x32xf32> to vector<8x32xf32>
    %cst_288 = arith.constant dense<0.000000e+00> : vector<8x256xf32>
    %315 = tpu.matmul %314, %312, %cst_288 {dimension_numbers = #tpu.dot_dimension_numbers<[1], [0], [0], [1], [0, 0, 1, 1], [], []>} : vector<8x32xf32>, vector<32x256xf32>, vector<8x256xf32> -> vector<8x256xf32>
    %c11_289 = arith.constant 11 : index
    %c0_290 = arith.constant 0 : index
    %c0_291 = arith.constant 0 : index
    %316 = vector.load %arg1[%c11_289, %c0_290, %c0_291] : memref<28x8x32xf32, #tpu.memory_space<vmem>>, vector<1x8x32xf32>
    %317 = vector.shape_cast %316 : vector<1x8x32xf32> to vector<8x32xf32>
    %cst_292 = arith.constant dense<0.000000e+00> : vector<8x256xf32>
    %318 = tpu.matmul %317, %312, %cst_292 {dimension_numbers = #tpu.dot_dimension_numbers<[1], [0], [0], [1], [0, 0, 1, 1], [], []>} : vector<8x32xf32>, vector<32x256xf32>, vector<8x256xf32> -> vector<8x256xf32>
    %c1_293 = arith.constant 1 : index
    %c0_294 = arith.constant 0 : index
    %c0_295 = arith.constant 0 : index
    %319 = vector.load %arg2[%c1_293, %c0_294, %c0_295] : memref<5x32x256xf32, #tpu.memory_space<vmem>>, vector<1x32x256xf32>
    %320 = vector.shape_cast %319 : vector<1x32x256xf32> to vector<32x256xf32>
    %c11_296 = arith.constant 11 : index
    %c0_297 = arith.constant 0 : index
    %c0_298 = arith.constant 0 : index
    %321 = vector.load %arg1[%c11_296, %c0_297, %c0_298] : memref<28x8x32xf32, #tpu.memory_space<vmem>>, vector<1x8x32xf32>
    %322 = vector.shape_cast %321 : vector<1x8x32xf32> to vector<8x32xf32>
    %cst_299 = arith.constant dense<0.000000e+00> : vector<8x256xf32>
    %323 = tpu.matmul %322, %320, %cst_299 {dimension_numbers = #tpu.dot_dimension_numbers<[1], [0], [0], [1], [0, 0, 1, 1], [], []>} : vector<8x32xf32>, vector<32x256xf32>, vector<8x256xf32> -> vector<8x256xf32>
    %c12_300 = arith.constant 12 : index
    %c0_301 = arith.constant 0 : index
    %c0_302 = arith.constant 0 : index
    %324 = vector.load %arg1[%c12_300, %c0_301, %c0_302] : memref<28x8x32xf32, #tpu.memory_space<vmem>>, vector<1x8x32xf32>
    %325 = vector.shape_cast %324 : vector<1x8x32xf32> to vector<8x32xf32>
    %cst_303 = arith.constant dense<0.000000e+00> : vector<8x256xf32>
    %326 = tpu.matmul %325, %320, %cst_303 {dimension_numbers = #tpu.dot_dimension_numbers<[1], [0], [0], [1], [0, 0, 1, 1], [], []>} : vector<8x32xf32>, vector<32x256xf32>, vector<8x256xf32> -> vector<8x256xf32>
    %327 = arith.addf %315, %323 : vector<8x256xf32>
    %328 = arith.addf %318, %326 : vector<8x256xf32>
    %c2_304 = arith.constant 2 : index
    %c0_305 = arith.constant 0 : index
    %c0_306 = arith.constant 0 : index
    %329 = vector.load %arg2[%c2_304, %c0_305, %c0_306] : memref<5x32x256xf32, #tpu.memory_space<vmem>>, vector<1x32x256xf32>
    %330 = vector.shape_cast %329 : vector<1x32x256xf32> to vector<32x256xf32>
    %c12_307 = arith.constant 12 : index
    %c0_308 = arith.constant 0 : index
    %c0_309 = arith.constant 0 : index
    %331 = vector.load %arg1[%c12_307, %c0_308, %c0_309] : memref<28x8x32xf32, #tpu.memory_space<vmem>>, vector<1x8x32xf32>
    %332 = vector.shape_cast %331 : vector<1x8x32xf32> to vector<8x32xf32>
    %cst_310 = arith.constant dense<0.000000e+00> : vector<8x256xf32>
    %333 = tpu.matmul %332, %330, %cst_310 {dimension_numbers = #tpu.dot_dimension_numbers<[1], [0], [0], [1], [0, 0, 1, 1], [], []>} : vector<8x32xf32>, vector<32x256xf32>, vector<8x256xf32> -> vector<8x256xf32>
    %c13_311 = arith.constant 13 : index
    %c0_312 = arith.constant 0 : index
    %c0_313 = arith.constant 0 : index
    %334 = vector.load %arg1[%c13_311, %c0_312, %c0_313] : memref<28x8x32xf32, #tpu.memory_space<vmem>>, vector<1x8x32xf32>
    %335 = vector.shape_cast %334 : vector<1x8x32xf32> to vector<8x32xf32>
    %cst_314 = arith.constant dense<0.000000e+00> : vector<8x256xf32>
    %336 = tpu.matmul %335, %330, %cst_314 {dimension_numbers = #tpu.dot_dimension_numbers<[1], [0], [0], [1], [0, 0, 1, 1], [], []>} : vector<8x32xf32>, vector<32x256xf32>, vector<8x256xf32> -> vector<8x256xf32>
    %337 = arith.addf %327, %333 : vector<8x256xf32>
    %338 = arith.addf %328, %336 : vector<8x256xf32>
    %c3_315 = arith.constant 3 : index
    %c0_316 = arith.constant 0 : index
    %c0_317 = arith.constant 0 : index
    %339 = vector.load %arg2[%c3_315, %c0_316, %c0_317] : memref<5x32x256xf32, #tpu.memory_space<vmem>>, vector<1x32x256xf32>
    %340 = vector.shape_cast %339 : vector<1x32x256xf32> to vector<32x256xf32>
    %c13_318 = arith.constant 13 : index
    %c0_319 = arith.constant 0 : index
    %c0_320 = arith.constant 0 : index
    %341 = vector.load %arg1[%c13_318, %c0_319, %c0_320] : memref<28x8x32xf32, #tpu.memory_space<vmem>>, vector<1x8x32xf32>
    %342 = vector.shape_cast %341 : vector<1x8x32xf32> to vector<8x32xf32>
    %cst_321 = arith.constant dense<0.000000e+00> : vector<8x256xf32>
    %343 = tpu.matmul %342, %340, %cst_321 {dimension_numbers = #tpu.dot_dimension_numbers<[1], [0], [0], [1], [0, 0, 1, 1], [], []>} : vector<8x32xf32>, vector<32x256xf32>, vector<8x256xf32> -> vector<8x256xf32>
    %c14 = arith.constant 14 : index
    %c0_322 = arith.constant 0 : index
    %c0_323 = arith.constant 0 : index
    %344 = vector.load %arg1[%c14, %c0_322, %c0_323] : memref<28x8x32xf32, #tpu.memory_space<vmem>>, vector<1x8x32xf32>
    %345 = vector.shape_cast %344 : vector<1x8x32xf32> to vector<8x32xf32>
    %cst_324 = arith.constant dense<0.000000e+00> : vector<8x256xf32>
    %346 = tpu.matmul %345, %340, %cst_324 {dimension_numbers = #tpu.dot_dimension_numbers<[1], [0], [0], [1], [0, 0, 1, 1], [], []>} : vector<8x32xf32>, vector<32x256xf32>, vector<8x256xf32> -> vector<8x256xf32>
    %347 = arith.addf %337, %343 : vector<8x256xf32>
    %348 = arith.addf %338, %346 : vector<8x256xf32>
    %c4_325 = arith.constant 4 : index
    %c0_326 = arith.constant 0 : index
    %c0_327 = arith.constant 0 : index
    %349 = vector.load %arg2[%c4_325, %c0_326, %c0_327] : memref<5x32x256xf32, #tpu.memory_space<vmem>>, vector<1x32x256xf32>
    %350 = vector.shape_cast %349 : vector<1x32x256xf32> to vector<32x256xf32>
    %c14_328 = arith.constant 14 : index
    %c0_329 = arith.constant 0 : index
    %c0_330 = arith.constant 0 : index
    %351 = vector.load %arg1[%c14_328, %c0_329, %c0_330] : memref<28x8x32xf32, #tpu.memory_space<vmem>>, vector<1x8x32xf32>
    %352 = vector.shape_cast %351 : vector<1x8x32xf32> to vector<8x32xf32>
    %cst_331 = arith.constant dense<0.000000e+00> : vector<8x256xf32>
    %353 = tpu.matmul %352, %350, %cst_331 {dimension_numbers = #tpu.dot_dimension_numbers<[1], [0], [0], [1], [0, 0, 1, 1], [], []>} : vector<8x32xf32>, vector<32x256xf32>, vector<8x256xf32> -> vector<8x256xf32>
    %c15 = arith.constant 15 : index
    %c0_332 = arith.constant 0 : index
    %c0_333 = arith.constant 0 : index
    %354 = vector.load %arg1[%c15, %c0_332, %c0_333] : memref<28x8x32xf32, #tpu.memory_space<vmem>>, vector<1x8x32xf32>
    %355 = vector.shape_cast %354 : vector<1x8x32xf32> to vector<8x32xf32>
    %cst_334 = arith.constant dense<0.000000e+00> : vector<8x256xf32>
    %356 = tpu.matmul %355, %350, %cst_334 {dimension_numbers = #tpu.dot_dimension_numbers<[1], [0], [0], [1], [0, 0, 1, 1], [], []>} : vector<8x32xf32>, vector<32x256xf32>, vector<8x256xf32> -> vector<8x256xf32>
    %357 = arith.addf %347, %353 : vector<8x256xf32>
    %358 = arith.addf %348, %356 : vector<8x256xf32>
    %359 = vector.extract_strided_slice %357 {offsets = [0, 0], sizes = [8, 128], strides = [1, 1]} : vector<8x256xf32> to vector<8x128xf32>
    %360 = vector.extract_strided_slice %357 {offsets = [0, 128], sizes = [8, 128], strides = [1, 1]} : vector<8x256xf32> to vector<8x128xf32>
    %361 = arith.maximumf %359, %360 : vector<8x128xf32>
    %362 = vector.extract_strided_slice %358 {offsets = [0, 0], sizes = [8, 128], strides = [1, 1]} : vector<8x256xf32> to vector<8x128xf32>
    %363 = vector.extract_strided_slice %358 {offsets = [0, 128], sizes = [8, 128], strides = [1, 1]} : vector<8x256xf32> to vector<8x128xf32>
    %364 = arith.maximumf %362, %363 : vector<8x128xf32>
    %365 = arith.maximumf %361, %364 : vector<8x128xf32>
    %366 = vector.broadcast %0 : vector<1x128xf32> to vector<8x128xf32>
    %367 = arith.addf %365, %366 : vector<8x128xf32>
    %cst_335 = arith.constant 0.000000e+00 : f32
    %368 = vector.broadcast %cst_335 : f32 to vector<8x128xf32>
    %369 = arith.maximumf %367, %368 : vector<8x128xf32>
    %c5_336 = arith.constant 5 : index
    %c0_337 = arith.constant 0 : index
    %c0_338 = arith.constant 0 : index
    %370 = vector.load %arg4[%c5_336, %c0_337, %c0_338] : memref<12x8x128xf32, #tpu.memory_space<vmem>>, vector<1x8x128xf32>
    %371 = vector.shape_cast %370 : vector<1x8x128xf32> to vector<8x128xf32>
    %372 = vector.shape_cast %369 : vector<8x128xf32> to vector<1x8x128xf32>
    tpu.vector_store %arg4[%c5_336, %c0_337, %c0_338], %372 {strides = array<i32>} : memref<12x8x128xf32, #tpu.memory_space<vmem>>, vector<1x8x128xf32>,
    %c0_339 = arith.constant 0 : index
    %c0_340 = arith.constant 0 : index
    %c0_341 = arith.constant 0 : index
    %373 = vector.load %arg2[%c0_339, %c0_340, %c0_341] : memref<5x32x256xf32, #tpu.memory_space<vmem>>, vector<1x32x256xf32>
    %374 = vector.shape_cast %373 : vector<1x32x256xf32> to vector<32x256xf32>
    %c12_342 = arith.constant 12 : index
    %c0_343 = arith.constant 0 : index
    %c0_344 = arith.constant 0 : index
    %375 = vector.load %arg1[%c12_342, %c0_343, %c0_344] : memref<28x8x32xf32, #tpu.memory_space<vmem>>, vector<1x8x32xf32>
    %376 = vector.shape_cast %375 : vector<1x8x32xf32> to vector<8x32xf32>
    %cst_345 = arith.constant dense<0.000000e+00> : vector<8x256xf32>
    %377 = tpu.matmul %376, %374, %cst_345 {dimension_numbers = #tpu.dot_dimension_numbers<[1], [0], [0], [1], [0, 0, 1, 1], [], []>} : vector<8x32xf32>, vector<32x256xf32>, vector<8x256xf32> -> vector<8x256xf32>
    %c13_346 = arith.constant 13 : index
    %c0_347 = arith.constant 0 : index
    %c0_348 = arith.constant 0 : index
    %378 = vector.load %arg1[%c13_346, %c0_347, %c0_348] : memref<28x8x32xf32, #tpu.memory_space<vmem>>, vector<1x8x32xf32>
    %379 = vector.shape_cast %378 : vector<1x8x32xf32> to vector<8x32xf32>
    %cst_349 = arith.constant dense<0.000000e+00> : vector<8x256xf32>
    %380 = tpu.matmul %379, %374, %cst_349 {dimension_numbers = #tpu.dot_dimension_numbers<[1], [0], [0], [1], [0, 0, 1, 1], [], []>} : vector<8x32xf32>, vector<32x256xf32>, vector<8x256xf32> -> vector<8x256xf32>
    %c1_350 = arith.constant 1 : index
    %c0_351 = arith.constant 0 : index
    %c0_352 = arith.constant 0 : index
    %381 = vector.load %arg2[%c1_350, %c0_351, %c0_352] : memref<5x32x256xf32, #tpu.memory_space<vmem>>, vector<1x32x256xf32>
    %382 = vector.shape_cast %381 : vector<1x32x256xf32> to vector<32x256xf32>
    %c13_353 = arith.constant 13 : index
    %c0_354 = arith.constant 0 : index
    %c0_355 = arith.constant 0 : index
    %383 = vector.load %arg1[%c13_353, %c0_354, %c0_355] : memref<28x8x32xf32, #tpu.memory_space<vmem>>, vector<1x8x32xf32>
    %384 = vector.shape_cast %383 : vector<1x8x32xf32> to vector<8x32xf32>
    %cst_356 = arith.constant dense<0.000000e+00> : vector<8x256xf32>
    %385 = tpu.matmul %384, %382, %cst_356 {dimension_numbers = #tpu.dot_dimension_numbers<[1], [0], [0], [1], [0, 0, 1, 1], [], []>} : vector<8x32xf32>, vector<32x256xf32>, vector<8x256xf32> -> vector<8x256xf32>
    %c14_357 = arith.constant 14 : index
    %c0_358 = arith.constant 0 : index
    %c0_359 = arith.constant 0 : index
    %386 = vector.load %arg1[%c14_357, %c0_358, %c0_359] : memref<28x8x32xf32, #tpu.memory_space<vmem>>, vector<1x8x32xf32>
    %387 = vector.shape_cast %386 : vector<1x8x32xf32> to vector<8x32xf32>
    %cst_360 = arith.constant dense<0.000000e+00> : vector<8x256xf32>
    %388 = tpu.matmul %387, %382, %cst_360 {dimension_numbers = #tpu.dot_dimension_numbers<[1], [0], [0], [1], [0, 0, 1, 1], [], []>} : vector<8x32xf32>, vector<32x256xf32>, vector<8x256xf32> -> vector<8x256xf32>
    %389 = arith.addf %377, %385 : vector<8x256xf32>
    %390 = arith.addf %380, %388 : vector<8x256xf32>
    %c2_361 = arith.constant 2 : index
    %c0_362 = arith.constant 0 : index
    %c0_363 = arith.constant 0 : index
    %391 = vector.load %arg2[%c2_361, %c0_362, %c0_363] : memref<5x32x256xf32, #tpu.memory_space<vmem>>, vector<1x32x256xf32>
    %392 = vector.shape_cast %391 : vector<1x32x256xf32> to vector<32x256xf32>
    %c14_364 = arith.constant 14 : index
    %c0_365 = arith.constant 0 : index
    %c0_366 = arith.constant 0 : index
    %393 = vector.load %arg1[%c14_364, %c0_365, %c0_366] : memref<28x8x32xf32, #tpu.memory_space<vmem>>, vector<1x8x32xf32>
    %394 = vector.shape_cast %393 : vector<1x8x32xf32> to vector<8x32xf32>
    %cst_367 = arith.constant dense<0.000000e+00> : vector<8x256xf32>
    %395 = tpu.matmul %394, %392, %cst_367 {dimension_numbers = #tpu.dot_dimension_numbers<[1], [0], [0], [1], [0, 0, 1, 1], [], []>} : vector<8x32xf32>, vector<32x256xf32>, vector<8x256xf32> -> vector<8x256xf32>
    %c15_368 = arith.constant 15 : index
    %c0_369 = arith.constant 0 : index
    %c0_370 = arith.constant 0 : index
    %396 = vector.load %arg1[%c15_368, %c0_369, %c0_370] : memref<28x8x32xf32, #tpu.memory_space<vmem>>, vector<1x8x32xf32>
    %397 = vector.shape_cast %396 : vector<1x8x32xf32> to vector<8x32xf32>
    %cst_371 = arith.constant dense<0.000000e+00> : vector<8x256xf32>
    %398 = tpu.matmul %397, %392, %cst_371 {dimension_numbers = #tpu.dot_dimension_numbers<[1], [0], [0], [1], [0, 0, 1, 1], [], []>} : vector<8x32xf32>, vector<32x256xf32>, vector<8x256xf32> -> vector<8x256xf32>
    %399 = arith.addf %389, %395 : vector<8x256xf32>
    %400 = arith.addf %390, %398 : vector<8x256xf32>
    %c3_372 = arith.constant 3 : index
    %c0_373 = arith.constant 0 : index
    %c0_374 = arith.constant 0 : index
    %401 = vector.load %arg2[%c3_372, %c0_373, %c0_374] : memref<5x32x256xf32, #tpu.memory_space<vmem>>, vector<1x32x256xf32>
    %402 = vector.shape_cast %401 : vector<1x32x256xf32> to vector<32x256xf32>
    %c15_375 = arith.constant 15 : index
    %c0_376 = arith.constant 0 : index
    %c0_377 = arith.constant 0 : index
    %403 = vector.load %arg1[%c15_375, %c0_376, %c0_377] : memref<28x8x32xf32, #tpu.memory_space<vmem>>, vector<1x8x32xf32>
    %404 = vector.shape_cast %403 : vector<1x8x32xf32> to vector<8x32xf32>
    %cst_378 = arith.constant dense<0.000000e+00> : vector<8x256xf32>
    %405 = tpu.matmul %404, %402, %cst_378 {dimension_numbers = #tpu.dot_dimension_numbers<[1], [0], [0], [1], [0, 0, 1, 1], [], []>} : vector<8x32xf32>, vector<32x256xf32>, vector<8x256xf32> -> vector<8x256xf32>
    %c16 = arith.constant 16 : index
    %c0_379 = arith.constant 0 : index
    %c0_380 = arith.constant 0 : index
    %406 = vector.load %arg1[%c16, %c0_379, %c0_380] : memref<28x8x32xf32, #tpu.memory_space<vmem>>, vector<1x8x32xf32>
    %407 = vector.shape_cast %406 : vector<1x8x32xf32> to vector<8x32xf32>
    %cst_381 = arith.constant dense<0.000000e+00> : vector<8x256xf32>
    %408 = tpu.matmul %407, %402, %cst_381 {dimension_numbers = #tpu.dot_dimension_numbers<[1], [0], [0], [1], [0, 0, 1, 1], [], []>} : vector<8x32xf32>, vector<32x256xf32>, vector<8x256xf32> -> vector<8x256xf32>
    %409 = arith.addf %399, %405 : vector<8x256xf32>
    %410 = arith.addf %400, %408 : vector<8x256xf32>
    %c4_382 = arith.constant 4 : index
    %c0_383 = arith.constant 0 : index
    %c0_384 = arith.constant 0 : index
    %411 = vector.load %arg2[%c4_382, %c0_383, %c0_384] : memref<5x32x256xf32, #tpu.memory_space<vmem>>, vector<1x32x256xf32>
    %412 = vector.shape_cast %411 : vector<1x32x256xf32> to vector<32x256xf32>
    %c16_385 = arith.constant 16 : index
    %c0_386 = arith.constant 0 : index
    %c0_387 = arith.constant 0 : index
    %413 = vector.load %arg1[%c16_385, %c0_386, %c0_387] : memref<28x8x32xf32, #tpu.memory_space<vmem>>, vector<1x8x32xf32>
    %414 = vector.shape_cast %413 : vector<1x8x32xf32> to vector<8x32xf32>
    %cst_388 = arith.constant dense<0.000000e+00> : vector<8x256xf32>
    %415 = tpu.matmul %414, %412, %cst_388 {dimension_numbers = #tpu.dot_dimension_numbers<[1], [0], [0], [1], [0, 0, 1, 1], [], []>} : vector<8x32xf32>, vector<32x256xf32>, vector<8x256xf32> -> vector<8x256xf32>
    %c17 = arith.constant 17 : index
    %c0_389 = arith.constant 0 : index
    %c0_390 = arith.constant 0 : index
    %416 = vector.load %arg1[%c17, %c0_389, %c0_390] : memref<28x8x32xf32, #tpu.memory_space<vmem>>, vector<1x8x32xf32>
    %417 = vector.shape_cast %416 : vector<1x8x32xf32> to vector<8x32xf32>
    %cst_391 = arith.constant dense<0.000000e+00> : vector<8x256xf32>
    %418 = tpu.matmul %417, %412, %cst_391 {dimension_numbers = #tpu.dot_dimension_numbers<[1], [0], [0], [1], [0, 0, 1, 1], [], []>} : vector<8x32xf32>, vector<32x256xf32>, vector<8x256xf32> -> vector<8x256xf32>
    %419 = arith.addf %409, %415 : vector<8x256xf32>
    %420 = arith.addf %410, %418 : vector<8x256xf32>
    %421 = vector.extract_strided_slice %419 {offsets = [0, 0], sizes = [8, 128], strides = [1, 1]} : vector<8x256xf32> to vector<8x128xf32>
    %422 = vector.extract_strided_slice %419 {offsets = [0, 128], sizes = [8, 128], strides = [1, 1]} : vector<8x256xf32> to vector<8x128xf32>
    %423 = arith.maximumf %421, %422 : vector<8x128xf32>
    %424 = vector.extract_strided_slice %420 {offsets = [0, 0], sizes = [8, 128], strides = [1, 1]} : vector<8x256xf32> to vector<8x128xf32>
    %425 = vector.extract_strided_slice %420 {offsets = [0, 128], sizes = [8, 128], strides = [1, 1]} : vector<8x256xf32> to vector<8x128xf32>
    %426 = arith.maximumf %424, %425 : vector<8x128xf32>
    %427 = arith.maximumf %423, %426 : vector<8x128xf32>
    %428 = vector.broadcast %0 : vector<1x128xf32> to vector<8x128xf32>
    %429 = arith.addf %427, %428 : vector<8x128xf32>
    %cst_392 = arith.constant 0.000000e+00 : f32
    %430 = vector.broadcast %cst_392 : f32 to vector<8x128xf32>
    %431 = arith.maximumf %429, %430 : vector<8x128xf32>
    %c6_393 = arith.constant 6 : index
    %c0_394 = arith.constant 0 : index
    %c0_395 = arith.constant 0 : index
    %432 = vector.load %arg4[%c6_393, %c0_394, %c0_395] : memref<12x8x128xf32, #tpu.memory_space<vmem>>, vector<1x8x128xf32>
    %433 = vector.shape_cast %432 : vector<1x8x128xf32> to vector<8x128xf32>
    %434 = vector.shape_cast %431 : vector<8x128xf32> to vector<1x8x128xf32>
    tpu.vector_store %arg4[%c6_393, %c0_394, %c0_395], %434 {strides = array<i32>} : memref<12x8x128xf32, #tpu.memory_space<vmem>>, vector<1x8x128xf32>,
    %c0_396 = arith.constant 0 : index
    %c0_397 = arith.constant 0 : index
    %c0_398 = arith.constant 0 : index
    %435 = vector.load %arg2[%c0_396, %c0_397, %c0_398] : memref<5x32x256xf32, #tpu.memory_space<vmem>>, vector<1x32x256xf32>
    %436 = vector.shape_cast %435 : vector<1x32x256xf32> to vector<32x256xf32>
    %c14_399 = arith.constant 14 : index
    %c0_400 = arith.constant 0 : index
    %c0_401 = arith.constant 0 : index
    %437 = vector.load %arg1[%c14_399, %c0_400, %c0_401] : memref<28x8x32xf32, #tpu.memory_space<vmem>>, vector<1x8x32xf32>
    %438 = vector.shape_cast %437 : vector<1x8x32xf32> to vector<8x32xf32>
    %cst_402 = arith.constant dense<0.000000e+00> : vector<8x256xf32>
    %439 = tpu.matmul %438, %436, %cst_402 {dimension_numbers = #tpu.dot_dimension_numbers<[1], [0], [0], [1], [0, 0, 1, 1], [], []>} : vector<8x32xf32>, vector<32x256xf32>, vector<8x256xf32> -> vector<8x256xf32>
    %c15_403 = arith.constant 15 : index
    %c0_404 = arith.constant 0 : index
    %c0_405 = arith.constant 0 : index
    %440 = vector.load %arg1[%c15_403, %c0_404, %c0_405] : memref<28x8x32xf32, #tpu.memory_space<vmem>>, vector<1x8x32xf32>
    %441 = vector.shape_cast %440 : vector<1x8x32xf32> to vector<8x32xf32>
    %cst_406 = arith.constant dense<0.000000e+00> : vector<8x256xf32>
    %442 = tpu.matmul %441, %436, %cst_406 {dimension_numbers = #tpu.dot_dimension_numbers<[1], [0], [0], [1], [0, 0, 1, 1], [], []>} : vector<8x32xf32>, vector<32x256xf32>, vector<8x256xf32> -> vector<8x256xf32>
    %c1_407 = arith.constant 1 : index
    %c0_408 = arith.constant 0 : index
    %c0_409 = arith.constant 0 : index
    %443 = vector.load %arg2[%c1_407, %c0_408, %c0_409] : memref<5x32x256xf32, #tpu.memory_space<vmem>>, vector<1x32x256xf32>
    %444 = vector.shape_cast %443 : vector<1x32x256xf32> to vector<32x256xf32>
    %c15_410 = arith.constant 15 : index
    %c0_411 = arith.constant 0 : index
    %c0_412 = arith.constant 0 : index
    %445 = vector.load %arg1[%c15_410, %c0_411, %c0_412] : memref<28x8x32xf32, #tpu.memory_space<vmem>>, vector<1x8x32xf32>
    %446 = vector.shape_cast %445 : vector<1x8x32xf32> to vector<8x32xf32>
    %cst_413 = arith.constant dense<0.000000e+00> : vector<8x256xf32>
    %447 = tpu.matmul %446, %444, %cst_413 {dimension_numbers = #tpu.dot_dimension_numbers<[1], [0], [0], [1], [0, 0, 1, 1], [], []>} : vector<8x32xf32>, vector<32x256xf32>, vector<8x256xf32> -> vector<8x256xf32>
    %c16_414 = arith.constant 16 : index
    %c0_415 = arith.constant 0 : index
    %c0_416 = arith.constant 0 : index
    %448 = vector.load %arg1[%c16_414, %c0_415, %c0_416] : memref<28x8x32xf32, #tpu.memory_space<vmem>>, vector<1x8x32xf32>
    %449 = vector.shape_cast %448 : vector<1x8x32xf32> to vector<8x32xf32>
    %cst_417 = arith.constant dense<0.000000e+00> : vector<8x256xf32>
    %450 = tpu.matmul %449, %444, %cst_417 {dimension_numbers = #tpu.dot_dimension_numbers<[1], [0], [0], [1], [0, 0, 1, 1], [], []>} : vector<8x32xf32>, vector<32x256xf32>, vector<8x256xf32> -> vector<8x256xf32>
    %451 = arith.addf %439, %447 : vector<8x256xf32>
    %452 = arith.addf %442, %450 : vector<8x256xf32>
    %c2_418 = arith.constant 2 : index
    %c0_419 = arith.constant 0 : index
    %c0_420 = arith.constant 0 : index
    %453 = vector.load %arg2[%c2_418, %c0_419, %c0_420] : memref<5x32x256xf32, #tpu.memory_space<vmem>>, vector<1x32x256xf32>
    %454 = vector.shape_cast %453 : vector<1x32x256xf32> to vector<32x256xf32>
    %c16_421 = arith.constant 16 : index
    %c0_422 = arith.constant 0 : index
    %c0_423 = arith.constant 0 : index
    %455 = vector.load %arg1[%c16_421, %c0_422, %c0_423] : memref<28x8x32xf32, #tpu.memory_space<vmem>>, vector<1x8x32xf32>
    %456 = vector.shape_cast %455 : vector<1x8x32xf32> to vector<8x32xf32>
    %cst_424 = arith.constant dense<0.000000e+00> : vector<8x256xf32>
    %457 = tpu.matmul %456, %454, %cst_424 {dimension_numbers = #tpu.dot_dimension_numbers<[1], [0], [0], [1], [0, 0, 1, 1], [], []>} : vector<8x32xf32>, vector<32x256xf32>, vector<8x256xf32> -> vector<8x256xf32>
    %c17_425 = arith.constant 17 : index
    %c0_426 = arith.constant 0 : index
    %c0_427 = arith.constant 0 : index
    %458 = vector.load %arg1[%c17_425, %c0_426, %c0_427] : memref<28x8x32xf32, #tpu.memory_space<vmem>>, vector<1x8x32xf32>
    %459 = vector.shape_cast %458 : vector<1x8x32xf32> to vector<8x32xf32>
    %cst_428 = arith.constant dense<0.000000e+00> : vector<8x256xf32>
    %460 = tpu.matmul %459, %454, %cst_428 {dimension_numbers = #tpu.dot_dimension_numbers<[1], [0], [0], [1], [0, 0, 1, 1], [], []>} : vector<8x32xf32>, vector<32x256xf32>, vector<8x256xf32> -> vector<8x256xf32>
    %461 = arith.addf %451, %457 : vector<8x256xf32>
    %462 = arith.addf %452, %460 : vector<8x256xf32>
    %c3_429 = arith.constant 3 : index
    %c0_430 = arith.constant 0 : index
    %c0_431 = arith.constant 0 : index
    %463 = vector.load %arg2[%c3_429, %c0_430, %c0_431] : memref<5x32x256xf32, #tpu.memory_space<vmem>>, vector<1x32x256xf32>
    %464 = vector.shape_cast %463 : vector<1x32x256xf32> to vector<32x256xf32>
    %c17_432 = arith.constant 17 : index
    %c0_433 = arith.constant 0 : index
    %c0_434 = arith.constant 0 : index
    %465 = vector.load %arg1[%c17_432, %c0_433, %c0_434] : memref<28x8x32xf32, #tpu.memory_space<vmem>>, vector<1x8x32xf32>
    %466 = vector.shape_cast %465 : vector<1x8x32xf32> to vector<8x32xf32>
    %cst_435 = arith.constant dense<0.000000e+00> : vector<8x256xf32>
    %467 = tpu.matmul %466, %464, %cst_435 {dimension_numbers = #tpu.dot_dimension_numbers<[1], [0], [0], [1], [0, 0, 1, 1], [], []>} : vector<8x32xf32>, vector<32x256xf32>, vector<8x256xf32> -> vector<8x256xf32>
    %c18 = arith.constant 18 : index
    %c0_436 = arith.constant 0 : index
    %c0_437 = arith.constant 0 : index
    %468 = vector.load %arg1[%c18, %c0_436, %c0_437] : memref<28x8x32xf32, #tpu.memory_space<vmem>>, vector<1x8x32xf32>
    %469 = vector.shape_cast %468 : vector<1x8x32xf32> to vector<8x32xf32>
    %cst_438 = arith.constant dense<0.000000e+00> : vector<8x256xf32>
    %470 = tpu.matmul %469, %464, %cst_438 {dimension_numbers = #tpu.dot_dimension_numbers<[1], [0], [0], [1], [0, 0, 1, 1], [], []>} : vector<8x32xf32>, vector<32x256xf32>, vector<8x256xf32> -> vector<8x256xf32>
    %471 = arith.addf %461, %467 : vector<8x256xf32>
    %472 = arith.addf %462, %470 : vector<8x256xf32>
    %c4_439 = arith.constant 4 : index
    %c0_440 = arith.constant 0 : index
    %c0_441 = arith.constant 0 : index
    %473 = vector.load %arg2[%c4_439, %c0_440, %c0_441] : memref<5x32x256xf32, #tpu.memory_space<vmem>>, vector<1x32x256xf32>
    %474 = vector.shape_cast %473 : vector<1x32x256xf32> to vector<32x256xf32>
    %c18_442 = arith.constant 18 : index
    %c0_443 = arith.constant 0 : index
    %c0_444 = arith.constant 0 : index
    %475 = vector.load %arg1[%c18_442, %c0_443, %c0_444] : memref<28x8x32xf32, #tpu.memory_space<vmem>>, vector<1x8x32xf32>
    %476 = vector.shape_cast %475 : vector<1x8x32xf32> to vector<8x32xf32>
    %cst_445 = arith.constant dense<0.000000e+00> : vector<8x256xf32>
    %477 = tpu.matmul %476, %474, %cst_445 {dimension_numbers = #tpu.dot_dimension_numbers<[1], [0], [0], [1], [0, 0, 1, 1], [], []>} : vector<8x32xf32>, vector<32x256xf32>, vector<8x256xf32> -> vector<8x256xf32>
    %c19 = arith.constant 19 : index
    %c0_446 = arith.constant 0 : index
    %c0_447 = arith.constant 0 : index
    %478 = vector.load %arg1[%c19, %c0_446, %c0_447] : memref<28x8x32xf32, #tpu.memory_space<vmem>>, vector<1x8x32xf32>
    %479 = vector.shape_cast %478 : vector<1x8x32xf32> to vector<8x32xf32>
    %cst_448 = arith.constant dense<0.000000e+00> : vector<8x256xf32>
    %480 = tpu.matmul %479, %474, %cst_448 {dimension_numbers = #tpu.dot_dimension_numbers<[1], [0], [0], [1], [0, 0, 1, 1], [], []>} : vector<8x32xf32>, vector<32x256xf32>, vector<8x256xf32> -> vector<8x256xf32>
    %481 = arith.addf %471, %477 : vector<8x256xf32>
    %482 = arith.addf %472, %480 : vector<8x256xf32>
    %483 = vector.extract_strided_slice %481 {offsets = [0, 0], sizes = [8, 128], strides = [1, 1]} : vector<8x256xf32> to vector<8x128xf32>
    %484 = vector.extract_strided_slice %481 {offsets = [0, 128], sizes = [8, 128], strides = [1, 1]} : vector<8x256xf32> to vector<8x128xf32>
    %485 = arith.maximumf %483, %484 : vector<8x128xf32>
    %486 = vector.extract_strided_slice %482 {offsets = [0, 0], sizes = [8, 128], strides = [1, 1]} : vector<8x256xf32> to vector<8x128xf32>
    %487 = vector.extract_strided_slice %482 {offsets = [0, 128], sizes = [8, 128], strides = [1, 1]} : vector<8x256xf32> to vector<8x128xf32>
    %488 = arith.maximumf %486, %487 : vector<8x128xf32>
    %489 = arith.maximumf %485, %488 : vector<8x128xf32>
    %490 = vector.broadcast %0 : vector<1x128xf32> to vector<8x128xf32>
    %491 = arith.addf %489, %490 : vector<8x128xf32>
    %cst_449 = arith.constant 0.000000e+00 : f32
    %492 = vector.broadcast %cst_449 : f32 to vector<8x128xf32>
    %493 = arith.maximumf %491, %492 : vector<8x128xf32>
    %c7_450 = arith.constant 7 : index
    %c0_451 = arith.constant 0 : index
    %c0_452 = arith.constant 0 : index
    %494 = vector.load %arg4[%c7_450, %c0_451, %c0_452] : memref<12x8x128xf32, #tpu.memory_space<vmem>>, vector<1x8x128xf32>
    %495 = vector.shape_cast %494 : vector<1x8x128xf32> to vector<8x128xf32>
    %496 = vector.shape_cast %493 : vector<8x128xf32> to vector<1x8x128xf32>
    tpu.vector_store %arg4[%c7_450, %c0_451, %c0_452], %496 {strides = array<i32>} : memref<12x8x128xf32, #tpu.memory_space<vmem>>, vector<1x8x128xf32>,
    %c0_453 = arith.constant 0 : index
    %c0_454 = arith.constant 0 : index
    %c0_455 = arith.constant 0 : index
    %497 = vector.load %arg2[%c0_453, %c0_454, %c0_455] : memref<5x32x256xf32, #tpu.memory_space<vmem>>, vector<1x32x256xf32>
    %498 = vector.shape_cast %497 : vector<1x32x256xf32> to vector<32x256xf32>
    %c16_456 = arith.constant 16 : index
    %c0_457 = arith.constant 0 : index
    %c0_458 = arith.constant 0 : index
    %499 = vector.load %arg1[%c16_456, %c0_457, %c0_458] : memref<28x8x32xf32, #tpu.memory_space<vmem>>, vector<1x8x32xf32>
    %500 = vector.shape_cast %499 : vector<1x8x32xf32> to vector<8x32xf32>
    %cst_459 = arith.constant dense<0.000000e+00> : vector<8x256xf32>
    %501 = tpu.matmul %500, %498, %cst_459 {dimension_numbers = #tpu.dot_dimension_numbers<[1], [0], [0], [1], [0, 0, 1, 1], [], []>} : vector<8x32xf32>, vector<32x256xf32>, vector<8x256xf32> -> vector<8x256xf32>
    %c17_460 = arith.constant 17 : index
    %c0_461 = arith.constant 0 : index
    %c0_462 = arith.constant 0 : index
    %502 = vector.load %arg1[%c17_460, %c0_461, %c0_462] : memref<28x8x32xf32, #tpu.memory_space<vmem>>, vector<1x8x32xf32>
    %503 = vector.shape_cast %502 : vector<1x8x32xf32> to vector<8x32xf32>
    %cst_463 = arith.constant dense<0.000000e+00> : vector<8x256xf32>
    %504 = tpu.matmul %503, %498, %cst_463 {dimension_numbers = #tpu.dot_dimension_numbers<[1], [0], [0], [1], [0, 0, 1, 1], [], []>} : vector<8x32xf32>, vector<32x256xf32>, vector<8x256xf32> -> vector<8x256xf32>
    %c1_464 = arith.constant 1 : index
    %c0_465 = arith.constant 0 : index
    %c0_466 = arith.constant 0 : index
    %505 = vector.load %arg2[%c1_464, %c0_465, %c0_466] : memref<5x32x256xf32, #tpu.memory_space<vmem>>, vector<1x32x256xf32>
    %506 = vector.shape_cast %505 : vector<1x32x256xf32> to vector<32x256xf32>
    %c17_467 = arith.constant 17 : index
    %c0_468 = arith.constant 0 : index
    %c0_469 = arith.constant 0 : index
    %507 = vector.load %arg1[%c17_467, %c0_468, %c0_469] : memref<28x8x32xf32, #tpu.memory_space<vmem>>, vector<1x8x32xf32>
    %508 = vector.shape_cast %507 : vector<1x8x32xf32> to vector<8x32xf32>
    %cst_470 = arith.constant dense<0.000000e+00> : vector<8x256xf32>
    %509 = tpu.matmul %508, %506, %cst_470 {dimension_numbers = #tpu.dot_dimension_numbers<[1], [0], [0], [1], [0, 0, 1, 1], [], []>} : vector<8x32xf32>, vector<32x256xf32>, vector<8x256xf32> -> vector<8x256xf32>
    %c18_471 = arith.constant 18 : index
    %c0_472 = arith.constant 0 : index
    %c0_473 = arith.constant 0 : index
    %510 = vector.load %arg1[%c18_471, %c0_472, %c0_473] : memref<28x8x32xf32, #tpu.memory_space<vmem>>, vector<1x8x32xf32>
    %511 = vector.shape_cast %510 : vector<1x8x32xf32> to vector<8x32xf32>
    %cst_474 = arith.constant dense<0.000000e+00> : vector<8x256xf32>
    %512 = tpu.matmul %511, %506, %cst_474 {dimension_numbers = #tpu.dot_dimension_numbers<[1], [0], [0], [1], [0, 0, 1, 1], [], []>} : vector<8x32xf32>, vector<32x256xf32>, vector<8x256xf32> -> vector<8x256xf32>
    %513 = arith.addf %501, %509 : vector<8x256xf32>
    %514 = arith.addf %504, %512 : vector<8x256xf32>
    %c2_475 = arith.constant 2 : index
    %c0_476 = arith.constant 0 : index
    %c0_477 = arith.constant 0 : index
    %515 = vector.load %arg2[%c2_475, %c0_476, %c0_477] : memref<5x32x256xf32, #tpu.memory_space<vmem>>, vector<1x32x256xf32>
    %516 = vector.shape_cast %515 : vector<1x32x256xf32> to vector<32x256xf32>
    %c18_478 = arith.constant 18 : index
    %c0_479 = arith.constant 0 : index
    %c0_480 = arith.constant 0 : index
    %517 = vector.load %arg1[%c18_478, %c0_479, %c0_480] : memref<28x8x32xf32, #tpu.memory_space<vmem>>, vector<1x8x32xf32>
    %518 = vector.shape_cast %517 : vector<1x8x32xf32> to vector<8x32xf32>
    %cst_481 = arith.constant dense<0.000000e+00> : vector<8x256xf32>
    %519 = tpu.matmul %518, %516, %cst_481 {dimension_numbers = #tpu.dot_dimension_numbers<[1], [0], [0], [1], [0, 0, 1, 1], [], []>} : vector<8x32xf32>, vector<32x256xf32>, vector<8x256xf32> -> vector<8x256xf32>
    %c19_482 = arith.constant 19 : index
    %c0_483 = arith.constant 0 : index
    %c0_484 = arith.constant 0 : index
    %520 = vector.load %arg1[%c19_482, %c0_483, %c0_484] : memref<28x8x32xf32, #tpu.memory_space<vmem>>, vector<1x8x32xf32>
    %521 = vector.shape_cast %520 : vector<1x8x32xf32> to vector<8x32xf32>
    %cst_485 = arith.constant dense<0.000000e+00> : vector<8x256xf32>
    %522 = tpu.matmul %521, %516, %cst_485 {dimension_numbers = #tpu.dot_dimension_numbers<[1], [0], [0], [1], [0, 0, 1, 1], [], []>} : vector<8x32xf32>, vector<32x256xf32>, vector<8x256xf32> -> vector<8x256xf32>
    %523 = arith.addf %513, %519 : vector<8x256xf32>
    %524 = arith.addf %514, %522 : vector<8x256xf32>
    %c3_486 = arith.constant 3 : index
    %c0_487 = arith.constant 0 : index
    %c0_488 = arith.constant 0 : index
    %525 = vector.load %arg2[%c3_486, %c0_487, %c0_488] : memref<5x32x256xf32, #tpu.memory_space<vmem>>, vector<1x32x256xf32>
    %526 = vector.shape_cast %525 : vector<1x32x256xf32> to vector<32x256xf32>
    %c19_489 = arith.constant 19 : index
    %c0_490 = arith.constant 0 : index
    %c0_491 = arith.constant 0 : index
    %527 = vector.load %arg1[%c19_489, %c0_490, %c0_491] : memref<28x8x32xf32, #tpu.memory_space<vmem>>, vector<1x8x32xf32>
    %528 = vector.shape_cast %527 : vector<1x8x32xf32> to vector<8x32xf32>
    %cst_492 = arith.constant dense<0.000000e+00> : vector<8x256xf32>
    %529 = tpu.matmul %528, %526, %cst_492 {dimension_numbers = #tpu.dot_dimension_numbers<[1], [0], [0], [1], [0, 0, 1, 1], [], []>} : vector<8x32xf32>, vector<32x256xf32>, vector<8x256xf32> -> vector<8x256xf32>
    %c20 = arith.constant 20 : index
    %c0_493 = arith.constant 0 : index
    %c0_494 = arith.constant 0 : index
    %530 = vector.load %arg1[%c20, %c0_493, %c0_494] : memref<28x8x32xf32, #tpu.memory_space<vmem>>, vector<1x8x32xf32>
    %531 = vector.shape_cast %530 : vector<1x8x32xf32> to vector<8x32xf32>
    %cst_495 = arith.constant dense<0.000000e+00> : vector<8x256xf32>
    %532 = tpu.matmul %531, %526, %cst_495 {dimension_numbers = #tpu.dot_dimension_numbers<[1], [0], [0], [1], [0, 0, 1, 1], [], []>} : vector<8x32xf32>, vector<32x256xf32>, vector<8x256xf32> -> vector<8x256xf32>
    %533 = arith.addf %523, %529 : vector<8x256xf32>
    %534 = arith.addf %524, %532 : vector<8x256xf32>
    %c4_496 = arith.constant 4 : index
    %c0_497 = arith.constant 0 : index
    %c0_498 = arith.constant 0 : index
    %535 = vector.load %arg2[%c4_496, %c0_497, %c0_498] : memref<5x32x256xf32, #tpu.memory_space<vmem>>, vector<1x32x256xf32>
    %536 = vector.shape_cast %535 : vector<1x32x256xf32> to vector<32x256xf32>
    %c20_499 = arith.constant 20 : index
    %c0_500 = arith.constant 0 : index
    %c0_501 = arith.constant 0 : index
    %537 = vector.load %arg1[%c20_499, %c0_500, %c0_501] : memref<28x8x32xf32, #tpu.memory_space<vmem>>, vector<1x8x32xf32>
    %538 = vector.shape_cast %537 : vector<1x8x32xf32> to vector<8x32xf32>
    %cst_502 = arith.constant dense<0.000000e+00> : vector<8x256xf32>
    %539 = tpu.matmul %538, %536, %cst_502 {dimension_numbers = #tpu.dot_dimension_numbers<[1], [0], [0], [1], [0, 0, 1, 1], [], []>} : vector<8x32xf32>, vector<32x256xf32>, vector<8x256xf32> -> vector<8x256xf32>
    %c21 = arith.constant 21 : index
    %c0_503 = arith.constant 0 : index
    %c0_504 = arith.constant 0 : index
    %540 = vector.load %arg1[%c21, %c0_503, %c0_504] : memref<28x8x32xf32, #tpu.memory_space<vmem>>, vector<1x8x32xf32>
    %541 = vector.shape_cast %540 : vector<1x8x32xf32> to vector<8x32xf32>
    %cst_505 = arith.constant dense<0.000000e+00> : vector<8x256xf32>
    %542 = tpu.matmul %541, %536, %cst_505 {dimension_numbers = #tpu.dot_dimension_numbers<[1], [0], [0], [1], [0, 0, 1, 1], [], []>} : vector<8x32xf32>, vector<32x256xf32>, vector<8x256xf32> -> vector<8x256xf32>
    %543 = arith.addf %533, %539 : vector<8x256xf32>
    %544 = arith.addf %534, %542 : vector<8x256xf32>
    %545 = vector.extract_strided_slice %543 {offsets = [0, 0], sizes = [8, 128], strides = [1, 1]} : vector<8x256xf32> to vector<8x128xf32>
    %546 = vector.extract_strided_slice %543 {offsets = [0, 128], sizes = [8, 128], strides = [1, 1]} : vector<8x256xf32> to vector<8x128xf32>
    %547 = arith.maximumf %545, %546 : vector<8x128xf32>
    %548 = vector.extract_strided_slice %544 {offsets = [0, 0], sizes = [8, 128], strides = [1, 1]} : vector<8x256xf32> to vector<8x128xf32>
    %549 = vector.extract_strided_slice %544 {offsets = [0, 128], sizes = [8, 128], strides = [1, 1]} : vector<8x256xf32> to vector<8x128xf32>
    %550 = arith.maximumf %548, %549 : vector<8x128xf32>
    %551 = arith.maximumf %547, %550 : vector<8x128xf32>
    %552 = vector.broadcast %0 : vector<1x128xf32> to vector<8x128xf32>
    %553 = arith.addf %551, %552 : vector<8x128xf32>
    %cst_506 = arith.constant 0.000000e+00 : f32
    %554 = vector.broadcast %cst_506 : f32 to vector<8x128xf32>
    %555 = arith.maximumf %553, %554 : vector<8x128xf32>
    %c8_507 = arith.constant 8 : index
    %c0_508 = arith.constant 0 : index
    %c0_509 = arith.constant 0 : index
    %556 = vector.load %arg4[%c8_507, %c0_508, %c0_509] : memref<12x8x128xf32, #tpu.memory_space<vmem>>, vector<1x8x128xf32>
    %557 = vector.shape_cast %556 : vector<1x8x128xf32> to vector<8x128xf32>
    %558 = vector.shape_cast %555 : vector<8x128xf32> to vector<1x8x128xf32>
    tpu.vector_store %arg4[%c8_507, %c0_508, %c0_509], %558 {strides = array<i32>} : memref<12x8x128xf32, #tpu.memory_space<vmem>>, vector<1x8x128xf32>,
    %c0_510 = arith.constant 0 : index
    %c0_511 = arith.constant 0 : index
    %c0_512 = arith.constant 0 : index
    %559 = vector.load %arg2[%c0_510, %c0_511, %c0_512] : memref<5x32x256xf32, #tpu.memory_space<vmem>>, vector<1x32x256xf32>
    %560 = vector.shape_cast %559 : vector<1x32x256xf32> to vector<32x256xf32>
    %c18_513 = arith.constant 18 : index
    %c0_514 = arith.constant 0 : index
    %c0_515 = arith.constant 0 : index
    %561 = vector.load %arg1[%c18_513, %c0_514, %c0_515] : memref<28x8x32xf32, #tpu.memory_space<vmem>>, vector<1x8x32xf32>
    %562 = vector.shape_cast %561 : vector<1x8x32xf32> to vector<8x32xf32>
    %cst_516 = arith.constant dense<0.000000e+00> : vector<8x256xf32>
    %563 = tpu.matmul %562, %560, %cst_516 {dimension_numbers = #tpu.dot_dimension_numbers<[1], [0], [0], [1], [0, 0, 1, 1], [], []>} : vector<8x32xf32>, vector<32x256xf32>, vector<8x256xf32> -> vector<8x256xf32>
    %c19_517 = arith.constant 19 : index
    %c0_518 = arith.constant 0 : index
    %c0_519 = arith.constant 0 : index
    %564 = vector.load %arg1[%c19_517, %c0_518, %c0_519] : memref<28x8x32xf32, #tpu.memory_space<vmem>>, vector<1x8x32xf32>
    %565 = vector.shape_cast %564 : vector<1x8x32xf32> to vector<8x32xf32>
    %cst_520 = arith.constant dense<0.000000e+00> : vector<8x256xf32>
    %566 = tpu.matmul %565, %560, %cst_520 {dimension_numbers = #tpu.dot_dimension_numbers<[1], [0], [0], [1], [0, 0, 1, 1], [], []>} : vector<8x32xf32>, vector<32x256xf32>, vector<8x256xf32> -> vector<8x256xf32>
    %c1_521 = arith.constant 1 : index
    %c0_522 = arith.constant 0 : index
    %c0_523 = arith.constant 0 : index
    %567 = vector.load %arg2[%c1_521, %c0_522, %c0_523] : memref<5x32x256xf32, #tpu.memory_space<vmem>>, vector<1x32x256xf32>
    %568 = vector.shape_cast %567 : vector<1x32x256xf32> to vector<32x256xf32>
    %c19_524 = arith.constant 19 : index
    %c0_525 = arith.constant 0 : index
    %c0_526 = arith.constant 0 : index
    %569 = vector.load %arg1[%c19_524, %c0_525, %c0_526] : memref<28x8x32xf32, #tpu.memory_space<vmem>>, vector<1x8x32xf32>
    %570 = vector.shape_cast %569 : vector<1x8x32xf32> to vector<8x32xf32>
    %cst_527 = arith.constant dense<0.000000e+00> : vector<8x256xf32>
    %571 = tpu.matmul %570, %568, %cst_527 {dimension_numbers = #tpu.dot_dimension_numbers<[1], [0], [0], [1], [0, 0, 1, 1], [], []>} : vector<8x32xf32>, vector<32x256xf32>, vector<8x256xf32> -> vector<8x256xf32>
    %c20_528 = arith.constant 20 : index
    %c0_529 = arith.constant 0 : index
    %c0_530 = arith.constant 0 : index
    %572 = vector.load %arg1[%c20_528, %c0_529, %c0_530] : memref<28x8x32xf32, #tpu.memory_space<vmem>>, vector<1x8x32xf32>
    %573 = vector.shape_cast %572 : vector<1x8x32xf32> to vector<8x32xf32>
    %cst_531 = arith.constant dense<0.000000e+00> : vector<8x256xf32>
    %574 = tpu.matmul %573, %568, %cst_531 {dimension_numbers = #tpu.dot_dimension_numbers<[1], [0], [0], [1], [0, 0, 1, 1], [], []>} : vector<8x32xf32>, vector<32x256xf32>, vector<8x256xf32> -> vector<8x256xf32>
    %575 = arith.addf %563, %571 : vector<8x256xf32>
    %576 = arith.addf %566, %574 : vector<8x256xf32>
    %c2_532 = arith.constant 2 : index
    %c0_533 = arith.constant 0 : index
    %c0_534 = arith.constant 0 : index
    %577 = vector.load %arg2[%c2_532, %c0_533, %c0_534] : memref<5x32x256xf32, #tpu.memory_space<vmem>>, vector<1x32x256xf32>
    %578 = vector.shape_cast %577 : vector<1x32x256xf32> to vector<32x256xf32>
    %c20_535 = arith.constant 20 : index
    %c0_536 = arith.constant 0 : index
    %c0_537 = arith.constant 0 : index
    %579 = vector.load %arg1[%c20_535, %c0_536, %c0_537] : memref<28x8x32xf32, #tpu.memory_space<vmem>>, vector<1x8x32xf32>
    %580 = vector.shape_cast %579 : vector<1x8x32xf32> to vector<8x32xf32>
    %cst_538 = arith.constant dense<0.000000e+00> : vector<8x256xf32>
    %581 = tpu.matmul %580, %578, %cst_538 {dimension_numbers = #tpu.dot_dimension_numbers<[1], [0], [0], [1], [0, 0, 1, 1], [], []>} : vector<8x32xf32>, vector<32x256xf32>, vector<8x256xf32> -> vector<8x256xf32>
    %c21_539 = arith.constant 21 : index
    %c0_540 = arith.constant 0 : index
    %c0_541 = arith.constant 0 : index
    %582 = vector.load %arg1[%c21_539, %c0_540, %c0_541] : memref<28x8x32xf32, #tpu.memory_space<vmem>>, vector<1x8x32xf32>
    %583 = vector.shape_cast %582 : vector<1x8x32xf32> to vector<8x32xf32>
    %cst_542 = arith.constant dense<0.000000e+00> : vector<8x256xf32>
    %584 = tpu.matmul %583, %578, %cst_542 {dimension_numbers = #tpu.dot_dimension_numbers<[1], [0], [0], [1], [0, 0, 1, 1], [], []>} : vector<8x32xf32>, vector<32x256xf32>, vector<8x256xf32> -> vector<8x256xf32>
    %585 = arith.addf %575, %581 : vector<8x256xf32>
    %586 = arith.addf %576, %584 : vector<8x256xf32>
    %c3_543 = arith.constant 3 : index
    %c0_544 = arith.constant 0 : index
    %c0_545 = arith.constant 0 : index
    %587 = vector.load %arg2[%c3_543, %c0_544, %c0_545] : memref<5x32x256xf32, #tpu.memory_space<vmem>>, vector<1x32x256xf32>
    %588 = vector.shape_cast %587 : vector<1x32x256xf32> to vector<32x256xf32>
    %c21_546 = arith.constant 21 : index
    %c0_547 = arith.constant 0 : index
    %c0_548 = arith.constant 0 : index
    %589 = vector.load %arg1[%c21_546, %c0_547, %c0_548] : memref<28x8x32xf32, #tpu.memory_space<vmem>>, vector<1x8x32xf32>
    %590 = vector.shape_cast %589 : vector<1x8x32xf32> to vector<8x32xf32>
    %cst_549 = arith.constant dense<0.000000e+00> : vector<8x256xf32>
    %591 = tpu.matmul %590, %588, %cst_549 {dimension_numbers = #tpu.dot_dimension_numbers<[1], [0], [0], [1], [0, 0, 1, 1], [], []>} : vector<8x32xf32>, vector<32x256xf32>, vector<8x256xf32> -> vector<8x256xf32>
    %c22 = arith.constant 22 : index
    %c0_550 = arith.constant 0 : index
    %c0_551 = arith.constant 0 : index
    %592 = vector.load %arg1[%c22, %c0_550, %c0_551] : memref<28x8x32xf32, #tpu.memory_space<vmem>>, vector<1x8x32xf32>
    %593 = vector.shape_cast %592 : vector<1x8x32xf32> to vector<8x32xf32>
    %cst_552 = arith.constant dense<0.000000e+00> : vector<8x256xf32>
    %594 = tpu.matmul %593, %588, %cst_552 {dimension_numbers = #tpu.dot_dimension_numbers<[1], [0], [0], [1], [0, 0, 1, 1], [], []>} : vector<8x32xf32>, vector<32x256xf32>, vector<8x256xf32> -> vector<8x256xf32>
    %595 = arith.addf %585, %591 : vector<8x256xf32>
    %596 = arith.addf %586, %594 : vector<8x256xf32>
    %c4_553 = arith.constant 4 : index
    %c0_554 = arith.constant 0 : index
    %c0_555 = arith.constant 0 : index
    %597 = vector.load %arg2[%c4_553, %c0_554, %c0_555] : memref<5x32x256xf32, #tpu.memory_space<vmem>>, vector<1x32x256xf32>
    %598 = vector.shape_cast %597 : vector<1x32x256xf32> to vector<32x256xf32>
    %c22_556 = arith.constant 22 : index
    %c0_557 = arith.constant 0 : index
    %c0_558 = arith.constant 0 : index
    %599 = vector.load %arg1[%c22_556, %c0_557, %c0_558] : memref<28x8x32xf32, #tpu.memory_space<vmem>>, vector<1x8x32xf32>
    %600 = vector.shape_cast %599 : vector<1x8x32xf32> to vector<8x32xf32>
    %cst_559 = arith.constant dense<0.000000e+00> : vector<8x256xf32>
    %601 = tpu.matmul %600, %598, %cst_559 {dimension_numbers = #tpu.dot_dimension_numbers<[1], [0], [0], [1], [0, 0, 1, 1], [], []>} : vector<8x32xf32>, vector<32x256xf32>, vector<8x256xf32> -> vector<8x256xf32>
    %c23 = arith.constant 23 : index
    %c0_560 = arith.constant 0 : index
    %c0_561 = arith.constant 0 : index
    %602 = vector.load %arg1[%c23, %c0_560, %c0_561] : memref<28x8x32xf32, #tpu.memory_space<vmem>>, vector<1x8x32xf32>
    %603 = vector.shape_cast %602 : vector<1x8x32xf32> to vector<8x32xf32>
    %cst_562 = arith.constant dense<0.000000e+00> : vector<8x256xf32>
    %604 = tpu.matmul %603, %598, %cst_562 {dimension_numbers = #tpu.dot_dimension_numbers<[1], [0], [0], [1], [0, 0, 1, 1], [], []>} : vector<8x32xf32>, vector<32x256xf32>, vector<8x256xf32> -> vector<8x256xf32>
    %605 = arith.addf %595, %601 : vector<8x256xf32>
    %606 = arith.addf %596, %604 : vector<8x256xf32>
    %607 = vector.extract_strided_slice %605 {offsets = [0, 0], sizes = [8, 128], strides = [1, 1]} : vector<8x256xf32> to vector<8x128xf32>
    %608 = vector.extract_strided_slice %605 {offsets = [0, 128], sizes = [8, 128], strides = [1, 1]} : vector<8x256xf32> to vector<8x128xf32>
    %609 = arith.maximumf %607, %608 : vector<8x128xf32>
    %610 = vector.extract_strided_slice %606 {offsets = [0, 0], sizes = [8, 128], strides = [1, 1]} : vector<8x256xf32> to vector<8x128xf32>
    %611 = vector.extract_strided_slice %606 {offsets = [0, 128], sizes = [8, 128], strides = [1, 1]} : vector<8x256xf32> to vector<8x128xf32>
    %612 = arith.maximumf %610, %611 : vector<8x128xf32>
    %613 = arith.maximumf %609, %612 : vector<8x128xf32>
    %614 = vector.broadcast %0 : vector<1x128xf32> to vector<8x128xf32>
    %615 = arith.addf %613, %614 : vector<8x128xf32>
    %cst_563 = arith.constant 0.000000e+00 : f32
    %616 = vector.broadcast %cst_563 : f32 to vector<8x128xf32>
    %617 = arith.maximumf %615, %616 : vector<8x128xf32>
    %c9_564 = arith.constant 9 : index
    %c0_565 = arith.constant 0 : index
    %c0_566 = arith.constant 0 : index
    %618 = vector.load %arg4[%c9_564, %c0_565, %c0_566] : memref<12x8x128xf32, #tpu.memory_space<vmem>>, vector<1x8x128xf32>
    %619 = vector.shape_cast %618 : vector<1x8x128xf32> to vector<8x128xf32>
    %620 = vector.shape_cast %617 : vector<8x128xf32> to vector<1x8x128xf32>
    tpu.vector_store %arg4[%c9_564, %c0_565, %c0_566], %620 {strides = array<i32>} : memref<12x8x128xf32, #tpu.memory_space<vmem>>, vector<1x8x128xf32>,
    %c0_567 = arith.constant 0 : index
    %c0_568 = arith.constant 0 : index
    %c0_569 = arith.constant 0 : index
    %621 = vector.load %arg2[%c0_567, %c0_568, %c0_569] : memref<5x32x256xf32, #tpu.memory_space<vmem>>, vector<1x32x256xf32>
    %622 = vector.shape_cast %621 : vector<1x32x256xf32> to vector<32x256xf32>
    %c20_570 = arith.constant 20 : index
    %c0_571 = arith.constant 0 : index
    %c0_572 = arith.constant 0 : index
    %623 = vector.load %arg1[%c20_570, %c0_571, %c0_572] : memref<28x8x32xf32, #tpu.memory_space<vmem>>, vector<1x8x32xf32>
    %624 = vector.shape_cast %623 : vector<1x8x32xf32> to vector<8x32xf32>
    %cst_573 = arith.constant dense<0.000000e+00> : vector<8x256xf32>
    %625 = tpu.matmul %624, %622, %cst_573 {dimension_numbers = #tpu.dot_dimension_numbers<[1], [0], [0], [1], [0, 0, 1, 1], [], []>} : vector<8x32xf32>, vector<32x256xf32>, vector<8x256xf32> -> vector<8x256xf32>
    %c21_574 = arith.constant 21 : index
    %c0_575 = arith.constant 0 : index
    %c0_576 = arith.constant 0 : index
    %626 = vector.load %arg1[%c21_574, %c0_575, %c0_576] : memref<28x8x32xf32, #tpu.memory_space<vmem>>, vector<1x8x32xf32>
    %627 = vector.shape_cast %626 : vector<1x8x32xf32> to vector<8x32xf32>
    %cst_577 = arith.constant dense<0.000000e+00> : vector<8x256xf32>
    %628 = tpu.matmul %627, %622, %cst_577 {dimension_numbers = #tpu.dot_dimension_numbers<[1], [0], [0], [1], [0, 0, 1, 1], [], []>} : vector<8x32xf32>, vector<32x256xf32>, vector<8x256xf32> -> vector<8x256xf32>
    %c1_578 = arith.constant 1 : index
    %c0_579 = arith.constant 0 : index
    %c0_580 = arith.constant 0 : index
    %629 = vector.load %arg2[%c1_578, %c0_579, %c0_580] : memref<5x32x256xf32, #tpu.memory_space<vmem>>, vector<1x32x256xf32>
    %630 = vector.shape_cast %629 : vector<1x32x256xf32> to vector<32x256xf32>
    %c21_581 = arith.constant 21 : index
    %c0_582 = arith.constant 0 : index
    %c0_583 = arith.constant 0 : index
    %631 = vector.load %arg1[%c21_581, %c0_582, %c0_583] : memref<28x8x32xf32, #tpu.memory_space<vmem>>, vector<1x8x32xf32>
    %632 = vector.shape_cast %631 : vector<1x8x32xf32> to vector<8x32xf32>
    %cst_584 = arith.constant dense<0.000000e+00> : vector<8x256xf32>
    %633 = tpu.matmul %632, %630, %cst_584 {dimension_numbers = #tpu.dot_dimension_numbers<[1], [0], [0], [1], [0, 0, 1, 1], [], []>} : vector<8x32xf32>, vector<32x256xf32>, vector<8x256xf32> -> vector<8x256xf32>
    %c22_585 = arith.constant 22 : index
    %c0_586 = arith.constant 0 : index
    %c0_587 = arith.constant 0 : index
    %634 = vector.load %arg1[%c22_585, %c0_586, %c0_587] : memref<28x8x32xf32, #tpu.memory_space<vmem>>, vector<1x8x32xf32>
    %635 = vector.shape_cast %634 : vector<1x8x32xf32> to vector<8x32xf32>
    %cst_588 = arith.constant dense<0.000000e+00> : vector<8x256xf32>
    %636 = tpu.matmul %635, %630, %cst_588 {dimension_numbers = #tpu.dot_dimension_numbers<[1], [0], [0], [1], [0, 0, 1, 1], [], []>} : vector<8x32xf32>, vector<32x256xf32>, vector<8x256xf32> -> vector<8x256xf32>
    %637 = arith.addf %625, %633 : vector<8x256xf32>
    %638 = arith.addf %628, %636 : vector<8x256xf32>
    %c2_589 = arith.constant 2 : index
    %c0_590 = arith.constant 0 : index
    %c0_591 = arith.constant 0 : index
    %639 = vector.load %arg2[%c2_589, %c0_590, %c0_591] : memref<5x32x256xf32, #tpu.memory_space<vmem>>, vector<1x32x256xf32>
    %640 = vector.shape_cast %639 : vector<1x32x256xf32> to vector<32x256xf32>
    %c22_592 = arith.constant 22 : index
    %c0_593 = arith.constant 0 : index
    %c0_594 = arith.constant 0 : index
    %641 = vector.load %arg1[%c22_592, %c0_593, %c0_594] : memref<28x8x32xf32, #tpu.memory_space<vmem>>, vector<1x8x32xf32>
    %642 = vector.shape_cast %641 : vector<1x8x32xf32> to vector<8x32xf32>
    %cst_595 = arith.constant dense<0.000000e+00> : vector<8x256xf32>
    %643 = tpu.matmul %642, %640, %cst_595 {dimension_numbers = #tpu.dot_dimension_numbers<[1], [0], [0], [1], [0, 0, 1, 1], [], []>} : vector<8x32xf32>, vector<32x256xf32>, vector<8x256xf32> -> vector<8x256xf32>
    %c23_596 = arith.constant 23 : index
    %c0_597 = arith.constant 0 : index
    %c0_598 = arith.constant 0 : index
    %644 = vector.load %arg1[%c23_596, %c0_597, %c0_598] : memref<28x8x32xf32, #tpu.memory_space<vmem>>, vector<1x8x32xf32>
    %645 = vector.shape_cast %644 : vector<1x8x32xf32> to vector<8x32xf32>
    %cst_599 = arith.constant dense<0.000000e+00> : vector<8x256xf32>
    %646 = tpu.matmul %645, %640, %cst_599 {dimension_numbers = #tpu.dot_dimension_numbers<[1], [0], [0], [1], [0, 0, 1, 1], [], []>} : vector<8x32xf32>, vector<32x256xf32>, vector<8x256xf32> -> vector<8x256xf32>
    %647 = arith.addf %637, %643 : vector<8x256xf32>
    %648 = arith.addf %638, %646 : vector<8x256xf32>
    %c3_600 = arith.constant 3 : index
    %c0_601 = arith.constant 0 : index
    %c0_602 = arith.constant 0 : index
    %649 = vector.load %arg2[%c3_600, %c0_601, %c0_602] : memref<5x32x256xf32, #tpu.memory_space<vmem>>, vector<1x32x256xf32>
    %650 = vector.shape_cast %649 : vector<1x32x256xf32> to vector<32x256xf32>
    %c23_603 = arith.constant 23 : index
    %c0_604 = arith.constant 0 : index
    %c0_605 = arith.constant 0 : index
    %651 = vector.load %arg1[%c23_603, %c0_604, %c0_605] : memref<28x8x32xf32, #tpu.memory_space<vmem>>, vector<1x8x32xf32>
    %652 = vector.shape_cast %651 : vector<1x8x32xf32> to vector<8x32xf32>
    %cst_606 = arith.constant dense<0.000000e+00> : vector<8x256xf32>
    %653 = tpu.matmul %652, %650, %cst_606 {dimension_numbers = #tpu.dot_dimension_numbers<[1], [0], [0], [1], [0, 0, 1, 1], [], []>} : vector<8x32xf32>, vector<32x256xf32>, vector<8x256xf32> -> vector<8x256xf32>
    %c24 = arith.constant 24 : index
    %c0_607 = arith.constant 0 : index
    %c0_608 = arith.constant 0 : index
    %654 = vector.load %arg1[%c24, %c0_607, %c0_608] : memref<28x8x32xf32, #tpu.memory_space<vmem>>, vector<1x8x32xf32>
    %655 = vector.shape_cast %654 : vector<1x8x32xf32> to vector<8x32xf32>
    %cst_609 = arith.constant dense<0.000000e+00> : vector<8x256xf32>
    %656 = tpu.matmul %655, %650, %cst_609 {dimension_numbers = #tpu.dot_dimension_numbers<[1], [0], [0], [1], [0, 0, 1, 1], [], []>} : vector<8x32xf32>, vector<32x256xf32>, vector<8x256xf32> -> vector<8x256xf32>
    %657 = arith.addf %647, %653 : vector<8x256xf32>
    %658 = arith.addf %648, %656 : vector<8x256xf32>
    %c4_610 = arith.constant 4 : index
    %c0_611 = arith.constant 0 : index
    %c0_612 = arith.constant 0 : index
    %659 = vector.load %arg2[%c4_610, %c0_611, %c0_612] : memref<5x32x256xf32, #tpu.memory_space<vmem>>, vector<1x32x256xf32>
    %660 = vector.shape_cast %659 : vector<1x32x256xf32> to vector<32x256xf32>
    %c24_613 = arith.constant 24 : index
    %c0_614 = arith.constant 0 : index
    %c0_615 = arith.constant 0 : index
    %661 = vector.load %arg1[%c24_613, %c0_614, %c0_615] : memref<28x8x32xf32, #tpu.memory_space<vmem>>, vector<1x8x32xf32>
    %662 = vector.shape_cast %661 : vector<1x8x32xf32> to vector<8x32xf32>
    %cst_616 = arith.constant dense<0.000000e+00> : vector<8x256xf32>
    %663 = tpu.matmul %662, %660, %cst_616 {dimension_numbers = #tpu.dot_dimension_numbers<[1], [0], [0], [1], [0, 0, 1, 1], [], []>} : vector<8x32xf32>, vector<32x256xf32>, vector<8x256xf32> -> vector<8x256xf32>
    %c25 = arith.constant 25 : index
    %c0_617 = arith.constant 0 : index
    %c0_618 = arith.constant 0 : index
    %664 = vector.load %arg1[%c25, %c0_617, %c0_618] : memref<28x8x32xf32, #tpu.memory_space<vmem>>, vector<1x8x32xf32>
    %665 = vector.shape_cast %664 : vector<1x8x32xf32> to vector<8x32xf32>
    %cst_619 = arith.constant dense<0.000000e+00> : vector<8x256xf32>
    %666 = tpu.matmul %665, %660, %cst_619 {dimension_numbers = #tpu.dot_dimension_numbers<[1], [0], [0], [1], [0, 0, 1, 1], [], []>} : vector<8x32xf32>, vector<32x256xf32>, vector<8x256xf32> -> vector<8x256xf32>
    %667 = arith.addf %657, %663 : vector<8x256xf32>
    %668 = arith.addf %658, %666 : vector<8x256xf32>
    %669 = vector.extract_strided_slice %667 {offsets = [0, 0], sizes = [8, 128], strides = [1, 1]} : vector<8x256xf32> to vector<8x128xf32>
    %670 = vector.extract_strided_slice %667 {offsets = [0, 128], sizes = [8, 128], strides = [1, 1]} : vector<8x256xf32> to vector<8x128xf32>
    %671 = arith.maximumf %669, %670 : vector<8x128xf32>
    %672 = vector.extract_strided_slice %668 {offsets = [0, 0], sizes = [8, 128], strides = [1, 1]} : vector<8x256xf32> to vector<8x128xf32>
    %673 = vector.extract_strided_slice %668 {offsets = [0, 128], sizes = [8, 128], strides = [1, 1]} : vector<8x256xf32> to vector<8x128xf32>
    %674 = arith.maximumf %672, %673 : vector<8x128xf32>
    %675 = arith.maximumf %671, %674 : vector<8x128xf32>
    %676 = vector.broadcast %0 : vector<1x128xf32> to vector<8x128xf32>
    %677 = arith.addf %675, %676 : vector<8x128xf32>
    %cst_620 = arith.constant 0.000000e+00 : f32
    %678 = vector.broadcast %cst_620 : f32 to vector<8x128xf32>
    %679 = arith.maximumf %677, %678 : vector<8x128xf32>
    %c10_621 = arith.constant 10 : index
    %c0_622 = arith.constant 0 : index
    %c0_623 = arith.constant 0 : index
    %680 = vector.load %arg4[%c10_621, %c0_622, %c0_623] : memref<12x8x128xf32, #tpu.memory_space<vmem>>, vector<1x8x128xf32>
    %681 = vector.shape_cast %680 : vector<1x8x128xf32> to vector<8x128xf32>
    %682 = vector.shape_cast %679 : vector<8x128xf32> to vector<1x8x128xf32>
    tpu.vector_store %arg4[%c10_621, %c0_622, %c0_623], %682 {strides = array<i32>} : memref<12x8x128xf32, #tpu.memory_space<vmem>>, vector<1x8x128xf32>,
    %c0_624 = arith.constant 0 : index
    %c0_625 = arith.constant 0 : index
    %c0_626 = arith.constant 0 : index
    %683 = vector.load %arg2[%c0_624, %c0_625, %c0_626] : memref<5x32x256xf32, #tpu.memory_space<vmem>>, vector<1x32x256xf32>
    %684 = vector.shape_cast %683 : vector<1x32x256xf32> to vector<32x256xf32>
    %c22_627 = arith.constant 22 : index
    %c0_628 = arith.constant 0 : index
    %c0_629 = arith.constant 0 : index
    %685 = vector.load %arg1[%c22_627, %c0_628, %c0_629] : memref<28x8x32xf32, #tpu.memory_space<vmem>>, vector<1x8x32xf32>
    %686 = vector.shape_cast %685 : vector<1x8x32xf32> to vector<8x32xf32>
    %cst_630 = arith.constant dense<0.000000e+00> : vector<8x256xf32>
    %687 = tpu.matmul %686, %684, %cst_630 {dimension_numbers = #tpu.dot_dimension_numbers<[1], [0], [0], [1], [0, 0, 1, 1], [], []>} : vector<8x32xf32>, vector<32x256xf32>, vector<8x256xf32> -> vector<8x256xf32>
    %c23_631 = arith.constant 23 : index
    %c0_632 = arith.constant 0 : index
    %c0_633 = arith.constant 0 : index
    %688 = vector.load %arg1[%c23_631, %c0_632, %c0_633] : memref<28x8x32xf32, #tpu.memory_space<vmem>>, vector<1x8x32xf32>
    %689 = vector.shape_cast %688 : vector<1x8x32xf32> to vector<8x32xf32>
    %cst_634 = arith.constant dense<0.000000e+00> : vector<8x256xf32>
    %690 = tpu.matmul %689, %684, %cst_634 {dimension_numbers = #tpu.dot_dimension_numbers<[1], [0], [0], [1], [0, 0, 1, 1], [], []>} : vector<8x32xf32>, vector<32x256xf32>, vector<8x256xf32> -> vector<8x256xf32>
    %c1_635 = arith.constant 1 : index
    %c0_636 = arith.constant 0 : index
    %c0_637 = arith.constant 0 : index
    %691 = vector.load %arg2[%c1_635, %c0_636, %c0_637] : memref<5x32x256xf32, #tpu.memory_space<vmem>>, vector<1x32x256xf32>
    %692 = vector.shape_cast %691 : vector<1x32x256xf32> to vector<32x256xf32>
    %c23_638 = arith.constant 23 : index
    %c0_639 = arith.constant 0 : index
    %c0_640 = arith.constant 0 : index
    %693 = vector.load %arg1[%c23_638, %c0_639, %c0_640] : memref<28x8x32xf32, #tpu.memory_space<vmem>>, vector<1x8x32xf32>
    %694 = vector.shape_cast %693 : vector<1x8x32xf32> to vector<8x32xf32>
    %cst_641 = arith.constant dense<0.000000e+00> : vector<8x256xf32>
    %695 = tpu.matmul %694, %692, %cst_641 {dimension_numbers = #tpu.dot_dimension_numbers<[1], [0], [0], [1], [0, 0, 1, 1], [], []>} : vector<8x32xf32>, vector<32x256xf32>, vector<8x256xf32> -> vector<8x256xf32>
    %c24_642 = arith.constant 24 : index
    %c0_643 = arith.constant 0 : index
    %c0_644 = arith.constant 0 : index
    %696 = vector.load %arg1[%c24_642, %c0_643, %c0_644] : memref<28x8x32xf32, #tpu.memory_space<vmem>>, vector<1x8x32xf32>
    %697 = vector.shape_cast %696 : vector<1x8x32xf32> to vector<8x32xf32>
    %cst_645 = arith.constant dense<0.000000e+00> : vector<8x256xf32>
    %698 = tpu.matmul %697, %692, %cst_645 {dimension_numbers = #tpu.dot_dimension_numbers<[1], [0], [0], [1], [0, 0, 1, 1], [], []>} : vector<8x32xf32>, vector<32x256xf32>, vector<8x256xf32> -> vector<8x256xf32>
    %699 = arith.addf %687, %695 : vector<8x256xf32>
    %700 = arith.addf %690, %698 : vector<8x256xf32>
    %c2_646 = arith.constant 2 : index
    %c0_647 = arith.constant 0 : index
    %c0_648 = arith.constant 0 : index
    %701 = vector.load %arg2[%c2_646, %c0_647, %c0_648] : memref<5x32x256xf32, #tpu.memory_space<vmem>>, vector<1x32x256xf32>
    %702 = vector.shape_cast %701 : vector<1x32x256xf32> to vector<32x256xf32>
    %c24_649 = arith.constant 24 : index
    %c0_650 = arith.constant 0 : index
    %c0_651 = arith.constant 0 : index
    %703 = vector.load %arg1[%c24_649, %c0_650, %c0_651] : memref<28x8x32xf32, #tpu.memory_space<vmem>>, vector<1x8x32xf32>
    %704 = vector.shape_cast %703 : vector<1x8x32xf32> to vector<8x32xf32>
    %cst_652 = arith.constant dense<0.000000e+00> : vector<8x256xf32>
    %705 = tpu.matmul %704, %702, %cst_652 {dimension_numbers = #tpu.dot_dimension_numbers<[1], [0], [0], [1], [0, 0, 1, 1], [], []>} : vector<8x32xf32>, vector<32x256xf32>, vector<8x256xf32> -> vector<8x256xf32>
    %c25_653 = arith.constant 25 : index
    %c0_654 = arith.constant 0 : index
    %c0_655 = arith.constant 0 : index
    %706 = vector.load %arg1[%c25_653, %c0_654, %c0_655] : memref<28x8x32xf32, #tpu.memory_space<vmem>>, vector<1x8x32xf32>
    %707 = vector.shape_cast %706 : vector<1x8x32xf32> to vector<8x32xf32>
    %cst_656 = arith.constant dense<0.000000e+00> : vector<8x256xf32>
    %708 = tpu.matmul %707, %702, %cst_656 {dimension_numbers = #tpu.dot_dimension_numbers<[1], [0], [0], [1], [0, 0, 1, 1], [], []>} : vector<8x32xf32>, vector<32x256xf32>, vector<8x256xf32> -> vector<8x256xf32>
    %709 = arith.addf %699, %705 : vector<8x256xf32>
    %710 = arith.addf %700, %708 : vector<8x256xf32>
    %c3_657 = arith.constant 3 : index
    %c0_658 = arith.constant 0 : index
    %c0_659 = arith.constant 0 : index
    %711 = vector.load %arg2[%c3_657, %c0_658, %c0_659] : memref<5x32x256xf32, #tpu.memory_space<vmem>>, vector<1x32x256xf32>
    %712 = vector.shape_cast %711 : vector<1x32x256xf32> to vector<32x256xf32>
    %c25_660 = arith.constant 25 : index
    %c0_661 = arith.constant 0 : index
    %c0_662 = arith.constant 0 : index
    %713 = vector.load %arg1[%c25_660, %c0_661, %c0_662] : memref<28x8x32xf32, #tpu.memory_space<vmem>>, vector<1x8x32xf32>
    %714 = vector.shape_cast %713 : vector<1x8x32xf32> to vector<8x32xf32>
    %cst_663 = arith.constant dense<0.000000e+00> : vector<8x256xf32>
    %715 = tpu.matmul %714, %712, %cst_663 {dimension_numbers = #tpu.dot_dimension_numbers<[1], [0], [0], [1], [0, 0, 1, 1], [], []>} : vector<8x32xf32>, vector<32x256xf32>, vector<8x256xf32> -> vector<8x256xf32>
    %c26 = arith.constant 26 : index
    %c0_664 = arith.constant 0 : index
    %c0_665 = arith.constant 0 : index
    %716 = vector.load %arg1[%c26, %c0_664, %c0_665] : memref<28x8x32xf32, #tpu.memory_space<vmem>>, vector<1x8x32xf32>
    %717 = vector.shape_cast %716 : vector<1x8x32xf32> to vector<8x32xf32>
    %cst_666 = arith.constant dense<0.000000e+00> : vector<8x256xf32>
    %718 = tpu.matmul %717, %712, %cst_666 {dimension_numbers = #tpu.dot_dimension_numbers<[1], [0], [0], [1], [0, 0, 1, 1], [], []>} : vector<8x32xf32>, vector<32x256xf32>, vector<8x256xf32> -> vector<8x256xf32>
    %719 = arith.addf %709, %715 : vector<8x256xf32>
    %720 = arith.addf %710, %718 : vector<8x256xf32>
    %c4_667 = arith.constant 4 : index
    %c0_668 = arith.constant 0 : index
    %c0_669 = arith.constant 0 : index
    %721 = vector.load %arg2[%c4_667, %c0_668, %c0_669] : memref<5x32x256xf32, #tpu.memory_space<vmem>>, vector<1x32x256xf32>
    %722 = vector.shape_cast %721 : vector<1x32x256xf32> to vector<32x256xf32>
    %c26_670 = arith.constant 26 : index
    %c0_671 = arith.constant 0 : index
    %c0_672 = arith.constant 0 : index
    %723 = vector.load %arg1[%c26_670, %c0_671, %c0_672] : memref<28x8x32xf32, #tpu.memory_space<vmem>>, vector<1x8x32xf32>
    %724 = vector.shape_cast %723 : vector<1x8x32xf32> to vector<8x32xf32>
    %cst_673 = arith.constant dense<0.000000e+00> : vector<8x256xf32>
    %725 = tpu.matmul %724, %722, %cst_673 {dimension_numbers = #tpu.dot_dimension_numbers<[1], [0], [0], [1], [0, 0, 1, 1], [], []>} : vector<8x32xf32>, vector<32x256xf32>, vector<8x256xf32> -> vector<8x256xf32>
    %c27 = arith.constant 27 : index
    %c0_674 = arith.constant 0 : index
    %c0_675 = arith.constant 0 : index
    %726 = vector.load %arg1[%c27, %c0_674, %c0_675] : memref<28x8x32xf32, #tpu.memory_space<vmem>>, vector<1x8x32xf32>
    %727 = vector.shape_cast %726 : vector<1x8x32xf32> to vector<8x32xf32>
    %cst_676 = arith.constant dense<0.000000e+00> : vector<8x256xf32>
    %728 = tpu.matmul %727, %722, %cst_676 {dimension_numbers = #tpu.dot_dimension_numbers<[1], [0], [0], [1], [0, 0, 1, 1], [], []>} : vector<8x32xf32>, vector<32x256xf32>, vector<8x256xf32> -> vector<8x256xf32>
    %729 = arith.addf %719, %725 : vector<8x256xf32>
    %730 = arith.addf %720, %728 : vector<8x256xf32>
    %731 = vector.extract_strided_slice %729 {offsets = [0, 0], sizes = [8, 128], strides = [1, 1]} : vector<8x256xf32> to vector<8x128xf32>
    %732 = vector.extract_strided_slice %729 {offsets = [0, 128], sizes = [8, 128], strides = [1, 1]} : vector<8x256xf32> to vector<8x128xf32>
    %733 = arith.maximumf %731, %732 : vector<8x128xf32>
    %734 = vector.extract_strided_slice %730 {offsets = [0, 0], sizes = [8, 128], strides = [1, 1]} : vector<8x256xf32> to vector<8x128xf32>
    %735 = vector.extract_strided_slice %730 {offsets = [0, 128], sizes = [8, 128], strides = [1, 1]} : vector<8x256xf32> to vector<8x128xf32>
    %736 = arith.maximumf %734, %735 : vector<8x128xf32>
    %737 = arith.maximumf %733, %736 : vector<8x128xf32>
    %738 = vector.broadcast %0 : vector<1x128xf32> to vector<8x128xf32>
    %739 = arith.addf %737, %738 : vector<8x128xf32>
    %cst_677 = arith.constant 0.000000e+00 : f32
    %740 = vector.broadcast %cst_677 : f32 to vector<8x128xf32>
    %741 = arith.maximumf %739, %740 : vector<8x128xf32>
    %c11_678 = arith.constant 11 : index
    %c0_679 = arith.constant 0 : index
    %c0_680 = arith.constant 0 : index
    %742 = vector.load %arg4[%c11_678, %c0_679, %c0_680] : memref<12x8x128xf32, #tpu.memory_space<vmem>>, vector<1x8x128xf32>
    %743 = vector.shape_cast %742 : vector<1x8x128xf32> to vector<8x128xf32>
    %744 = vector.shape_cast %741 : vector<8x128xf32> to vector<1x8x128xf32>
    tpu.vector_store %arg4[%c11_678, %c0_679, %c0_680], %744 {strides = array<i32>} : memref<12x8x128xf32, #tpu.memory_space<vmem>>, vector<1x8x128xf32>,
    return
  }
  func.func @transform_0(%arg0: i32) -> (i32, i32, i32) {
    %c0_i32 = arith.constant 0 : i32
    %c0_i32_0 = arith.constant 0 : i32
    %c0_i32_1 = arith.constant 0 : i32
    return %c0_i32, %arg0, %c0_i32_0 : i32, i32, i32
  }
  func.func @transform_1(%arg0: i32) -> (i32, i32, i32) {
    %c0_i32 = arith.constant 0 : i32
    %c0_i32_0 = arith.constant 0 : i32
    %c0_i32_1 = arith.constant 0 : i32
    %c0_i32_2 = arith.constant 0 : i32
    return %c0_i32, %c0_i32_0, %c0_i32_1 : i32, i32, i32
  }
  func.func @transform_2(%arg0: i32) -> (i32, i32) {
    %c0_i32 = arith.constant 0 : i32
    %c0_i32_0 = arith.constant 0 : i32
    %c0_i32_1 = arith.constant 0 : i32
    return %c0_i32, %c0_i32_0 : i32, i32
  }
  func.func @transform_3(%arg0: i32) -> (i32, i32, i32) {
    %c0_i32 = arith.constant 0 : i32
    %c0_i32_0 = arith.constant 0 : i32
    %c0_i32_1 = arith.constant 0 : i32
    return %c0_i32, %arg0, %c0_i32_0 : i32, i32, i32
  }
}

module attributes {stable_mosaic.version = 11 : i64} {
  func.func @_conv2_mlp_kernel(%arg0: i32, %arg1: memref<12x8x128xf32, #tpu.memory_space<vmem>>, %arg2: memref<5x128x256xf32, #tpu.memory_space<vmem>>, %arg3: memref<1x128xf32, #tpu.memory_space<vmem>>, %arg4: memref<4x128x64xf32, #tpu.memory_space<vmem>>, %arg5: memref<1x64xf32, #tpu.memory_space<vmem>>, %arg6: memref<64x10xf32, #tpu.memory_space<vmem>>, %arg7: memref<1x10xf32, #tpu.memory_space<vmem>>, %arg8: memref<8x10xf32, #tpu.memory_space<vmem>>) attributes {dimension_semantics = [#tpu.dimension_semantics<parallel>], iteration_bounds = array<i64: 2>, scalar_prefetch = 0 : i64, scratch_operands = 0 : i64, tpu.core_type = #tpu.core_type<tc>, window_params = [{transform_indices = @transform_0, window_bounds = array<i64: 12, 8, 128>}, {pipeline_mode = #tpu.pipeline_mode<synchronous>, transform_indices = @transform_1, window_bounds = array<i64: 5, 128, 256>}, {pipeline_mode = #tpu.pipeline_mode<synchronous>, transform_indices = @transform_2, window_bounds = array<i64: 1, 128>}, {pipeline_mode = #tpu.pipeline_mode<synchronous>, transform_indices = @transform_3, window_bounds = array<i64: 4, 128, 64>}, {pipeline_mode = #tpu.pipeline_mode<synchronous>, transform_indices = @transform_4, window_bounds = array<i64: 1, 64>}, {pipeline_mode = #tpu.pipeline_mode<synchronous>, transform_indices = @transform_5, window_bounds = array<i64: 64, 10>}, {pipeline_mode = #tpu.pipeline_mode<synchronous>, transform_indices = @transform_6, window_bounds = array<i64: 1, 10>}, {transform_indices = @transform_7, window_bounds = array<i64: 8, 10>}]} {
    %c0 = arith.constant 0 : index
    %c0_0 = arith.constant 0 : index
    %0 = vector.load %arg3[%c0, %c0_0] : memref<1x128xf32, #tpu.memory_space<vmem>>, vector<1x128xf32>
    %c0_1 = arith.constant 0 : index
    %c0_2 = arith.constant 0 : index
    %c0_3 = arith.constant 0 : index
    %1 = vector.load %arg2[%c0_1, %c0_2, %c0_3] : memref<5x128x256xf32, #tpu.memory_space<vmem>>, vector<1x128x256xf32>
    %2 = vector.shape_cast %1 : vector<1x128x256xf32> to vector<128x256xf32>
    %c0_4 = arith.constant 0 : index
    %c0_5 = arith.constant 0 : index
    %c0_6 = arith.constant 0 : index
    %3 = vector.load %arg1[%c0_4, %c0_5, %c0_6] : memref<12x8x128xf32, #tpu.memory_space<vmem>>, vector<1x8x128xf32>
    %4 = vector.shape_cast %3 : vector<1x8x128xf32> to vector<8x128xf32>
    %cst = arith.constant dense<0.000000e+00> : vector<8x256xf32>
    %5 = tpu.matmul %4, %2, %cst {dimension_numbers = #tpu.dot_dimension_numbers<[1], [0], [0], [1], [0, 0, 1, 1], [], []>} : vector<8x128xf32>, vector<128x256xf32>, vector<8x256xf32> -> vector<8x256xf32>
    %c1 = arith.constant 1 : index
    %c0_7 = arith.constant 0 : index
    %c0_8 = arith.constant 0 : index
    %6 = vector.load %arg1[%c1, %c0_7, %c0_8] : memref<12x8x128xf32, #tpu.memory_space<vmem>>, vector<1x8x128xf32>
    %7 = vector.shape_cast %6 : vector<1x8x128xf32> to vector<8x128xf32>
    %cst_9 = arith.constant dense<0.000000e+00> : vector<8x256xf32>
    %8 = tpu.matmul %7, %2, %cst_9 {dimension_numbers = #tpu.dot_dimension_numbers<[1], [0], [0], [1], [0, 0, 1, 1], [], []>} : vector<8x128xf32>, vector<128x256xf32>, vector<8x256xf32> -> vector<8x256xf32>
    %c1_10 = arith.constant 1 : index
    %c0_11 = arith.constant 0 : index
    %c0_12 = arith.constant 0 : index
    %9 = vector.load %arg2[%c1_10, %c0_11, %c0_12] : memref<5x128x256xf32, #tpu.memory_space<vmem>>, vector<1x128x256xf32>
    %10 = vector.shape_cast %9 : vector<1x128x256xf32> to vector<128x256xf32>
    %c1_13 = arith.constant 1 : index
    %c0_14 = arith.constant 0 : index
    %c0_15 = arith.constant 0 : index
    %11 = vector.load %arg1[%c1_13, %c0_14, %c0_15] : memref<12x8x128xf32, #tpu.memory_space<vmem>>, vector<1x8x128xf32>
    %12 = vector.shape_cast %11 : vector<1x8x128xf32> to vector<8x128xf32>
    %cst_16 = arith.constant dense<0.000000e+00> : vector<8x256xf32>
    %13 = tpu.matmul %12, %10, %cst_16 {dimension_numbers = #tpu.dot_dimension_numbers<[1], [0], [0], [1], [0, 0, 1, 1], [], []>} : vector<8x128xf32>, vector<128x256xf32>, vector<8x256xf32> -> vector<8x256xf32>
    %c2 = arith.constant 2 : index
    %c0_17 = arith.constant 0 : index
    %c0_18 = arith.constant 0 : index
    %14 = vector.load %arg1[%c2, %c0_17, %c0_18] : memref<12x8x128xf32, #tpu.memory_space<vmem>>, vector<1x8x128xf32>
    %15 = vector.shape_cast %14 : vector<1x8x128xf32> to vector<8x128xf32>
    %cst_19 = arith.constant dense<0.000000e+00> : vector<8x256xf32>
    %16 = tpu.matmul %15, %10, %cst_19 {dimension_numbers = #tpu.dot_dimension_numbers<[1], [0], [0], [1], [0, 0, 1, 1], [], []>} : vector<8x128xf32>, vector<128x256xf32>, vector<8x256xf32> -> vector<8x256xf32>
    %17 = arith.addf %5, %13 : vector<8x256xf32>
    %18 = arith.addf %8, %16 : vector<8x256xf32>
    %c2_20 = arith.constant 2 : index
    %c0_21 = arith.constant 0 : index
    %c0_22 = arith.constant 0 : index
    %19 = vector.load %arg2[%c2_20, %c0_21, %c0_22] : memref<5x128x256xf32, #tpu.memory_space<vmem>>, vector<1x128x256xf32>
    %20 = vector.shape_cast %19 : vector<1x128x256xf32> to vector<128x256xf32>
    %c2_23 = arith.constant 2 : index
    %c0_24 = arith.constant 0 : index
    %c0_25 = arith.constant 0 : index
    %21 = vector.load %arg1[%c2_23, %c0_24, %c0_25] : memref<12x8x128xf32, #tpu.memory_space<vmem>>, vector<1x8x128xf32>
    %22 = vector.shape_cast %21 : vector<1x8x128xf32> to vector<8x128xf32>
    %cst_26 = arith.constant dense<0.000000e+00> : vector<8x256xf32>
    %23 = tpu.matmul %22, %20, %cst_26 {dimension_numbers = #tpu.dot_dimension_numbers<[1], [0], [0], [1], [0, 0, 1, 1], [], []>} : vector<8x128xf32>, vector<128x256xf32>, vector<8x256xf32> -> vector<8x256xf32>
    %c3 = arith.constant 3 : index
    %c0_27 = arith.constant 0 : index
    %c0_28 = arith.constant 0 : index
    %24 = vector.load %arg1[%c3, %c0_27, %c0_28] : memref<12x8x128xf32, #tpu.memory_space<vmem>>, vector<1x8x128xf32>
    %25 = vector.shape_cast %24 : vector<1x8x128xf32> to vector<8x128xf32>
    %cst_29 = arith.constant dense<0.000000e+00> : vector<8x256xf32>
    %26 = tpu.matmul %25, %20, %cst_29 {dimension_numbers = #tpu.dot_dimension_numbers<[1], [0], [0], [1], [0, 0, 1, 1], [], []>} : vector<8x128xf32>, vector<128x256xf32>, vector<8x256xf32> -> vector<8x256xf32>
    %27 = arith.addf %17, %23 : vector<8x256xf32>
    %28 = arith.addf %18, %26 : vector<8x256xf32>
    %c3_30 = arith.constant 3 : index
    %c0_31 = arith.constant 0 : index
    %c0_32 = arith.constant 0 : index
    %29 = vector.load %arg2[%c3_30, %c0_31, %c0_32] : memref<5x128x256xf32, #tpu.memory_space<vmem>>, vector<1x128x256xf32>
    %30 = vector.shape_cast %29 : vector<1x128x256xf32> to vector<128x256xf32>
    %c3_33 = arith.constant 3 : index
    %c0_34 = arith.constant 0 : index
    %c0_35 = arith.constant 0 : index
    %31 = vector.load %arg1[%c3_33, %c0_34, %c0_35] : memref<12x8x128xf32, #tpu.memory_space<vmem>>, vector<1x8x128xf32>
    %32 = vector.shape_cast %31 : vector<1x8x128xf32> to vector<8x128xf32>
    %cst_36 = arith.constant dense<0.000000e+00> : vector<8x256xf32>
    %33 = tpu.matmul %32, %30, %cst_36 {dimension_numbers = #tpu.dot_dimension_numbers<[1], [0], [0], [1], [0, 0, 1, 1], [], []>} : vector<8x128xf32>, vector<128x256xf32>, vector<8x256xf32> -> vector<8x256xf32>
    %c4 = arith.constant 4 : index
    %c0_37 = arith.constant 0 : index
    %c0_38 = arith.constant 0 : index
    %34 = vector.load %arg1[%c4, %c0_37, %c0_38] : memref<12x8x128xf32, #tpu.memory_space<vmem>>, vector<1x8x128xf32>
    %35 = vector.shape_cast %34 : vector<1x8x128xf32> to vector<8x128xf32>
    %cst_39 = arith.constant dense<0.000000e+00> : vector<8x256xf32>
    %36 = tpu.matmul %35, %30, %cst_39 {dimension_numbers = #tpu.dot_dimension_numbers<[1], [0], [0], [1], [0, 0, 1, 1], [], []>} : vector<8x128xf32>, vector<128x256xf32>, vector<8x256xf32> -> vector<8x256xf32>
    %37 = arith.addf %27, %33 : vector<8x256xf32>
    %38 = arith.addf %28, %36 : vector<8x256xf32>
    %c4_40 = arith.constant 4 : index
    %c0_41 = arith.constant 0 : index
    %c0_42 = arith.constant 0 : index
    %39 = vector.load %arg2[%c4_40, %c0_41, %c0_42] : memref<5x128x256xf32, #tpu.memory_space<vmem>>, vector<1x128x256xf32>
    %40 = vector.shape_cast %39 : vector<1x128x256xf32> to vector<128x256xf32>
    %c4_43 = arith.constant 4 : index
    %c0_44 = arith.constant 0 : index
    %c0_45 = arith.constant 0 : index
    %41 = vector.load %arg1[%c4_43, %c0_44, %c0_45] : memref<12x8x128xf32, #tpu.memory_space<vmem>>, vector<1x8x128xf32>
    %42 = vector.shape_cast %41 : vector<1x8x128xf32> to vector<8x128xf32>
    %cst_46 = arith.constant dense<0.000000e+00> : vector<8x256xf32>
    %43 = tpu.matmul %42, %40, %cst_46 {dimension_numbers = #tpu.dot_dimension_numbers<[1], [0], [0], [1], [0, 0, 1, 1], [], []>} : vector<8x128xf32>, vector<128x256xf32>, vector<8x256xf32> -> vector<8x256xf32>
    %c5 = arith.constant 5 : index
    %c0_47 = arith.constant 0 : index
    %c0_48 = arith.constant 0 : index
    %44 = vector.load %arg1[%c5, %c0_47, %c0_48] : memref<12x8x128xf32, #tpu.memory_space<vmem>>, vector<1x8x128xf32>
    %45 = vector.shape_cast %44 : vector<1x8x128xf32> to vector<8x128xf32>
    %cst_49 = arith.constant dense<0.000000e+00> : vector<8x256xf32>
    %46 = tpu.matmul %45, %40, %cst_49 {dimension_numbers = #tpu.dot_dimension_numbers<[1], [0], [0], [1], [0, 0, 1, 1], [], []>} : vector<8x128xf32>, vector<128x256xf32>, vector<8x256xf32> -> vector<8x256xf32>
    %47 = arith.addf %37, %43 : vector<8x256xf32>
    %48 = arith.addf %38, %46 : vector<8x256xf32>
    %49 = vector.extract_strided_slice %47 {offsets = [0, 0], sizes = [8, 128], strides = [1, 1]} : vector<8x256xf32> to vector<8x128xf32>
    %50 = vector.extract_strided_slice %47 {offsets = [0, 128], sizes = [8, 128], strides = [1, 1]} : vector<8x256xf32> to vector<8x128xf32>
    %51 = arith.maximumf %49, %50 : vector<8x128xf32>
    %52 = vector.extract_strided_slice %48 {offsets = [0, 0], sizes = [8, 128], strides = [1, 1]} : vector<8x256xf32> to vector<8x128xf32>
    %53 = vector.extract_strided_slice %48 {offsets = [0, 128], sizes = [8, 128], strides = [1, 1]} : vector<8x256xf32> to vector<8x128xf32>
    %54 = arith.maximumf %52, %53 : vector<8x128xf32>
    %55 = arith.maximumf %51, %54 : vector<8x128xf32>
    %56 = vector.broadcast %0 : vector<1x128xf32> to vector<8x128xf32>
    %57 = arith.addf %55, %56 : vector<8x128xf32>
    %cst_50 = arith.constant 0.000000e+00 : f32
    %58 = vector.broadcast %cst_50 : f32 to vector<8x128xf32>
    %59 = arith.maximumf %57, %58 : vector<8x128xf32>
    %c0_51 = arith.constant 0 : index
    %c0_52 = arith.constant 0 : index
    %c0_53 = arith.constant 0 : index
    %60 = vector.load %arg4[%c0_51, %c0_52, %c0_53] : memref<4x128x64xf32, #tpu.memory_space<vmem>>, vector<1x128x64xf32>
    %61 = vector.shape_cast %60 : vector<1x128x64xf32> to vector<128x64xf32>
    %cst_54 = arith.constant dense<0.000000e+00> : vector<8x64xf32>
    %62 = tpu.matmul %59, %61, %cst_54 {dimension_numbers = #tpu.dot_dimension_numbers<[1], [0], [0], [1], [0, 0, 1, 1], [], []>} : vector<8x128xf32>, vector<128x64xf32>, vector<8x64xf32> -> vector<8x64xf32>
    %c0_55 = arith.constant 0 : index
    %c0_56 = arith.constant 0 : index
    %c0_57 = arith.constant 0 : index
    %63 = vector.load %arg2[%c0_55, %c0_56, %c0_57] : memref<5x128x256xf32, #tpu.memory_space<vmem>>, vector<1x128x256xf32>
    %64 = vector.shape_cast %63 : vector<1x128x256xf32> to vector<128x256xf32>
    %c2_58 = arith.constant 2 : index
    %c0_59 = arith.constant 0 : index
    %c0_60 = arith.constant 0 : index
    %65 = vector.load %arg1[%c2_58, %c0_59, %c0_60] : memref<12x8x128xf32, #tpu.memory_space<vmem>>, vector<1x8x128xf32>
    %66 = vector.shape_cast %65 : vector<1x8x128xf32> to vector<8x128xf32>
    %cst_61 = arith.constant dense<0.000000e+00> : vector<8x256xf32>
    %67 = tpu.matmul %66, %64, %cst_61 {dimension_numbers = #tpu.dot_dimension_numbers<[1], [0], [0], [1], [0, 0, 1, 1], [], []>} : vector<8x128xf32>, vector<128x256xf32>, vector<8x256xf32> -> vector<8x256xf32>
    %c3_62 = arith.constant 3 : index
    %c0_63 = arith.constant 0 : index
    %c0_64 = arith.constant 0 : index
    %68 = vector.load %arg1[%c3_62, %c0_63, %c0_64] : memref<12x8x128xf32, #tpu.memory_space<vmem>>, vector<1x8x128xf32>
    %69 = vector.shape_cast %68 : vector<1x8x128xf32> to vector<8x128xf32>
    %cst_65 = arith.constant dense<0.000000e+00> : vector<8x256xf32>
    %70 = tpu.matmul %69, %64, %cst_65 {dimension_numbers = #tpu.dot_dimension_numbers<[1], [0], [0], [1], [0, 0, 1, 1], [], []>} : vector<8x128xf32>, vector<128x256xf32>, vector<8x256xf32> -> vector<8x256xf32>
    %c1_66 = arith.constant 1 : index
    %c0_67 = arith.constant 0 : index
    %c0_68 = arith.constant 0 : index
    %71 = vector.load %arg2[%c1_66, %c0_67, %c0_68] : memref<5x128x256xf32, #tpu.memory_space<vmem>>, vector<1x128x256xf32>
    %72 = vector.shape_cast %71 : vector<1x128x256xf32> to vector<128x256xf32>
    %c3_69 = arith.constant 3 : index
    %c0_70 = arith.constant 0 : index
    %c0_71 = arith.constant 0 : index
    %73 = vector.load %arg1[%c3_69, %c0_70, %c0_71] : memref<12x8x128xf32, #tpu.memory_space<vmem>>, vector<1x8x128xf32>
    %74 = vector.shape_cast %73 : vector<1x8x128xf32> to vector<8x128xf32>
    %cst_72 = arith.constant dense<0.000000e+00> : vector<8x256xf32>
    %75 = tpu.matmul %74, %72, %cst_72 {dimension_numbers = #tpu.dot_dimension_numbers<[1], [0], [0], [1], [0, 0, 1, 1], [], []>} : vector<8x128xf32>, vector<128x256xf32>, vector<8x256xf32> -> vector<8x256xf32>
    %c4_73 = arith.constant 4 : index
    %c0_74 = arith.constant 0 : index
    %c0_75 = arith.constant 0 : index
    %76 = vector.load %arg1[%c4_73, %c0_74, %c0_75] : memref<12x8x128xf32, #tpu.memory_space<vmem>>, vector<1x8x128xf32>
    %77 = vector.shape_cast %76 : vector<1x8x128xf32> to vector<8x128xf32>
    %cst_76 = arith.constant dense<0.000000e+00> : vector<8x256xf32>
    %78 = tpu.matmul %77, %72, %cst_76 {dimension_numbers = #tpu.dot_dimension_numbers<[1], [0], [0], [1], [0, 0, 1, 1], [], []>} : vector<8x128xf32>, vector<128x256xf32>, vector<8x256xf32> -> vector<8x256xf32>
    %79 = arith.addf %67, %75 : vector<8x256xf32>
    %80 = arith.addf %70, %78 : vector<8x256xf32>
    %c2_77 = arith.constant 2 : index
    %c0_78 = arith.constant 0 : index
    %c0_79 = arith.constant 0 : index
    %81 = vector.load %arg2[%c2_77, %c0_78, %c0_79] : memref<5x128x256xf32, #tpu.memory_space<vmem>>, vector<1x128x256xf32>
    %82 = vector.shape_cast %81 : vector<1x128x256xf32> to vector<128x256xf32>
    %c4_80 = arith.constant 4 : index
    %c0_81 = arith.constant 0 : index
    %c0_82 = arith.constant 0 : index
    %83 = vector.load %arg1[%c4_80, %c0_81, %c0_82] : memref<12x8x128xf32, #tpu.memory_space<vmem>>, vector<1x8x128xf32>
    %84 = vector.shape_cast %83 : vector<1x8x128xf32> to vector<8x128xf32>
    %cst_83 = arith.constant dense<0.000000e+00> : vector<8x256xf32>
    %85 = tpu.matmul %84, %82, %cst_83 {dimension_numbers = #tpu.dot_dimension_numbers<[1], [0], [0], [1], [0, 0, 1, 1], [], []>} : vector<8x128xf32>, vector<128x256xf32>, vector<8x256xf32> -> vector<8x256xf32>
    %c5_84 = arith.constant 5 : index
    %c0_85 = arith.constant 0 : index
    %c0_86 = arith.constant 0 : index
    %86 = vector.load %arg1[%c5_84, %c0_85, %c0_86] : memref<12x8x128xf32, #tpu.memory_space<vmem>>, vector<1x8x128xf32>
    %87 = vector.shape_cast %86 : vector<1x8x128xf32> to vector<8x128xf32>
    %cst_87 = arith.constant dense<0.000000e+00> : vector<8x256xf32>
    %88 = tpu.matmul %87, %82, %cst_87 {dimension_numbers = #tpu.dot_dimension_numbers<[1], [0], [0], [1], [0, 0, 1, 1], [], []>} : vector<8x128xf32>, vector<128x256xf32>, vector<8x256xf32> -> vector<8x256xf32>
    %89 = arith.addf %79, %85 : vector<8x256xf32>
    %90 = arith.addf %80, %88 : vector<8x256xf32>
    %c3_88 = arith.constant 3 : index
    %c0_89 = arith.constant 0 : index
    %c0_90 = arith.constant 0 : index
    %91 = vector.load %arg2[%c3_88, %c0_89, %c0_90] : memref<5x128x256xf32, #tpu.memory_space<vmem>>, vector<1x128x256xf32>
    %92 = vector.shape_cast %91 : vector<1x128x256xf32> to vector<128x256xf32>
    %c5_91 = arith.constant 5 : index
    %c0_92 = arith.constant 0 : index
    %c0_93 = arith.constant 0 : index
    %93 = vector.load %arg1[%c5_91, %c0_92, %c0_93] : memref<12x8x128xf32, #tpu.memory_space<vmem>>, vector<1x8x128xf32>
    %94 = vector.shape_cast %93 : vector<1x8x128xf32> to vector<8x128xf32>
    %cst_94 = arith.constant dense<0.000000e+00> : vector<8x256xf32>
    %95 = tpu.matmul %94, %92, %cst_94 {dimension_numbers = #tpu.dot_dimension_numbers<[1], [0], [0], [1], [0, 0, 1, 1], [], []>} : vector<8x128xf32>, vector<128x256xf32>, vector<8x256xf32> -> vector<8x256xf32>
    %c6 = arith.constant 6 : index
    %c0_95 = arith.constant 0 : index
    %c0_96 = arith.constant 0 : index
    %96 = vector.load %arg1[%c6, %c0_95, %c0_96] : memref<12x8x128xf32, #tpu.memory_space<vmem>>, vector<1x8x128xf32>
    %97 = vector.shape_cast %96 : vector<1x8x128xf32> to vector<8x128xf32>
    %cst_97 = arith.constant dense<0.000000e+00> : vector<8x256xf32>
    %98 = tpu.matmul %97, %92, %cst_97 {dimension_numbers = #tpu.dot_dimension_numbers<[1], [0], [0], [1], [0, 0, 1, 1], [], []>} : vector<8x128xf32>, vector<128x256xf32>, vector<8x256xf32> -> vector<8x256xf32>
    %99 = arith.addf %89, %95 : vector<8x256xf32>
    %100 = arith.addf %90, %98 : vector<8x256xf32>
    %c4_98 = arith.constant 4 : index
    %c0_99 = arith.constant 0 : index
    %c0_100 = arith.constant 0 : index
    %101 = vector.load %arg2[%c4_98, %c0_99, %c0_100] : memref<5x128x256xf32, #tpu.memory_space<vmem>>, vector<1x128x256xf32>
    %102 = vector.shape_cast %101 : vector<1x128x256xf32> to vector<128x256xf32>
    %c6_101 = arith.constant 6 : index
    %c0_102 = arith.constant 0 : index
    %c0_103 = arith.constant 0 : index
    %103 = vector.load %arg1[%c6_101, %c0_102, %c0_103] : memref<12x8x128xf32, #tpu.memory_space<vmem>>, vector<1x8x128xf32>
    %104 = vector.shape_cast %103 : vector<1x8x128xf32> to vector<8x128xf32>
    %cst_104 = arith.constant dense<0.000000e+00> : vector<8x256xf32>
    %105 = tpu.matmul %104, %102, %cst_104 {dimension_numbers = #tpu.dot_dimension_numbers<[1], [0], [0], [1], [0, 0, 1, 1], [], []>} : vector<8x128xf32>, vector<128x256xf32>, vector<8x256xf32> -> vector<8x256xf32>
    %c7 = arith.constant 7 : index
    %c0_105 = arith.constant 0 : index
    %c0_106 = arith.constant 0 : index
    %106 = vector.load %arg1[%c7, %c0_105, %c0_106] : memref<12x8x128xf32, #tpu.memory_space<vmem>>, vector<1x8x128xf32>
    %107 = vector.shape_cast %106 : vector<1x8x128xf32> to vector<8x128xf32>
    %cst_107 = arith.constant dense<0.000000e+00> : vector<8x256xf32>
    %108 = tpu.matmul %107, %102, %cst_107 {dimension_numbers = #tpu.dot_dimension_numbers<[1], [0], [0], [1], [0, 0, 1, 1], [], []>} : vector<8x128xf32>, vector<128x256xf32>, vector<8x256xf32> -> vector<8x256xf32>
    %109 = arith.addf %99, %105 : vector<8x256xf32>
    %110 = arith.addf %100, %108 : vector<8x256xf32>
    %111 = vector.extract_strided_slice %109 {offsets = [0, 0], sizes = [8, 128], strides = [1, 1]} : vector<8x256xf32> to vector<8x128xf32>
    %112 = vector.extract_strided_slice %109 {offsets = [0, 128], sizes = [8, 128], strides = [1, 1]} : vector<8x256xf32> to vector<8x128xf32>
    %113 = arith.maximumf %111, %112 : vector<8x128xf32>
    %114 = vector.extract_strided_slice %110 {offsets = [0, 0], sizes = [8, 128], strides = [1, 1]} : vector<8x256xf32> to vector<8x128xf32>
    %115 = vector.extract_strided_slice %110 {offsets = [0, 128], sizes = [8, 128], strides = [1, 1]} : vector<8x256xf32> to vector<8x128xf32>
    %116 = arith.maximumf %114, %115 : vector<8x128xf32>
    %117 = arith.maximumf %113, %116 : vector<8x128xf32>
    %118 = vector.broadcast %0 : vector<1x128xf32> to vector<8x128xf32>
    %119 = arith.addf %117, %118 : vector<8x128xf32>
    %cst_108 = arith.constant 0.000000e+00 : f32
    %120 = vector.broadcast %cst_108 : f32 to vector<8x128xf32>
    %121 = arith.maximumf %119, %120 : vector<8x128xf32>
    %c1_109 = arith.constant 1 : index
    %c0_110 = arith.constant 0 : index
    %c0_111 = arith.constant 0 : index
    %122 = vector.load %arg4[%c1_109, %c0_110, %c0_111] : memref<4x128x64xf32, #tpu.memory_space<vmem>>, vector<1x128x64xf32>
    %123 = vector.shape_cast %122 : vector<1x128x64xf32> to vector<128x64xf32>
    %cst_112 = arith.constant dense<0.000000e+00> : vector<8x64xf32>
    %124 = tpu.matmul %121, %123, %cst_112 {dimension_numbers = #tpu.dot_dimension_numbers<[1], [0], [0], [1], [0, 0, 1, 1], [], []>} : vector<8x128xf32>, vector<128x64xf32>, vector<8x64xf32> -> vector<8x64xf32>
    %125 = arith.addf %62, %124 : vector<8x64xf32>
    %c0_113 = arith.constant 0 : index
    %c0_114 = arith.constant 0 : index
    %c0_115 = arith.constant 0 : index
    %126 = vector.load %arg2[%c0_113, %c0_114, %c0_115] : memref<5x128x256xf32, #tpu.memory_space<vmem>>, vector<1x128x256xf32>
    %127 = vector.shape_cast %126 : vector<1x128x256xf32> to vector<128x256xf32>
    %c4_116 = arith.constant 4 : index
    %c0_117 = arith.constant 0 : index
    %c0_118 = arith.constant 0 : index
    %128 = vector.load %arg1[%c4_116, %c0_117, %c0_118] : memref<12x8x128xf32, #tpu.memory_space<vmem>>, vector<1x8x128xf32>
    %129 = vector.shape_cast %128 : vector<1x8x128xf32> to vector<8x128xf32>
    %cst_119 = arith.constant dense<0.000000e+00> : vector<8x256xf32>
    %130 = tpu.matmul %129, %127, %cst_119 {dimension_numbers = #tpu.dot_dimension_numbers<[1], [0], [0], [1], [0, 0, 1, 1], [], []>} : vector<8x128xf32>, vector<128x256xf32>, vector<8x256xf32> -> vector<8x256xf32>
    %c5_120 = arith.constant 5 : index
    %c0_121 = arith.constant 0 : index
    %c0_122 = arith.constant 0 : index
    %131 = vector.load %arg1[%c5_120, %c0_121, %c0_122] : memref<12x8x128xf32, #tpu.memory_space<vmem>>, vector<1x8x128xf32>
    %132 = vector.shape_cast %131 : vector<1x8x128xf32> to vector<8x128xf32>
    %cst_123 = arith.constant dense<0.000000e+00> : vector<8x256xf32>
    %133 = tpu.matmul %132, %127, %cst_123 {dimension_numbers = #tpu.dot_dimension_numbers<[1], [0], [0], [1], [0, 0, 1, 1], [], []>} : vector<8x128xf32>, vector<128x256xf32>, vector<8x256xf32> -> vector<8x256xf32>
    %c1_124 = arith.constant 1 : index
    %c0_125 = arith.constant 0 : index
    %c0_126 = arith.constant 0 : index
    %134 = vector.load %arg2[%c1_124, %c0_125, %c0_126] : memref<5x128x256xf32, #tpu.memory_space<vmem>>, vector<1x128x256xf32>
    %135 = vector.shape_cast %134 : vector<1x128x256xf32> to vector<128x256xf32>
    %c5_127 = arith.constant 5 : index
    %c0_128 = arith.constant 0 : index
    %c0_129 = arith.constant 0 : index
    %136 = vector.load %arg1[%c5_127, %c0_128, %c0_129] : memref<12x8x128xf32, #tpu.memory_space<vmem>>, vector<1x8x128xf32>
    %137 = vector.shape_cast %136 : vector<1x8x128xf32> to vector<8x128xf32>
    %cst_130 = arith.constant dense<0.000000e+00> : vector<8x256xf32>
    %138 = tpu.matmul %137, %135, %cst_130 {dimension_numbers = #tpu.dot_dimension_numbers<[1], [0], [0], [1], [0, 0, 1, 1], [], []>} : vector<8x128xf32>, vector<128x256xf32>, vector<8x256xf32> -> vector<8x256xf32>
    %c6_131 = arith.constant 6 : index
    %c0_132 = arith.constant 0 : index
    %c0_133 = arith.constant 0 : index
    %139 = vector.load %arg1[%c6_131, %c0_132, %c0_133] : memref<12x8x128xf32, #tpu.memory_space<vmem>>, vector<1x8x128xf32>
    %140 = vector.shape_cast %139 : vector<1x8x128xf32> to vector<8x128xf32>
    %cst_134 = arith.constant dense<0.000000e+00> : vector<8x256xf32>
    %141 = tpu.matmul %140, %135, %cst_134 {dimension_numbers = #tpu.dot_dimension_numbers<[1], [0], [0], [1], [0, 0, 1, 1], [], []>} : vector<8x128xf32>, vector<128x256xf32>, vector<8x256xf32> -> vector<8x256xf32>
    %142 = arith.addf %130, %138 : vector<8x256xf32>
    %143 = arith.addf %133, %141 : vector<8x256xf32>
    %c2_135 = arith.constant 2 : index
    %c0_136 = arith.constant 0 : index
    %c0_137 = arith.constant 0 : index
    %144 = vector.load %arg2[%c2_135, %c0_136, %c0_137] : memref<5x128x256xf32, #tpu.memory_space<vmem>>, vector<1x128x256xf32>
    %145 = vector.shape_cast %144 : vector<1x128x256xf32> to vector<128x256xf32>
    %c6_138 = arith.constant 6 : index
    %c0_139 = arith.constant 0 : index
    %c0_140 = arith.constant 0 : index
    %146 = vector.load %arg1[%c6_138, %c0_139, %c0_140] : memref<12x8x128xf32, #tpu.memory_space<vmem>>, vector<1x8x128xf32>
    %147 = vector.shape_cast %146 : vector<1x8x128xf32> to vector<8x128xf32>
    %cst_141 = arith.constant dense<0.000000e+00> : vector<8x256xf32>
    %148 = tpu.matmul %147, %145, %cst_141 {dimension_numbers = #tpu.dot_dimension_numbers<[1], [0], [0], [1], [0, 0, 1, 1], [], []>} : vector<8x128xf32>, vector<128x256xf32>, vector<8x256xf32> -> vector<8x256xf32>
    %c7_142 = arith.constant 7 : index
    %c0_143 = arith.constant 0 : index
    %c0_144 = arith.constant 0 : index
    %149 = vector.load %arg1[%c7_142, %c0_143, %c0_144] : memref<12x8x128xf32, #tpu.memory_space<vmem>>, vector<1x8x128xf32>
    %150 = vector.shape_cast %149 : vector<1x8x128xf32> to vector<8x128xf32>
    %cst_145 = arith.constant dense<0.000000e+00> : vector<8x256xf32>
    %151 = tpu.matmul %150, %145, %cst_145 {dimension_numbers = #tpu.dot_dimension_numbers<[1], [0], [0], [1], [0, 0, 1, 1], [], []>} : vector<8x128xf32>, vector<128x256xf32>, vector<8x256xf32> -> vector<8x256xf32>
    %152 = arith.addf %142, %148 : vector<8x256xf32>
    %153 = arith.addf %143, %151 : vector<8x256xf32>
    %c3_146 = arith.constant 3 : index
    %c0_147 = arith.constant 0 : index
    %c0_148 = arith.constant 0 : index
    %154 = vector.load %arg2[%c3_146, %c0_147, %c0_148] : memref<5x128x256xf32, #tpu.memory_space<vmem>>, vector<1x128x256xf32>
    %155 = vector.shape_cast %154 : vector<1x128x256xf32> to vector<128x256xf32>
    %c7_149 = arith.constant 7 : index
    %c0_150 = arith.constant 0 : index
    %c0_151 = arith.constant 0 : index
    %156 = vector.load %arg1[%c7_149, %c0_150, %c0_151] : memref<12x8x128xf32, #tpu.memory_space<vmem>>, vector<1x8x128xf32>
    %157 = vector.shape_cast %156 : vector<1x8x128xf32> to vector<8x128xf32>
    %cst_152 = arith.constant dense<0.000000e+00> : vector<8x256xf32>
    %158 = tpu.matmul %157, %155, %cst_152 {dimension_numbers = #tpu.dot_dimension_numbers<[1], [0], [0], [1], [0, 0, 1, 1], [], []>} : vector<8x128xf32>, vector<128x256xf32>, vector<8x256xf32> -> vector<8x256xf32>
    %c8 = arith.constant 8 : index
    %c0_153 = arith.constant 0 : index
    %c0_154 = arith.constant 0 : index
    %159 = vector.load %arg1[%c8, %c0_153, %c0_154] : memref<12x8x128xf32, #tpu.memory_space<vmem>>, vector<1x8x128xf32>
    %160 = vector.shape_cast %159 : vector<1x8x128xf32> to vector<8x128xf32>
    %cst_155 = arith.constant dense<0.000000e+00> : vector<8x256xf32>
    %161 = tpu.matmul %160, %155, %cst_155 {dimension_numbers = #tpu.dot_dimension_numbers<[1], [0], [0], [1], [0, 0, 1, 1], [], []>} : vector<8x128xf32>, vector<128x256xf32>, vector<8x256xf32> -> vector<8x256xf32>
    %162 = arith.addf %152, %158 : vector<8x256xf32>
    %163 = arith.addf %153, %161 : vector<8x256xf32>
    %c4_156 = arith.constant 4 : index
    %c0_157 = arith.constant 0 : index
    %c0_158 = arith.constant 0 : index
    %164 = vector.load %arg2[%c4_156, %c0_157, %c0_158] : memref<5x128x256xf32, #tpu.memory_space<vmem>>, vector<1x128x256xf32>
    %165 = vector.shape_cast %164 : vector<1x128x256xf32> to vector<128x256xf32>
    %c8_159 = arith.constant 8 : index
    %c0_160 = arith.constant 0 : index
    %c0_161 = arith.constant 0 : index
    %166 = vector.load %arg1[%c8_159, %c0_160, %c0_161] : memref<12x8x128xf32, #tpu.memory_space<vmem>>, vector<1x8x128xf32>
    %167 = vector.shape_cast %166 : vector<1x8x128xf32> to vector<8x128xf32>
    %cst_162 = arith.constant dense<0.000000e+00> : vector<8x256xf32>
    %168 = tpu.matmul %167, %165, %cst_162 {dimension_numbers = #tpu.dot_dimension_numbers<[1], [0], [0], [1], [0, 0, 1, 1], [], []>} : vector<8x128xf32>, vector<128x256xf32>, vector<8x256xf32> -> vector<8x256xf32>
    %c9 = arith.constant 9 : index
    %c0_163 = arith.constant 0 : index
    %c0_164 = arith.constant 0 : index
    %169 = vector.load %arg1[%c9, %c0_163, %c0_164] : memref<12x8x128xf32, #tpu.memory_space<vmem>>, vector<1x8x128xf32>
    %170 = vector.shape_cast %169 : vector<1x8x128xf32> to vector<8x128xf32>
    %cst_165 = arith.constant dense<0.000000e+00> : vector<8x256xf32>
    %171 = tpu.matmul %170, %165, %cst_165 {dimension_numbers = #tpu.dot_dimension_numbers<[1], [0], [0], [1], [0, 0, 1, 1], [], []>} : vector<8x128xf32>, vector<128x256xf32>, vector<8x256xf32> -> vector<8x256xf32>
    %172 = arith.addf %162, %168 : vector<8x256xf32>
    %173 = arith.addf %163, %171 : vector<8x256xf32>
    %174 = vector.extract_strided_slice %172 {offsets = [0, 0], sizes = [8, 128], strides = [1, 1]} : vector<8x256xf32> to vector<8x128xf32>
    %175 = vector.extract_strided_slice %172 {offsets = [0, 128], sizes = [8, 128], strides = [1, 1]} : vector<8x256xf32> to vector<8x128xf32>
    %176 = arith.maximumf %174, %175 : vector<8x128xf32>
    %177 = vector.extract_strided_slice %173 {offsets = [0, 0], sizes = [8, 128], strides = [1, 1]} : vector<8x256xf32> to vector<8x128xf32>
    %178 = vector.extract_strided_slice %173 {offsets = [0, 128], sizes = [8, 128], strides = [1, 1]} : vector<8x256xf32> to vector<8x128xf32>
    %179 = arith.maximumf %177, %178 : vector<8x128xf32>
    %180 = arith.maximumf %176, %179 : vector<8x128xf32>
    %181 = vector.broadcast %0 : vector<1x128xf32> to vector<8x128xf32>
    %182 = arith.addf %180, %181 : vector<8x128xf32>
    %cst_166 = arith.constant 0.000000e+00 : f32
    %183 = vector.broadcast %cst_166 : f32 to vector<8x128xf32>
    %184 = arith.maximumf %182, %183 : vector<8x128xf32>
    %c2_167 = arith.constant 2 : index
    %c0_168 = arith.constant 0 : index
    %c0_169 = arith.constant 0 : index
    %185 = vector.load %arg4[%c2_167, %c0_168, %c0_169] : memref<4x128x64xf32, #tpu.memory_space<vmem>>, vector<1x128x64xf32>
    %186 = vector.shape_cast %185 : vector<1x128x64xf32> to vector<128x64xf32>
    %cst_170 = arith.constant dense<0.000000e+00> : vector<8x64xf32>
    %187 = tpu.matmul %184, %186, %cst_170 {dimension_numbers = #tpu.dot_dimension_numbers<[1], [0], [0], [1], [0, 0, 1, 1], [], []>} : vector<8x128xf32>, vector<128x64xf32>, vector<8x64xf32> -> vector<8x64xf32>
    %188 = arith.addf %125, %187 : vector<8x64xf32>
    %c0_171 = arith.constant 0 : index
    %c0_172 = arith.constant 0 : index
    %c0_173 = arith.constant 0 : index
    %189 = vector.load %arg2[%c0_171, %c0_172, %c0_173] : memref<5x128x256xf32, #tpu.memory_space<vmem>>, vector<1x128x256xf32>
    %190 = vector.shape_cast %189 : vector<1x128x256xf32> to vector<128x256xf32>
    %c6_174 = arith.constant 6 : index
    %c0_175 = arith.constant 0 : index
    %c0_176 = arith.constant 0 : index
    %191 = vector.load %arg1[%c6_174, %c0_175, %c0_176] : memref<12x8x128xf32, #tpu.memory_space<vmem>>, vector<1x8x128xf32>
    %192 = vector.shape_cast %191 : vector<1x8x128xf32> to vector<8x128xf32>
    %cst_177 = arith.constant dense<0.000000e+00> : vector<8x256xf32>
    %193 = tpu.matmul %192, %190, %cst_177 {dimension_numbers = #tpu.dot_dimension_numbers<[1], [0], [0], [1], [0, 0, 1, 1], [], []>} : vector<8x128xf32>, vector<128x256xf32>, vector<8x256xf32> -> vector<8x256xf32>
    %c7_178 = arith.constant 7 : index
    %c0_179 = arith.constant 0 : index
    %c0_180 = arith.constant 0 : index
    %194 = vector.load %arg1[%c7_178, %c0_179, %c0_180] : memref<12x8x128xf32, #tpu.memory_space<vmem>>, vector<1x8x128xf32>
    %195 = vector.shape_cast %194 : vector<1x8x128xf32> to vector<8x128xf32>
    %cst_181 = arith.constant dense<0.000000e+00> : vector<8x256xf32>
    %196 = tpu.matmul %195, %190, %cst_181 {dimension_numbers = #tpu.dot_dimension_numbers<[1], [0], [0], [1], [0, 0, 1, 1], [], []>} : vector<8x128xf32>, vector<128x256xf32>, vector<8x256xf32> -> vector<8x256xf32>
    %c1_182 = arith.constant 1 : index
    %c0_183 = arith.constant 0 : index
    %c0_184 = arith.constant 0 : index
    %197 = vector.load %arg2[%c1_182, %c0_183, %c0_184] : memref<5x128x256xf32, #tpu.memory_space<vmem>>, vector<1x128x256xf32>
    %198 = vector.shape_cast %197 : vector<1x128x256xf32> to vector<128x256xf32>
    %c7_185 = arith.constant 7 : index
    %c0_186 = arith.constant 0 : index
    %c0_187 = arith.constant 0 : index
    %199 = vector.load %arg1[%c7_185, %c0_186, %c0_187] : memref<12x8x128xf32, #tpu.memory_space<vmem>>, vector<1x8x128xf32>
    %200 = vector.shape_cast %199 : vector<1x8x128xf32> to vector<8x128xf32>
    %cst_188 = arith.constant dense<0.000000e+00> : vector<8x256xf32>
    %201 = tpu.matmul %200, %198, %cst_188 {dimension_numbers = #tpu.dot_dimension_numbers<[1], [0], [0], [1], [0, 0, 1, 1], [], []>} : vector<8x128xf32>, vector<128x256xf32>, vector<8x256xf32> -> vector<8x256xf32>
    %c8_189 = arith.constant 8 : index
    %c0_190 = arith.constant 0 : index
    %c0_191 = arith.constant 0 : index
    %202 = vector.load %arg1[%c8_189, %c0_190, %c0_191] : memref<12x8x128xf32, #tpu.memory_space<vmem>>, vector<1x8x128xf32>
    %203 = vector.shape_cast %202 : vector<1x8x128xf32> to vector<8x128xf32>
    %cst_192 = arith.constant dense<0.000000e+00> : vector<8x256xf32>
    %204 = tpu.matmul %203, %198, %cst_192 {dimension_numbers = #tpu.dot_dimension_numbers<[1], [0], [0], [1], [0, 0, 1, 1], [], []>} : vector<8x128xf32>, vector<128x256xf32>, vector<8x256xf32> -> vector<8x256xf32>
    %205 = arith.addf %193, %201 : vector<8x256xf32>
    %206 = arith.addf %196, %204 : vector<8x256xf32>
    %c2_193 = arith.constant 2 : index
    %c0_194 = arith.constant 0 : index
    %c0_195 = arith.constant 0 : index
    %207 = vector.load %arg2[%c2_193, %c0_194, %c0_195] : memref<5x128x256xf32, #tpu.memory_space<vmem>>, vector<1x128x256xf32>
    %208 = vector.shape_cast %207 : vector<1x128x256xf32> to vector<128x256xf32>
    %c8_196 = arith.constant 8 : index
    %c0_197 = arith.constant 0 : index
    %c0_198 = arith.constant 0 : index
    %209 = vector.load %arg1[%c8_196, %c0_197, %c0_198] : memref<12x8x128xf32, #tpu.memory_space<vmem>>, vector<1x8x128xf32>
    %210 = vector.shape_cast %209 : vector<1x8x128xf32> to vector<8x128xf32>
    %cst_199 = arith.constant dense<0.000000e+00> : vector<8x256xf32>
    %211 = tpu.matmul %210, %208, %cst_199 {dimension_numbers = #tpu.dot_dimension_numbers<[1], [0], [0], [1], [0, 0, 1, 1], [], []>} : vector<8x128xf32>, vector<128x256xf32>, vector<8x256xf32> -> vector<8x256xf32>
    %c9_200 = arith.constant 9 : index
    %c0_201 = arith.constant 0 : index
    %c0_202 = arith.constant 0 : index
    %212 = vector.load %arg1[%c9_200, %c0_201, %c0_202] : memref<12x8x128xf32, #tpu.memory_space<vmem>>, vector<1x8x128xf32>
    %213 = vector.shape_cast %212 : vector<1x8x128xf32> to vector<8x128xf32>
    %cst_203 = arith.constant dense<0.000000e+00> : vector<8x256xf32>
    %214 = tpu.matmul %213, %208, %cst_203 {dimension_numbers = #tpu.dot_dimension_numbers<[1], [0], [0], [1], [0, 0, 1, 1], [], []>} : vector<8x128xf32>, vector<128x256xf32>, vector<8x256xf32> -> vector<8x256xf32>
    %215 = arith.addf %205, %211 : vector<8x256xf32>
    %216 = arith.addf %206, %214 : vector<8x256xf32>
    %c3_204 = arith.constant 3 : index
    %c0_205 = arith.constant 0 : index
    %c0_206 = arith.constant 0 : index
    %217 = vector.load %arg2[%c3_204, %c0_205, %c0_206] : memref<5x128x256xf32, #tpu.memory_space<vmem>>, vector<1x128x256xf32>
    %218 = vector.shape_cast %217 : vector<1x128x256xf32> to vector<128x256xf32>
    %c9_207 = arith.constant 9 : index
    %c0_208 = arith.constant 0 : index
    %c0_209 = arith.constant 0 : index
    %219 = vector.load %arg1[%c9_207, %c0_208, %c0_209] : memref<12x8x128xf32, #tpu.memory_space<vmem>>, vector<1x8x128xf32>
    %220 = vector.shape_cast %219 : vector<1x8x128xf32> to vector<8x128xf32>
    %cst_210 = arith.constant dense<0.000000e+00> : vector<8x256xf32>
    %221 = tpu.matmul %220, %218, %cst_210 {dimension_numbers = #tpu.dot_dimension_numbers<[1], [0], [0], [1], [0, 0, 1, 1], [], []>} : vector<8x128xf32>, vector<128x256xf32>, vector<8x256xf32> -> vector<8x256xf32>
    %c10 = arith.constant 10 : index
    %c0_211 = arith.constant 0 : index
    %c0_212 = arith.constant 0 : index
    %222 = vector.load %arg1[%c10, %c0_211, %c0_212] : memref<12x8x128xf32, #tpu.memory_space<vmem>>, vector<1x8x128xf32>
    %223 = vector.shape_cast %222 : vector<1x8x128xf32> to vector<8x128xf32>
    %cst_213 = arith.constant dense<0.000000e+00> : vector<8x256xf32>
    %224 = tpu.matmul %223, %218, %cst_213 {dimension_numbers = #tpu.dot_dimension_numbers<[1], [0], [0], [1], [0, 0, 1, 1], [], []>} : vector<8x128xf32>, vector<128x256xf32>, vector<8x256xf32> -> vector<8x256xf32>
    %225 = arith.addf %215, %221 : vector<8x256xf32>
    %226 = arith.addf %216, %224 : vector<8x256xf32>
    %c4_214 = arith.constant 4 : index
    %c0_215 = arith.constant 0 : index
    %c0_216 = arith.constant 0 : index
    %227 = vector.load %arg2[%c4_214, %c0_215, %c0_216] : memref<5x128x256xf32, #tpu.memory_space<vmem>>, vector<1x128x256xf32>
    %228 = vector.shape_cast %227 : vector<1x128x256xf32> to vector<128x256xf32>
    %c10_217 = arith.constant 10 : index
    %c0_218 = arith.constant 0 : index
    %c0_219 = arith.constant 0 : index
    %229 = vector.load %arg1[%c10_217, %c0_218, %c0_219] : memref<12x8x128xf32, #tpu.memory_space<vmem>>, vector<1x8x128xf32>
    %230 = vector.shape_cast %229 : vector<1x8x128xf32> to vector<8x128xf32>
    %cst_220 = arith.constant dense<0.000000e+00> : vector<8x256xf32>
    %231 = tpu.matmul %230, %228, %cst_220 {dimension_numbers = #tpu.dot_dimension_numbers<[1], [0], [0], [1], [0, 0, 1, 1], [], []>} : vector<8x128xf32>, vector<128x256xf32>, vector<8x256xf32> -> vector<8x256xf32>
    %c11 = arith.constant 11 : index
    %c0_221 = arith.constant 0 : index
    %c0_222 = arith.constant 0 : index
    %232 = vector.load %arg1[%c11, %c0_221, %c0_222] : memref<12x8x128xf32, #tpu.memory_space<vmem>>, vector<1x8x128xf32>
    %233 = vector.shape_cast %232 : vector<1x8x128xf32> to vector<8x128xf32>
    %cst_223 = arith.constant dense<0.000000e+00> : vector<8x256xf32>
    %234 = tpu.matmul %233, %228, %cst_223 {dimension_numbers = #tpu.dot_dimension_numbers<[1], [0], [0], [1], [0, 0, 1, 1], [], []>} : vector<8x128xf32>, vector<128x256xf32>, vector<8x256xf32> -> vector<8x256xf32>
    %235 = arith.addf %225, %231 : vector<8x256xf32>
    %236 = arith.addf %226, %234 : vector<8x256xf32>
    %237 = vector.extract_strided_slice %235 {offsets = [0, 0], sizes = [8, 128], strides = [1, 1]} : vector<8x256xf32> to vector<8x128xf32>
    %238 = vector.extract_strided_slice %235 {offsets = [0, 128], sizes = [8, 128], strides = [1, 1]} : vector<8x256xf32> to vector<8x128xf32>
    %239 = arith.maximumf %237, %238 : vector<8x128xf32>
    %240 = vector.extract_strided_slice %236 {offsets = [0, 0], sizes = [8, 128], strides = [1, 1]} : vector<8x256xf32> to vector<8x128xf32>
    %241 = vector.extract_strided_slice %236 {offsets = [0, 128], sizes = [8, 128], strides = [1, 1]} : vector<8x256xf32> to vector<8x128xf32>
    %242 = arith.maximumf %240, %241 : vector<8x128xf32>
    %243 = arith.maximumf %239, %242 : vector<8x128xf32>
    %244 = vector.broadcast %0 : vector<1x128xf32> to vector<8x128xf32>
    %245 = arith.addf %243, %244 : vector<8x128xf32>
    %cst_224 = arith.constant 0.000000e+00 : f32
    %246 = vector.broadcast %cst_224 : f32 to vector<8x128xf32>
    %247 = arith.maximumf %245, %246 : vector<8x128xf32>
    %c3_225 = arith.constant 3 : index
    %c0_226 = arith.constant 0 : index
    %c0_227 = arith.constant 0 : index
    %248 = vector.load %arg4[%c3_225, %c0_226, %c0_227] : memref<4x128x64xf32, #tpu.memory_space<vmem>>, vector<1x128x64xf32>
    %249 = vector.shape_cast %248 : vector<1x128x64xf32> to vector<128x64xf32>
    %cst_228 = arith.constant dense<0.000000e+00> : vector<8x64xf32>
    %250 = tpu.matmul %247, %249, %cst_228 {dimension_numbers = #tpu.dot_dimension_numbers<[1], [0], [0], [1], [0, 0, 1, 1], [], []>} : vector<8x128xf32>, vector<128x64xf32>, vector<8x64xf32> -> vector<8x64xf32>
    %251 = arith.addf %188, %250 : vector<8x64xf32>
    %c0_229 = arith.constant 0 : index
    %c0_230 = arith.constant 0 : index
    %252 = vector.load %arg5[%c0_229, %c0_230] : memref<1x64xf32, #tpu.memory_space<vmem>>, vector<1x64xf32>
    %253 = vector.broadcast %252 : vector<1x64xf32> to vector<8x64xf32>
    %254 = arith.addf %251, %253 : vector<8x64xf32>
    %cst_231 = arith.constant 0.000000e+00 : f32
    %255 = vector.broadcast %cst_231 : f32 to vector<8x64xf32>
    %256 = arith.maximumf %254, %255 : vector<8x64xf32>
    %c0_232 = arith.constant 0 : index
    %c0_233 = arith.constant 0 : index
    %257 = vector.load %arg6[%c0_232, %c0_233] : memref<64x10xf32, #tpu.memory_space<vmem>>, vector<64x10xf32>
    %cst_234 = arith.constant dense<0.000000e+00> : vector<8x10xf32>
    %258 = tpu.matmul %256, %257, %cst_234 {dimension_numbers = #tpu.dot_dimension_numbers<[1], [0], [0], [1], [0, 0, 1, 1], [], []>} : vector<8x64xf32>, vector<64x10xf32>, vector<8x10xf32> -> vector<8x10xf32>
    %c0_235 = arith.constant 0 : index
    %c0_236 = arith.constant 0 : index
    %259 = vector.load %arg7[%c0_235, %c0_236] : memref<1x10xf32, #tpu.memory_space<vmem>>, vector<1x10xf32>
    %260 = vector.broadcast %259 : vector<1x10xf32> to vector<8x10xf32>
    %261 = arith.addf %258, %260 : vector<8x10xf32>
    %cst_237 = arith.constant dense<0xFF800000> : vector<8xf32>
    %262 = vector.multi_reduction <maximumf>, %261, %cst_237 [1] : vector<8x10xf32> to vector<8xf32>
    %263 = vector.shape_cast %262 : vector<8xf32> to vector<8x1xf32>
    %264 = vector.broadcast %263 : vector<8x1xf32> to vector<8x10xf32>
    %265 = arith.subf %261, %264 : vector<8x10xf32>
    %266 = math.exp %265 : vector<8x10xf32>
    %cst_238 = arith.constant dense<0.000000e+00> : vector<8xf32>
    %267 = vector.multi_reduction <add>, %266, %cst_238 [1] : vector<8x10xf32> to vector<8xf32>
    %268 = vector.shape_cast %267 : vector<8xf32> to vector<8x1xf32>
    %269 = math.log %268 : vector<8x1xf32>
    %270 = vector.broadcast %269 : vector<8x1xf32> to vector<8x10xf32>
    %271 = arith.subf %265, %270 : vector<8x10xf32>
    %c0_239 = arith.constant 0 : index
    %c0_240 = arith.constant 0 : index
    %272 = vector.load %arg8[%c0_239, %c0_240] : memref<8x10xf32, #tpu.memory_space<vmem>>, vector<8x10xf32>
    tpu.vector_store %arg8[%c0_239, %c0_240], %271 {strides = array<i32>} : memref<8x10xf32, #tpu.memory_space<vmem>>, vector<8x10xf32>,
    return
  }
  func.func @transform_0(%arg0: i32) -> (i32, i32, i32) {
    %c0_i32 = arith.constant 0 : i32
    %c0_i32_0 = arith.constant 0 : i32
    %c0_i32_1 = arith.constant 0 : i32
    return %c0_i32, %arg0, %c0_i32_0 : i32, i32, i32
  }
  func.func @transform_1(%arg0: i32) -> (i32, i32, i32) {
    %c0_i32 = arith.constant 0 : i32
    %c0_i32_0 = arith.constant 0 : i32
    %c0_i32_1 = arith.constant 0 : i32
    %c0_i32_2 = arith.constant 0 : i32
    return %c0_i32, %c0_i32_0, %c0_i32_1 : i32, i32, i32
  }
  func.func @transform_2(%arg0: i32) -> (i32, i32) {
    %c0_i32 = arith.constant 0 : i32
    %c0_i32_0 = arith.constant 0 : i32
    %c0_i32_1 = arith.constant 0 : i32
    return %c0_i32, %c0_i32_0 : i32, i32
  }
  func.func @transform_3(%arg0: i32) -> (i32, i32, i32) {
    %c0_i32 = arith.constant 0 : i32
    %c0_i32_0 = arith.constant 0 : i32
    %c0_i32_1 = arith.constant 0 : i32
    %c0_i32_2 = arith.constant 0 : i32
    return %c0_i32, %c0_i32_0, %c0_i32_1 : i32, i32, i32
  }
  func.func @transform_4(%arg0: i32) -> (i32, i32) {
    %c0_i32 = arith.constant 0 : i32
    %c0_i32_0 = arith.constant 0 : i32
    %c0_i32_1 = arith.constant 0 : i32
    return %c0_i32, %c0_i32_0 : i32, i32
  }
  func.func @transform_5(%arg0: i32) -> (i32, i32) {
    %c0_i32 = arith.constant 0 : i32
    %c0_i32_0 = arith.constant 0 : i32
    %c0_i32_1 = arith.constant 0 : i32
    return %c0_i32, %c0_i32_0 : i32, i32
  }
  func.func @transform_6(%arg0: i32) -> (i32, i32) {
    %c0_i32 = arith.constant 0 : i32
    %c0_i32_0 = arith.constant 0 : i32
    %c0_i32_1 = arith.constant 0 : i32
    return %c0_i32, %c0_i32_0 : i32, i32
  }
  func.func @transform_7(%arg0: i32) -> (i32, i32) {
    %c0_i32 = arith.constant 0 : i32
    %c0_i32_0 = arith.constant 0 : i32
    return %arg0, %c0_i32 : i32, i32
  }
}

</mosaic_0001>

<bundles_post_ra>
// kernel: forward.3
= control target key start
LH: loop header
LB: loop body
LE: loop exit
PB: predicated region body
PF: predicated region fallthrough
CT: control target
= control target key end

     0   :  { %s4840_s24 = smov 0   ;;  %s4842_s25 = smov 0   ;;  %s8550_s0 = inlined_call_operand.vmem [shape: f32[12,16,128], index: 0, kind: input, shape index: {}]   ;;  %s8551_s1 = inlined_call_operand.vmem [shape: f32[5,128,256], index: 1, kind: input, shape index: {}]   ;;  %s8552_s2 = inlined_call_operand.vmem [shape: f32[1,128], index: 2, kind: input, shape index: {}]   ;;  %s8553_s3 = inlined_call_operand.vmem [shape: f32[4,128,64], index: 3, kind: input, shape index: {}]   ;;  %s8554_s4 = inlined_call_operand.vmem [shape: f32[1,64], index: 4, kind: input, shape index: {}]   ;;  %s8555_s5 = inlined_call_operand.vmem [shape: f32[64,10], index: 5, kind: input, shape index: {}]   ;;  %s8556_s6 = inlined_call_operand.vmem [shape: f32[1,10], index: 6, kind: input, shape index: {}]   ;;  %s8557_s7 = inlined_call_operand.vmem [shape: f32[16,10], index: 7, kind: output, shape index: {}]  }
   0x1   :  { %s4844_s26 = smov 0  }
   0x2 LB: > { %s3978_s27 = sadd.s32 4294967295, %s4796_s26   ;;  %s4857_s28 = sadd.s32 1, %s4796_s26   ;;  %s4796_s26 = sphi %s4844_s26, %s9423_s26   ;;  %s4792_s25 = sphi %s4842_s25, %s9422_s25   ;;  %s4788_s24 = sphi %s4840_s24, %s9421_s24  }
   0x3   : > { %s21_s29 = ssub.s32 %s4796_s26, %s4857_s28  ;;  %s24_s30 = sadd.s32 1, %s4792_s25 }
   0x4   : > { %p22_p0 = scmp.eq.s32.totalorder %s21_s29, 0  ;;  %p31_p1 = scmp.ne.s32.totalorder %s4792_s25, %s4788_s24 }
   0x5   : > { %p32_p2 = scmp.eq.s32.totalorder %s4796_s26, 0  ;;  %p3981_p4 = scmp.ge.s32.totalorder %s4796_s26, 2 }
   0x6   : > { %s4866_s8 = scalar_select %p22_p0, %s4792_s25, %s24_s30  }
   0x7   : > { %p33_p3 = por %p32_p2, %p31_p1  ;;  %227 = sbr.rel (%p3981_p4) target bundleno = 22 (0x16), region = 40 }
   0xc   : > { %230 = sbr.rel (!%p33_p3) target bundleno = 22 (0x16), region = 44  ;;  %s232_s9 = sand.u32 (%p33_p3), 1, %s4792_s25  }
   0xd   : > { %s3982_s10 = sshll.u32 (%p33_p3), %s4796_s26, 3  ;;  %s4414_s11 = smul.u32 (%p33_p3), 96, %s232_s9 }
   0xe   : > { %s236_s14 = scalar_lea.vmem (%p33_p3), %s8550_s0, %s3982_s10 }
   0xf   : > { %v287_v0 = vld [vmem:[%s236_s14] sm:$0xff] (%p33_p3)  ;;  %v289_v1 = vld [vmem:[%s236_s14 + $0x10] sm:$0xff] (%p33_p3)  ;;  %s234_s15 = scalar_lea.vmem (%p33_p3), [#allocation2], %s4414_s11 }
  0x10   : > { %v291_v2 = vld [vmem:[%s236_s14 + $0x20] sm:$0xff] (%p33_p3)  ;;  %v293_v3 = vld [vmem:[%s236_s14 + $0x30] sm:$0xff] (%p33_p3)  ;;  %288 = vst [vmem:[%s234_s15] sm:$0xff] (%p33_p3), %v287_v0  ;;  %290 = vst [vmem:[%s234_s15 + $0x8] sm:$0xff] (%p33_p3), %v289_v1 }
  0x11   : > { %v295_v4 = vld [vmem:[%s236_s14 + $0x40] sm:$0xff]  ;;  %v297_v5 = vld [vmem:[%s236_s14 + $0x50] sm:$0xff]  ;;  %292 = vst [vmem:[%s234_s15 + $0x10] sm:$0xff] %v291_v2  ;;  %294 = vst [vmem:[%s234_s15 + $0x18] sm:$0xff] %v293_v3 }
  0x12   : > { %296 = vst [vmem:[%s234_s15 + $0x20] sm:$0xff] %v295_v4  ;;  %298 = vst [vmem:[%s234_s15 + $0x28] sm:$0xff] %v297_v5  ;;  %v299_v6 = vld [vmem:[%s236_s14 + $0x60] sm:$0xff]  ;;  %v301_v7 = vld [vmem:[%s236_s14 + $0x70] sm:$0xff] }
  0x13   : > { %v303_v8 = vld [vmem:[%s236_s14 + $0x80] sm:$0xff]  ;;  %300 = vst [vmem:[%s234_s15 + $0x30] sm:$0xff] %v299_v6  ;;  %302 = vst [vmem:[%s234_s15 + $0x38] sm:$0xff] %v301_v7  ;;  %v305_v9 = vld [vmem:[%s236_s14 + $0x90] sm:$0xff] }
  0x14   : > { %304 = vst [vmem:[%s234_s15 + $0x40] sm:$0xff] %v303_v8  ;;  %v307_v10 = vld [vmem:[%s236_s14 + $0xa0] sm:$0xff]  ;;  %v309_v11 = vld [vmem:[%s236_s14 + $0xb0] sm:$0xff]  ;;  %306 = vst [vmem:[%s234_s15 + $0x48] sm:$0xff] %v305_v9 }
  0x15   : > { %308 = vst [vmem:[%s234_s15 + $0x50] sm:$0xff] %v307_v10  ;;  %310 = vst [vmem:[%s234_s15 + $0x58] sm:$0xff] %v309_v11 }
  0x16 PF: > { %p3983_p5 = scmp.ge.s32.totalorder %s4796_s26, 1  ;;  %p315_p6 = scmp.lt.s32.totalorder %s4796_s26, 3 }
  0x18   : > { %p316_p7 = pnand %p3983_p5, %p315_p6 }
  0x1a   : > { %319 = sbr.rel (%p316_p7) target bundleno = 2015 (0x7df), region = 82 }
  0x1f   : > { %v4879_v12 = vld [vmem:[%s8551_s1 + $0x1f8] sm:$0xff]  ;;  %v4884_v13 = vld [vmem:[%s8551_s1 + $0x1f0] sm:$0xff]  ;;  %v4015_v14 = vld [vmem:[%s8551_s1 + $0x1e8] sm:$0xff]  ;;  %s322_s13 = sand.u32 1, %s4788_s24   ;;  %v8558_v46 = vmov 0.0   ;;  %vm4799_vm0 = vmmov 0  }
  0x20   : > { %425 = vmatprep.subr.mxu0 %v4879_v12  ;;  %498 = vmatprep.subr.mxu1 %v4879_v12  ;;  %v4894_v15 = vld [vmem:[%s8551_s1 + $0x1e0] sm:$0xff]  ;;  %v4901_v16 = vld [vmem:[%s8551_s1 + $0x1d8] sm:$0xff]  ;;  %v4906_v17 = vld [vmem:[%s8551_s1 + $0x1d0] sm:$0xff]  ;;  %s4415_s19 = smul.u32 96, %s322_s13  ;;  %vm3831_vm1 = vcmask 523264   ;;  %vm3905_vm2 = vcmask 80896  }
  0x21   : > { %426 = vmatpush1.msra.mxu0 %v4884_v13  ;;  %499 = vmatpush1.msra.mxu1 %v4884_v13  ;;  %v4913_v18 = vld [vmem:[%s8551_s1 + $0x1c8] sm:$0xff]  ;;  %v4920_v19 = vld [vmem:[%s8551_s1 + $0x1c0] sm:$0xff]  ;;  %v4927_v20 = vld [vmem:[%s8551_s1 + $0x1b8] sm:$0xff]  ;;  %p352_p8 = scmp.lt.s32.totalorder %s3978_s27, 1 }
  0x22   : > { %427 = vmatprep.subr.mxu0 %v4015_v14  ;;  %500 = vmatprep.subr.mxu1 %v4015_v14  ;;  %v4934_v21 = vld [vmem:[%s8551_s1 + $0x1b0] sm:$0xff]  ;;  %v4941_v22 = vld [vmem:[%s8551_s1 + $0x1a8] sm:$0xff]  ;;  %v4948_v23 = vld [vmem:[%s8551_s1 + $0x1a0] sm:$0xff]  ;;  %s5095_s13 = scalar_lea.vmem [#allocation2], %s4415_s19 }
  0x23   : > { %428 = vmatpush1.msra.mxu0 %v4894_v15  ;;  %501 = vmatpush1.msra.mxu1 %v4894_v15  ;;  %v4955_v24 = vld [vmem:[%s8551_s1 + $0x198] sm:$0xff]  ;;  %v4962_v25 = vld [vmem:[%s8551_s1 + $0x190] sm:$0xff]  ;;  %v4969_v26 = vld [vmem:[%s8551_s1 + $0x188] sm:$0xff]  ;;  %s9425_s27 = smov (!%p352_p8, %s3978_s27), 1 }
  0x24   : > { %429 = vmatprep.subr.mxu0 %v4901_v16  ;;  %502 = vmatprep.subr.mxu1 %v4901_v16  ;;  %v4976_v27 = vld [vmem:[%s8551_s1 + $0x180] sm:$0xff]  ;;  %v4983_v28 = vld [vmem:[%s8551_s1 + $0x178] sm:$0xff]  ;;  %v4990_v29 = vld [vmem:[%s8551_s1 + $0x170] sm:$0xff]  ;;  %s3984_s21 = sshll.u32 %s9425_s27, 3 }
  0x25   : > { %430 = vmatpush1.msra.mxu0 %v4906_v17  ;;  %503 = vmatpush1.msra.mxu1 %v4906_v17  ;;  %v4997_v30 = vld [vmem:[%s8551_s1 + $0x168] sm:$0xff]  ;;  %v5004_v31 = vld [vmem:[%s8551_s1 + $0x160] sm:$0xff]  ;;  %v5011_v32 = vld [vmem:[%s8551_s1 + $0x158] sm:$0xff]  ;;  %s355_s23 = scalar_lea.vmem %s8557_s7, %s3984_s21 }
  0x26   : > { %431 = vmatprep.subr.mxu0 %v4913_v18  ;;  %504 = vmatprep.subr.mxu1 %v4913_v18  ;;  %v5018_v33 = vld [vmem:[%s8551_s1 + $0x150] sm:$0xff]  ;;  %v5025_v34 = vld [vmem:[%s8551_s1 + $0x148] sm:$0xff]  ;;  %v5032_v35 = vld [vmem:[%s8551_s1 + $0x140] sm:$0xff] }
  0x27   : > { %432 = vmatpush1.msra.mxu0 %v4920_v19  ;;  %505 = vmatpush1.msra.mxu1 %v4920_v19  ;;  %v5040_v36 = vld [vmem:[%s8551_s1 + $0x138] sm:$0xff]  ;;  %v5047_v37 = vld [vmem:[%s8551_s1 + $0x130] sm:$0xff]  ;;  %v5054_v38 = vld [vmem:[%s8551_s1 + $0x128] sm:$0xff] }
  0x28   : > { %433 = vmatprep.subr.mxu0 %v4927_v20  ;;  %506 = vmatprep.subr.mxu1 %v4927_v20  ;;  %v5061_v39 = vld [vmem:[%s8551_s1 + $0x120] sm:$0xff]  ;;  %v5068_v40 = vld [vmem:[%s8551_s1 + $0x118] sm:$0xff]  ;;  %v5075_v41 = vld [vmem:[%s8551_s1 + $0x110] sm:$0xff] }
  0x29   : > { %434 = vmatpush1.msra.mxu0 %v4934_v21  ;;  %507 = vmatpush1.msra.mxu1 %v4934_v21  ;;  %v5082_v42 = vld [vmem:[%s8551_s1 + $0x108] sm:$0xff]  ;;  %v5089_v43 = vld [vmem:[%s8551_s1 + $0x100] sm:$0xff]  ;;  %v5101_v45 = vld [vmem:[%s5095_s13 + $0x10] sm:$0xff] }
  0x2a   : > { %435 = vmatprep.subr.mxu0 %v4941_v22  ;;  %508 = vmatprep.subr.mxu1 %v4941_v22  ;;  %v5098_v44 = vld [vmem:[%s5095_s13 + $0x8] sm:$0xff]  ;;  %v5108_v47 = vld [vmem:[%s8551_s1 + $0xf8] sm:$0xff]  ;;  %v5115_v48 = vld [vmem:[%s8551_s1 + $0xf0] sm:$0xff] }
  0x2b   : > { %436 = vmatpush1.msra.mxu0 %v4948_v23  ;;  %509 = vmatpush1.msra.mxu1 %v4948_v23  ;;  %v5122_v49 = vld [vmem:[%s8551_s1 + $0xe8] sm:$0xff]  ;;  %v5129_v50 = vld [vmem:[%s8551_s1 + $0xe0] sm:$0xff]  ;;  %v5136_v51 = vld [vmem:[%s8551_s1 + $0xd8] sm:$0xff] }
  0x2c   : > { %437 = vmatprep.subr.mxu0 %v4955_v24  ;;  %510 = vmatprep.subr.mxu1 %v4955_v24  ;;  %v5143_v52 = vld [vmem:[%s8551_s1 + $0xd0] sm:$0xff]  ;;  %v5150_v53 = vld [vmem:[%s8551_s1 + $0xc8] sm:$0xff]  ;;  %v5157_v54 = vld [vmem:[%s8551_s1 + $0xc0] sm:$0xff] }
  0x2d   : > { %438 = vmatpush1.msra.mxu0 %v4962_v25  ;;  %511 = vmatpush1.msra.mxu1 %v4962_v25  ;;  %v5164_v55 = vld [vmem:[%s8551_s1 + $0xb8] sm:$0xff]  ;;  %v5171_v56 = vld [vmem:[%s8551_s1 + $0xb0] sm:$0xff]  ;;  %v5178_v57 = vld [vmem:[%s8551_s1 + $0xa8] sm:$0xff] }
  0x2e   : > { %439 = vmatprep.subr.mxu0 %v4969_v26  ;;  %512 = vmatprep.subr.mxu1 %v4969_v26  ;;  %v5185_v58 = vld [vmem:[%s8551_s1 + $0xa0] sm:$0xff]  ;;  %v5192_v59 = vld [vmem:[%s8551_s1 + $0x98] sm:$0xff]  ;;  %v5199_v60 = vld [vmem:[%s8551_s1 + $0x90] sm:$0xff] }
  0x2f   : > { %440 = vmatpush1.msra.mxu0 %v4976_v27  ;;  %513 = vmatpush1.msra.mxu1 %v4976_v27  ;;  %v5206_v61 = vld [vmem:[%s8551_s1 + $0x88] sm:$0xff]  ;;  %v5213_v62 = vld [vmem:[%s8551_s1 + $0x80] sm:$0xff]  ;;  %v5220_v63 = vld [vmem:[%s8551_s1 + $0x78] sm:$0xff] }
  0x30   : > { %441 = vmatprep.subr.mxu0 %v4983_v28  ;;  %514 = vmatprep.subr.mxu1 %v4983_v28  ;;  %v5227_v0 = vld [vmem:[%s8551_s1 + $0x70] sm:$0xff]  ;;  %v5234_v1 = vld [vmem:[%s8551_s1 + $0x68] sm:$0xff]  ;;  %v5241_v2 = vld [vmem:[%s8551_s1 + $0x60] sm:$0xff] }
  0x31   : > { %442 = vmatpush1.msra.mxu0 %v4990_v29  ;;  %515 = vmatpush1.msra.mxu1 %v4990_v29  ;;  %v5248_v3 = vld [vmem:[%s8551_s1 + $0x58] sm:$0xff]  ;;  %v5255_v4 = vld [vmem:[%s8551_s1 + $0x50] sm:$0xff]  ;;  %v5262_v5 = vld [vmem:[%s8551_s1 + $0x48] sm:$0xff] }
  0x32   : > { %443 = vmatprep.subr.mxu0 %v4997_v30  ;;  %516 = vmatprep.subr.mxu1 %v4997_v30  ;;  %v5269_v6 = vld [vmem:[%s8551_s1 + $0x40] sm:$0xff]  ;;  %v5276_v7 = vld [vmem:[%s8551_s1 + $0x38] sm:$0xff]  ;;  %v5283_v8 = vld [vmem:[%s8551_s1 + $0x30] sm:$0xff] }
  0x33   : > { %444 = vmatpush1.msra.mxu0 %v5004_v31  ;;  %517 = vmatpush1.msra.mxu1 %v5004_v31  ;;  %8990 = vst [vmem:[#allocation3_spill] sm:$0xff] %v5283_v8  ;;  %v5290_v9 = vld [vmem:[%s8551_s1 + $0x28] sm:$0xff]  ;;  %v5297_v10 = vld [vmem:[%s8551_s1 + $0x20] sm:$0xff]  ;;  %v5304_v11 = vld [vmem:[%s8551_s1 + $0x18] sm:$0xff] }
  0x34   : > { %445 = vmatprep.subr.mxu0 %v5011_v32  ;;  %518 = vmatprep.subr.mxu1 %v5011_v32  ;;  %8991 = vst [vmem:[#allocation4_spill] sm:$0xff] %v5290_v9  ;;  %8992 = vst [vmem:[#allocation5_spill] sm:$0xff] %v5297_v10  ;;  %v5311_v14 = vld [vmem:[%s8551_s1 + $0x10] sm:$0xff] }
  0x35   : > { %446 = vmatpush1.msra.mxu0 %v5018_v33  ;;  %519 = vmatpush1.msra.mxu1 %v5018_v33  ;;  %8993 = vst [vmem:[#allocation6_spill] sm:$0xff] %v5304_v11  ;;  %8994 = vst [vmem:[#allocation7_spill] sm:$0xff] %v5311_v14 }
  0x36   : > { %447 = vmatprep.subr.mxu0 %v5025_v34  ;;  %520 = vmatprep.subr.mxu1 %v5025_v34 }
  0x37   : > { %448 = vmatpush1.msra.mxu0 %v5032_v35  ;;  %521 = vmatpush1.msra.mxu1 %v5032_v35 }
  0x38   : > { %449 = vmatprep.subr.mxu0 %v5040_v36  ;;  %522 = vmatprep.subr.mxu1 %v5040_v36 }
  0x39   : > { %450 = vmatpush1.msra.mxu0 %v5047_v37  ;;  %523 = vmatpush1.msra.mxu1 %v5047_v37 }
  0x3a   : > { %451 = vmatprep.subr.mxu0 %v5054_v38  ;;  %524 = vmatprep.subr.mxu1 %v5054_v38 }
  0x3b   : > { %452 = vmatpush1.msra.mxu0 %v5061_v39  ;;  %525 = vmatpush1.msra.mxu1 %v5061_v39 }
  0x3c   : > { %453 = vmatprep.subr.mxu0 %v5068_v40  ;;  %526 = vmatprep.subr.mxu1 %v5068_v40 }
  0x3d   : > { %454 = vmatpush1.msra.mxu0 %v5075_v41  ;;  %527 = vmatpush1.msra.mxu1 %v5075_v41 }
  0x3e   : > { %455 = vmatprep.subr.mxu0 %v5082_v42  ;;  %528 = vmatprep.subr.mxu1 %v5082_v42 }
  0x3f   : > { %456 = vmatpush1.msra.mxu0 %v5089_v43  ;;  %489 = vmatprep.mubr.f32.mxu0 %v8558_v46 }
  0x40   : > { %529 = vmatpush1.msra.mxu1 %v5089_v43  ;;  %562 = vmatprep.mubr.f32.mxu1 %v8558_v46  ;;  %v5318_v46 = vld [vmem:[%s8551_s1 + $0x8] sm:$0xff] }
  0x41   : > { %490 = vmatmul.mubr.f32.vlgmr.msra.gmra.mxu0 %v5098_v44  ;;  %563 = vmatmul.mubr.f32.vlgmr.msra.gmra.mxu1 %v5101_v45  ;;  %8995 = vst [vmem:[#allocation8_spill] sm:$0xff] %v5318_v46 }
  0x42   : > { %569 = vmatprep.subr.mxu0 %v5108_v47  ;;  %640 = vmatprep.subr.mxu1 %v5108_v47 }
  0x43   : > { %570 = vmatpush1.msra.mxu0 %v5115_v48  ;;  %641 = vmatpush1.msra.mxu1 %v5115_v48 }
  0x44   : > { %571 = vmatprep.subr.mxu0 %v5122_v49  ;;  %642 = vmatprep.subr.mxu1 %v5122_v49 }
  0x45   : > { %572 = vmatpush1.msra.mxu0 %v5129_v50  ;;  %643 = vmatpush1.msra.mxu1 %v5129_v50 }
  0x46   : > { %573 = vmatprep.subr.mxu0 %v5136_v51  ;;  %644 = vmatprep.subr.mxu1 %v5136_v51 }
  0x47   : > { %574 = vmatpush1.msra.mxu0 %v5143_v52  ;;  %645 = vmatpush1.msra.mxu1 %v5143_v52 }
  0x48   : > { %575 = vmatprep.subr.mxu0 %v5150_v53  ;;  %646 = vmatprep.subr.mxu1 %v5150_v53 }
  0x49   : > { %576 = vmatpush1.msra.mxu0 %v5157_v54  ;;  %647 = vmatpush1.msra.mxu1 %v5157_v54 }
  0x4a   : > { %577 = vmatprep.subr.mxu0 %v5164_v55  ;;  %648 = vmatprep.subr.mxu1 %v5164_v55 }
  0x4b   : > { %578 = vmatpush1.msra.mxu0 %v5171_v56  ;;  %649 = vmatpush1.msra.mxu1 %v5171_v56 }
  0x4c   : > { %579 = vmatprep.subr.mxu0 %v5178_v57  ;;  %650 = vmatprep.subr.mxu1 %v5178_v57 }
  0x4d   : > { %580 = vmatpush1.msra.mxu0 %v5185_v58  ;;  %651 = vmatpush1.msra.mxu1 %v5185_v58 }
  0x4e   : > { %581 = vmatprep.subr.mxu0 %v5192_v59  ;;  %652 = vmatprep.subr.mxu1 %v5192_v59 }
  0x4f   : > { %582 = vmatpush1.msra.mxu0 %v5199_v60  ;;  %653 = vmatpush1.msra.mxu1 %v5199_v60 }
  0x50   : > { %583 = vmatprep.subr.mxu0 %v5206_v61  ;;  %654 = vmatprep.subr.mxu1 %v5206_v61 }
  0x51   : > { %584 = vmatpush1.msra.mxu0 %v5213_v62  ;;  %655 = vmatpush1.msra.mxu1 %v5213_v62 }
  0x52   : > { %585 = vmatprep.subr.mxu0 %v5220_v63  ;;  %656 = vmatprep.subr.mxu1 %v5220_v63 }
  0x53   : > { %586 = vmatpush1.msra.mxu0 %v5227_v0  ;;  %657 = vmatpush1.msra.mxu1 %v5227_v0 }
  0x54   : > { %587 = vmatprep.subr.mxu0 %v5234_v1  ;;  %658 = vmatprep.subr.mxu1 %v5234_v1 }
  0x55   : > { %588 = vmatpush1.msra.mxu0 %v5241_v2  ;;  %659 = vmatpush1.msra.mxu1 %v5241_v2 }
  0x56   : > { %589 = vmatprep.subr.mxu0 %v5248_v3  ;;  %660 = vmatprep.subr.mxu1 %v5248_v3 }
  0x57   : > { %590 = vmatpush1.msra.mxu0 %v5255_v4  ;;  %661 = vmatpush1.msra.mxu1 %v5255_v4 }
  0x58   : > { %591 = vmatprep.subr.mxu0 %v5262_v5  ;;  %662 = vmatprep.subr.mxu1 %v5262_v5 }
  0x59   : > { %592 = vmatpush1.msra.mxu0 %v5269_v6  ;;  %663 = vmatpush1.msra.mxu1 %v5269_v6 }
  0x5a   : > { %593 = vmatprep.subr.mxu0 %v5276_v7  ;;  %664 = vmatprep.subr.mxu1 %v5276_v7 }
  0x5b   : > { %594 = vmatpush1.msra.mxu0 %v5283_v8  ;;  %665 = vmatpush1.msra.mxu1 %v5283_v8  ;;  %v8997_v8 = vmov 0.0  }
  0x5c   : > { %595 = vmatprep.subr.mxu0 %v5290_v9  ;;  %666 = vmatprep.subr.mxu1 %v5290_v9  ;;  %v5325_v9 = vld [vmem:[%s8551_s1] sm:$0xff] }
  0x5d   : > { %596 = vmatpush1.msra.mxu0 %v5297_v10  ;;  %667 = vmatpush1.msra.mxu1 %v5297_v10  ;;  %8996 = vst [vmem:[#allocation9_spill] sm:$0xff] %v5325_v9  ;;  %v389_v10 = vld [vmem:[%s5095_s13] sm:$0xff] }
  0x5e   : > { %597 = vmatprep.subr.mxu0 %v5304_v11  ;;  %668 = vmatprep.subr.mxu1 %v5304_v11  ;;  %v5337_v11 = vld [vmem:[%s8551_s1 + $0x2f8] sm:$0xff] }
  0x5f   : > { %598 = vmatpush1.msra.mxu0 %v5311_v14  ;;  %669 = vmatpush1.msra.mxu1 %v5311_v14  ;;  %8998 = vst [vmem:[#allocation10_spill] sm:$0xff] %v5337_v11  ;;  %v5344_v14 = vld [vmem:[%s8551_s1 + $0x2f0] sm:$0xff] }
  0x60   : > { %599 = vmatprep.subr.mxu0 %v5318_v46  ;;  %670 = vmatprep.subr.mxu1 %v5318_v46  ;;  %8999 = vst [vmem:[#allocation11_spill] sm:$0xff] %v5344_v14  ;;  %v5350_v46 = vld [vmem:[%s8551_s1 + $0x2e8] sm:$0xff] }
  0x61   : > { %600 = vmatpush1.msra.mxu0 %v5325_v9  ;;  %633 = vmatprep.mubr.f32.mxu0 %v8997_v8  ;;  %9000 = vst [vmem:[#allocation12_spill] sm:$0xff] %v5350_v46 }
  0x62   : > { %671 = vmatpush1.msra.mxu1 %v5325_v9  ;;  %704 = vmatprep.mubr.f32.mxu1 %v8997_v8  ;;  %v5357_v9 = vld [vmem:[%s8551_s1 + $0x2e0] sm:$0xff] }
  0x63   : > { %634 = vmatmul.mubr.f32.vlgmr.msra.gmra.mxu0 %v389_v10  ;;  %705 = vmatmul.mubr.f32.vlgmr.msra.gmra.mxu1 %v5098_v44  ;;  %9001 = vst [vmem:[#allocation13_spill] sm:$0xff] %v5357_v9  ;;  %v5364_v44 = vld [vmem:[%s8551_s1 + $0x2d8] sm:$0xff]  ;;  %v5371_v10 = vld [vmem:[%s8551_s1 + $0x2d0] sm:$0xff] }
  0x64   : > { %744 = vmatprep.subr.mxu0 %v5337_v11  ;;  %817 = vmatprep.subr.mxu1 %v5337_v11  ;;  %9002 = vst [vmem:[#allocation14_spill] sm:$0xff] %v5364_v44  ;;  %9003 = vst [vmem:[#allocation15_spill] sm:$0xff] %v5371_v10  ;;  %v5826_v11 = vld [vmem:[%s8551_s1 + $0x4d8] sm:$0xff] }
  0x65   : > { %745 = vmatpush1.msra.mxu0 %v5344_v14  ;;  %818 = vmatpush1.msra.mxu1 %v5344_v14  ;;  %v5378_v14 = vld [vmem:[%s8551_s1 + $0x2c8] sm:$0xff]  ;;  %9066 = vst [vmem:[#allocation78_spill] sm:$0xff] %v5826_v11 }
  0x66   : > { %746 = vmatprep.subr.mxu0 %v5350_v46  ;;  %819 = vmatprep.subr.mxu1 %v5350_v46  ;;  %9004 = vst [vmem:[#allocation16_spill] sm:$0xff] %v5378_v14  ;;  %v5385_v46 = vld [vmem:[%s8551_s1 + $0x2c0] sm:$0xff] }
  0x67   : > { %747 = vmatpush1.msra.mxu0 %v5357_v9  ;;  %820 = vmatpush1.msra.mxu1 %v5357_v9  ;;  %9005 = vst [vmem:[#allocation17_spill] sm:$0xff] %v5385_v46  ;;  %v5392_v9 = vld [vmem:[%s8551_s1 + $0x2b8] sm:$0xff] }
  0x68   : > { %748 = vmatprep.subr.mxu0 %v5364_v44  ;;  %821 = vmatprep.subr.mxu1 %v5364_v44  ;;  %9006 = vst [vmem:[#allocation18_spill] sm:$0xff] %v5392_v9  ;;  %v5399_v44 = vld [vmem:[%s8551_s1 + $0x2b0] sm:$0xff] }
  0x69   : > { %749 = vmatpush1.msra.mxu0 %v5371_v10  ;;  %822 = vmatpush1.msra.mxu1 %v5371_v10  ;;  %9007 = vst [vmem:[#allocation19_spill] sm:$0xff] %v5399_v44  ;;  %v5406_v10 = vld [vmem:[%s8551_s1 + $0x2a8] sm:$0xff] }
  0x6a   : > { %750 = vmatprep.subr.mxu0 %v5378_v14  ;;  %823 = vmatprep.subr.mxu1 %v5378_v14  ;;  %9008 = vst [vmem:[#allocation20_spill] sm:$0xff] %v5406_v10  ;;  %v5413_v14 = vld [vmem:[%s8551_s1 + $0x2a0] sm:$0xff] }
  0x6b   : > { %751 = vmatpush1.msra.mxu0 %v5385_v46  ;;  %824 = vmatpush1.msra.mxu1 %v5385_v46  ;;  %9009 = vst [vmem:[#allocation21_spill] sm:$0xff] %v5413_v14  ;;  %v5420_v46 = vld [vmem:[%s8551_s1 + $0x298] sm:$0xff] }
  0x6c   : > { %752 = vmatprep.subr.mxu0 %v5392_v9  ;;  %825 = vmatprep.subr.mxu1 %v5392_v9  ;;  %9010 = vst [vmem:[#allocation22_spill] sm:$0xff] %v5420_v46  ;;  %v5427_v9 = vld [vmem:[%s8551_s1 + $0x290] sm:$0xff] }
  0x6d   : > { %753 = vmatpush1.msra.mxu0 %v5399_v44  ;;  %826 = vmatpush1.msra.mxu1 %v5399_v44  ;;  %9011 = vst [vmem:[#allocation23_spill] sm:$0xff] %v5427_v9  ;;  %v5434_v44 = vld [vmem:[%s8551_s1 + $0x288] sm:$0xff] }
  0x6e   : > { %754 = vmatprep.subr.mxu0 %v5406_v10  ;;  %827 = vmatprep.subr.mxu1 %v5406_v10  ;;  %9012 = vst [vmem:[#allocation24_spill] sm:$0xff] %v5434_v44  ;;  %v5441_v10 = vld [vmem:[%s8551_s1 + $0x280] sm:$0xff] }
  0x6f   : > { %755 = vmatpush1.msra.mxu0 %v5413_v14  ;;  %828 = vmatpush1.msra.mxu1 %v5413_v14  ;;  %9013 = vst [vmem:[#allocation25_spill] sm:$0xff] %v5441_v10  ;;  %v5448_v14 = vld [vmem:[%s8551_s1 + $0x278] sm:$0xff] }
  0x70   : > { %756 = vmatprep.subr.mxu0 %v5420_v46  ;;  %829 = vmatprep.subr.mxu1 %v5420_v46  ;;  %9014 = vst [vmem:[#allocation26_spill] sm:$0xff] %v5448_v14  ;;  %v5455_v46 = vld [vmem:[%s8551_s1 + $0x270] sm:$0xff] }
  0x71   : > { %757 = vmatpush1.msra.mxu0 %v5427_v9  ;;  %830 = vmatpush1.msra.mxu1 %v5427_v9  ;;  %9015 = vst [vmem:[#allocation27_spill] sm:$0xff] %v5455_v46  ;;  %v5462_v9 = vld [vmem:[%s8551_s1 + $0x268] sm:$0xff] }
  0x72   : > { %758 = vmatprep.subr.mxu0 %v5434_v44  ;;  %831 = vmatprep.subr.mxu1 %v5434_v44  ;;  %9016 = vst [vmem:[#allocation28_spill] sm:$0xff] %v5462_v9  ;;  %v5469_v44 = vld [vmem:[%s8551_s1 + $0x260] sm:$0xff] }
  0x73   : > { %759 = vmatpush1.msra.mxu0 %v5441_v10  ;;  %832 = vmatpush1.msra.mxu1 %v5441_v10  ;;  %9017 = vst [vmem:[#allocation29_spill] sm:$0xff] %v5469_v44  ;;  %v5476_v10 = vld [vmem:[%s8551_s1 + $0x258] sm:$0xff] }
  0x74   : > { %760 = vmatprep.subr.mxu0 %v5448_v14  ;;  %833 = vmatprep.subr.mxu1 %v5448_v14  ;;  %9018 = vst [vmem:[#allocation30_spill] sm:$0xff] %v5476_v10  ;;  %v5483_v14 = vld [vmem:[%s8551_s1 + $0x250] sm:$0xff] }
  0x75   : > { %761 = vmatpush1.msra.mxu0 %v5455_v46  ;;  %834 = vmatpush1.msra.mxu1 %v5455_v46  ;;  %9019 = vst [vmem:[#allocation31_spill] sm:$0xff] %v5483_v14  ;;  %v5490_v46 = vld [vmem:[%s8551_s1 + $0x248] sm:$0xff] }
  0x76   : > { %762 = vmatprep.subr.mxu0 %v5462_v9  ;;  %835 = vmatprep.subr.mxu1 %v5462_v9  ;;  %9020 = vst [vmem:[#allocation32_spill] sm:$0xff] %v5490_v46  ;;  %v5497_v9 = vld [vmem:[%s8551_s1 + $0x240] sm:$0xff] }
  0x77   : > { %763 = vmatpush1.msra.mxu0 %v5469_v44  ;;  %836 = vmatpush1.msra.mxu1 %v5469_v44  ;;  %9021 = vst [vmem:[#allocation33_spill] sm:$0xff] %v5497_v9  ;;  %v5504_v44 = vld [vmem:[%s8551_s1 + $0x238] sm:$0xff] }
  0x78   : > { %764 = vmatprep.subr.mxu0 %v5476_v10  ;;  %837 = vmatprep.subr.mxu1 %v5476_v10  ;;  %9022 = vst [vmem:[#allocation34_spill] sm:$0xff] %v5504_v44  ;;  %v5511_v10 = vld [vmem:[%s8551_s1 + $0x230] sm:$0xff] }
  0x79   : > { %765 = vmatpush1.msra.mxu0 %v5483_v14  ;;  %838 = vmatpush1.msra.mxu1 %v5483_v14  ;;  %9023 = vst [vmem:[#allocation35_spill] sm:$0xff] %v5511_v10  ;;  %v5518_v14 = vld [vmem:[%s8551_s1 + $0x228] sm:$0xff] }
  0x7a   : > { %766 = vmatprep.subr.mxu0 %v5490_v46  ;;  %839 = vmatprep.subr.mxu1 %v5490_v46  ;;  %9024 = vst [vmem:[#allocation36_spill] sm:$0xff] %v5518_v14  ;;  %v5525_v46 = vld [vmem:[%s8551_s1 + $0x220] sm:$0xff] }
  0x7b   : > { %767 = vmatpush1.msra.mxu0 %v5497_v9  ;;  %840 = vmatpush1.msra.mxu1 %v5497_v9  ;;  %9025 = vst [vmem:[#allocation37_spill] sm:$0xff] %v5525_v46  ;;  %v5532_v9 = vld [vmem:[%s8551_s1 + $0x218] sm:$0xff] }
  0x7c   : > { %768 = vmatprep.subr.mxu0 %v5504_v44  ;;  %841 = vmatprep.subr.mxu1 %v5504_v44  ;;  %9026 = vst [vmem:[#allocation38_spill] sm:$0xff] %v5532_v9  ;;  %v5539_v44 = vld [vmem:[%s8551_s1 + $0x210] sm:$0xff] }
  0x7d   : > { %769 = vmatpush1.msra.mxu0 %v5511_v10  ;;  %842 = vmatpush1.msra.mxu1 %v5511_v10  ;;  %9027 = vst [vmem:[#allocation39_spill] sm:$0xff] %v5539_v44  ;;  %v5546_v10 = vld [vmem:[%s8551_s1 + $0x208] sm:$0xff] }
  0x7e   : > { %770 = vmatprep.subr.mxu0 %v5518_v14  ;;  %843 = vmatprep.subr.mxu1 %v5518_v14  ;;  %9028 = vst [vmem:[#allocation40_spill] sm:$0xff] %v5546_v10  ;;  %v5553_v14 = vld [vmem:[%s8551_s1 + $0x200] sm:$0xff] }
  0x7f   : > { %771 = vmatpush1.msra.mxu0 %v5525_v46  ;;  %844 = vmatpush1.msra.mxu1 %v5525_v46  ;;  %9029 = vst [vmem:[#allocation41_spill] sm:$0xff] %v5553_v14  ;;  %v5560_v46 = vld [vmem:[%s5095_s13 + $0x18] sm:$0xff] }
  0x80   : > { %772 = vmatprep.subr.mxu0 %v5532_v9  ;;  %845 = vmatprep.subr.mxu1 %v5532_v9  ;;  %v5567_v9 = vld [vmem:[%s8551_s1 + $0x3f8] sm:$0xff] }
  0x81   : > { %773 = vmatpush1.msra.mxu0 %v5539_v44  ;;  %846 = vmatpush1.msra.mxu1 %v5539_v44  ;;  %9030 = vst [vmem:[#allocation42_spill] sm:$0xff] %v5567_v9  ;;  %v5574_v44 = vld [vmem:[%s8551_s1 + $0x3f0] sm:$0xff] }
  0x82   : > { %774 = vmatprep.subr.mxu0 %v5546_v10  ;;  %847 = vmatprep.subr.mxu1 %v5546_v10  ;;  %9031 = vst [vmem:[#allocation43_spill] sm:$0xff] %v5574_v44  ;;  %v5581_v10 = vld [vmem:[%s8551_s1 + $0x3e8] sm:$0xff] }
  0x83   : > { %775 = vmatpush1.msra.mxu0 %v5553_v14  ;;  %808 = vmatprep.mubr.f32.mxu0 %v8997_v8  ;;  %9032 = vst [vmem:[#allocation44_spill] sm:$0xff] %v5581_v10 }
  0x84   : > { %848 = vmatpush1.msra.mxu1 %v5553_v14  ;;  %881 = vmatprep.mubr.f32.mxu1 %v8997_v8  ;;  %v5588_v14 = vld [vmem:[%s8551_s1 + $0x3e0] sm:$0xff] }
  0x85   : > { %809 = vmatmul.mubr.f32.vlgmr.msra.gmra.mxu0 %v5101_v45  ;;  %882 = vmatmul.mubr.f32.vlgmr.msra.gmra.mxu1 %v5560_v46  ;;  %9033 = vst [vmem:[#allocation45_spill] sm:$0xff] %v5588_v14  ;;  %v5595_v45 = vld [vmem:[%s8551_s1 + $0x3d8] sm:$0xff] }
  0x86   : > { %925 = vmatprep.subr.mxu0 %v5567_v9  ;;  %998 = vmatprep.subr.mxu1 %v5567_v9  ;;  %9034 = vst [vmem:[#allocation46_spill] sm:$0xff] %v5595_v45  ;;  %v5602_v9 = vld [vmem:[%s8551_s1 + $0x3d0] sm:$0xff] }
  0x87   : > { %926 = vmatpush1.msra.mxu0 %v5574_v44  ;;  %999 = vmatpush1.msra.mxu1 %v5574_v44  ;;  %9035 = vst [vmem:[#allocation47_spill] sm:$0xff] %v5602_v9  ;;  %v5609_v44 = vld [vmem:[%s8551_s1 + $0x3c8] sm:$0xff] }
  0x88   : > { %927 = vmatprep.subr.mxu0 %v5581_v10  ;;  %1000 = vmatprep.subr.mxu1 %v5581_v10  ;;  %9036 = vst [vmem:[#allocation48_spill] sm:$0xff] %v5609_v44  ;;  %v5616_v10 = vld [vmem:[%s8551_s1 + $0x3c0] sm:$0xff] }
  0x89   : > { %928 = vmatpush1.msra.mxu0 %v5588_v14  ;;  %1001 = vmatpush1.msra.mxu1 %v5588_v14  ;;  %9037 = vst [vmem:[#allocation49_spill] sm:$0xff] %v5616_v10  ;;  %v5623_v14 = vld [vmem:[%s8551_s1 + $0x3b8] sm:$0xff] }
  0x8a   : > { %929 = vmatprep.subr.mxu0 %v5595_v45  ;;  %1002 = vmatprep.subr.mxu1 %v5595_v45  ;;  %9038 = vst [vmem:[#allocation50_spill] sm:$0xff] %v5623_v14  ;;  %v5630_v45 = vld [vmem:[%s8551_s1 + $0x3b0] sm:$0xff] }
  0x8b   : > { %930 = vmatpush1.msra.mxu0 %v5602_v9  ;;  %1003 = vmatpush1.msra.mxu1 %v5602_v9  ;;  %9039 = vst [vmem:[#allocation51_spill] sm:$0xff] %v5630_v45  ;;  %v5637_v9 = vld [vmem:[%s8551_s1 + $0x3a8] sm:$0xff] }
  0x8c   : > { %931 = vmatprep.subr.mxu0 %v5609_v44  ;;  %1004 = vmatprep.subr.mxu1 %v5609_v44  ;;  %9040 = vst [vmem:[#allocation52_spill] sm:$0xff] %v5637_v9  ;;  %v5644_v44 = vld [vmem:[%s8551_s1 + $0x3a0] sm:$0xff] }
  0x8d   : > { %932 = vmatpush1.msra.mxu0 %v5616_v10  ;;  %1005 = vmatpush1.msra.mxu1 %v5616_v10  ;;  %9041 = vst [vmem:[#allocation53_spill] sm:$0xff] %v5644_v44  ;;  %v5651_v10 = vld [vmem:[%s8551_s1 + $0x398] sm:$0xff] }
  0x8e   : > { %933 = vmatprep.subr.mxu0 %v5623_v14  ;;  %1006 = vmatprep.subr.mxu1 %v5623_v14  ;;  %9042 = vst [vmem:[#allocation54_spill] sm:$0xff] %v5651_v10  ;;  %v5658_v14 = vld [vmem:[%s8551_s1 + $0x390] sm:$0xff] }
  0x8f   : > { %934 = vmatpush1.msra.mxu0 %v5630_v45  ;;  %1007 = vmatpush1.msra.mxu1 %v5630_v45  ;;  %9043 = vst [vmem:[#allocation55_spill] sm:$0xff] %v5658_v14  ;;  %v5665_v45 = vld [vmem:[%s8551_s1 + $0x388] sm:$0xff] }
  0x90   : > { %935 = vmatprep.subr.mxu0 %v5637_v9  ;;  %1008 = vmatprep.subr.mxu1 %v5637_v9  ;;  %9044 = vst [vmem:[#allocation56_spill] sm:$0xff] %v5665_v45  ;;  %v5672_v9 = vld [vmem:[%s8551_s1 + $0x380] sm:$0xff] }
  0x91   : > { %936 = vmatpush1.msra.mxu0 %v5644_v44  ;;  %1009 = vmatpush1.msra.mxu1 %v5644_v44  ;;  %9045 = vst [vmem:[#allocation57_spill] sm:$0xff] %v5672_v9  ;;  %v5679_v44 = vld [vmem:[%s8551_s1 + $0x378] sm:$0xff] }
  0x92   : > { %937 = vmatprep.subr.mxu0 %v5651_v10  ;;  %1010 = vmatprep.subr.mxu1 %v5651_v10  ;;  %9046 = vst [vmem:[#allocation58_spill] sm:$0xff] %v5679_v44  ;;  %v5686_v10 = vld [vmem:[%s8551_s1 + $0x370] sm:$0xff] }
  0x93   : > { %938 = vmatpush1.msra.mxu0 %v5658_v14  ;;  %1011 = vmatpush1.msra.mxu1 %v5658_v14  ;;  %9047 = vst [vmem:[#allocation59_spill] sm:$0xff] %v5686_v10  ;;  %v5693_v14 = vld [vmem:[%s8551_s1 + $0x368] sm:$0xff] }
  0x94   : > { %939 = vmatprep.subr.mxu0 %v5665_v45  ;;  %1012 = vmatprep.subr.mxu1 %v5665_v45  ;;  %9048 = vst [vmem:[#allocation60_spill] sm:$0xff] %v5693_v14  ;;  %v5700_v45 = vld [vmem:[%s8551_s1 + $0x360] sm:$0xff] }
  0x95   : > { %940 = vmatpush1.msra.mxu0 %v5672_v9  ;;  %1013 = vmatpush1.msra.mxu1 %v5672_v9  ;;  %9049 = vst [vmem:[#allocation61_spill] sm:$0xff] %v5700_v45  ;;  %v5707_v9 = vld [vmem:[%s8551_s1 + $0x358] sm:$0xff] }
  0x96   : > { %941 = vmatprep.subr.mxu0 %v5679_v44  ;;  %1014 = vmatprep.subr.mxu1 %v5679_v44  ;;  %9050 = vst [vmem:[#allocation62_spill] sm:$0xff] %v5707_v9  ;;  %v5714_v44 = vld [vmem:[%s8551_s1 + $0x350] sm:$0xff] }
  0x97   : > { %942 = vmatpush1.msra.mxu0 %v5686_v10  ;;  %1015 = vmatpush1.msra.mxu1 %v5686_v10  ;;  %9051 = vst [vmem:[#allocation63_spill] sm:$0xff] %v5714_v44  ;;  %v5721_v10 = vld [vmem:[%s8551_s1 + $0x348] sm:$0xff] }
  0x98   : > { %943 = vmatprep.subr.mxu0 %v5693_v14  ;;  %1016 = vmatprep.subr.mxu1 %v5693_v14  ;;  %9052 = vst [vmem:[#allocation64_spill] sm:$0xff] %v5721_v10  ;;  %v5728_v14 = vld [vmem:[%s8551_s1 + $0x340] sm:$0xff] }
  0x99   : > { %944 = vmatpush1.msra.mxu0 %v5700_v45  ;;  %1017 = vmatpush1.msra.mxu1 %v5700_v45  ;;  %9053 = vst [vmem:[#allocation65_spill] sm:$0xff] %v5728_v14  ;;  %v5735_v45 = vld [vmem:[%s8551_s1 + $0x338] sm:$0xff] }
  0x9a   : > { %945 = vmatprep.subr.mxu0 %v5707_v9  ;;  %1018 = vmatprep.subr.mxu1 %v5707_v9  ;;  %9054 = vst [vmem:[#allocation66_spill] sm:$0xff] %v5735_v45  ;;  %v5742_v9 = vld [vmem:[%s8551_s1 + $0x330] sm:$0xff] }
  0x9b   : > { %946 = vmatpush1.msra.mxu0 %v5714_v44  ;;  %1019 = vmatpush1.msra.mxu1 %v5714_v44  ;;  %9055 = vst [vmem:[#allocation67_spill] sm:$0xff] %v5742_v9  ;;  %v5749_v44 = vld [vmem:[%s8551_s1 + $0x328] sm:$0xff] }
  0x9c   : > { %947 = vmatprep.subr.mxu0 %v5721_v10  ;;  %1020 = vmatprep.subr.mxu1 %v5721_v10  ;;  %9056 = vst [vmem:[#allocation68_spill] sm:$0xff] %v5749_v44  ;;  %v5756_v10 = vld [vmem:[%s8551_s1 + $0x320] sm:$0xff] }
  0x9d   : > { %948 = vmatpush1.msra.mxu0 %v5728_v14  ;;  %1021 = vmatpush1.msra.mxu1 %v5728_v14  ;;  %9057 = vst [vmem:[#allocation69_spill] sm:$0xff] %v5756_v10  ;;  %v5763_v14 = vld [vmem:[%s8551_s1 + $0x318] sm:$0xff] }
  0x9e   : > { %949 = vmatprep.subr.mxu0 %v5735_v45  ;;  %1022 = vmatprep.subr.mxu1 %v5735_v45  ;;  %9058 = vst [vmem:[#allocation70_spill] sm:$0xff] %v5763_v14  ;;  %v5770_v45 = vld [vmem:[%s8551_s1 + $0x310] sm:$0xff] }
  0x9f   : > { %950 = vmatpush1.msra.mxu0 %v5742_v9  ;;  %1023 = vmatpush1.msra.mxu1 %v5742_v9  ;;  %9059 = vst [vmem:[#allocation71_spill] sm:$0xff] %v5770_v45  ;;  %v5777_v9 = vld [vmem:[%s8551_s1 + $0x308] sm:$0xff] }
  0xa0   : > { %951 = vmatprep.subr.mxu0 %v5749_v44  ;;  %1024 = vmatprep.subr.mxu1 %v5749_v44  ;;  %9060 = vst [vmem:[#allocation72_spill] sm:$0xff] %v5777_v9  ;;  %v5784_v44 = vld [vmem:[%s8551_s1 + $0x300] sm:$0xff] }
  0xa1   : > { %952 = vmatpush1.msra.mxu0 %v5756_v10  ;;  %1025 = vmatpush1.msra.mxu1 %v5756_v10  ;;  %9061 = vst [vmem:[#allocation73_spill] sm:$0xff] %v5784_v44  ;;  %v5791_v10 = vld [vmem:[%s5095_s13 + $0x20] sm:$0xff] }
  0xa2   : > { %953 = vmatprep.subr.mxu0 %v5763_v14  ;;  %1026 = vmatprep.subr.mxu1 %v5763_v14  ;;  %v5798_v14 = vld [vmem:[%s8551_s1 + $0x4f8] sm:$0xff] }
  0xa3   : > { %954 = vmatpush1.msra.mxu0 %v5770_v45  ;;  %1027 = vmatpush1.msra.mxu1 %v5770_v45  ;;  %9062 = vst [vmem:[#allocation74_spill] sm:$0xff] %v5798_v14  ;;  %v5805_v45 = vld [vmem:[%s8551_s1 + $0x4f0] sm:$0xff] }
  0xa4   : > { %955 = vmatprep.subr.mxu0 %v5777_v9  ;;  %1028 = vmatprep.subr.mxu1 %v5777_v9  ;;  %9063 = vst [vmem:[#allocation75_spill] sm:$0xff] %v5805_v45  ;;  %v5812_v9 = vld [vmem:[%s8551_s1 + $0x4e8] sm:$0xff] }
  0xa5   : > { %956 = vmatpush1.msra.mxu0 %v5784_v44  ;;  %989 = vmatprep.mubr.f32.mxu0 %v8997_v8  ;;  %9064 = vst [vmem:[#allocation76_spill] sm:$0xff] %v5812_v9 }
  0xa6   : > { %1029 = vmatpush1.msra.mxu1 %v5784_v44  ;;  %1062 = vmatprep.mubr.f32.mxu1 %v8997_v8  ;;  %v5819_v44 = vld [vmem:[%s8551_s1 + $0x4e0] sm:$0xff] }
  0xa7   : > { %990 = vmatmul.mubr.f32.vlgmr.msra.gmra.mxu0 %v5560_v46  ;;  %1063 = vmatmul.mubr.f32.vlgmr.msra.gmra.mxu1 %v5791_v10  ;;  %9065 = vst [vmem:[#allocation77_spill] sm:$0xff] %v5819_v44 }
  0xa8   : > { %1106 = vmatprep.subr.mxu0 %v5798_v14  ;;  %1179 = vmatprep.subr.mxu1 %v5798_v14  ;;  %v5833_v14 = vld [vmem:[%s8551_s1 + $0x4d0] sm:$0xff] }
  0xa9   : > { %1107 = vmatpush1.msra.mxu0 %v5805_v45  ;;  %1180 = vmatpush1.msra.mxu1 %v5805_v45  ;;  %9067 = vst [vmem:[#allocation79_spill] sm:$0xff] %v5833_v14  ;;  %v5840_v45 = vld [vmem:[%s8551_s1 + $0x4c8] sm:$0xff] }
  0xaa   : > { %1108 = vmatprep.subr.mxu0 %v5812_v9  ;;  %1181 = vmatprep.subr.mxu1 %v5812_v9  ;;  %9068 = vst [vmem:[#allocation80_spill] sm:$0xff] %v5840_v45  ;;  %v5847_v9 = vld [vmem:[%s8551_s1 + $0x4c0] sm:$0xff] }
  0xab   : > { %1109 = vmatpush1.msra.mxu0 %v5819_v44  ;;  %1182 = vmatpush1.msra.mxu1 %v5819_v44  ;;  %9069 = vst [vmem:[#allocation81_spill] sm:$0xff] %v5847_v9  ;;  %v5854_v44 = vld [vmem:[%s8551_s1 + $0x4b8] sm:$0xff] }
  0xac   : > { %1110 = vmatprep.subr.mxu0 %v5826_v11  ;;  %1183 = vmatprep.subr.mxu1 %v5826_v11  ;;  %9070 = vst [vmem:[#allocation82_spill] sm:$0xff] %v5854_v44  ;;  %v5861_v11 = vld [vmem:[%s8551_s1 + $0x4b0] sm:$0xff] }
  0xad   : > { %1111 = vmatpush1.msra.mxu0 %v5833_v14  ;;  %1184 = vmatpush1.msra.mxu1 %v5833_v14  ;;  %9071 = vst [vmem:[#allocation83_spill] sm:$0xff] %v5861_v11  ;;  %v5868_v14 = vld [vmem:[%s8551_s1 + $0x4a8] sm:$0xff] }
  0xae   : > { %1112 = vmatprep.subr.mxu0 %v5840_v45  ;;  %1185 = vmatprep.subr.mxu1 %v5840_v45  ;;  %9072 = vst [vmem:[#allocation84_spill] sm:$0xff] %v5868_v14  ;;  %v5875_v45 = vld [vmem:[%s8551_s1 + $0x4a0] sm:$0xff] }
  0xaf   : > { %1113 = vmatpush1.msra.mxu0 %v5847_v9  ;;  %1186 = vmatpush1.msra.mxu1 %v5847_v9  ;;  %9073 = vst [vmem:[#allocation85_spill] sm:$0xff] %v5875_v45  ;;  %v5882_v9 = vld [vmem:[%s8551_s1 + $0x498] sm:$0xff] }
  0xb0   : > { %1114 = vmatprep.subr.mxu0 %v5854_v44  ;;  %1187 = vmatprep.subr.mxu1 %v5854_v44  ;;  %9074 = vst [vmem:[#allocation86_spill] sm:$0xff] %v5882_v9  ;;  %v5889_v44 = vld [vmem:[%s8551_s1 + $0x490] sm:$0xff] }
  0xb1   : > { %1115 = vmatpush1.msra.mxu0 %v5861_v11  ;;  %1188 = vmatpush1.msra.mxu1 %v5861_v11  ;;  %9075 = vst [vmem:[#allocation87_spill] sm:$0xff] %v5889_v44  ;;  %v5896_v11 = vld [vmem:[%s8551_s1 + $0x488] sm:$0xff] }
  0xb2   : > { %1116 = vmatprep.subr.mxu0 %v5868_v14  ;;  %1189 = vmatprep.subr.mxu1 %v5868_v14  ;;  %9076 = vst [vmem:[#allocation88_spill] sm:$0xff] %v5896_v11  ;;  %v5903_v14 = vld [vmem:[%s8551_s1 + $0x480] sm:$0xff] }
  0xb3   : > { %1117 = vmatpush1.msra.mxu0 %v5875_v45  ;;  %1190 = vmatpush1.msra.mxu1 %v5875_v45  ;;  %9077 = vst [vmem:[#allocation89_spill] sm:$0xff] %v5903_v14  ;;  %v5910_v45 = vld [vmem:[%s8551_s1 + $0x478] sm:$0xff] }
  0xb4   : > { %1118 = vmatprep.subr.mxu0 %v5882_v9  ;;  %1191 = vmatprep.subr.mxu1 %v5882_v9  ;;  %9078 = vst [vmem:[#allocation90_spill] sm:$0xff] %v5910_v45  ;;  %v5917_v9 = vld [vmem:[%s8551_s1 + $0x470] sm:$0xff] }
  0xb5   : > { %1119 = vmatpush1.msra.mxu0 %v5889_v44  ;;  %1192 = vmatpush1.msra.mxu1 %v5889_v44  ;;  %9079 = vst [vmem:[#allocation91_spill] sm:$0xff] %v5917_v9  ;;  %v5924_v44 = vld [vmem:[%s8551_s1 + $0x468] sm:$0xff] }
  0xb6   : > { %1120 = vmatprep.subr.mxu0 %v5896_v11  ;;  %1193 = vmatprep.subr.mxu1 %v5896_v11  ;;  %9080 = vst [vmem:[#allocation92_spill] sm:$0xff] %v5924_v44  ;;  %v5931_v11 = vld [vmem:[%s8551_s1 + $0x460] sm:$0xff] }
  0xb7   : > { %1121 = vmatpush1.msra.mxu0 %v5903_v14  ;;  %1194 = vmatpush1.msra.mxu1 %v5903_v14  ;;  %9081 = vst [vmem:[#allocation93_spill] sm:$0xff] %v5931_v11  ;;  %v5938_v14 = vld [vmem:[%s8551_s1 + $0x458] sm:$0xff] }
  0xb8   : > { %1122 = vmatprep.subr.mxu0 %v5910_v45  ;;  %1195 = vmatprep.subr.mxu1 %v5910_v45  ;;  %9082 = vst [vmem:[#allocation94_spill] sm:$0xff] %v5938_v14  ;;  %v5945_v45 = vld [vmem:[%s8551_s1 + $0x450] sm:$0xff] }
  0xb9   : > { %1123 = vmatpush1.msra.mxu0 %v5917_v9  ;;  %1196 = vmatpush1.msra.mxu1 %v5917_v9  ;;  %9083 = vst [vmem:[#allocation95_spill] sm:$0xff] %v5945_v45  ;;  %v5952_v9 = vld [vmem:[%s8551_s1 + $0x448] sm:$0xff] }
  0xba   : > { %1124 = vmatprep.subr.mxu0 %v5924_v44  ;;  %1197 = vmatprep.subr.mxu1 %v5924_v44  ;;  %9084 = vst [vmem:[#allocation96_spill] sm:$0xff] %v5952_v9  ;;  %v5959_v44 = vld [vmem:[%s8551_s1 + $0x440] sm:$0xff] }
  0xbb   : > { %1125 = vmatpush1.msra.mxu0 %v5931_v11  ;;  %1198 = vmatpush1.msra.mxu1 %v5931_v11  ;;  %9085 = vst [vmem:[#allocation97_spill] sm:$0xff] %v5959_v44  ;;  %v5966_v11 = vld [vmem:[%s8551_s1 + $0x438] sm:$0xff] }
  0xbc   : > { %1126 = vmatprep.subr.mxu0 %v5938_v14  ;;  %1199 = vmatprep.subr.mxu1 %v5938_v14  ;;  %9086 = vst [vmem:[#allocation98_spill] sm:$0xff] %v5966_v11  ;;  %v5973_v14 = vld [vmem:[%s8551_s1 + $0x430] sm:$0xff] }
  0xbd   : > { %1127 = vmatpush1.msra.mxu0 %v5945_v45  ;;  %1200 = vmatpush1.msra.mxu1 %v5945_v45  ;;  %9087 = vst [vmem:[#allocation99_spill] sm:$0xff] %v5973_v14  ;;  %v5980_v45 = vld [vmem:[%s8551_s1 + $0x428] sm:$0xff] }
  0xbe   : > { %1128 = vmatprep.subr.mxu0 %v5952_v9  ;;  %1201 = vmatprep.subr.mxu1 %v5952_v9  ;;  %9088 = vst [vmem:[#allocation100_spill] sm:$0xff] %v5980_v45  ;;  %v5987_v9 = vld [vmem:[%s8551_s1 + $0x420] sm:$0xff] }
  0xbf   : > { %1129 = vmatpush1.msra.mxu0 %v5959_v44  ;;  %1202 = vmatpush1.msra.mxu1 %v5959_v44  ;;  %9089 = vst [vmem:[#allocation101_spill] sm:$0xff] %v5987_v9  ;;  %v5994_v44 = vld [vmem:[%s8551_s1 + $0x418] sm:$0xff] }
  0xc0   : > { %1130 = vmatprep.subr.mxu0 %v5966_v11  ;;  %1203 = vmatprep.subr.mxu1 %v5966_v11  ;;  %v6001_v11 = vld [vmem:[%s8551_s1 + $0x410] sm:$0xff] }
  0xc1   : > { %1131 = vmatpush1.msra.mxu0 %v5973_v14  ;;  %1204 = vmatpush1.msra.mxu1 %v5973_v14  ;;  %v6008_v14 = vld [vmem:[%s8551_s1 + $0x408] sm:$0xff] }
  0xc2   : > { %1132 = vmatprep.subr.mxu0 %v5980_v45  ;;  %1205 = vmatprep.subr.mxu1 %v5980_v45  ;;  %9090 = vst [vmem:[#allocation102_spill] sm:$0xff] %v6008_v14  ;;  %v6015_v45 = vld [vmem:[%s8551_s1 + $0x400] sm:$0xff] }
  0xc3   : > { %1133 = vmatpush1.msra.mxu0 %v5987_v9  ;;  %1206 = vmatpush1.msra.mxu1 %v5987_v9  ;;  %9091 = vst [vmem:[#allocation103_spill] sm:$0xff] %v6015_v45  ;;  %v6022_v9 = vld [vmem:[%s5095_s13 + $0x28] sm:$0xff] }
  0xc4   : > { %1134 = vmatprep.subr.mxu0 %v5994_v44  ;;  %1207 = vmatprep.subr.mxu1 %v5994_v44 }
  0xc5   : > { %1135 = vmatpush1.msra.mxu0 %v6001_v11  ;;  %1208 = vmatpush1.msra.mxu1 %v6001_v11 }
  0xc6   : > { %1136 = vmatprep.subr.mxu0 %v6008_v14  ;;  %1209 = vmatprep.subr.mxu1 %v6008_v14  ;;  %v6036_v14 = vld [vmem:[%s8551_s1 + $0x1f0] sm:$0xff] }
  0xc7   : > { %1137 = vmatpush1.msra.mxu0 %v6015_v45  ;;  %1170 = vmatprep.mubr.f32.mxu0 %v8997_v8 }
  0xc8   : > { %1210 = vmatpush1.msra.mxu1 %v6015_v45  ;;  %1243 = vmatprep.mubr.f32.mxu1 %v8997_v8  ;;  %v6042_v45 = vld [vmem:[%s8551_s1 + $0x1e8] sm:$0xff] }
  0xc9   : > { %1171 = vmatmul.mubr.f32.vlgmr.msra.gmra.mxu0 %v5791_v10  ;;  %1244 = vmatmul.mubr.f32.vlgmr.msra.gmra.mxu1 %v6022_v9 }
  0xca   : > { %1281 = vmatprep.subr.mxu0 %v4879_v12  ;;  %1352 = vmatprep.subr.mxu1 %v4879_v12  ;;  %v6050_v12 = vld [vmem:[%s8551_s1 + $0x1e0] sm:$0xff] }
  0xcb   : > { %1282 = vmatpush1.msra.mxu0 %v4884_v13  ;;  %1353 = vmatpush1.msra.mxu1 %v6036_v14  ;;  %v9092_v13 = vld [vmem:[#allocation3_spill] sm:$0xff] }
  0xcc   : > { %1283 = vmatprep.subr.mxu0 %v6042_v45  ;;  %1354 = vmatprep.subr.mxu1 %v6042_v45 }
  0xcd   : > { %1284 = vmatpush1.msra.mxu0 %v4894_v15  ;;  %1355 = vmatpush1.msra.mxu1 %v6050_v12  ;;  %v9093_v15 = vld [vmem:[#allocation4_spill] sm:$0xff] }
  0xce   : > { %1285 = vmatprep.subr.mxu0 %v4901_v16  ;;  %1356 = vmatprep.subr.mxu1 %v4901_v16  ;;  %v9094_v16 = vld [vmem:[#allocation5_spill] sm:$0xff] }
  0xcf   : > { %1286 = vmatpush1.msra.mxu0 %v4906_v17  ;;  %1357 = vmatpush1.msra.mxu1 %v4906_v17  ;;  %v9095_v17 = vld [vmem:[#allocation6_spill] sm:$0xff] }
  0xd0   : > { %1287 = vmatprep.subr.mxu0 %v4913_v18  ;;  %1358 = vmatprep.subr.mxu1 %v4913_v18  ;;  %v9096_v18 = vld [vmem:[#allocation7_spill] sm:$0xff] }
  0xd1   : > { %1288 = vmatpush1.msra.mxu0 %v4920_v19  ;;  %1359 = vmatpush1.msra.mxu1 %v4920_v19  ;;  %v9097_v19 = vld [vmem:[#allocation8_spill] sm:$0xff] }
  0xd2   : > { %1289 = vmatprep.subr.mxu0 %v4927_v20  ;;  %1360 = vmatprep.subr.mxu1 %v4927_v20  ;;  %v9098_v20 = vld [vmem:[#allocation9_spill] sm:$0xff] }
  0xd3   : > { %1290 = vmatpush1.msra.mxu0 %v4934_v21  ;;  %1361 = vmatpush1.msra.mxu1 %v4934_v21  ;;  %v4449_v21 = vld [vmem:[%s5095_s13 + $0x10] sm:$0xff] }
  0xd4   : > { %1291 = vmatprep.subr.mxu0 %v4941_v22  ;;  %1362 = vmatprep.subr.mxu1 %v4941_v22  ;;  %v9099_v22 = vld [vmem:[#allocation10_spill] sm:$0xff] }
  0xd5   : > { %1292 = vmatpush1.msra.mxu0 %v4948_v23  ;;  %1363 = vmatpush1.msra.mxu1 %v4948_v23  ;;  %v9100_v23 = vld [vmem:[#allocation11_spill] sm:$0xff] }
  0xd6   : > { %1293 = vmatprep.subr.mxu0 %v4955_v24  ;;  %1364 = vmatprep.subr.mxu1 %v4955_v24  ;;  %v9101_v24 = vld [vmem:[#allocation12_spill] sm:$0xff] }
  0xd7   : > { %1294 = vmatpush1.msra.mxu0 %v4962_v25  ;;  %1365 = vmatpush1.msra.mxu1 %v4962_v25  ;;  %v9102_v25 = vld [vmem:[#allocation13_spill] sm:$0xff] }
  0xd8   : > { %1295 = vmatprep.subr.mxu0 %v4969_v26  ;;  %1366 = vmatprep.subr.mxu1 %v4969_v26  ;;  %v9103_v26 = vld [vmem:[#allocation14_spill] sm:$0xff] }
  0xd9   : > { %1296 = vmatpush1.msra.mxu0 %v4976_v27  ;;  %1367 = vmatpush1.msra.mxu1 %v4976_v27  ;;  %v9104_v27 = vld [vmem:[#allocation15_spill] sm:$0xff] }
  0xda   : > { %1297 = vmatprep.subr.mxu0 %v4983_v28  ;;  %1368 = vmatprep.subr.mxu1 %v4983_v28  ;;  %v9105_v28 = vld [vmem:[#allocation16_spill] sm:$0xff] }
  0xdb   : > { %1298 = vmatpush1.msra.mxu0 %v4990_v29  ;;  %1369 = vmatpush1.msra.mxu1 %v4990_v29  ;;  %v9106_v29 = vld [vmem:[#allocation17_spill] sm:$0xff] }
  0xdc   : > { %1299 = vmatprep.subr.mxu0 %v4997_v30  ;;  %1370 = vmatprep.subr.mxu1 %v4997_v30  ;;  %v9107_v30 = vld [vmem:[#allocation18_spill] sm:$0xff] }
  0xdd   : > { %1300 = vmatpush1.msra.mxu0 %v5004_v31  ;;  %1371 = vmatpush1.msra.mxu1 %v5004_v31  ;;  %v9108_v31 = vld [vmem:[#allocation19_spill] sm:$0xff] }
  0xde   : > { %1301 = vmatprep.subr.mxu0 %v5011_v32  ;;  %1372 = vmatprep.subr.mxu1 %v5011_v32  ;;  %v9109_v32 = vld [vmem:[#allocation20_spill] sm:$0xff] }
  0xdf   : > { %1302 = vmatpush1.msra.mxu0 %v5018_v33  ;;  %1373 = vmatpush1.msra.mxu1 %v5018_v33  ;;  %v9110_v33 = vld [vmem:[#allocation21_spill] sm:$0xff] }
  0xe0   : > { %1303 = vmatprep.subr.mxu0 %v5025_v34  ;;  %1374 = vmatprep.subr.mxu1 %v5025_v34  ;;  %v9111_v34 = vld [vmem:[#allocation22_spill] sm:$0xff] }
  0xe1   : > { %1304 = vmatpush1.msra.mxu0 %v5032_v35  ;;  %1375 = vmatpush1.msra.mxu1 %v5032_v35  ;;  %v9112_v35 = vld [vmem:[#allocation23_spill] sm:$0xff] }
  0xe2   : > { %1305 = vmatprep.subr.mxu0 %v5040_v36  ;;  %1376 = vmatprep.subr.mxu1 %v5040_v36  ;;  %v9113_v36 = vld [vmem:[#allocation24_spill] sm:$0xff] }
  0xe3   : > { %1306 = vmatpush1.msra.mxu0 %v5047_v37  ;;  %1377 = vmatpush1.msra.mxu1 %v5047_v37  ;;  %v9114_v37 = vld [vmem:[#allocation25_spill] sm:$0xff] }
  0xe4   : > { %1307 = vmatprep.subr.mxu0 %v5054_v38  ;;  %1378 = vmatprep.subr.mxu1 %v5054_v38  ;;  %v9115_v38 = vld [vmem:[#allocation26_spill] sm:$0xff] }
  0xe5   : > { %1308 = vmatpush1.msra.mxu0 %v5061_v39  ;;  %1379 = vmatpush1.msra.mxu1 %v5061_v39  ;;  %v9116_v39 = vld [vmem:[#allocation27_spill] sm:$0xff] }
  0xe6   : > { %1309 = vmatprep.subr.mxu0 %v5068_v40  ;;  %1380 = vmatprep.subr.mxu1 %v5068_v40  ;;  %v9117_v40 = vld [vmem:[#allocation28_spill] sm:$0xff] }
  0xe7   : > { %1310 = vmatpush1.msra.mxu0 %v5075_v41  ;;  %1381 = vmatpush1.msra.mxu1 %v5075_v41  ;;  %v9118_v41 = vld [vmem:[#allocation29_spill] sm:$0xff] }
  0xe8   : > { %1311 = vmatprep.subr.mxu0 %v5082_v42  ;;  %1382 = vmatprep.subr.mxu1 %v5082_v42  ;;  %v9119_v42 = vld [vmem:[#allocation30_spill] sm:$0xff] }
  0xe9   : > { %1312 = vmatpush1.msra.mxu0 %v5089_v43  ;;  %1345 = vmatprep.mubr.f32.mxu0 %v8997_v8 }
  0xea   : > { %1383 = vmatpush1.msra.mxu1 %v5089_v43  ;;  %1416 = vmatprep.mubr.f32.mxu1 %v8997_v8  ;;  %v9120_v43 = vld [vmem:[#allocation31_spill] sm:$0xff] }
  0xeb   : > { %1346 = vmatmul.mubr.f32.vlgmr.msra.gmra.mxu0 %v5560_v46  ;;  %1417 = vmatmul.mubr.f32.vlgmr.msra.gmra.mxu1 %v5791_v10 }
  0xec   : > { %1423 = vmatprep.subr.mxu0 %v5108_v47  ;;  %1494 = vmatprep.subr.mxu1 %v5108_v47  ;;  %v9122_v47 = vld [vmem:[#allocation33_spill] sm:$0xff] }
  0xed   : > { %1424 = vmatpush1.msra.mxu0 %v5115_v48  ;;  %1495 = vmatpush1.msra.mxu1 %v5115_v48  ;;  %v9123_v48 = vld [vmem:[#allocation34_spill] sm:$0xff] }
  0xee   : > { %1425 = vmatprep.subr.mxu0 %v5122_v49  ;;  %1496 = vmatprep.subr.mxu1 %v5122_v49  ;;  %v9124_v49 = vld [vmem:[#allocation35_spill] sm:$0xff] }
  0xef   : > { %1426 = vmatpush1.msra.mxu0 %v5129_v50  ;;  %1497 = vmatpush1.msra.mxu1 %v5129_v50  ;;  %v9125_v50 = vld [vmem:[#allocation36_spill] sm:$0xff] }
  0xf0   : > { %1427 = vmatprep.subr.mxu0 %v5136_v51  ;;  %1498 = vmatprep.subr.mxu1 %v5136_v51  ;;  %v9126_v51 = vld [vmem:[#allocation37_spill] sm:$0xff] }
  0xf1   : > { %1428 = vmatpush1.msra.mxu0 %v5143_v52  ;;  %1499 = vmatpush1.msra.mxu1 %v5143_v52  ;;  %v9127_v52 = vld [vmem:[#allocation38_spill] sm:$0xff] }
  0xf2   : > { %1429 = vmatprep.subr.mxu0 %v5150_v53  ;;  %1500 = vmatprep.subr.mxu1 %v5150_v53  ;;  %v9128_v53 = vld [vmem:[#allocation39_spill] sm:$0xff] }
  0xf3   : > { %1430 = vmatpush1.msra.mxu0 %v5157_v54  ;;  %1501 = vmatpush1.msra.mxu1 %v5157_v54  ;;  %v9129_v54 = vld [vmem:[#allocation40_spill] sm:$0xff] }
  0xf4   : > { %1431 = vmatprep.subr.mxu0 %v5164_v55  ;;  %1502 = vmatprep.subr.mxu1 %v5164_v55  ;;  %v9130_v55 = vld [vmem:[#allocation41_spill] sm:$0xff] }
  0xf5   : > { %1432 = vmatpush1.msra.mxu0 %v5171_v56  ;;  %1503 = vmatpush1.msra.mxu1 %v5171_v56  ;;  %v9131_v56 = vld [vmem:[#allocation42_spill] sm:$0xff] }
  0xf6   : > { %1433 = vmatprep.subr.mxu0 %v5178_v57  ;;  %1504 = vmatprep.subr.mxu1 %v5178_v57  ;;  %v9132_v57 = vld [vmem:[#allocation43_spill] sm:$0xff] }
  0xf7   : > { %1434 = vmatpush1.msra.mxu0 %v5185_v58  ;;  %1505 = vmatpush1.msra.mxu1 %v5185_v58  ;;  %v9133_v58 = vld [vmem:[#allocation44_spill] sm:$0xff] }
  0xf8   : > { %1435 = vmatprep.subr.mxu0 %v5192_v59  ;;  %1506 = vmatprep.subr.mxu1 %v5192_v59  ;;  %v9134_v59 = vld [vmem:[#allocation45_spill] sm:$0xff] }
  0xf9   : > { %1436 = vmatpush1.msra.mxu0 %v5199_v60  ;;  %1507 = vmatpush1.msra.mxu1 %v5199_v60  ;;  %v9135_v60 = vld [vmem:[#allocation46_spill] sm:$0xff] }
  0xfa   : > { %1437 = vmatprep.subr.mxu0 %v5206_v61  ;;  %1508 = vmatprep.subr.mxu1 %v5206_v61  ;;  %v9136_v61 = vld [vmem:[#allocation47_spill] sm:$0xff] }
  0xfb   : > { %1438 = vmatpush1.msra.mxu0 %v5213_v62  ;;  %1509 = vmatpush1.msra.mxu1 %v5213_v62  ;;  %v9137_v62 = vld [vmem:[#allocation48_spill] sm:$0xff] }
  0xfc   : > { %1439 = vmatprep.subr.mxu0 %v5220_v63  ;;  %1510 = vmatprep.subr.mxu1 %v5220_v63  ;;  %v9138_v63 = vld [vmem:[#allocation49_spill] sm:$0xff] }
  0xfd   : > { %1440 = vmatpush1.msra.mxu0 %v5227_v0  ;;  %1511 = vmatpush1.msra.mxu1 %v5227_v0  ;;  %v9139_v0 = vld [vmem:[#allocation50_spill] sm:$0xff] }
  0xfe   : > { %1441 = vmatprep.subr.mxu0 %v5234_v1  ;;  %1512 = vmatprep.subr.mxu1 %v5234_v1  ;;  %v9140_v1 = vld [vmem:[#allocation51_spill] sm:$0xff] }
  0xff   : > { %1442 = vmatpush1.msra.mxu0 %v5241_v2  ;;  %1513 = vmatpush1.msra.mxu1 %v5241_v2  ;;  %v9141_v2 = vld [vmem:[#allocation52_spill] sm:$0xff] }
 0x100   : > { %1443 = vmatprep.subr.mxu0 %v5248_v3  ;;  %1514 = vmatprep.subr.mxu1 %v5248_v3  ;;  %v9142_v3 = vld [vmem:[#allocation53_spill] sm:$0xff] }
 0x101   : > { %1444 = vmatpush1.msra.mxu0 %v5255_v4  ;;  %1515 = vmatpush1.msra.mxu1 %v5255_v4  ;;  %v9143_v4 = vld [vmem:[#allocation54_spill] sm:$0xff] }
 0x102   : > { %1445 = vmatprep.subr.mxu0 %v5262_v5  ;;  %1516 = vmatprep.subr.mxu1 %v5262_v5  ;;  %v9144_v5 = vld [vmem:[#allocation55_spill] sm:$0xff] }
 0x103   : > { %1446 = vmatpush1.msra.mxu0 %v5269_v6  ;;  %1517 = vmatpush1.msra.mxu1 %v5269_v6  ;;  %v9145_v6 = vld [vmem:[#allocation56_spill] sm:$0xff] }
 0x104   : > { %1447 = vmatprep.subr.mxu0 %v5276_v7  ;;  %1518 = vmatprep.subr.mxu1 %v5276_v7  ;;  %v9146_v7 = vld [vmem:[#allocation57_spill] sm:$0xff] }
 0x105   : > { %1448 = vmatpush1.msra.mxu0 %v9092_v13  ;;  %1519 = vmatpush1.msra.mxu1 %v9092_v13  ;;  %v9148_v13 = vld [vmem:[#allocation59_spill] sm:$0xff] }
 0x106   : > { %1449 = vmatprep.subr.mxu0 %v9093_v15  ;;  %1520 = vmatprep.subr.mxu1 %v9093_v15  ;;  %v9149_v15 = vld [vmem:[#allocation60_spill] sm:$0xff] }
 0x107   : > { %1450 = vmatpush1.msra.mxu0 %v9094_v16  ;;  %1521 = vmatpush1.msra.mxu1 %v9094_v16  ;;  %v9150_v16 = vld [vmem:[#allocation61_spill] sm:$0xff] }
 0x108   : > { %1451 = vmatprep.subr.mxu0 %v9095_v17  ;;  %1522 = vmatprep.subr.mxu1 %v9095_v17  ;;  %v9151_v17 = vld [vmem:[#allocation62_spill] sm:$0xff] }
 0x109   : > { %1452 = vmatpush1.msra.mxu0 %v9096_v18  ;;  %1523 = vmatpush1.msra.mxu1 %v9096_v18  ;;  %v9152_v18 = vld [vmem:[#allocation63_spill] sm:$0xff] }
 0x10a   : > { %1453 = vmatprep.subr.mxu0 %v9097_v19  ;;  %1524 = vmatprep.subr.mxu1 %v9097_v19  ;;  %v9153_v19 = vld [vmem:[#allocation64_spill] sm:$0xff] }
 0x10b   : > { %1454 = vmatpush1.msra.mxu0 %v9098_v20  ;;  %1487 = vmatprep.mubr.f32.mxu0 %v8997_v8 }
 0x10c   : > { %1525 = vmatpush1.msra.mxu1 %v9098_v20  ;;  %1558 = vmatprep.mubr.f32.mxu1 %v8997_v8  ;;  %v9154_v20 = vld [vmem:[#allocation65_spill] sm:$0xff] }
 0x10d   : > { %1488 = vmatmul.mubr.f32.vlgmr.msra.gmra.mxu0 %v4449_v21  ;;  %1559 = vmatmul.mubr.f32.vlgmr.msra.gmra.mxu1 %v5560_v46  ;;  %v9121_v46 = vld [vmem:[#allocation32_spill] sm:$0xff]  ;;  %v9155_v21 = vld [vmem:[#allocation66_spill] sm:$0xff] }
 0x10e   : > { %1565 = vmatprep.subr.mxu0 %v9099_v22  ;;  %1636 = vmatprep.subr.mxu1 %v9099_v22  ;;  %v9156_v22 = vld [vmem:[#allocation67_spill] sm:$0xff] }
 0x10f   : > { %1566 = vmatpush1.msra.mxu0 %v9100_v23  ;;  %1637 = vmatpush1.msra.mxu1 %v9100_v23  ;;  %v9157_v23 = vld [vmem:[#allocation68_spill] sm:$0xff] }
 0x110   : > { %1567 = vmatprep.subr.mxu0 %v9101_v24  ;;  %1638 = vmatprep.subr.mxu1 %v9101_v24  ;;  %v9158_v24 = vld [vmem:[#allocation69_spill] sm:$0xff] }
 0x111   : > { %1568 = vmatpush1.msra.mxu0 %v9102_v25  ;;  %1639 = vmatpush1.msra.mxu1 %v9102_v25  ;;  %v9159_v25 = vld [vmem:[#allocation70_spill] sm:$0xff] }
 0x112   : > { %1569 = vmatprep.subr.mxu0 %v9103_v26  ;;  %1640 = vmatprep.subr.mxu1 %v9103_v26  ;;  %v9160_v26 = vld [vmem:[#allocation71_spill] sm:$0xff] }
 0x113   : > { %1570 = vmatpush1.msra.mxu0 %v9104_v27  ;;  %1641 = vmatpush1.msra.mxu1 %v9104_v27  ;;  %v9161_v27 = vld [vmem:[#allocation72_spill] sm:$0xff] }
 0x114   : > { %1571 = vmatprep.subr.mxu0 %v9105_v28  ;;  %1642 = vmatprep.subr.mxu1 %v9105_v28  ;;  %v6312_v28 = vld [vmem:[%s5095_s13 + $0x30] sm:$0xff] }
 0x115   : > { %1572 = vmatpush1.msra.mxu0 %v9106_v29  ;;  %1643 = vmatpush1.msra.mxu1 %v9106_v29  ;;  %v9162_v29 = vld [vmem:[#allocation73_spill] sm:$0xff] }
 0x116   : > { %1573 = vmatprep.subr.mxu0 %v9107_v30  ;;  %1644 = vmatprep.subr.mxu1 %v9107_v30  ;;  %v9163_v30 = vld [vmem:[#allocation74_spill] sm:$0xff] }
 0x117   : > { %1574 = vmatpush1.msra.mxu0 %v9108_v31  ;;  %1645 = vmatpush1.msra.mxu1 %v9108_v31  ;;  %v9164_v31 = vld [vmem:[#allocation75_spill] sm:$0xff] }
 0x118   : > { %1575 = vmatprep.subr.mxu0 %v9109_v32  ;;  %1646 = vmatprep.subr.mxu1 %v9109_v32  ;;  %v9165_v32 = vld [vmem:[#allocation76_spill] sm:$0xff] }
 0x119   : > { %1576 = vmatpush1.msra.mxu0 %v9110_v33  ;;  %1647 = vmatpush1.msra.mxu1 %v9110_v33  ;;  %v9166_v33 = vld [vmem:[#allocation77_spill] sm:$0xff] }
 0x11a   : > { %1577 = vmatprep.subr.mxu0 %v9111_v34  ;;  %1648 = vmatprep.subr.mxu1 %v9111_v34  ;;  %v9167_v34 = vld [vmem:[#allocation78_spill] sm:$0xff] }
 0x11b   : > { %1578 = vmatpush1.msra.mxu0 %v9112_v35  ;;  %1649 = vmatpush1.msra.mxu1 %v9112_v35  ;;  %v9169_v35 = vld [vmem:[#allocation80_spill] sm:$0xff] }
 0x11c   : > { %1579 = vmatprep.subr.mxu0 %v9113_v36  ;;  %1650 = vmatprep.subr.mxu1 %v9113_v36  ;;  %v9170_v36 = vld [vmem:[#allocation81_spill] sm:$0xff] }
 0x11d   : > { %1580 = vmatpush1.msra.mxu0 %v9114_v37  ;;  %1651 = vmatpush1.msra.mxu1 %v9114_v37  ;;  %v9171_v37 = vld [vmem:[#allocation82_spill] sm:$0xff] }
 0x11e   : > { %1581 = vmatprep.subr.mxu0 %v9115_v38  ;;  %1652 = vmatprep.subr.mxu1 %v9115_v38  ;;  %v9172_v38 = vld [vmem:[#allocation83_spill] sm:$0xff] }
 0x11f   : > { %1582 = vmatpush1.msra.mxu0 %v9116_v39  ;;  %1653 = vmatpush1.msra.mxu1 %v9116_v39  ;;  %v9173_v39 = vld [vmem:[#allocation84_spill] sm:$0xff] }
 0x120   : > { %1583 = vmatprep.subr.mxu0 %v9117_v40  ;;  %1654 = vmatprep.subr.mxu1 %v9117_v40  ;;  %v9174_v40 = vld [vmem:[#allocation85_spill] sm:$0xff] }
 0x121   : > { %1584 = vmatpush1.msra.mxu0 %v9118_v41  ;;  %1655 = vmatpush1.msra.mxu1 %v9118_v41  ;;  %v9175_v41 = vld [vmem:[#allocation86_spill] sm:$0xff] }
 0x122   : > { %1585 = vmatprep.subr.mxu0 %v9119_v42  ;;  %1656 = vmatprep.subr.mxu1 %v9119_v42  ;;  %v9176_v42 = vld [vmem:[#allocation87_spill] sm:$0xff] }
 0x123   : > { %1586 = vmatpush1.msra.mxu0 %v9120_v43  ;;  %1657 = vmatpush1.msra.mxu1 %v9120_v43  ;;  %v9177_v43 = vld [vmem:[#allocation88_spill] sm:$0xff] }
 0x124   : > { %1587 = vmatprep.subr.mxu0 %v9121_v46  ;;  %1658 = vmatprep.subr.mxu1 %v9121_v46  ;;  %v9178_v46 = vld [vmem:[#allocation89_spill] sm:$0xff] }
 0x125   : > { %1588 = vmatpush1.msra.mxu0 %v9122_v47  ;;  %1659 = vmatpush1.msra.mxu1 %v9122_v47  ;;  %v9179_v47 = vld [vmem:[#allocation90_spill] sm:$0xff] }
 0x126   : > { %1589 = vmatprep.subr.mxu0 %v9123_v48  ;;  %1660 = vmatprep.subr.mxu1 %v9123_v48  ;;  %v9180_v48 = vld [vmem:[#allocation91_spill] sm:$0xff] }
 0x127   : > { %1590 = vmatpush1.msra.mxu0 %v9124_v49  ;;  %1661 = vmatpush1.msra.mxu1 %v9124_v49  ;;  %v9181_v49 = vld [vmem:[#allocation92_spill] sm:$0xff] }
 0x128   : > { %1591 = vmatprep.subr.mxu0 %v9125_v50  ;;  %1662 = vmatprep.subr.mxu1 %v9125_v50  ;;  %v9182_v50 = vld [vmem:[#allocation93_spill] sm:$0xff] }
 0x129   : > { %1592 = vmatpush1.msra.mxu0 %v9126_v51  ;;  %1663 = vmatpush1.msra.mxu1 %v9126_v51  ;;  %v9183_v51 = vld [vmem:[#allocation94_spill] sm:$0xff] }
 0x12a   : > { %1593 = vmatprep.subr.mxu0 %v9127_v52  ;;  %1664 = vmatprep.subr.mxu1 %v9127_v52  ;;  %v9184_v52 = vld [vmem:[#allocation95_spill] sm:$0xff] }
 0x12b   : > { %1594 = vmatpush1.msra.mxu0 %v9128_v53  ;;  %1665 = vmatpush1.msra.mxu1 %v9128_v53  ;;  %v9185_v53 = vld [vmem:[#allocation96_spill] sm:$0xff] }
 0x12c   : > { %1595 = vmatprep.subr.mxu0 %v9129_v54  ;;  %1666 = vmatprep.subr.mxu1 %v9129_v54  ;;  %v9186_v54 = vld [vmem:[#allocation97_spill] sm:$0xff] }
 0x12d   : > { %1596 = vmatpush1.msra.mxu0 %v9130_v55  ;;  %1629 = vmatprep.mubr.f32.mxu0 %v8997_v8 }
 0x12e   : > { %1667 = vmatpush1.msra.mxu1 %v9130_v55  ;;  %1700 = vmatprep.mubr.f32.mxu1 %v8997_v8  ;;  %v9187_v55 = vld [vmem:[#allocation98_spill] sm:$0xff] }
 0x12f   : > { %1630 = vmatmul.mubr.f32.vlgmr.msra.gmra.mxu0 %v5791_v10  ;;  %1701 = vmatmul.mubr.f32.vlgmr.msra.gmra.mxu1 %v6022_v9  ;;  %v9147_v10 = vld [vmem:[#allocation58_spill] sm:$0xff] }
 0x130   : > { %1711 = vmatprep.subr.mxu0 %v9131_v56  ;;  %1784 = vmatprep.subr.mxu1 %v9131_v56  ;;  %v9188_v56 = vld [vmem:[#allocation99_spill] sm:$0xff] }
 0x131   : > { %1712 = vmatpush1.msra.mxu0 %v9132_v57  ;;  %1785 = vmatpush1.msra.mxu1 %v9132_v57  ;;  %v9189_v57 = vld [vmem:[#allocation100_spill] sm:$0xff] }
 0x132   : > { %1713 = vmatprep.subr.mxu0 %v9133_v58  ;;  %1786 = vmatprep.subr.mxu1 %v9133_v58  ;;  %v9190_v58 = vld [vmem:[#allocation101_spill] sm:$0xff] }
 0x133   : > { %1714 = vmatpush1.msra.mxu0 %v9134_v59  ;;  %1787 = vmatpush1.msra.mxu1 %v9134_v59  ;;  %v9191_v59 = vld [vmem:[#allocation102_spill] sm:$0xff] }
 0x134   : > { %1715 = vmatprep.subr.mxu0 %v9135_v60  ;;  %1788 = vmatprep.subr.mxu1 %v9135_v60  ;;  %v6383_v60 = vld [vmem:[%s5095_s13 + $0x38] sm:$0xff] }
 0x135   : > { %1716 = vmatpush1.msra.mxu0 %v9136_v61  ;;  %1789 = vmatpush1.msra.mxu1 %v9136_v61  ;;  %v491_v61 = vpop.f32.mrf.mxu0 }
 0x136   : > { %1717 = vmatprep.subr.mxu0 %v9137_v62  ;;  %1790 = vmatprep.subr.mxu1 %v9137_v62  ;;  %v564_v62 = vpop.f32.mrf.mxu1 }
 0x137   : > { %1718 = vmatpush1.msra.mxu0 %v9138_v63  ;;  %1791 = vmatpush1.msra.mxu1 %v9138_v63  ;;  %v9192_v63 = vld [vmem:[#allocation103_spill] sm:$0xff] }
 0x138   : > { %1719 = vmatprep.subr.mxu0 %v9139_v0  ;;  %1792 = vmatprep.subr.mxu1 %v9139_v0  ;;  %v493_v0 = vpop.f32.mrf.mxu0 }
 0x139   : > { %1720 = vmatpush1.msra.mxu0 %v9140_v1  ;;  %1793 = vmatpush1.msra.mxu1 %v9140_v1  ;;  %v566_v1 = vpop.f32.mrf.mxu1 }
 0x13a   : > { %1721 = vmatprep.subr.mxu0 %v9141_v2  ;;  %1794 = vmatprep.subr.mxu1 %v9141_v2  ;;  %v1278_v2 = vld [vmem:[%s8553_s3 + $0x68] sm:$0xff] }
 0x13b   : > { %1722 = vmatpush1.msra.mxu0 %v9142_v3  ;;  %1795 = vmatpush1.msra.mxu1 %v9142_v3  ;;  %v635_v3 = vpop.f32.mrf.mxu0 }
 0x13c   : > { %1723 = vmatprep.subr.mxu0 %v9143_v4  ;;  %1796 = vmatprep.subr.mxu1 %v9143_v4  ;;  %v706_v4 = vpop.f32.mrf.mxu1 }
 0x13d   : > { %1724 = vmatpush1.msra.mxu0 %v9144_v5  ;;  %1797 = vmatpush1.msra.mxu1 %v9144_v5  ;;  %v1277_v5 = vld [vmem:[%s8553_s3 + $0x60] sm:$0xff] }
 0x13e   : > { %1725 = vmatprep.subr.mxu0 %v9145_v6  ;;  %1798 = vmatprep.subr.mxu1 %v9145_v6  ;;  %v1276_v6 = vld [vmem:[%s8553_s3 + $0x58] sm:$0xff] }
 0x13f   : > { %1726 = vmatpush1.msra.mxu0 %v9146_v7  ;;  %1799 = vmatpush1.msra.mxu1 %v9146_v7  ;;  %v637_v7 = vpop.f32.mrf.mxu0 }
 0x140   : > { %1727 = vmatprep.subr.mxu0 %v9147_v10  ;;  %1800 = vmatprep.subr.mxu1 %v9147_v10  ;;  %v708_v10 = vpop.f32.mrf.mxu1 }
 0x141   : > { %1728 = vmatpush1.msra.mxu0 %v9148_v13  ;;  %1801 = vmatpush1.msra.mxu1 %v9148_v13  ;;  %v1275_v13 = vld [vmem:[%s8553_s3 + $0x50] sm:$0xff] }
 0x142   : > { %1729 = vmatprep.subr.mxu0 %v9149_v15  ;;  %1802 = vmatprep.subr.mxu1 %v9149_v15 }
 0x143   : > { %1730 = vmatpush1.msra.mxu0 %v9150_v16  ;;  %1803 = vmatpush1.msra.mxu1 %v9150_v16 }
 0x144   : > { %1731 = vmatprep.subr.mxu0 %v9151_v17  ;;  %1804 = vmatprep.subr.mxu1 %v9151_v17  ;;  %v1274_v17 = vld [vmem:[%s8553_s3 + $0x48] sm:$0xff] }
 0x145   : > { %1732 = vmatpush1.msra.mxu0 %v9152_v18  ;;  %1805 = vmatpush1.msra.mxu1 %v9152_v18  ;;  %v810_v15 = vpop.f32.mrf.mxu0  ;;  %v883_v16 = vpop.f32.mrf.mxu1  ;;  %v1273_v18 = vld [vmem:[%s8553_s3 + $0x40] sm:$0xff] }
 0x146   : > { %1733 = vmatprep.subr.mxu0 %v9153_v19  ;;  %1806 = vmatprep.subr.mxu1 %v9153_v19 }
 0x147   : > { %1734 = vmatpush1.msra.mxu0 %v9154_v20  ;;  %1807 = vmatpush1.msra.mxu1 %v9154_v20  ;;  %v812_v19 = vpop.f32.mrf.mxu0  ;;  %v885_v20 = vpop.f32.mrf.mxu1 }
 0x148   : > { %1735 = vmatprep.subr.mxu0 %v9155_v21  ;;  %1808 = vmatprep.subr.mxu1 %v9155_v21  ;;  %v1272_v21 = vld [vmem:[%s8553_s3 + $0x38] sm:$0xff] }
 0x149   : > { %1736 = vmatpush1.msra.mxu0 %v9156_v22  ;;  %1809 = vmatpush1.msra.mxu1 %v9156_v22 }
 0x14a   : > { %1737 = vmatprep.subr.mxu0 %v9157_v23  ;;  %1810 = vmatprep.subr.mxu1 %v9157_v23 }
 0x14b   : > { %1738 = vmatpush1.msra.mxu0 %v9158_v24  ;;  %1811 = vmatpush1.msra.mxu1 %v9158_v24  ;;  %v1271_v24 = vld [vmem:[%s8553_s3 + $0x30] sm:$0xff] }
 0x14c   : > { %1739 = vmatprep.subr.mxu0 %v9159_v25  ;;  %1812 = vmatprep.subr.mxu1 %v9159_v25  ;;  %v636_v25 = vadd.f32 %v635_v3, %v491_v61  ;;  %v4131_v3 = vld [vmem:[%s8553_s3 + $0xd0] sm:$0xff] }
 0x14d   : > { %1740 = vmatpush1.msra.mxu0 %v9160_v26  ;;  %1813 = vmatpush1.msra.mxu1 %v9160_v26  ;;  %v707_v26 = vadd.f32 %v706_v4, %v564_v62  ;;  %v6469_v62 = vld [vmem:[%s8551_s1 + $0x1f8] sm:$0xff] }
 0x14e   : > { %1741 = vmatprep.subr.mxu0 %v9161_v27  ;;  %1814 = vmatprep.subr.mxu1 %v9161_v27  ;;  %v638_v27 = vadd.f32 %v637_v7, %v493_v0  ;;  %v4133_v0 = vld [vmem:[%s8553_s3 + $0xe0] sm:$0xff]  ;;  %v6525_v4 = vld [vmem:[%s8551_s1 + $0x1b8] sm:$0xff]  ;;  %v6541_v7 = vld [vmem:[%s8551_s1 + $0x1a8] sm:$0xff] }
 0x14f   : > { %1742 = vmatpush1.msra.mxu0 %v9162_v29  ;;  %1775 = vmatprep.mubr.f32.mxu0 %v8997_v8 }
 0x150   : > { %1815 = vmatpush1.msra.mxu1 %v9162_v29  ;;  %1848 = vmatprep.mubr.f32.mxu1 %v8997_v8  ;;  %v709_v29 = vadd.f32 %v708_v10, %v566_v1  ;;  %v6509_v1 = vld [vmem:[%s8551_s1 + $0x1c8] sm:$0xff]  ;;  %v6547_v10 = vld [vmem:[%s8551_s1 + $0x1a0] sm:$0xff] }
 0x151   : > { %1776 = vmatmul.mubr.f32.vlgmr.msra.gmra.mxu0 %v6022_v9  ;;  %1849 = vmatmul.mubr.f32.vlgmr.msra.gmra.mxu1 %v6312_v28  ;;  %v9168_v9 = vld [vmem:[#allocation79_spill] sm:$0xff] }
 0x152   : > { %1859 = vmatprep.subr.mxu0 %v9163_v30  ;;  %1932 = vmatprep.subr.mxu1 %v9163_v30  ;;  %v1270_v30 = vld [vmem:[%s8553_s3 + $0x28] sm:$0xff] }
 0x153   : > { %1860 = vmatpush1.msra.mxu0 %v9164_v31  ;;  %1933 = vmatpush1.msra.mxu1 %v9164_v31 }
 0x154   : > { %1861 = vmatprep.subr.mxu0 %v9165_v32  ;;  %1934 = vmatprep.subr.mxu1 %v9165_v32 }
 0x155   : > { %1862 = vmatpush1.msra.mxu0 %v9166_v33  ;;  %1935 = vmatpush1.msra.mxu1 %v9166_v33  ;;  %v888_v33 = vadd.f32 %v810_v15, %v636_v25  ;;  %v6557_v15 = vld [vmem:[%s8551_s1 + $0x198] sm:$0xff] }
 0x156   : > { %1863 = vmatprep.subr.mxu0 %v9167_v34  ;;  %1936 = vmatprep.subr.mxu1 %v9167_v34  ;;  %v890_v34 = vadd.f32 %v883_v16, %v707_v26  ;;  %v6563_v16 = vld [vmem:[%s8551_s1 + $0x190] sm:$0xff]  ;;  %v6615_v25 = vld [vmem:[%s8551_s1 + $0x158] sm:$0xff] }
 0x157   : > { %1864 = vmatpush1.msra.mxu0 %v9168_v9  ;;  %1937 = vmatpush1.msra.mxu1 %v9168_v9  ;;  %v889_v9 = vadd.f32 %v812_v19, %v638_v27  ;;  %v6579_v19 = vld [vmem:[%s8551_s1 + $0x180] sm:$0xff]  ;;  %v6621_v26 = vld [vmem:[%s8551_s1 + $0x150] sm:$0xff]  ;;  %v6627_v27 = vld [vmem:[%s8551_s1 + $0x148] sm:$0xff] }
 0x158   : > { %1865 = vmatprep.subr.mxu0 %v9169_v35  ;;  %1938 = vmatprep.subr.mxu1 %v9169_v35  ;;  %v891_v35 = vadd.f32 %v885_v20, %v709_v29  ;;  %v4127_v20 = vld [vmem:[%s8553_s3 + $0xb0] sm:$0xff]  ;;  %v6633_v29 = vld [vmem:[%s8551_s1 + $0x140] sm:$0xff] }
 0x159   : > { %1866 = vmatpush1.msra.mxu0 %v9170_v36  ;;  %1939 = vmatpush1.msra.mxu1 %v9170_v36  ;;  %v1269_v36 = vld [vmem:[%s8553_s3 + $0x20] sm:$0xff] }
 0x15a   : > { %1867 = vmatprep.subr.mxu0 %v9171_v37  ;;  %1940 = vmatprep.subr.mxu1 %v9171_v37 }
 0x15b   : > { %1868 = vmatpush1.msra.mxu0 %v9172_v38  ;;  %1941 = vmatpush1.msra.mxu1 %v9172_v38 }
 0x15c   : > { %1869 = vmatprep.subr.mxu0 %v9173_v39  ;;  %1942 = vmatprep.subr.mxu1 %v9173_v39 }
 0x15d   : > { %1870 = vmatpush1.msra.mxu0 %v9174_v40  ;;  %1943 = vmatpush1.msra.mxu1 %v9174_v40 }
 0x15e   : > { %1871 = vmatprep.subr.mxu0 %v9175_v41  ;;  %1944 = vmatprep.subr.mxu1 %v9175_v41 }
 0x15f   : > { %1872 = vmatpush1.msra.mxu0 %v9176_v42  ;;  %1945 = vmatpush1.msra.mxu1 %v9176_v42 }
 0x160   : > { %1873 = vmatprep.subr.mxu0 %v9177_v43  ;;  %1946 = vmatprep.subr.mxu1 %v9177_v43  ;;  %v1268_v43 = vld [vmem:[%s8553_s3 + $0x18] sm:$0xff] }
 0x161   : > { %1874 = vmatpush1.msra.mxu0 %v9178_v46  ;;  %1947 = vmatpush1.msra.mxu1 %v9178_v46 }
 0x162   : > { %1875 = vmatprep.subr.mxu0 %v9179_v47  ;;  %1948 = vmatprep.subr.mxu1 %v9179_v47 }
 0x163   : > { %1876 = vmatpush1.msra.mxu0 %v9180_v48  ;;  %1949 = vmatpush1.msra.mxu1 %v9180_v48 }
 0x164   : > { %1877 = vmatprep.subr.mxu0 %v9181_v49  ;;  %1950 = vmatprep.subr.mxu1 %v9181_v49 }
 0x165   : > { %1878 = vmatpush1.msra.mxu0 %v9182_v50  ;;  %1951 = vmatpush1.msra.mxu1 %v9182_v50 }
 0x166   : > { %1879 = vmatprep.subr.mxu0 %v9183_v51  ;;  %1952 = vmatprep.subr.mxu1 %v9183_v51 }
 0x167   : > { %1880 = vmatpush1.msra.mxu0 %v9184_v52  ;;  %1953 = vmatpush1.msra.mxu1 %v9184_v52  ;;  %v991_v22 = vpop.f32.mrf.mxu0  ;;  %v1064_v23 = vpop.f32.mrf.mxu1  ;;  %v1267_v52 = vld [vmem:[%s8553_s3 + $0x10] sm:$0xff] }
 0x168   : > { %1881 = vmatprep.subr.mxu0 %v9185_v53  ;;  %1954 = vmatprep.subr.mxu1 %v9185_v53  ;;  %v1069_v39 = vadd.f32 %v991_v22, %v888_v33  ;;  %v1071_v40 = vadd.f32 %v1064_v23, %v890_v34  ;;  %v6595_v22 = vld [vmem:[%s8551_s1 + $0x170] sm:$0xff]  ;;  %v6602_v23 = vld [vmem:[%s8551_s1 + $0x168] sm:$0xff]  ;;  %v6657_v33 = vld [vmem:[%s8551_s1 + $0x120] sm:$0xff] }
 0x169   : > { %1882 = vmatpush1.msra.mxu0 %v9186_v54  ;;  %1955 = vmatpush1.msra.mxu1 %v9186_v54  ;;  %v993_v31 = vpop.f32.mrf.mxu0  ;;  %v1066_v32 = vpop.f32.mrf.mxu1  ;;  %v6663_v34 = vld [vmem:[%s8551_s1 + $0x118] sm:$0xff] }
 0x16a   : > { %1883 = vmatprep.subr.mxu0 %v9187_v55  ;;  %1956 = vmatprep.subr.mxu1 %v9187_v55  ;;  %v1070_v41 = vadd.f32 %v993_v31, %v889_v9  ;;  %v1072_v42 = vadd.f32 %v1066_v32, %v891_v35  ;;  %v1266_v55 = vld [vmem:[%s8553_s3 + $0x8] sm:$0xff]  ;;  %v6645_v31 = vld [vmem:[%s8551_s1 + $0x130] sm:$0xff] }
 0x16b   : > { %1884 = vmatpush1.msra.mxu0 %v9188_v56  ;;  %1957 = vmatpush1.msra.mxu1 %v9188_v56  ;;  %v6458_v56 = vld [vmem:[%s8552_s2] ss:$0 sm:$0xff]  ;;  %v6651_v32 = vld [vmem:[%s8551_s1 + $0x128] sm:$0xff]  ;;  %v6669_v9 = vld [vmem:[%s8551_s1 + $0x110] sm:$0xff] }
 0x16c   : > { %1885 = vmatprep.subr.mxu0 %v9189_v57  ;;  %1958 = vmatprep.subr.mxu1 %v9189_v57  ;;  %v4126_v35 = vld [vmem:[%s8553_s3 + $0xa8] sm:$0xff] }
 0x16d   : > { %1886 = vmatpush1.msra.mxu0 %v9190_v58  ;;  %1959 = vmatpush1.msra.mxu1 %v9190_v58  ;;  %v1265_v58 = vld [vmem:[%s8553_s3] sm:$0xff] }
 0x16e   : > { %1887 = vmatprep.subr.mxu0 %v5994_v44  ;;  %1960 = vmatprep.subr.mxu1 %v5994_v44  ;;  %v1279_v44 = vld [vmem:[%s8553_s3 + $0x70] sm:$0xff] }
 0x16f   : > { %1888 = vmatpush1.msra.mxu0 %v6001_v11  ;;  %1961 = vmatpush1.msra.mxu1 %v6001_v11  ;;  %v1280_v11 = vld [vmem:[%s8553_s3 + $0x78] sm:$0xff] }
 0x170   : > { %1889 = vmatprep.subr.mxu0 %v9191_v59  ;;  %1962 = vmatprep.subr.mxu1 %v9191_v59 }
 0x171   : > { %1890 = vmatpush1.msra.mxu0 %v9192_v63  ;;  %1923 = vmatprep.mubr.f32.mxu0 %v8997_v8 }
 0x172   : > { %1963 = vmatpush1.msra.mxu1 %v9192_v63  ;;  %1996 = vmatprep.mubr.f32.mxu1 %v8997_v8  ;;  %v4136_v63 = vld [vmem:[%s8553_s3 + $0xf8] sm:$0xff] }
 0x173   : > { %1924 = vmatmul.mubr.f32.vlgmr.msra.gmra.mxu0 %v6312_v28  ;;  %1997 = vmatmul.mubr.f32.vlgmr.msra.gmra.mxu1 %v6383_v60 }
 0x174   : > { %4290 = vmatprep.subr.mxu1 %v8997_v8  ;;  %4322 = vmatprep.mubr.msk.f32.mxu1 %vm4799_vm0, %v8997_v8 }
 0x175   : > { %4291 = vmatpush3.msra.mxu1 %v1280_v11  ;;  %4255 = vmatprep.subr.mxu0 %v8997_v8  ;;  %v4135_v11 = vld [vmem:[%s8553_s3 + $0xf0] sm:$0xff] }
 0x176   : > { %4292 = vmatprep.subr.mxu1 %v8997_v8  ;;  %4287 = vmatprep.mubr.msk.f32.mxu0 %vm4799_vm0, %v8997_v8 }
 0x177   : > { %4293 = vmatpush3.msra.mxu1 %v1279_v44  ;;  %4256 = vmatpush3.msra.mxu0 %v4136_v63  ;;  %v4134_v44 = vld [vmem:[%s8553_s3 + $0xe8] sm:$0xff]  ;;  %v6809_v63 = vld [vmem:[%s8551_s1 + $0x78] sm:$0xff] }
 0x178   : > { %4294 = vmatprep.subr.mxu1 %v8997_v8  ;;  %4257 = vmatprep.subr.mxu0 %v8997_v8  ;;  %9200 = vst [vmem:[#allocation10_spill] sm:$0xff] %v6809_v63 }
 0x179   : > { %4295 = vmatpush3.msra.mxu1 %v1278_v2  ;;  %4258 = vmatpush3.msra.mxu0 %v4135_v11  ;;  %v6515_v2 = vld [vmem:[%s8551_s1 + $0x1c0] sm:$0xff]  ;;  %v6815_v11 = vld [vmem:[%s8551_s1 + $0x70] sm:$0xff] }
 0x17a   : > { %4296 = vmatprep.subr.mxu1 %v8997_v8  ;;  %4259 = vmatprep.subr.mxu0 %v8997_v8  ;;  %9201 = vst [vmem:[#allocation11_spill] sm:$0xff] %v6815_v11 }
 0x17b   : > { %4297 = vmatpush3.msra.mxu1 %v1277_v5  ;;  %4260 = vmatpush3.msra.mxu0 %v4134_v44  ;;  %v6531_v5 = vld [vmem:[%s8551_s1 + $0x1b0] sm:$0xff]  ;;  %v6821_v44 = vld [vmem:[%s8551_s1 + $0x68] sm:$0xff] }
 0x17c   : > { %4298 = vmatprep.subr.mxu1 %v8997_v8  ;;  %4261 = vmatprep.subr.mxu0 %v8997_v8  ;;  %9202 = vst [vmem:[#allocation12_spill] sm:$0xff] %v6821_v44 }
 0x17d   : > { %4299 = vmatpush3.msra.mxu1 %v1276_v6  ;;  %4262 = vmatpush3.msra.mxu0 %v4133_v0  ;;  %v4130_v6 = vld [vmem:[%s8553_s3 + $0xc8] sm:$0xff]  ;;  %v6827_v0 = vld [vmem:[%s8551_s1 + $0x60] sm:$0xff] }
 0x17e   : > { %4300 = vmatprep.subr.mxu1 %v8997_v8  ;;  %4263 = vmatprep.subr.mxu0 %v8997_v8  ;;  %9203 = vst [vmem:[#allocation13_spill] sm:$0xff] %v6827_v0 }
 0x17f   : > { %4301 = vmatpush3.msra.mxu1 %v1275_v13  ;;  %v4129_v13 = vld [vmem:[%s8553_s3 + $0xc0] sm:$0xff] }
 0x180   : > { %4302 = vmatprep.subr.mxu1 %v8997_v8 }
 0x181   : > { %4303 = vmatpush3.msra.mxu1 %v1274_v17  ;;  %v4128_v17 = vld [vmem:[%s8553_s3 + $0xb8] sm:$0xff] }
 0x182   : > { %4304 = vmatprep.subr.mxu1 %v8997_v8 }
 0x183   : > { %4305 = vmatpush3.msra.mxu1 %v1273_v18  ;;  %v6573_v18 = vld [vmem:[%s8551_s1 + $0x188] sm:$0xff] }
 0x184   : > { %4306 = vmatprep.subr.mxu1 %v8997_v8 }
 0x185   : > { %4307 = vmatpush3.msra.mxu1 %v1272_v21  ;;  %v6589_v21 = vld [vmem:[%s8551_s1 + $0x178] sm:$0xff] }
 0x186   : > { %4308 = vmatprep.subr.mxu1 %v8997_v8 }
 0x187   : > { %4309 = vmatpush3.msra.mxu1 %v1271_v24  ;;  %v6608_v24 = vld [vmem:[%s8551_s1 + $0x160] sm:$0xff] }
 0x188   : > { %4310 = vmatprep.subr.mxu1 %v8997_v8 }
 0x189   : > { %v1172_v37 = vpop.f32.mrf.mxu0  ;;  %v1245_v38 = vpop.f32.mrf.mxu1  ;;  %4311 = vmatpush3.msra.mxu1 %v1270_v30  ;;  %v6639_v30 = vld [vmem:[%s8551_s1 + $0x138] sm:$0xff] }
 0x18a   : > { %4312 = vmatprep.subr.mxu1 %v8997_v8  ;;  %v1250_v48 = vadd.f32 %v1172_v37, %v1069_v39  ;;  %v1252_v49 = vadd.f32 %v1245_v38, %v1071_v40  ;;  %v6684_v37 = vld [vmem:[%s8551_s1 + $0x100] sm:$0xff]  ;;  %v6694_v39 = vld [vmem:[%s8551_s1 + $0xf8] sm:$0xff]  ;;  %v6701_v40 = vld [vmem:[%s8551_s1 + $0xf0] sm:$0xff] }
 0x18b   : > { %v1174_v46 = vpop.f32.mrf.mxu0  ;;  %v1247_v47 = vpop.f32.mrf.mxu1  ;;  %4313 = vmatpush3.msra.mxu1 %v1269_v36  ;;  %v6678_v36 = vld [vmem:[%s8551_s1 + $0x108] sm:$0xff]  ;;  %v4125_v38 = vld [vmem:[%s8553_s3 + $0xa0] sm:$0xff] }
 0x18c   : > { %v1251_v50 = vadd.f32 %v1174_v46, %v1070_v41  ;;  %v1253_v51 = vadd.f32 %v1247_v47, %v1072_v42  ;;  %4314 = vmatprep.subr.mxu1 %v8997_v8  ;;  %v4124_v41 = vld [vmem:[%s8553_s3 + $0x98] sm:$0xff]  ;;  %v6711_v42 = vld [vmem:[%s8551_s1 + $0xe8] sm:$0xff]  ;;  %v6733_v47 = vld [vmem:[%s8551_s1 + $0xd0] sm:$0xff] }
 0x18d   : > { %4315 = vmatpush3.msra.mxu1 %v1268_v43  ;;  %v4123_v43 = vld [vmem:[%s8553_s3 + $0x90] sm:$0xff]  ;;  %v6727_v46 = vld [vmem:[%s8551_s1 + $0xd8] sm:$0xff] }
 0x18e   : > { %v1254_v53 = vmax.f32 %v1250_v48, %v1251_v50  ;;  %v1255_v54 = vmax.f32 %v1252_v49, %v1253_v51  ;;  %4316 = vmatprep.subr.mxu1 %v8997_v8  ;;  %v4122_v48 = vld [vmem:[%s8553_s3 + $0x88] sm:$0xff]  ;;  %v6749_v50 = vld [vmem:[%s8551_s1 + $0xc0] sm:$0xff] }
 0x18f   : > { %4317 = vmatpush3.msra.mxu1 %v1267_v52  ;;  %v6743_v49 = vld [vmem:[%s8551_s1 + $0xc8] sm:$0xff]  ;;  %v4121_v51 = vld [vmem:[%s8553_s3 + $0x80] sm:$0xff]  ;;  %v6759_v52 = vld [vmem:[%s8551_s1 + $0xb8] sm:$0xff] }
 0x190   : > { %v1256_v57 = vmax.f32 %v1254_v53, %v1255_v54  ;;  %4318 = vmatprep.subr.mxu1 %v8997_v8  ;;  %v6765_v53 = vld [vmem:[%s8551_s1 + $0xb0] sm:$0xff]  ;;  %v6772_v54 = vld [vmem:[%s8551_s1 + $0xa8] sm:$0xff] }
 0x191   : > { %4319 = vmatpush3.msra.mxu1 %v1266_v55  ;;  %9193 = vst [vmem:[#allocation3_spill] sm:$0xff] %v6765_v53  ;;  %9194 = vst [vmem:[#allocation4_spill] sm:$0xff] %v6772_v54  ;;  %v6778_v55 = vld [vmem:[%s8551_s1 + $0xa0] sm:$0xff] }
 0x192   : > { %v1263_v59 = vadd.f32 %v6458_v56, %v1256_v57  ;;  %4320 = vmatprep.subr.mxu1 %v8997_v8  ;;  %9195 = vst [vmem:[#allocation5_spill] sm:$0xff] %v6778_v55  ;;  %v6785_v57 = vld [vmem:[%s8551_s1 + $0x98] sm:$0xff] }
 0x193   : > { %4321 = vmatpush3.msra.mxu1 %v1265_v58  ;;  %9196 = vst [vmem:[#allocation6_spill] sm:$0xff] %v6785_v57  ;;  %v6791_v58 = vld [vmem:[%s8551_s1 + $0x90] sm:$0xff] }
 0x194   : > { %v1264_v61 = vmax.f32 %v1263_v59, 0.0  ;;  %2240 = vmatprep.subr.mxu1 %v6469_v62  ;;  %9197 = vst [vmem:[#allocation7_spill] sm:$0xff] %v6791_v58  ;;  %v6797_v59 = vld [vmem:[%s8551_s1 + $0x88] sm:$0xff] }
 0x195   : > { %9198 = vst [vmem:[#allocation8_spill] sm:$0xff] %v6797_v59 }
 0x196   : > { %4323 = vmatmul.mubr.f32.vlgmr.msra.gmra.mxu1 %v1264_v61  ;;  %v6803_v61 = vld [vmem:[%s8551_s1 + $0x80] sm:$0xff] }
 0x197   : > { %2241 = vmatpush1.msra.mxu1 %v6036_v14  ;;  %2304 = vmatprep.mubr.f32.mxu1 %v8997_v8  ;;  %v6493_v14 = vld [vmem:[%s8551_s1 + $0x1d8] sm:$0xff]  ;;  %9199 = vst [vmem:[#allocation9_spill] sm:$0xff] %v6803_v61 }
 0x198   : > { %2242 = vmatprep.subr.mxu1 %v6042_v45  ;;  %v6499_v45 = vld [vmem:[%s8551_s1 + $0x1d0] sm:$0xff] }
 0x199   : > { %2243 = vmatpush1.msra.mxu1 %v6050_v12  ;;  %v4132_v12 = vld [vmem:[%s8553_s3 + $0xd8] sm:$0xff] }
 0x19a   : > { %2244 = vmatprep.subr.mxu1 %v6493_v14  ;;  %4264 = vmatpush3.msra.mxu0 %v4132_v12  ;;  %v6833_v12 = vld [vmem:[%s8551_s1 + $0x58] sm:$0xff] }
 0x19b   : > { %2245 = vmatpush1.msra.mxu1 %v6499_v45  ;;  %4265 = vmatprep.subr.mxu0 %v8997_v8  ;;  %9204 = vst [vmem:[#allocation14_spill] sm:$0xff] %v6833_v12 }
 0x19c   : > { %2246 = vmatprep.subr.mxu1 %v6509_v1  ;;  %4266 = vmatpush3.msra.mxu0 %v4131_v3  ;;  %v6839_v3 = vld [vmem:[%s8551_s1 + $0x50] sm:$0xff] }
 0x19d   : > { %2247 = vmatpush1.msra.mxu1 %v6515_v2  ;;  %4267 = vmatprep.subr.mxu0 %v8997_v8  ;;  %9205 = vst [vmem:[#allocation15_spill] sm:$0xff] %v6839_v3 }
 0x19e   : > { %2248 = vmatprep.subr.mxu1 %v6525_v4  ;;  %4268 = vmatpush3.msra.mxu0 %v4130_v6  ;;  %v6845_v6 = vld [vmem:[%s8551_s1 + $0x48] sm:$0xff] }
 0x19f   : > { %2249 = vmatpush1.msra.mxu1 %v6531_v5  ;;  %4269 = vmatprep.subr.mxu0 %v8997_v8  ;;  %9206 = vst [vmem:[#allocation16_spill] sm:$0xff] %v6845_v6 }
 0x1a0   : > { %2250 = vmatprep.subr.mxu1 %v6541_v7  ;;  %4270 = vmatpush3.msra.mxu0 %v4129_v13  ;;  %v6851_v13 = vld [vmem:[%s8551_s1 + $0x40] sm:$0xff] }
 0x1a1   : > { %2251 = vmatpush1.msra.mxu1 %v6547_v10  ;;  %4271 = vmatprep.subr.mxu0 %v8997_v8  ;;  %9207 = vst [vmem:[#allocation17_spill] sm:$0xff] %v6851_v13 }
 0x1a2   : > { %2252 = vmatprep.subr.mxu1 %v6557_v15  ;;  %4272 = vmatpush3.msra.mxu0 %v4128_v17  ;;  %v6857_v17 = vld [vmem:[%s8551_s1 + $0x38] sm:$0xff] }
 0x1a3   : > { %2253 = vmatpush1.msra.mxu1 %v6563_v16  ;;  %4273 = vmatprep.subr.mxu0 %v8997_v8  ;;  %9208 = vst [vmem:[#allocation18_spill] sm:$0xff] %v6857_v17 }
 0x1a4   : > { %2254 = vmatprep.subr.mxu1 %v6573_v18  ;;  %4274 = vmatpush3.msra.mxu0 %v4127_v20  ;;  %v6863_v20 = vld [vmem:[%s8551_s1 + $0x30] sm:$0xff] }
 0x1a5   : > { %2255 = vmatpush1.msra.mxu1 %v6579_v19  ;;  %4275 = vmatprep.subr.mxu0 %v8997_v8  ;;  %9209 = vst [vmem:[#allocation19_spill] sm:$0xff] %v6863_v20 }
 0x1a6   : > { %2256 = vmatprep.subr.mxu1 %v6589_v21  ;;  %4276 = vmatpush3.msra.mxu0 %v4126_v35  ;;  %v6869_v35 = vld [vmem:[%s8551_s1 + $0x28] sm:$0xff] }
 0x1a7   : > { %2257 = vmatpush1.msra.mxu1 %v6595_v22  ;;  %4277 = vmatprep.subr.mxu0 %v8997_v8  ;;  %9210 = vst [vmem:[#allocation20_spill] sm:$0xff] %v6869_v35 }
 0x1a8   : > { %2258 = vmatprep.subr.mxu1 %v6602_v23  ;;  %4278 = vmatpush3.msra.mxu0 %v4125_v38  ;;  %v6875_v38 = vld [vmem:[%s8551_s1 + $0x20] sm:$0xff] }
 0x1a9   : > { %2259 = vmatpush1.msra.mxu1 %v6608_v24  ;;  %4279 = vmatprep.subr.mxu0 %v8997_v8  ;;  %9211 = vst [vmem:[#allocation21_spill] sm:$0xff] %v6875_v38 }
 0x1aa   : > { %2260 = vmatprep.subr.mxu1 %v6615_v25  ;;  %4280 = vmatpush3.msra.mxu0 %v4124_v41  ;;  %v6881_v41 = vld [vmem:[%s8551_s1 + $0x18] sm:$0xff] }
 0x1ab   : > { %2261 = vmatpush1.msra.mxu1 %v6621_v26  ;;  %4281 = vmatprep.subr.mxu0 %v8997_v8  ;;  %9212 = vst [vmem:[#allocation22_spill] sm:$0xff] %v6881_v41 }
 0x1ac   : > { %2262 = vmatprep.subr.mxu1 %v6627_v27  ;;  %4282 = vmatpush3.msra.mxu0 %v4123_v43  ;;  %v6887_v43 = vld [vmem:[%s8551_s1 + $0x10] sm:$0xff] }
 0x1ad   : > { %2263 = vmatpush1.msra.mxu1 %v6633_v29  ;;  %4283 = vmatprep.subr.mxu0 %v8997_v8  ;;  %9213 = vst [vmem:[#allocation23_spill] sm:$0xff] %v6887_v43 }
 0x1ae   : > { %2264 = vmatprep.subr.mxu1 %v6639_v30  ;;  %4284 = vmatpush3.msra.mxu0 %v4122_v48  ;;  %v6893_v48 = vld [vmem:[%s8551_s1 + $0x8] sm:$0xff] }
 0x1af   : > { %2265 = vmatpush1.msra.mxu1 %v6645_v31  ;;  %4285 = vmatprep.subr.mxu0 %v8997_v8  ;;  %9214 = vst [vmem:[#allocation24_spill] sm:$0xff] %v6893_v48 }
 0x1b0   : > { %2266 = vmatprep.subr.mxu1 %v6651_v32  ;;  %4286 = vmatpush3.msra.mxu0 %v4121_v51  ;;  %v6899_v51 = vld [vmem:[%s8551_s1] sm:$0xff] }
 0x1b1   : > { %2267 = vmatpush1.msra.mxu1 %v6657_v33  ;;  %2169 = vmatprep.subr.mxu0 %v6469_v62  ;;  %9215 = vst [vmem:[#allocation25_spill] sm:$0xff] %v6899_v51 }
 0x1b2   : > { %2268 = vmatprep.subr.mxu1 %v6663_v34 }
 0x1b3   : > { %2269 = vmatpush1.msra.mxu1 %v6669_v9 }
 0x1b4   : > { %2270 = vmatprep.subr.mxu1 %v6678_v36 }
 0x1b5   : > { %2271 = vmatpush1.msra.mxu1 %v6684_v37 }
 0x1b6   : > { %2382 = vmatprep.subr.mxu1 %v6694_v39  ;;  %2305 = vmatmul.mubr.f32.vlgmr.msra.gmra.mxu1 %v6312_v28  ;;  %v6717_v28 = vld [vmem:[%s8551_s1 + $0xe0] sm:$0xff] }
 0x1b7   : > { %2383 = vmatpush1.msra.mxu1 %v6701_v40  ;;  %2446 = vmatprep.mubr.f32.mxu1 %v8997_v8 }
 0x1b8   : > { %2384 = vmatprep.subr.mxu1 %v6711_v42 }
 0x1b9   : > { %2385 = vmatpush1.msra.mxu1 %v6717_v28 }
 0x1ba   : > { %2386 = vmatprep.subr.mxu1 %v6727_v46 }
 0x1bb   : > { %2387 = vmatpush1.msra.mxu1 %v6733_v47 }
 0x1bc   : > { %2388 = vmatprep.subr.mxu1 %v6743_v49 }
 0x1bd   : > { %2389 = vmatpush1.msra.mxu1 %v6749_v50 }
 0x1be   : > { %2390 = vmatprep.subr.mxu1 %v6759_v52 }
 0x1bf   : > { %2391 = vmatpush1.msra.mxu1 %v6765_v53  ;;  %v7463_v53 = vld [vmem:[%s8551_s1 + $0x420] sm:$0xff] }
 0x1c0   : > { %2392 = vmatprep.subr.mxu1 %v6772_v54 }
 0x1c1   : > { %2393 = vmatpush1.msra.mxu1 %v6778_v55 }
 0x1c2   : > { %2394 = vmatprep.subr.mxu1 %v6785_v57 }
 0x1c3   : > { %2395 = vmatpush1.msra.mxu1 %v6791_v58 }
 0x1c4   : > { %2396 = vmatprep.subr.mxu1 %v6797_v59 }
 0x1c5   : > { %2397 = vmatpush1.msra.mxu1 %v6803_v61 }
 0x1c6   : > { %2398 = vmatprep.subr.mxu1 %v6809_v63 }
 0x1c7   : > { %2399 = vmatpush1.msra.mxu1 %v6815_v11  ;;  %v7421_v11 = vld [vmem:[%s8551_s1 + $0x458] sm:$0xff] }
 0x1c8   : > { %2400 = vmatprep.subr.mxu1 %v6821_v44  ;;  %9301 = vst [vmem:[#allocation111_spill] sm:$0xff] %v7421_v11 }
 0x1c9   : > { %2401 = vmatpush1.msra.mxu1 %v6827_v0 }
 0x1ca   : > { %2402 = vmatprep.subr.mxu1 %v6833_v12 }
 0x1cb   : > { %2403 = vmatpush1.msra.mxu1 %v6839_v3  ;;  %v7385_v3 = vld [vmem:[%s8551_s1 + $0x488] sm:$0xff] }
 0x1cc   : > { %2404 = vmatprep.subr.mxu1 %v6845_v6  ;;  %9295 = vst [vmem:[#allocation105_spill] sm:$0xff] %v7385_v3 }
 0x1cd   : > { %2405 = vmatpush1.msra.mxu1 %v6851_v13 }
 0x1ce   : > { %2406 = vmatprep.subr.mxu1 %v6857_v17 }
 0x1cf   : > { %2407 = vmatpush1.msra.mxu1 %v6863_v20  ;;  %v7349_v20 = vld [vmem:[%s8551_s1 + $0x4b8] sm:$0xff] }
 0x1d0   : > { %2408 = vmatprep.subr.mxu1 %v6869_v35  ;;  %v1418_v35 = vpop.f32.mrf.mxu1  ;;  %9289 = vst [vmem:[#allocation99_spill] sm:$0xff] %v7349_v20 }
 0x1d1   : > { %2409 = vmatpush1.msra.mxu1 %v6875_v38  ;;  %v6940_v38 = vld [vmem:[%s8551_s1 + $0x2d0] sm:$0xff] }
 0x1d2   : > { %2410 = vmatprep.subr.mxu1 %v6881_v41  ;;  %v6905_v41 = vld [vmem:[%s8551_s1 + $0x2f8] sm:$0xff]  ;;  %9221 = vst [vmem:[#allocation31_spill] sm:$0xff] %v6940_v38  ;;  %v1420_v17 = vpop.f32.mrf.mxu1 }
 0x1d3   : > { %2411 = vmatpush1.msra.mxu1 %v6887_v43  ;;  %9216 = vst [vmem:[#allocation26_spill] sm:$0xff] %v6905_v41  ;;  %v6909_v43 = vld [vmem:[%s5095_s13 + $0x28] sm:$0xff] }
 0x1d4   : > { %2412 = vmatprep.subr.mxu1 %v6893_v48  ;;  %v6915_v48 = vld [vmem:[%s8551_s1 + $0x2f0] sm:$0xff]  ;;  %v1560_v6 = vpop.f32.mrf.mxu1 }
 0x1d5   : > { %2413 = vmatpush1.msra.mxu1 %v6899_v51  ;;  %9217 = vst [vmem:[#allocation27_spill] sm:$0xff] %v6915_v48  ;;  %v6922_v51 = vld [vmem:[%s8551_s1 + $0x2e8] sm:$0xff]  ;;  %v1561_v57 = vadd.f32 %v1560_v6, %v1418_v35 }
 0x1d6   : > { %2524 = vmatprep.subr.mxu1 %v6905_v41  ;;  %2447 = vmatmul.mubr.f32.vlgmr.msra.gmra.mxu1 %v6909_v43  ;;  %9218 = vst [vmem:[#allocation28_spill] sm:$0xff] %v6922_v51  ;;  %v6928_v41 = vld [vmem:[%s8551_s1 + $0x2e0] sm:$0xff]  ;;  %v1562_v12 = vpop.f32.mrf.mxu1 }
 0x1d7   : > { %2525 = vmatpush1.msra.mxu1 %v6915_v48  ;;  %2588 = vmatprep.mubr.f32.mxu1 %v8997_v8  ;;  %9219 = vst [vmem:[#allocation29_spill] sm:$0xff] %v6928_v41  ;;  %v6934_v48 = vld [vmem:[%s8551_s1 + $0x2d8] sm:$0xff]  ;;  %v1563_v54 = vadd.f32 %v1562_v12, %v1420_v17 }
 0x1d8   : > { %2526 = vmatprep.subr.mxu1 %v6922_v51  ;;  %9220 = vst [vmem:[#allocation30_spill] sm:$0xff] %v6934_v48  ;;  %v6946_v51 = vld [vmem:[%s8551_s1 + $0x2c8] sm:$0xff] }
 0x1d9   : > { %2527 = vmatpush1.msra.mxu1 %v6928_v41  ;;  %9222 = vst [vmem:[#allocation32_spill] sm:$0xff] %v6946_v51  ;;  %v6952_v41 = vld [vmem:[%s8551_s1 + $0x2c0] sm:$0xff] }
 0x1da   : > { %2528 = vmatprep.subr.mxu1 %v6934_v48  ;;  %9223 = vst [vmem:[#allocation33_spill] sm:$0xff] %v6952_v41  ;;  %v6958_v48 = vld [vmem:[%s8551_s1 + $0x2b8] sm:$0xff] }
 0x1db   : > { %2529 = vmatpush1.msra.mxu1 %v6940_v38  ;;  %9224 = vst [vmem:[#allocation34_spill] sm:$0xff] %v6958_v48  ;;  %v6964_v38 = vld [vmem:[%s8551_s1 + $0x2b0] sm:$0xff] }
 0x1dc   : > { %2530 = vmatprep.subr.mxu1 %v6946_v51  ;;  %9225 = vst [vmem:[#allocation35_spill] sm:$0xff] %v6964_v38  ;;  %v6970_v51 = vld [vmem:[%s8551_s1 + $0x2a8] sm:$0xff] }
 0x1dd   : > { %2531 = vmatpush1.msra.mxu1 %v6952_v41  ;;  %9226 = vst [vmem:[#allocation36_spill] sm:$0xff] %v6970_v51  ;;  %v6976_v41 = vld [vmem:[%s8551_s1 + $0x2a0] sm:$0xff] }
 0x1de   : > { %2532 = vmatprep.subr.mxu1 %v6958_v48  ;;  %9227 = vst [vmem:[#allocation37_spill] sm:$0xff] %v6976_v41  ;;  %v6982_v48 = vld [vmem:[%s8551_s1 + $0x298] sm:$0xff] }
 0x1df   : > { %2533 = vmatpush1.msra.mxu1 %v6964_v38  ;;  %9228 = vst [vmem:[#allocation38_spill] sm:$0xff] %v6982_v48  ;;  %v6988_v38 = vld [vmem:[%s8551_s1 + $0x290] sm:$0xff] }
 0x1e0   : > { %2534 = vmatprep.subr.mxu1 %v6970_v51  ;;  %9229 = vst [vmem:[#allocation39_spill] sm:$0xff] %v6988_v38  ;;  %v6994_v51 = vld [vmem:[%s8551_s1 + $0x288] sm:$0xff] }
 0x1e1   : > { %2535 = vmatpush1.msra.mxu1 %v6976_v41  ;;  %9230 = vst [vmem:[#allocation40_spill] sm:$0xff] %v6994_v51  ;;  %v7000_v41 = vld [vmem:[%s8551_s1 + $0x280] sm:$0xff] }
 0x1e2   : > { %2536 = vmatprep.subr.mxu1 %v6982_v48  ;;  %9231 = vst [vmem:[#allocation41_spill] sm:$0xff] %v7000_v41  ;;  %v7006_v48 = vld [vmem:[%s8551_s1 + $0x278] sm:$0xff] }
 0x1e3   : > { %2537 = vmatpush1.msra.mxu1 %v6988_v38  ;;  %9232 = vst [vmem:[#allocation42_spill] sm:$0xff] %v7006_v48  ;;  %v7012_v38 = vld [vmem:[%s8551_s1 + $0x270] sm:$0xff] }
 0x1e4   : > { %2538 = vmatprep.subr.mxu1 %v6994_v51  ;;  %9233 = vst [vmem:[#allocation43_spill] sm:$0xff] %v7012_v38  ;;  %v7018_v51 = vld [vmem:[%s8551_s1 + $0x268] sm:$0xff] }
 0x1e5   : > { %2539 = vmatpush1.msra.mxu1 %v7000_v41  ;;  %9234 = vst [vmem:[#allocation44_spill] sm:$0xff] %v7018_v51  ;;  %v7024_v41 = vld [vmem:[%s8551_s1 + $0x260] sm:$0xff] }
 0x1e6   : > { %2540 = vmatprep.subr.mxu1 %v7006_v48  ;;  %9235 = vst [vmem:[#allocation45_spill] sm:$0xff] %v7024_v41  ;;  %v7030_v48 = vld [vmem:[%s8551_s1 + $0x258] sm:$0xff] }
 0x1e7   : > { %2541 = vmatpush1.msra.mxu1 %v7012_v38  ;;  %9236 = vst [vmem:[#allocation46_spill] sm:$0xff] %v7030_v48  ;;  %v7036_v38 = vld [vmem:[%s8551_s1 + $0x250] sm:$0xff] }
 0x1e8   : > { %2542 = vmatprep.subr.mxu1 %v7018_v51  ;;  %9237 = vst [vmem:[#allocation47_spill] sm:$0xff] %v7036_v38  ;;  %v7042_v51 = vld [vmem:[%s8551_s1 + $0x248] sm:$0xff] }
 0x1e9   : > { %2543 = vmatpush1.msra.mxu1 %v7024_v41  ;;  %9238 = vst [vmem:[#allocation48_spill] sm:$0xff] %v7042_v51  ;;  %v7048_v41 = vld [vmem:[%s8551_s1 + $0x240] sm:$0xff] }
 0x1ea   : > { %2544 = vmatprep.subr.mxu1 %v7030_v48  ;;  %9239 = vst [vmem:[#allocation49_spill] sm:$0xff] %v7048_v41  ;;  %v7054_v48 = vld [vmem:[%s8551_s1 + $0x238] sm:$0xff] }
 0x1eb   : > { %2545 = vmatpush1.msra.mxu1 %v7036_v38  ;;  %9240 = vst [vmem:[#allocation50_spill] sm:$0xff] %v7054_v48  ;;  %v7060_v38 = vld [vmem:[%s8551_s1 + $0x230] sm:$0xff] }
 0x1ec   : > { %2546 = vmatprep.subr.mxu1 %v7042_v51  ;;  %9241 = vst [vmem:[#allocation51_spill] sm:$0xff] %v7060_v38  ;;  %v7066_v51 = vld [vmem:[%s8551_s1 + $0x228] sm:$0xff] }
 0x1ed   : > { %2547 = vmatpush1.msra.mxu1 %v7048_v41  ;;  %9242 = vst [vmem:[#allocation52_spill] sm:$0xff] %v7066_v51  ;;  %v7072_v41 = vld [vmem:[%s8551_s1 + $0x220] sm:$0xff] }
 0x1ee   : > { %2548 = vmatprep.subr.mxu1 %v7054_v48  ;;  %9243 = vst [vmem:[#allocation53_spill] sm:$0xff] %v7072_v41  ;;  %v7078_v48 = vld [vmem:[%s8551_s1 + $0x218] sm:$0xff] }
 0x1ef   : > { %2549 = vmatpush1.msra.mxu1 %v7060_v38  ;;  %9244 = vst [vmem:[#allocation54_spill] sm:$0xff] %v7078_v48  ;;  %v7084_v38 = vld [vmem:[%s8551_s1 + $0x210] sm:$0xff]  ;;  %v1702_v44 = vpop.f32.mrf.mxu1 }
 0x1f0   : > { %2550 = vmatprep.subr.mxu1 %v7066_v51  ;;  %9245 = vst [vmem:[#allocation55_spill] sm:$0xff] %v7084_v38  ;;  %v7090_v51 = vld [vmem:[%s8551_s1 + $0x208] sm:$0xff]  ;;  %v1709_v6 = vadd.f32 %v1702_v44, %v1561_v57 }
 0x1f1   : > { %2551 = vmatpush1.msra.mxu1 %v7072_v41  ;;  %9246 = vst [vmem:[#allocation56_spill] sm:$0xff] %v7090_v51  ;;  %v7096_v41 = vld [vmem:[%s8551_s1 + $0x200] sm:$0xff]  ;;  %v1704_v63 = vpop.f32.mrf.mxu1  ;;  %v7479_v57 = vld [vmem:[%s5095_s13 + $0x48] sm:$0xff] }
 0x1f2   : > { %2552 = vmatprep.subr.mxu1 %v7078_v48  ;;  %9247 = vst [vmem:[#allocation57_spill] sm:$0xff] %v7096_v41  ;;  %v7102_v48 = vld [vmem:[%s8551_s1 + $0x3f8] sm:$0xff]  ;;  %v1710_v17 = vadd.f32 %v1704_v63, %v1563_v54  ;;  %v7484_v44 = vld [vmem:[%s8551_s1 + $0x408] sm:$0xff] }
 0x1f3   : > { %2553 = vmatpush1.msra.mxu1 %v7084_v38  ;;  %9248 = vst [vmem:[#allocation58_spill] sm:$0xff] %v7102_v48  ;;  %v7134_v38 = vld [vmem:[%s8551_s1 + $0x3d0] sm:$0xff] }
 0x1f4   : > { %2554 = vmatprep.subr.mxu1 %v7090_v51  ;;  %v7109_v51 = vld [vmem:[%s8551_s1 + $0x3f0] sm:$0xff]  ;;  %9253 = vst [vmem:[#allocation63_spill] sm:$0xff] %v7134_v38 }
 0x1f5   : > { %2555 = vmatpush1.msra.mxu1 %v7096_v41  ;;  %9249 = vst [vmem:[#allocation59_spill] sm:$0xff] %v7109_v51  ;;  %v7116_v41 = vld [vmem:[%s8551_s1 + $0x3e8] sm:$0xff] }
 0x1f6   : > { %2672 = vmatprep.subr.mxu1 %v7102_v48  ;;  %2589 = vmatmul.mubr.f32.vlgmr.msra.gmra.mxu1 %v6383_v60  ;;  %9250 = vst [vmem:[#allocation60_spill] sm:$0xff] %v7116_v41  ;;  %v7122_v48 = vld [vmem:[%s8551_s1 + $0x3e0] sm:$0xff] }
 0x1f7   : > { %2673 = vmatpush1.msra.mxu1 %v7109_v51  ;;  %2736 = vmatprep.mubr.f32.mxu1 %v8997_v8  ;;  %9251 = vst [vmem:[#allocation61_spill] sm:$0xff] %v7122_v48  ;;  %v7128_v51 = vld [vmem:[%s8551_s1 + $0x3d8] sm:$0xff] }
 0x1f8   : > { %2674 = vmatprep.subr.mxu1 %v7116_v41  ;;  %9252 = vst [vmem:[#allocation62_spill] sm:$0xff] %v7128_v51  ;;  %v7140_v41 = vld [vmem:[%s8551_s1 + $0x3c8] sm:$0xff] }
 0x1f9   : > { %2675 = vmatpush1.msra.mxu1 %v7122_v48  ;;  %9254 = vst [vmem:[#allocation64_spill] sm:$0xff] %v7140_v41  ;;  %v7146_v48 = vld [vmem:[%s8551_s1 + $0x3c0] sm:$0xff] }
 0x1fa   : > { %2676 = vmatprep.subr.mxu1 %v7128_v51  ;;  %9255 = vst [vmem:[#allocation65_spill] sm:$0xff] %v7146_v48  ;;  %v7152_v51 = vld [vmem:[%s8551_s1 + $0x3b8] sm:$0xff] }
 0x1fb   : > { %2677 = vmatpush1.msra.mxu1 %v7134_v38  ;;  %9256 = vst [vmem:[#allocation66_spill] sm:$0xff] %v7152_v51  ;;  %v7158_v38 = vld [vmem:[%s8551_s1 + $0x3b0] sm:$0xff] }
 0x1fc   : > { %2678 = vmatprep.subr.mxu1 %v7140_v41  ;;  %9257 = vst [vmem:[#allocation67_spill] sm:$0xff] %v7158_v38  ;;  %v7164_v41 = vld [vmem:[%s8551_s1 + $0x3a8] sm:$0xff] }
 0x1fd   : > { %2679 = vmatpush1.msra.mxu1 %v7146_v48  ;;  %9258 = vst [vmem:[#allocation68_spill] sm:$0xff] %v7164_v41  ;;  %v7170_v48 = vld [vmem:[%s8551_s1 + $0x3a0] sm:$0xff] }
 0x1fe   : > { %2680 = vmatprep.subr.mxu1 %v7152_v51  ;;  %9259 = vst [vmem:[#allocation69_spill] sm:$0xff] %v7170_v48  ;;  %v7176_v51 = vld [vmem:[%s8551_s1 + $0x398] sm:$0xff] }
 0x1ff   : > { %2681 = vmatpush1.msra.mxu1 %v7158_v38  ;;  %9260 = vst [vmem:[#allocation70_spill] sm:$0xff] %v7176_v51  ;;  %v7182_v38 = vld [vmem:[%s8551_s1 + $0x390] sm:$0xff] }
 0x200   : > { %2682 = vmatprep.subr.mxu1 %v7164_v41  ;;  %9261 = vst [vmem:[#allocation71_spill] sm:$0xff] %v7182_v38  ;;  %v7188_v41 = vld [vmem:[%s8551_s1 + $0x388] sm:$0xff] }
 0x201   : > { %2683 = vmatpush1.msra.mxu1 %v7170_v48  ;;  %9262 = vst [vmem:[#allocation72_spill] sm:$0xff] %v7188_v41  ;;  %v7194_v48 = vld [vmem:[%s8551_s1 + $0x380] sm:$0xff] }
 0x202   : > { %2684 = vmatprep.subr.mxu1 %v7176_v51  ;;  %9263 = vst [vmem:[#allocation73_spill] sm:$0xff] %v7194_v48  ;;  %v7200_v51 = vld [vmem:[%s8551_s1 + $0x378] sm:$0xff] }
 0x203   : > { %2685 = vmatpush1.msra.mxu1 %v7182_v38  ;;  %9264 = vst [vmem:[#allocation74_spill] sm:$0xff] %v7200_v51  ;;  %v7206_v38 = vld [vmem:[%s8551_s1 + $0x370] sm:$0xff] }
 0x204   : > { %2686 = vmatprep.subr.mxu1 %v7188_v41  ;;  %9265 = vst [vmem:[#allocation75_spill] sm:$0xff] %v7206_v38  ;;  %v7212_v41 = vld [vmem:[%s8551_s1 + $0x368] sm:$0xff] }
 0x205   : > { %2687 = vmatpush1.msra.mxu1 %v7194_v48  ;;  %9266 = vst [vmem:[#allocation76_spill] sm:$0xff] %v7212_v41  ;;  %v7218_v48 = vld [vmem:[%s8551_s1 + $0x360] sm:$0xff] }
 0x206   : > { %2688 = vmatprep.subr.mxu1 %v7200_v51  ;;  %9267 = vst [vmem:[#allocation77_spill] sm:$0xff] %v7218_v48  ;;  %v7224_v51 = vld [vmem:[%s8551_s1 + $0x358] sm:$0xff] }
 0x207   : > { %2689 = vmatpush1.msra.mxu1 %v7206_v38  ;;  %9268 = vst [vmem:[#allocation78_spill] sm:$0xff] %v7224_v51  ;;  %v7230_v38 = vld [vmem:[%s8551_s1 + $0x350] sm:$0xff] }
 0x208   : > { %2690 = vmatprep.subr.mxu1 %v7212_v41  ;;  %9269 = vst [vmem:[#allocation79_spill] sm:$0xff] %v7230_v38  ;;  %v7236_v41 = vld [vmem:[%s8551_s1 + $0x348] sm:$0xff] }
 0x209   : > { %2691 = vmatpush1.msra.mxu1 %v7218_v48  ;;  %9270 = vst [vmem:[#allocation80_spill] sm:$0xff] %v7236_v41  ;;  %v7242_v48 = vld [vmem:[%s8551_s1 + $0x340] sm:$0xff] }
 0x20a   : > { %2692 = vmatprep.subr.mxu1 %v7224_v51  ;;  %9271 = vst [vmem:[#allocation81_spill] sm:$0xff] %v7242_v48  ;;  %v7248_v51 = vld [vmem:[%s8551_s1 + $0x338] sm:$0xff] }
 0x20b   : > { %2693 = vmatpush1.msra.mxu1 %v7230_v38  ;;  %9272 = vst [vmem:[#allocation82_spill] sm:$0xff] %v7248_v51  ;;  %v7254_v38 = vld [vmem:[%s8551_s1 + $0x330] sm:$0xff] }
 0x20c   : > { %2694 = vmatprep.subr.mxu1 %v7236_v41  ;;  %9273 = vst [vmem:[#allocation83_spill] sm:$0xff] %v7254_v38  ;;  %v7260_v41 = vld [vmem:[%s8551_s1 + $0x328] sm:$0xff] }
 0x20d   : > { %2695 = vmatpush1.msra.mxu1 %v7242_v48  ;;  %9274 = vst [vmem:[#allocation84_spill] sm:$0xff] %v7260_v41  ;;  %v7266_v48 = vld [vmem:[%s8551_s1 + $0x320] sm:$0xff] }
 0x20e   : > { %2696 = vmatprep.subr.mxu1 %v7248_v51  ;;  %9275 = vst [vmem:[#allocation85_spill] sm:$0xff] %v7266_v48  ;;  %v7272_v51 = vld [vmem:[%s8551_s1 + $0x318] sm:$0xff] }
 0x20f   : > { %2697 = vmatpush1.msra.mxu1 %v7254_v38  ;;  %9276 = vst [vmem:[#allocation86_spill] sm:$0xff] %v7272_v51  ;;  %v7278_v38 = vld [vmem:[%s8551_s1 + $0x310] sm:$0xff] }
 0x210   : > { %2698 = vmatprep.subr.mxu1 %v7260_v41  ;;  %9277 = vst [vmem:[#allocation87_spill] sm:$0xff] %v7278_v38  ;;  %v7282_v41 = vld [vmem:[%s5095_s13 + $0x40] sm:$0xff] }
 0x211   : > { %2699 = vmatpush1.msra.mxu1 %v7266_v48  ;;  %9278 = vst [vmem:[#allocation88_spill] sm:$0xff] %v7282_v41  ;;  %v7287_v48 = vld [vmem:[%s8551_s1 + $0x308] sm:$0xff]  ;;  %v1850_v59 = vpop.f32.mrf.mxu1 }
 0x212   : > { %2700 = vmatprep.subr.mxu1 %v7272_v51  ;;  %9279 = vst [vmem:[#allocation89_spill] sm:$0xff] %v7287_v48  ;;  %v7293_v51 = vld [vmem:[%s8551_s1 + $0x300] sm:$0xff]  ;;  %v1857_v54 = vadd.f32 %v1850_v59, %v1709_v6  ;;  %v7498_v6 = vld [vmem:[%s8551_s1 + $0x1f0] sm:$0xff] }
 0x213   : > { %2701 = vmatpush1.msra.mxu1 %v7278_v38  ;;  %9280 = vst [vmem:[#allocation90_spill] sm:$0xff] %v7293_v51  ;;  %v7299_v38 = vld [vmem:[%s8551_s1 + $0x4f8] sm:$0xff] }
 0x214   : > { %2702 = vmatprep.subr.mxu1 %v7287_v48  ;;  %9281 = vst [vmem:[#allocation91_spill] sm:$0xff] %v7299_v38  ;;  %v7306_v48 = vld [vmem:[%s8551_s1 + $0x4f0] sm:$0xff] }
 0x215   : > { %2703 = vmatpush1.msra.mxu1 %v7293_v51  ;;  %9282 = vst [vmem:[#allocation92_spill] sm:$0xff] %v7306_v48  ;;  %v7313_v51 = vld [vmem:[%s8551_s1 + $0x4e8] sm:$0xff] }
 0x216   : > { %2820 = vmatprep.subr.mxu1 %v7299_v38  ;;  %2737 = vmatmul.mubr.f32.vlgmr.msra.gmra.mxu1 %v7282_v41  ;;  %9283 = vst [vmem:[#allocation93_spill] sm:$0xff] %v7313_v51  ;;  %v7319_v38 = vld [vmem:[%s8551_s1 + $0x4e0] sm:$0xff]  ;;  %v1347_v41 = vpop.f32.mrf.mxu0 }
 0x217   : > { %2821 = vmatpush1.msra.mxu1 %v7306_v48  ;;  %2884 = vmatprep.mubr.f32.mxu1 %v8997_v8  ;;  %9284 = vst [vmem:[#allocation94_spill] sm:$0xff] %v7319_v38  ;;  %v7325_v48 = vld [vmem:[%s8551_s1 + $0x4d8] sm:$0xff] }
 0x218   : > { %2822 = vmatprep.subr.mxu1 %v7313_v51  ;;  %9285 = vst [vmem:[#allocation95_spill] sm:$0xff] %v7325_v48  ;;  %v7331_v51 = vld [vmem:[%s8551_s1 + $0x4d0] sm:$0xff] }
 0x219   : > { %2823 = vmatpush1.msra.mxu1 %v7319_v38  ;;  %9286 = vst [vmem:[#allocation96_spill] sm:$0xff] %v7331_v51  ;;  %v7337_v38 = vld [vmem:[%s8551_s1 + $0x4c8] sm:$0xff] }
 0x21a   : > { %2824 = vmatprep.subr.mxu1 %v7325_v48  ;;  %9287 = vst [vmem:[#allocation97_spill] sm:$0xff] %v7337_v38  ;;  %v7343_v48 = vld [vmem:[%s8551_s1 + $0x4c0] sm:$0xff] }
 0x21b   : > { %2825 = vmatpush1.msra.mxu1 %v7331_v51  ;;  %9288 = vst [vmem:[#allocation98_spill] sm:$0xff] %v7343_v48  ;;  %v1349_v51 = vpop.f32.mrf.mxu0 }
 0x21c   : > { %2826 = vmatprep.subr.mxu1 %v7337_v38  ;;  %v7355_v38 = vld [vmem:[%s8551_s1 + $0x4b0] sm:$0xff] }
 0x21d   : > { %2827 = vmatpush1.msra.mxu1 %v7343_v48  ;;  %9290 = vst [vmem:[#allocation100_spill] sm:$0xff] %v7355_v38  ;;  %v7361_v48 = vld [vmem:[%s8551_s1 + $0x4a8] sm:$0xff]  ;;  %v1489_v13 = vpop.f32.mrf.mxu0 }
 0x21e   : > { %2828 = vmatprep.subr.mxu1 %v7349_v20  ;;  %9291 = vst [vmem:[#allocation101_spill] sm:$0xff] %v7361_v48  ;;  %v7367_v20 = vld [vmem:[%s8551_s1 + $0x4a0] sm:$0xff]  ;;  %v1490_v58 = vadd.f32 %v1489_v13, %v1347_v41  ;;  %v1852_v41 = vpop.f32.mrf.mxu1 }
 0x21f   : > { %2829 = vmatpush1.msra.mxu1 %v7355_v38  ;;  %9292 = vst [vmem:[#allocation102_spill] sm:$0xff] %v7367_v20  ;;  %v7373_v38 = vld [vmem:[%s8551_s1 + $0x498] sm:$0xff]  ;;  %v1858_v63 = vadd.f32 %v1852_v41, %v1710_v17 }
 0x220   : > { %2830 = vmatprep.subr.mxu1 %v7361_v48  ;;  %9293 = vst [vmem:[#allocation103_spill] sm:$0xff] %v7373_v38  ;;  %v7379_v48 = vld [vmem:[%s8551_s1 + $0x490] sm:$0xff] }
 0x221   : > { %2831 = vmatpush1.msra.mxu1 %v7367_v20  ;;  %9294 = vst [vmem:[#allocation104_spill] sm:$0xff] %v7379_v48  ;;  %v1491_v20 = vpop.f32.mrf.mxu0 }
 0x222   : > { %2832 = vmatprep.subr.mxu1 %v7373_v38  ;;  %v7391_v38 = vld [vmem:[%s8551_s1 + $0x480] sm:$0xff]  ;;  %v1492_v55 = vadd.f32 %v1491_v20, %v1349_v51  ;;  %v7469_v20 = vld [vmem:[%s8551_s1 + $0x418] sm:$0xff]  ;;  %v7475_v51 = vld [vmem:[%s8551_s1 + $0x410] sm:$0xff] }
 0x223   : > { %2833 = vmatpush1.msra.mxu1 %v7379_v48  ;;  %9296 = vst [vmem:[#allocation106_spill] sm:$0xff] %v7391_v38  ;;  %v7397_v48 = vld [vmem:[%s8551_s1 + $0x478] sm:$0xff]  ;;  %v1631_v0 = vpop.f32.mrf.mxu0  ;;  %9306 = vst [vmem:[#allocation116_spill] sm:$0xff] %v7469_v20 }
 0x224   : > { %2834 = vmatprep.subr.mxu1 %v7385_v3  ;;  %9297 = vst [vmem:[#allocation107_spill] sm:$0xff] %v7397_v48  ;;  %v7403_v3 = vld [vmem:[%s8551_s1 + $0x470] sm:$0xff] }
 0x225   : > { %2835 = vmatpush1.msra.mxu1 %v7391_v38  ;;  %9298 = vst [vmem:[#allocation108_spill] sm:$0xff] %v7403_v3  ;;  %v7409_v38 = vld [vmem:[%s8551_s1 + $0x468] sm:$0xff] }
 0x226   : > { %2836 = vmatprep.subr.mxu1 %v7397_v48  ;;  %9299 = vst [vmem:[#allocation109_spill] sm:$0xff] %v7409_v38  ;;  %v7415_v48 = vld [vmem:[%s8551_s1 + $0x460] sm:$0xff] }
 0x227   : > { %2837 = vmatpush1.msra.mxu1 %v7403_v3  ;;  %9300 = vst [vmem:[#allocation110_spill] sm:$0xff] %v7415_v48  ;;  %v1633_v3 = vpop.f32.mrf.mxu0 }
 0x228   : > { %2838 = vmatprep.subr.mxu1 %v7409_v38  ;;  %v7427_v38 = vld [vmem:[%s8551_s1 + $0x450] sm:$0xff]  ;;  %v1708_v12 = vadd.f32 %v1633_v3, %v1492_v55 }
 0x229   : > { %2839 = vmatpush1.msra.mxu1 %v7415_v48  ;;  %9302 = vst [vmem:[#allocation112_spill] sm:$0xff] %v7427_v38  ;;  %v7433_v48 = vld [vmem:[%s8551_s1 + $0x448] sm:$0xff]  ;;  %v1777_v61 = vpop.f32.mrf.mxu0 }
 0x22a   : > { %2840 = vmatprep.subr.mxu1 %v7421_v11  ;;  %9303 = vst [vmem:[#allocation113_spill] sm:$0xff] %v7433_v48  ;;  %v7439_v11 = vld [vmem:[%s8551_s1 + $0x440] sm:$0xff] }
 0x22b   : > { %2841 = vmatpush1.msra.mxu1 %v7427_v38  ;;  %9304 = vst [vmem:[#allocation114_spill] sm:$0xff] %v7439_v11  ;;  %v7445_v38 = vld [vmem:[%s8551_s1 + $0x438] sm:$0xff]  ;;  %v1779_v13 = vpop.f32.mrf.mxu0 }
 0x22c   : > { %2842 = vmatprep.subr.mxu1 %v7433_v48  ;;  %9305 = vst [vmem:[#allocation115_spill] sm:$0xff] %v7445_v38  ;;  %v7451_v48 = vld [vmem:[%s8551_s1 + $0x430] sm:$0xff]  ;;  %v1856_v55 = vadd.f32 %v1779_v13, %v1708_v12 }
 0x22d   : > { %2843 = vmatpush1.msra.mxu1 %v7439_v11  ;;  %v7457_v11 = vld [vmem:[%s8551_s1 + $0x428] sm:$0xff] }
 0x22e   : > { %2844 = vmatprep.subr.mxu1 %v7445_v38  ;;  %v1707_v38 = vadd.f32 %v1631_v0, %v1490_v58 }
 0x22f   : > { %2845 = vmatpush1.msra.mxu1 %v7451_v48 }
 0x230   : > { %2846 = vmatprep.subr.mxu1 %v7457_v11  ;;  %v1855_v58 = vadd.f32 %v1777_v61, %v1707_v38 }
 0x231   : > { %2847 = vmatpush1.msra.mxu1 %v7463_v53 }
 0x232   : > { %2848 = vmatprep.subr.mxu1 %v7469_v20  ;;  %v7490_v20 = vld [vmem:[%s8551_s1 + $0x400] sm:$0xff] }
 0x233   : > { %v1925_v0 = vpop.f32.mrf.mxu0  ;;  %v1998_v35 = vpop.f32.mrf.mxu1  ;;  %2849 = vmatpush1.msra.mxu1 %v7475_v51 }
 0x234   : > { %2850 = vmatprep.subr.mxu1 %v7484_v44  ;;  %v2003_v61 = vadd.f32 %v1925_v0, %v1855_v58  ;;  %v2005_v59 = vadd.f32 %v1998_v35, %v1857_v54  ;;  %v7505_v58 = vld [vmem:[%s8551_s1 + $0x1e8] sm:$0xff] }
 0x235   : > { %v1927_v3 = vpop.f32.mrf.mxu0  ;;  %v2000_v38 = vpop.f32.mrf.mxu1  ;;  %2851 = vmatpush1.msra.mxu1 %v7490_v20 }
 0x236   : > { %v2004_v13 = vadd.f32 %v1927_v3, %v1856_v55  ;;  %v2006_v41 = vadd.f32 %v2000_v38, %v1858_v63  ;;  %2885 = vmatmul.mubr.f32.vlgmr.msra.gmra.mxu1 %v7479_v57  ;;  %2988 = vmatprep.subr.mxu1 %v6469_v62  ;;  %v7511_v62 = vld [vmem:[%s8551_s1 + $0x1e0] sm:$0xff]  ;;  %v9344_v63 = vld [vmem:[#allocation40_spill] sm:$0xff]  ;;  %v9346_v3 = vld [vmem:[#allocation42_spill] sm:$0xff] }
 0x237   : > { %2989 = vmatpush1.msra.mxu1 %v7498_v6  ;;  %3052 = vmatprep.mubr.f32.mxu1 %v8997_v8  ;;  %v9343_v55 = vld [vmem:[#allocation39_spill] sm:$0xff] }
 0x238   : > { %v2007_v12 = vmax.f32 %v2003_v61, %v2004_v13  ;;  %v2008_v17 = vmax.f32 %v2005_v59, %v2006_v41  ;;  %2990 = vmatprep.subr.mxu1 %v7505_v58  ;;  %v9345_v61 = vld [vmem:[#allocation41_spill] sm:$0xff]  ;;  %v9347_v38 = vld [vmem:[#allocation43_spill] sm:$0xff]  ;;  %v9348_v59 = vld [vmem:[#allocation44_spill] sm:$0xff] }
 0x239   : > { %2991 = vmatpush1.msra.mxu1 %v7511_v62  ;;  %v9349_v13 = vld [vmem:[#allocation45_spill] sm:$0xff]  ;;  %v9350_v41 = vld [vmem:[#allocation46_spill] sm:$0xff] }
 0x23a   : > { %v2009_v0 = vmax.f32 %v2007_v12, %v2008_v17  ;;  %2992 = vmatprep.subr.mxu1 %v6493_v14  ;;  %v9351_v12 = vld [vmem:[#allocation47_spill] sm:$0xff]  ;;  %v9352_v17 = vld [vmem:[#allocation48_spill] sm:$0xff] }
 0x23b   : > { %2993 = vmatpush1.msra.mxu1 %v6499_v45 }
 0x23c   : > { %v2010_v35 = vadd.f32 %v6458_v56, %v2009_v0  ;;  %2994 = vmatprep.subr.mxu1 %v6509_v1  ;;  %v9353_v0 = vld [vmem:[#allocation49_spill] sm:$0xff] }
 0x23d   : > { %2995 = vmatpush1.msra.mxu1 %v6515_v2 }
 0x23e   : > { %v2011_v54 = vmax.f32 %v2010_v35, 0.0  ;;  %2996 = vmatprep.subr.mxu1 %v6525_v4  ;;  %v9354_v35 = vld [vmem:[#allocation50_spill] sm:$0xff] }
 0x23f   : > { %2997 = vmatpush1.msra.mxu1 %v6531_v5 }
 0x240   : > { %4288 = vmatmul.mubr.f32.vlgmr.msra.gmra.mxu0 %v2011_v54  ;;  %2998 = vmatprep.subr.mxu1 %v6541_v7  ;;  %v9355_v54 = vld [vmem:[#allocation51_spill] sm:$0xff] }
 0x241   : > { %2170 = vmatpush1.msra.mxu0 %v7498_v6  ;;  %2233 = vmatprep.mubr.f32.mxu0 %v8997_v8 }
 0x242   : > { %2171 = vmatprep.subr.mxu0 %v7505_v58  ;;  %2999 = vmatpush1.msra.mxu1 %v6547_v10 }
 0x243   : > { %2172 = vmatpush1.msra.mxu0 %v7511_v62  ;;  %3000 = vmatprep.subr.mxu1 %v6557_v15 }
 0x244   : > { %2173 = vmatprep.subr.mxu0 %v6493_v14  ;;  %3001 = vmatpush1.msra.mxu1 %v6563_v16 }
 0x245   : > { %2174 = vmatpush1.msra.mxu0 %v6499_v45  ;;  %3002 = vmatprep.subr.mxu1 %v6573_v18  ;;  %v9308_v45 = vld [vmem:[#allocation4_spill] sm:$0xff] }
 0x246   : > { %2175 = vmatprep.subr.mxu0 %v6509_v1  ;;  %3003 = vmatpush1.msra.mxu1 %v6579_v19  ;;  %v9309_v1 = vld [vmem:[#allocation5_spill] sm:$0xff] }
 0x247   : > { %2176 = vmatpush1.msra.mxu0 %v6515_v2  ;;  %3004 = vmatprep.subr.mxu1 %v6589_v21  ;;  %v9310_v2 = vld [vmem:[#allocation6_spill] sm:$0xff] }
 0x248   : > { %2177 = vmatprep.subr.mxu0 %v6525_v4  ;;  %3005 = vmatpush1.msra.mxu1 %v6595_v22  ;;  %v9311_v4 = vld [vmem:[#allocation7_spill] sm:$0xff] }
 0x249   : > { %2178 = vmatpush1.msra.mxu0 %v6531_v5  ;;  %3006 = vmatprep.subr.mxu1 %v6602_v23  ;;  %v9312_v5 = vld [vmem:[#allocation8_spill] sm:$0xff] }
 0x24a   : > { %2179 = vmatprep.subr.mxu0 %v6541_v7  ;;  %3007 = vmatpush1.msra.mxu1 %v6608_v24  ;;  %v9313_v7 = vld [vmem:[#allocation9_spill] sm:$0xff] }
 0x24b   : > { %2180 = vmatpush1.msra.mxu0 %v6547_v10  ;;  %3008 = vmatprep.subr.mxu1 %v6615_v25  ;;  %v9314_v10 = vld [vmem:[#allocation10_spill] sm:$0xff] }
 0x24c   : > { %2181 = vmatprep.subr.mxu0 %v6557_v15  ;;  %3009 = vmatpush1.msra.mxu1 %v6621_v26  ;;  %v9315_v15 = vld [vmem:[#allocation11_spill] sm:$0xff] }
 0x24d   : > { %2182 = vmatpush1.msra.mxu0 %v6563_v16  ;;  %3010 = vmatprep.subr.mxu1 %v6627_v27  ;;  %v9316_v16 = vld [vmem:[#allocation12_spill] sm:$0xff] }
 0x24e   : > { %2183 = vmatprep.subr.mxu0 %v6573_v18  ;;  %3011 = vmatpush1.msra.mxu1 %v6633_v29  ;;  %v9317_v18 = vld [vmem:[#allocation13_spill] sm:$0xff] }
 0x24f   : > { %2184 = vmatpush1.msra.mxu0 %v6579_v19  ;;  %3012 = vmatprep.subr.mxu1 %v6639_v30  ;;  %v9318_v19 = vld [vmem:[#allocation14_spill] sm:$0xff] }
 0x250   : > { %2185 = vmatprep.subr.mxu0 %v6589_v21  ;;  %3013 = vmatpush1.msra.mxu1 %v6645_v31  ;;  %v9319_v21 = vld [vmem:[#allocation15_spill] sm:$0xff] }
 0x251   : > { %2186 = vmatpush1.msra.mxu0 %v6595_v22  ;;  %3014 = vmatprep.subr.mxu1 %v6651_v32  ;;  %v9320_v22 = vld [vmem:[#allocation16_spill] sm:$0xff] }
 0x252   : > { %2187 = vmatprep.subr.mxu0 %v6602_v23  ;;  %3015 = vmatpush1.msra.mxu1 %v6657_v33  ;;  %v9321_v23 = vld [vmem:[#allocation17_spill] sm:$0xff] }
 0x253   : > { %2188 = vmatpush1.msra.mxu0 %v6608_v24  ;;  %3016 = vmatprep.subr.mxu1 %v6663_v34  ;;  %v9322_v24 = vld [vmem:[#allocation18_spill] sm:$0xff] }
 0x254   : > { %2189 = vmatprep.subr.mxu0 %v6615_v25  ;;  %3017 = vmatpush1.msra.mxu1 %v6669_v9  ;;  %v9323_v25 = vld [vmem:[#allocation19_spill] sm:$0xff] }
 0x255   : > { %2190 = vmatpush1.msra.mxu0 %v6621_v26  ;;  %3018 = vmatprep.subr.mxu1 %v6678_v36  ;;  %v9324_v26 = vld [vmem:[#allocation20_spill] sm:$0xff] }
 0x256   : > { %2191 = vmatprep.subr.mxu0 %v6627_v27  ;;  %v7565_v56 = vpop.f32.mrf.mxu1  ;;  %3019 = vmatpush1.msra.mxu1 %v6684_v37  ;;  %v9325_v27 = vld [vmem:[#allocation21_spill] sm:$0xff] }
 0x257   : > { %2192 = vmatpush1.msra.mxu0 %v6633_v29  ;;  %3130 = vmatprep.subr.mxu1 %v6694_v39  ;;  %v9326_v29 = vld [vmem:[#allocation22_spill] sm:$0xff] }
 0x258   : > { %2193 = vmatprep.subr.mxu0 %v6639_v30  ;;  %v4324_v14 = vpop.f32.mrf.mxu1  ;;  %3053 = vmatmul.mubr.f32.vlgmr.msra.gmra.mxu1 %v6383_v60  ;;  %v9307_v60 = vld [vmem:[#allocation3_spill] sm:$0xff] }
 0x259   : > { %2194 = vmatpush1.msra.mxu0 %v6645_v31  ;;  %3131 = vmatpush1.msra.mxu1 %v6701_v40  ;;  %v9327_v30 = vld [vmem:[#allocation23_spill] sm:$0xff]  ;;  %v9328_v31 = vld [vmem:[#allocation24_spill] sm:$0xff] }
 0x25a   : > { %2195 = vmatprep.subr.mxu0 %v6651_v32  ;;  %3132 = vmatprep.subr.mxu1 %v6711_v42  ;;  %v9329_v32 = vld [vmem:[#allocation25_spill] sm:$0xff]  ;;  %v9356_v14 = vld [vmem:[#allocation52_spill] sm:$0xff] }
 0x25b   : > { %2196 = vmatpush1.msra.mxu0 %v6657_v33  ;;  %3133 = vmatpush1.msra.mxu1 %v6717_v28  ;;  %v9330_v33 = vld [vmem:[#allocation26_spill] sm:$0xff] }
 0x25c   : > { %2197 = vmatprep.subr.mxu0 %v6663_v34  ;;  %3134 = vmatprep.subr.mxu1 %v6727_v46  ;;  %v7644_v34 = vld [vmem:[%s5095_s13 + $0x30] sm:$0xff] }
 0x25d   : > { %2198 = vmatpush1.msra.mxu0 %v6669_v9  ;;  %3135 = vmatpush1.msra.mxu1 %v6733_v47  ;;  %v9331_v9 = vld [vmem:[#allocation27_spill] sm:$0xff] }
 0x25e   : > { %2199 = vmatprep.subr.mxu0 %v6678_v36  ;;  %3136 = vmatprep.subr.mxu1 %v6743_v49  ;;  %v9332_v36 = vld [vmem:[#allocation28_spill] sm:$0xff] }
 0x25f   : > { %2200 = vmatpush1.msra.mxu0 %v6684_v37  ;;  %3137 = vmatpush1.msra.mxu1 %v6749_v50  ;;  %v9333_v37 = vld [vmem:[#allocation29_spill] sm:$0xff] }
 0x260   : > { %2234 = vmatmul.mubr.f32.vlgmr.msra.gmra.mxu0 %v6909_v43  ;;  %2311 = vmatprep.subr.mxu0 %v6694_v39  ;;  %v4612_v39 = vld [vmem:[%s5095_s13 + $0x20] sm:$0xff]  ;;  %v9342_v43 = vld [vmem:[#allocation38_spill] sm:$0xff] }
 0x261   : > { %2312 = vmatpush1.msra.mxu0 %v6701_v40  ;;  %2375 = vmatprep.mubr.f32.mxu0 %v8997_v8  ;;  %v9334_v40 = vld [vmem:[#allocation30_spill] sm:$0xff] }
 0x262   : > { %2313 = vmatprep.subr.mxu0 %v6711_v42  ;;  %3138 = vmatprep.subr.mxu1 %v6759_v52  ;;  %v9335_v42 = vld [vmem:[#allocation31_spill] sm:$0xff] }
 0x263   : > { %2314 = vmatpush1.msra.mxu0 %v6717_v28  ;;  %3139 = vmatpush1.msra.mxu1 %v9307_v60  ;;  %v9336_v28 = vld [vmem:[#allocation32_spill] sm:$0xff] }
 0x264   : > { %2315 = vmatprep.subr.mxu0 %v6727_v46  ;;  %3140 = vmatprep.subr.mxu1 %v9308_v45  ;;  %v9337_v46 = vld [vmem:[#allocation33_spill] sm:$0xff] }
 0x265   : > { %2316 = vmatpush1.msra.mxu0 %v6733_v47  ;;  %3141 = vmatpush1.msra.mxu1 %v9309_v1  ;;  %v9338_v47 = vld [vmem:[#allocation34_spill] sm:$0xff] }
 0x266   : > { %2317 = vmatprep.subr.mxu0 %v6743_v49  ;;  %3142 = vmatprep.subr.mxu1 %v9310_v2  ;;  %v9339_v49 = vld [vmem:[#allocation35_spill] sm:$0xff] }
 0x267   : > { %2318 = vmatpush1.msra.mxu0 %v6749_v50  ;;  %3143 = vmatpush1.msra.mxu1 %v9311_v4  ;;  %v9340_v50 = vld [vmem:[#allocation36_spill] sm:$0xff] }
 0x268   : > { %2319 = vmatprep.subr.mxu0 %v6759_v52  ;;  %3144 = vmatprep.subr.mxu1 %v9312_v5  ;;  %v9341_v52 = vld [vmem:[#allocation37_spill] sm:$0xff] }
 0x269   : > { %2320 = vmatpush1.msra.mxu0 %v9307_v60  ;;  %3145 = vmatpush1.msra.mxu1 %v9313_v7  ;;  %v9357_v60 = vld [vmem:[#allocation53_spill] sm:$0xff] }
 0x26a   : > { %2321 = vmatprep.subr.mxu0 %v9308_v45  ;;  %3146 = vmatprep.subr.mxu1 %v9314_v10  ;;  %v9358_v45 = vld [vmem:[#allocation54_spill] sm:$0xff] }
 0x26b   : > { %2322 = vmatpush1.msra.mxu0 %v9309_v1  ;;  %3147 = vmatpush1.msra.mxu1 %v9315_v15  ;;  %v9359_v1 = vld [vmem:[#allocation55_spill] sm:$0xff] }
 0x26c   : > { %2323 = vmatprep.subr.mxu0 %v9310_v2  ;;  %3148 = vmatprep.subr.mxu1 %v9316_v16  ;;  %v9360_v2 = vld [vmem:[#allocation56_spill] sm:$0xff] }
 0x26d   : > { %2324 = vmatpush1.msra.mxu0 %v9311_v4  ;;  %3149 = vmatpush1.msra.mxu1 %v9317_v18  ;;  %v9361_v4 = vld [vmem:[#allocation57_spill] sm:$0xff] }
 0x26e   : > { %2325 = vmatprep.subr.mxu0 %v9312_v5  ;;  %3150 = vmatprep.subr.mxu1 %v9318_v19  ;;  %v9362_v5 = vld [vmem:[#allocation58_spill] sm:$0xff] }
 0x26f   : > { %2326 = vmatpush1.msra.mxu0 %v9313_v7  ;;  %3151 = vmatpush1.msra.mxu1 %v9319_v21  ;;  %v9363_v7 = vld [vmem:[#allocation59_spill] sm:$0xff] }
 0x270   : > { %2327 = vmatprep.subr.mxu0 %v9314_v10  ;;  %3152 = vmatprep.subr.mxu1 %v9320_v22  ;;  %v9364_v10 = vld [vmem:[#allocation60_spill] sm:$0xff] }
 0x271   : > { %2328 = vmatpush1.msra.mxu0 %v9315_v15  ;;  %3153 = vmatpush1.msra.mxu1 %v9321_v23  ;;  %v9365_v15 = vld [vmem:[#allocation88_spill] sm:$0xff] }
 0x272   : > { %2329 = vmatprep.subr.mxu0 %v9316_v16  ;;  %3154 = vmatprep.subr.mxu1 %v9322_v24  ;;  %v9366_v16 = vld [vmem:[#allocation61_spill] sm:$0xff] }
 0x273   : > { %2330 = vmatpush1.msra.mxu0 %v9317_v18  ;;  %3155 = vmatpush1.msra.mxu1 %v9323_v25  ;;  %v9367_v18 = vld [vmem:[#allocation62_spill] sm:$0xff] }
 0x274   : > { %2331 = vmatprep.subr.mxu0 %v9318_v19  ;;  %3156 = vmatprep.subr.mxu1 %v9324_v26  ;;  %v9368_v19 = vld [vmem:[#allocation63_spill] sm:$0xff] }
 0x275   : > { %2332 = vmatpush1.msra.mxu0 %v9319_v21  ;;  %3157 = vmatpush1.msra.mxu1 %v9325_v27  ;;  %v9369_v21 = vld [vmem:[#allocation64_spill] sm:$0xff] }
 0x276   : > { %2333 = vmatprep.subr.mxu0 %v9320_v22  ;;  %3158 = vmatprep.subr.mxu1 %v9326_v29  ;;  %v9370_v22 = vld [vmem:[#allocation65_spill] sm:$0xff] }
 0x277   : > { %2334 = vmatpush1.msra.mxu0 %v9321_v23  ;;  %3159 = vmatpush1.msra.mxu1 %v9327_v30  ;;  %v9371_v23 = vld [vmem:[#allocation66_spill] sm:$0xff] }
 0x278   : > { %2335 = vmatprep.subr.mxu0 %v9322_v24  ;;  %3160 = vmatprep.subr.mxu1 %v9328_v31  ;;  %v9372_v24 = vld [vmem:[#allocation67_spill] sm:$0xff] }
 0x279   : > { %2336 = vmatpush1.msra.mxu0 %v9323_v25  ;;  %3161 = vmatpush1.msra.mxu1 %v9329_v32  ;;  %v9373_v25 = vld [vmem:[#allocation68_spill] sm:$0xff] }
 0x27a   : > { %2337 = vmatprep.subr.mxu0 %v9324_v26  ;;  %3194 = vmatprep.mubr.f32.mxu1 %v8997_v8  ;;  %v9374_v26 = vld [vmem:[#allocation69_spill] sm:$0xff] }
 0x27b   : > { %2338 = vmatpush1.msra.mxu0 %v9325_v27  ;;  %3272 = vmatprep.subr.mxu1 %v9330_v33  ;;  %v9375_v27 = vld [vmem:[#allocation70_spill] sm:$0xff] }
 0x27c   : > { %2339 = vmatprep.subr.mxu0 %v9326_v29  ;;  %3195 = vmatmul.mubr.f32.vlgmr.msra.gmra.mxu1 %v7644_v34  ;;  %v9376_v29 = vld [vmem:[#allocation71_spill] sm:$0xff] }
 0x27d   : > { %2340 = vmatpush1.msra.mxu0 %v9327_v30  ;;  %3273 = vmatpush1.msra.mxu1 %v9331_v9  ;;  %v9377_v30 = vld [vmem:[#allocation72_spill] sm:$0xff] }
 0x27e   : > { %2341 = vmatprep.subr.mxu0 %v9328_v31  ;;  %3274 = vmatprep.subr.mxu1 %v9332_v36  ;;  %v9378_v31 = vld [vmem:[#allocation73_spill] sm:$0xff] }
 0x27f   : > { %2342 = vmatpush1.msra.mxu0 %v9329_v32  ;;  %3275 = vmatpush1.msra.mxu1 %v9333_v37  ;;  %v9379_v32 = vld [vmem:[#allocation74_spill] sm:$0xff] }
 0x280   : > { %2376 = vmatmul.mubr.f32.vlgmr.msra.gmra.mxu0 %v4612_v39  ;;  %2453 = vmatprep.subr.mxu0 %v9330_v33  ;;  %v9380_v33 = vld [vmem:[#allocation75_spill] sm:$0xff]  ;;  %v9385_v39 = vld [vmem:[#allocation80_spill] sm:$0xff] }
 0x281   : > { %2454 = vmatpush1.msra.mxu0 %v9331_v9  ;;  %2517 = vmatprep.mubr.f32.mxu0 %v8997_v8  ;;  %v9382_v9 = vld [vmem:[#allocation77_spill] sm:$0xff] }
 0x282   : > { %2455 = vmatprep.subr.mxu0 %v9332_v36  ;;  %3276 = vmatprep.subr.mxu1 %v9334_v40  ;;  %v9383_v36 = vld [vmem:[#allocation78_spill] sm:$0xff] }
 0x283   : > { %2456 = vmatpush1.msra.mxu0 %v9333_v37  ;;  %3277 = vmatpush1.msra.mxu1 %v9335_v42  ;;  %v9384_v37 = vld [vmem:[#allocation79_spill] sm:$0xff] }
 0x284   : > { %2457 = vmatprep.subr.mxu0 %v9334_v40  ;;  %3278 = vmatprep.subr.mxu1 %v9336_v28  ;;  %v9386_v40 = vld [vmem:[#allocation81_spill] sm:$0xff] }
 0x285   : > { %2458 = vmatpush1.msra.mxu0 %v9335_v42  ;;  %3279 = vmatpush1.msra.mxu1 %v9337_v46  ;;  %v9387_v42 = vld [vmem:[#allocation82_spill] sm:$0xff] }
 0x286   : > { %2459 = vmatprep.subr.mxu0 %v9336_v28  ;;  %3280 = vmatprep.subr.mxu1 %v9338_v47  ;;  %v9388_v28 = vld [vmem:[#allocation83_spill] sm:$0xff] }
 0x287   : > { %2460 = vmatpush1.msra.mxu0 %v9337_v46  ;;  %3281 = vmatpush1.msra.mxu1 %v9339_v49  ;;  %v9389_v46 = vld [vmem:[#allocation84_spill] sm:$0xff] }
 0x288   : > { %2461 = vmatprep.subr.mxu0 %v9338_v47  ;;  %3282 = vmatprep.subr.mxu1 %v9340_v50  ;;  %v9390_v47 = vld [vmem:[#allocation85_spill] sm:$0xff] }
 0x289   : > { %2462 = vmatpush1.msra.mxu0 %v9339_v49  ;;  %3283 = vmatpush1.msra.mxu1 %v9341_v52  ;;  %v9391_v49 = vld [vmem:[#allocation86_spill] sm:$0xff] }
 0x28a   : > { %2463 = vmatprep.subr.mxu0 %v9340_v50  ;;  %3284 = vmatprep.subr.mxu1 %v9342_v43  ;;  %v9392_v50 = vld [vmem:[#allocation87_spill] sm:$0xff] }
 0x28b   : > { %2464 = vmatpush1.msra.mxu0 %v9341_v52  ;;  %3285 = vmatpush1.msra.mxu1 %v9343_v55  ;;  %v9393_v52 = vld [vmem:[#allocation89_spill] sm:$0xff] }
 0x28c   : > { %2465 = vmatprep.subr.mxu0 %v9342_v43  ;;  %3286 = vmatprep.subr.mxu1 %v9344_v63  ;;  %v9394_v43 = vld [vmem:[#allocation90_spill] sm:$0xff] }
 0x28d   : > { %2466 = vmatpush1.msra.mxu0 %v9343_v55  ;;  %3287 = vmatpush1.msra.mxu1 %v9345_v61  ;;  %v7782_v55 = vld [vmem:[%s5095_s13 + $0x38] sm:$0xff] }
 0x28e   : > { %2467 = vmatprep.subr.mxu0 %v9344_v63  ;;  %3288 = vmatprep.subr.mxu1 %v9346_v3  ;;  %v9395_v63 = vld [vmem:[#allocation91_spill] sm:$0xff] }
 0x28f   : > { %2468 = vmatpush1.msra.mxu0 %v9345_v61  ;;  %3289 = vmatpush1.msra.mxu1 %v9347_v38  ;;  %v9396_v61 = vld [vmem:[#allocation92_spill] sm:$0xff] }
 0x290   : > { %2469 = vmatprep.subr.mxu0 %v9346_v3  ;;  %3290 = vmatprep.subr.mxu1 %v9348_v59  ;;  %v9397_v3 = vld [vmem:[#allocation93_spill] sm:$0xff] }
 0x291   : > { %2470 = vmatpush1.msra.mxu0 %v9347_v38  ;;  %3291 = vmatpush1.msra.mxu1 %v9349_v13  ;;  %v9398_v38 = vld [vmem:[#allocation94_spill] sm:$0xff] }
 0x292   : > { %2471 = vmatprep.subr.mxu0 %v9348_v59  ;;  %3292 = vmatprep.subr.mxu1 %v9350_v41  ;;  %v9399_v59 = vld [vmem:[#allocation95_spill] sm:$0xff] }
 0x293   : > { %2472 = vmatpush1.msra.mxu0 %v9349_v13  ;;  %3293 = vmatpush1.msra.mxu1 %v9351_v12  ;;  %v9400_v13 = vld [vmem:[#allocation96_spill] sm:$0xff] }
 0x294   : > { %2473 = vmatprep.subr.mxu0 %v9350_v41  ;;  %3294 = vmatprep.subr.mxu1 %v9352_v17  ;;  %v9401_v41 = vld [vmem:[#allocation97_spill] sm:$0xff] }
 0x295   : > { %2474 = vmatpush1.msra.mxu0 %v9351_v12  ;;  %3295 = vmatpush1.msra.mxu1 %v9353_v0  ;;  %v9402_v12 = vld [vmem:[#allocation98_spill] sm:$0xff] }
 0x296   : > { %2475 = vmatprep.subr.mxu0 %v9352_v17  ;;  %3296 = vmatprep.subr.mxu1 %v9354_v35  ;;  %v9403_v17 = vld [vmem:[#allocation99_spill] sm:$0xff] }
 0x297   : > { %2476 = vmatpush1.msra.mxu0 %v9353_v0  ;;  %3297 = vmatpush1.msra.mxu1 %v9355_v54  ;;  %v9404_v0 = vld [vmem:[#allocation100_spill] sm:$0xff] }
 0x298   : > { %2477 = vmatprep.subr.mxu0 %v9354_v35  ;;  %3298 = vmatprep.subr.mxu1 %v9356_v14  ;;  %v9405_v35 = vld [vmem:[#allocation101_spill] sm:$0xff] }
 0x299   : > { %2478 = vmatpush1.msra.mxu0 %v9355_v54  ;;  %3299 = vmatpush1.msra.mxu1 %v9357_v60  ;;  %v9406_v54 = vld [vmem:[#allocation102_spill] sm:$0xff] }
 0x29a   : > { %2479 = vmatprep.subr.mxu0 %v9356_v14  ;;  %3300 = vmatprep.subr.mxu1 %v9358_v45  ;;  %v9408_v14 = vld [vmem:[#allocation104_spill] sm:$0xff] }
 0x29b   : > { %2480 = vmatpush1.msra.mxu0 %v9357_v60  ;;  %3301 = vmatpush1.msra.mxu1 %v9359_v1  ;;  %v9409_v60 = vld [vmem:[#allocation105_spill] sm:$0xff] }
 0x29c   : > { %2481 = vmatprep.subr.mxu0 %v9358_v45  ;;  %3302 = vmatprep.subr.mxu1 %v9360_v2  ;;  %v9410_v45 = vld [vmem:[#allocation106_spill] sm:$0xff] }
 0x29d   : > { %2482 = vmatpush1.msra.mxu0 %v9359_v1  ;;  %3303 = vmatpush1.msra.mxu1 %v9361_v4  ;;  %v9411_v1 = vld [vmem:[#allocation107_spill] sm:$0xff] }
 0x29e   : > { %2483 = vmatprep.subr.mxu0 %v9360_v2  ;;  %3336 = vmatprep.mubr.f32.mxu1 %v8997_v8  ;;  %v9412_v2 = vld [vmem:[#allocation108_spill] sm:$0xff] }
 0x29f   : > { %2484 = vmatpush1.msra.mxu0 %v9361_v4  ;;  %3418 = vmatprep.subr.mxu1 %v9362_v5  ;;  %v9413_v4 = vld [vmem:[#allocation109_spill] sm:$0xff] }
 0x2a0   : > { %2518 = vmatmul.mubr.f32.vlgmr.msra.gmra.mxu0 %v7644_v34  ;;  %2599 = vmatprep.subr.mxu0 %v9362_v5  ;;  %v9381_v34 = vld [vmem:[#allocation76_spill] sm:$0xff]  ;;  %v9414_v5 = vld [vmem:[#allocation110_spill] sm:$0xff] }
 0x2a1   : > { %2600 = vmatpush1.msra.mxu0 %v9363_v7  ;;  %2663 = vmatprep.mubr.f32.mxu0 %v8997_v8 }
 0x2a2   : > { %2601 = vmatprep.subr.mxu0 %v9364_v10  ;;  %3337 = vmatmul.mubr.f32.vlgmr.msra.gmra.mxu1 %v9365_v15 }
 0x2a3   : > { %2602 = vmatpush1.msra.mxu0 %v9366_v16  ;;  %3419 = vmatpush1.msra.mxu1 %v9363_v7  ;;  %v9415_v7 = vld [vmem:[#allocation111_spill] sm:$0xff] }
 0x2a4   : > { %2603 = vmatprep.subr.mxu0 %v9367_v18  ;;  %3420 = vmatprep.subr.mxu1 %v9364_v10  ;;  %v9416_v10 = vld [vmem:[#allocation112_spill] sm:$0xff] }
 0x2a5   : > { %2604 = vmatpush1.msra.mxu0 %v9368_v19  ;;  %3421 = vmatpush1.msra.mxu1 %v9366_v16  ;;  %v9417_v16 = vld [vmem:[#allocation113_spill] sm:$0xff] }
 0x2a6   : > { %2605 = vmatprep.subr.mxu0 %v9369_v21  ;;  %3422 = vmatprep.subr.mxu1 %v9367_v18  ;;  %v9418_v18 = vld [vmem:[#allocation114_spill] sm:$0xff] }
 0x2a7   : > { %2606 = vmatpush1.msra.mxu0 %v9370_v22  ;;  %3423 = vmatpush1.msra.mxu1 %v9368_v19  ;;  %v9419_v19 = vld [vmem:[#allocation115_spill] sm:$0xff] }
 0x2a8   : > { %2607 = vmatprep.subr.mxu0 %v9371_v23  ;;  %3424 = vmatprep.subr.mxu1 %v9369_v21  ;;  %v9420_v21 = vld [vmem:[#allocation116_spill] sm:$0xff] }
 0x2a9   : > { %2608 = vmatpush1.msra.mxu0 %v9372_v24  ;;  %3425 = vmatpush1.msra.mxu1 %v9370_v22  ;;  %v4149_v22 = vld [vmem:[%s8553_s3 + $0x150] sm:$0xff] }
 0x2aa   : > { %2609 = vmatprep.subr.mxu0 %v9373_v25  ;;  %3426 = vmatprep.subr.mxu1 %v9371_v23  ;;  %v4148_v23 = vld [vmem:[%s8553_s3 + $0x148] sm:$0xff] }
 0x2ab   : > { %2610 = vmatpush1.msra.mxu0 %v9374_v26  ;;  %3427 = vmatpush1.msra.mxu1 %v9372_v24  ;;  %v4147_v24 = vld [vmem:[%s8553_s3 + $0x140] sm:$0xff] }
 0x2ac   : > { %2611 = vmatprep.subr.mxu0 %v9375_v27  ;;  %3428 = vmatprep.subr.mxu1 %v9373_v25  ;;  %v4146_v25 = vld [vmem:[%s8553_s3 + $0x138] sm:$0xff] }
 0x2ad   : > { %2612 = vmatpush1.msra.mxu0 %v9376_v29  ;;  %3429 = vmatpush1.msra.mxu1 %v9374_v26  ;;  %v4145_v26 = vld [vmem:[%s8553_s3 + $0x130] sm:$0xff] }
 0x2ae   : > { %2613 = vmatprep.subr.mxu0 %v9377_v30  ;;  %3430 = vmatprep.subr.mxu1 %v9375_v27  ;;  %v4144_v27 = vld [vmem:[%s8553_s3 + $0x128] sm:$0xff] }
 0x2af   : > { %2614 = vmatpush1.msra.mxu0 %v9378_v31  ;;  %3431 = vmatpush1.msra.mxu1 %v9376_v29  ;;  %v4143_v29 = vld [vmem:[%s8553_s3 + $0x120] sm:$0xff] }
 0x2b0   : > { %2615 = vmatprep.subr.mxu0 %v9379_v32  ;;  %3432 = vmatprep.subr.mxu1 %v9377_v30  ;;  %v4142_v30 = vld [vmem:[%s8553_s3 + $0x118] sm:$0xff] }
 0x2b1   : > { %2616 = vmatpush1.msra.mxu0 %v9380_v33  ;;  %3433 = vmatpush1.msra.mxu1 %v9378_v31  ;;  %v4141_v31 = vld [vmem:[%s8553_s3 + $0x110] sm:$0xff] }
 0x2b2   : > { %2617 = vmatprep.subr.mxu0 %v9381_v34  ;;  %3434 = vmatprep.subr.mxu1 %v9379_v32  ;;  %v4140_v32 = vld [vmem:[%s8553_s3 + $0x108] sm:$0xff] }
 0x2b3   : > { %2618 = vmatpush1.msra.mxu0 %v9382_v9  ;;  %3435 = vmatpush1.msra.mxu1 %v9380_v33  ;;  %v4139_v33 = vld [vmem:[%s8553_s3 + $0x100] sm:$0xff] }
 0x2b4   : > { %2619 = vmatprep.subr.mxu0 %v9383_v36  ;;  %3436 = vmatprep.subr.mxu1 %v9381_v34  ;;  %v4614_v34 = vld [vmem:[%s8551_s1 + $0x1f8] sm:$0xff] }
 0x2b5   : > { %2620 = vmatpush1.msra.mxu0 %v9384_v37  ;;  %3437 = vmatpush1.msra.mxu1 %v9382_v9  ;;  %v7929_v9 = vld [vmem:[%s5095_s13 + $0x50] sm:$0xff] }
 0x2b6   : > { %2621 = vmatprep.subr.mxu0 %v9385_v39  ;;  %3438 = vmatprep.subr.mxu1 %v9383_v36  ;;  %v2306_v36 = vpop.f32.mrf.mxu1 }
 0x2b7   : > { %2622 = vmatpush1.msra.mxu0 %v9386_v40  ;;  %3439 = vmatpush1.msra.mxu1 %v9384_v37 }
 0x2b8   : > { %2623 = vmatprep.subr.mxu0 %v9387_v42  ;;  %3440 = vmatprep.subr.mxu1 %v9385_v39  ;;  %v2308_v37 = vpop.f32.mrf.mxu1 }
 0x2b9   : > { %2624 = vmatpush1.msra.mxu0 %v9388_v28  ;;  %3441 = vmatpush1.msra.mxu1 %v9386_v40 }
 0x2ba   : > { %2625 = vmatprep.subr.mxu0 %v9389_v46  ;;  %3442 = vmatprep.subr.mxu1 %v9387_v42  ;;  %v2448_v39 = vpop.f32.mrf.mxu1 }
 0x2bb   : > { %2626 = vmatpush1.msra.mxu0 %v9390_v47  ;;  %3443 = vmatpush1.msra.mxu1 %v9388_v28 }
 0x2bc   : > { %2627 = vmatprep.subr.mxu0 %v9391_v49  ;;  %3444 = vmatprep.subr.mxu1 %v9389_v46  ;;  %v2450_v40 = vpop.f32.mrf.mxu1 }
 0x2bd   : > { %2628 = vmatpush1.msra.mxu0 %v9392_v50  ;;  %3445 = vmatpush1.msra.mxu1 %v9390_v47 }
 0x2be   : > { %2629 = vmatprep.subr.mxu0 %v9393_v52  ;;  %3446 = vmatprep.subr.mxu1 %v9391_v49  ;;  %v2590_v28 = vpop.f32.mrf.mxu1 }
 0x2bf   : > { %2630 = vmatpush1.msra.mxu0 %v9394_v43  ;;  %3447 = vmatpush1.msra.mxu1 %v9392_v50 }
 0x2c0   : > { %2664 = vmatmul.mubr.f32.vlgmr.msra.gmra.mxu0 %v7782_v55  ;;  %2747 = vmatprep.subr.mxu0 %v9395_v63  ;;  %v2592_v47 = vpop.f32.mrf.mxu1 }
 0x2c1   : > { %2748 = vmatpush1.msra.mxu0 %v9396_v61  ;;  %2811 = vmatprep.mubr.f32.mxu0 %v8997_v8 }
 0x2c2   : > { %2749 = vmatprep.subr.mxu0 %v9397_v3  ;;  %3448 = vmatprep.subr.mxu1 %v9393_v52 }
 0x2c3   : > { %2750 = vmatpush1.msra.mxu0 %v9398_v38  ;;  %3449 = vmatpush1.msra.mxu1 %v9394_v43 }
 0x2c4   : > { %2751 = vmatprep.subr.mxu0 %v9399_v59  ;;  %3482 = vmatprep.mubr.f32.mxu1 %v8997_v8 }
 0x2c5   : > { %2752 = vmatpush1.msra.mxu0 %v9400_v13  ;;  %3566 = vmatprep.subr.mxu1 %v9395_v63  ;;  %v2449_v63 = vadd.f32 %v2448_v39, %v2306_v36  ;;  %v4633_v36 = vld [vmem:[%s8551_s1 + $0x150] sm:$0xff]  ;;  %v4635_v39 = vld [vmem:[%s8551_s1 + $0x140] sm:$0xff] }
 0x2c6   : > { %2753 = vmatprep.subr.mxu0 %v9401_v41  ;;  %3483 = vmatmul.mubr.f32.vlgmr.msra.gmra.mxu1 %v7479_v57  ;;  %v9407_v57 = vld [vmem:[#allocation103_spill] sm:$0xff] }
 0x2c7   : > { %2754 = vmatpush1.msra.mxu0 %v9402_v12  ;;  %3567 = vmatpush1.msra.mxu1 %v9396_v61  ;;  %v2451_v61 = vadd.f32 %v2450_v40, %v2308_v37  ;;  %v4634_v37 = vld [vmem:[%s8551_s1 + $0x148] sm:$0xff]  ;;  %v4636_v40 = vld [vmem:[%s8551_s1 + $0x138] sm:$0xff] }
 0x2c8   : > { %2755 = vmatprep.subr.mxu0 %v9403_v17  ;;  %3568 = vmatprep.subr.mxu1 %v9397_v3 }
 0x2c9   : > { %2756 = vmatpush1.msra.mxu0 %v9404_v0  ;;  %3569 = vmatpush1.msra.mxu1 %v9398_v38 }
 0x2ca   : > { %2757 = vmatprep.subr.mxu0 %v9405_v35  ;;  %3570 = vmatprep.subr.mxu1 %v9399_v59  ;;  %v2597_v59 = vadd.f32 %v2590_v28, %v2449_v63  ;;  %v4638_v28 = vld [vmem:[%s8551_s1 + $0x128] sm:$0xff]  ;;  %v4645_v63 = vld [vmem:[%s8551_s1 + $0xf8] sm:$0xff] }
 0x2cb   : > { %2758 = vmatpush1.msra.mxu0 %v9406_v54  ;;  %3571 = vmatpush1.msra.mxu1 %v9400_v13  ;;  %v2598_v13 = vadd.f32 %v2592_v47, %v2451_v61  ;;  %v4640_v47 = vld [vmem:[%s8551_s1 + $0x118] sm:$0xff]  ;;  %v4646_v61 = vld [vmem:[%s8551_s1 + $0xf0] sm:$0xff] }
 0x2cc   : > { %2759 = vmatprep.subr.mxu0 %v9407_v57  ;;  %3572 = vmatprep.subr.mxu1 %v9401_v41 }
 0x2cd   : > { %2760 = vmatpush1.msra.mxu0 %v9408_v14  ;;  %3573 = vmatpush1.msra.mxu1 %v9402_v12 }
 0x2ce   : > { %2761 = vmatprep.subr.mxu0 %v9409_v60  ;;  %3574 = vmatprep.subr.mxu1 %v9403_v17 }
 0x2cf   : > { %2762 = vmatpush1.msra.mxu0 %v9410_v45  ;;  %3575 = vmatpush1.msra.mxu1 %v9404_v0 }
 0x2d0   : > { %2763 = vmatprep.subr.mxu0 %v9411_v1  ;;  %3576 = vmatprep.subr.mxu1 %v9405_v35 }
 0x2d1   : > { %2764 = vmatpush1.msra.mxu0 %v9412_v2  ;;  %3577 = vmatpush1.msra.mxu1 %v9406_v54 }
 0x2d2   : > { %2765 = vmatprep.subr.mxu0 %v9413_v4  ;;  %3578 = vmatprep.subr.mxu1 %v9407_v57 }
 0x2d3   : > { %2766 = vmatpush1.msra.mxu0 %v9414_v5  ;;  %3579 = vmatpush1.msra.mxu1 %v9408_v14 }
 0x2d4   : > { %2767 = vmatprep.subr.mxu0 %v9415_v7  ;;  %3580 = vmatprep.subr.mxu1 %v9409_v60 }
 0x2d5   : > { %2768 = vmatpush1.msra.mxu0 %v9416_v10  ;;  %3581 = vmatpush1.msra.mxu1 %v9410_v45 }
 0x2d6   : > { %2769 = vmatprep.subr.mxu0 %v9417_v16  ;;  %3582 = vmatprep.subr.mxu1 %v9411_v1  ;;  %v2738_v50 = vpop.f32.mrf.mxu1 }
 0x2d7   : > { %2770 = vmatpush1.msra.mxu0 %v9418_v18  ;;  %3583 = vmatpush1.msra.mxu1 %v9412_v2  ;;  %v2745_v17 = vadd.f32 %v2738_v50, %v2597_v59  ;;  %v4642_v50 = vld [vmem:[%s8551_s1 + $0x108] sm:$0xff]  ;;  %v4649_v59 = vld [vmem:[%s8551_s1 + $0xd8] sm:$0xff] }
 0x2d8   : > { %2771 = vmatprep.subr.mxu0 %v9419_v19  ;;  %3584 = vmatprep.subr.mxu1 %v9413_v4  ;;  %v2740_v3 = vpop.f32.mrf.mxu1 }
 0x2d9   : > { %2772 = vmatpush1.msra.mxu0 %v7451_v48  ;;  %3585 = vmatpush1.msra.mxu1 %v9414_v5  ;;  %v2746_v0 = vadd.f32 %v2740_v3, %v2598_v13  ;;  %v4647_v3 = vld [vmem:[%s8551_s1 + $0xe8] sm:$0xff]  ;;  %v4650_v13 = vld [vmem:[%s8551_s1 + $0xd0] sm:$0xff] }
 0x2da   : > { %2773 = vmatprep.subr.mxu0 %v7457_v11  ;;  %3586 = vmatprep.subr.mxu1 %v9415_v7 }
 0x2db   : > { %2774 = vmatpush1.msra.mxu0 %v7463_v53  ;;  %3587 = vmatpush1.msra.mxu1 %v9416_v10 }
 0x2dc   : > { %2775 = vmatprep.subr.mxu0 %v9420_v21  ;;  %3588 = vmatprep.subr.mxu1 %v9417_v16 }
 0x2dd   : > { %2776 = vmatpush1.msra.mxu0 %v7475_v51  ;;  %3589 = vmatpush1.msra.mxu1 %v9418_v18 }
 0x2de   : > { %2777 = vmatprep.subr.mxu0 %v7484_v44  ;;  %3590 = vmatprep.subr.mxu1 %v9419_v19 }
 0x2df   : > { %2778 = vmatpush1.msra.mxu0 %v7490_v20  ;;  %3591 = vmatpush1.msra.mxu1 %v7451_v48 }
 0x2e0   : > { %2812 = vmatmul.mubr.f32.vlgmr.msra.gmra.mxu0 %v9365_v15  ;;  %4325 = vmatprep.subr.mxu0 %v8997_v8 }
 0x2e1   : > { %4357 = vmatprep.mubr.msk.f32.mxu0 %vm4799_vm0, %v8997_v8  ;;  %3592 = vmatprep.subr.mxu1 %v7457_v11  ;;  %v4154_v11 = vld [vmem:[%s8553_s3 + $0x178] sm:$0xff] }
 0x2e2   : > { %3593 = vmatpush1.msra.mxu1 %v7463_v53  ;;  %3630 = vmatprep.mubr.f32.mxu1 %v8997_v8  ;;  %v4153_v53 = vld [vmem:[%s8553_s3 + $0x170] sm:$0xff] }
 0x2e3   : > { %3594 = vmatprep.subr.mxu1 %v9420_v21  ;;  %4326 = vmatpush3.msra.mxu0 %v4154_v11  ;;  %v7937_v11 = vld [vmem:[%s8552_s2] ss:$0 sm:$0xff] }
 0x2e4   : > { %3595 = vmatpush1.msra.mxu1 %v7475_v51  ;;  %4327 = vmatprep.subr.mxu0 %v8997_v8  ;;  %v4151_v51 = vld [vmem:[%s8553_s3 + $0x160] sm:$0xff] }
 0x2e5   : > { %3596 = vmatprep.subr.mxu1 %v7484_v44  ;;  %4328 = vmatpush3.msra.mxu0 %v4153_v53  ;;  %v4150_v44 = vld [vmem:[%s8553_s3 + $0x158] sm:$0xff] }
 0x2e6   : > { %3597 = vmatpush1.msra.mxu1 %v7490_v20  ;;  %v4152_v20 = vld [vmem:[%s8553_s3 + $0x168] sm:$0xff]  ;;  %4329 = vmatprep.subr.mxu0 %v8997_v8 }
 0x2e7   : > { %4360 = vmatprep.subr.mxu1 %v8997_v8  ;;  %4330 = vmatpush3.msra.mxu0 %v4152_v20 }
 0x2e8   : > { %4331 = vmatprep.subr.mxu0 %v8997_v8  ;;  %3631 = vmatmul.mubr.f32.vlgmr.msra.gmra.mxu1 %v7929_v9 }
 0x2e9   : > { %4332 = vmatpush3.msra.mxu0 %v4151_v51  ;;  %4392 = vmatprep.mubr.msk.f32.mxu1 %vm4799_vm0, %v8997_v8  ;;  %v4616_v51 = vld [vmem:[%s8551_s1 + $0x1d8] sm:$0xff] }
 0x2ea   : > { %4333 = vmatprep.subr.mxu0 %v8997_v8 }
 0x2eb   : > { %4334 = vmatpush3.msra.mxu0 %v4150_v44  ;;  %v4617_v44 = vld [vmem:[%s8551_s1 + $0x1d0] sm:$0xff] }
 0x2ec   : > { %4335 = vmatprep.subr.mxu0 %v8997_v8 }
 0x2ed   : > { %4336 = vmatpush3.msra.mxu0 %v4149_v22  ;;  %v4621_v22 = vld [vmem:[%s8551_s1 + $0x1b0] sm:$0xff] }
 0x2ee   : > { %4337 = vmatprep.subr.mxu0 %v8997_v8 }
 0x2ef   : > { %4338 = vmatpush3.msra.mxu0 %v4148_v23  ;;  %v4622_v23 = vld [vmem:[%s8551_s1 + $0x1a8] sm:$0xff] }
 0x2f0   : > { %4339 = vmatprep.subr.mxu0 %v8997_v8 }
 0x2f1   : > { %4340 = vmatpush3.msra.mxu0 %v4147_v24  ;;  %v4623_v24 = vld [vmem:[%s8551_s1 + $0x1a0] sm:$0xff] }
 0x2f2   : > { %4341 = vmatprep.subr.mxu0 %v8997_v8 }
 0x2f3   : > { %4342 = vmatpush3.msra.mxu0 %v4146_v25  ;;  %v4624_v25 = vld [vmem:[%s8551_s1 + $0x198] sm:$0xff] }
 0x2f4   : > { %4343 = vmatprep.subr.mxu0 %v8997_v8 }
 0x2f5   : > { %4344 = vmatpush3.msra.mxu0 %v4145_v26  ;;  %v4625_v26 = vld [vmem:[%s8551_s1 + $0x190] sm:$0xff] }
 0x2f6   : > { %4345 = vmatprep.subr.mxu0 %v8997_v8  ;;  %v2886_v41 = vpop.f32.mrf.mxu1 }
 0x2f7   : > { %4346 = vmatpush3.msra.mxu0 %v4144_v27  ;;  %v2893_v2 = vadd.f32 %v2886_v41, %v2745_v17  ;;  %v4626_v27 = vld [vmem:[%s8551_s1 + $0x188] sm:$0xff]  ;;  %v4653_v17 = vld [vmem:[%s8551_s1 + $0xb8] sm:$0xff] }
 0x2f8   : > { %4347 = vmatprep.subr.mxu0 %v8997_v8  ;;  %v2888_v57 = vpop.f32.mrf.mxu1  ;;  %v4651_v41 = vld [vmem:[%s8551_s1 + $0xc8] sm:$0xff] }
 0x2f9   : > { %4348 = vmatpush3.msra.mxu0 %v4143_v29  ;;  %v2894_v4 = vadd.f32 %v2888_v57, %v2746_v0  ;;  %v4627_v29 = vld [vmem:[%s8551_s1 + $0x180] sm:$0xff]  ;;  %v4654_v0 = vld [vmem:[%s8551_s1 + $0xb0] sm:$0xff]  ;;  %v4657_v57 = vld [vmem:[%s8551_s1 + $0x98] sm:$0xff] }
 0x2fa   : > { %4349 = vmatprep.subr.mxu0 %v8997_v8 }
 0x2fb   : > { %4350 = vmatpush3.msra.mxu0 %v4142_v30  ;;  %v2896_v19 = vmax.f32 %v2893_v2, %v2894_v4  ;;  %v4628_v30 = vld [vmem:[%s8551_s1 + $0x178] sm:$0xff]  ;;  %v4662_v2 = vld [vmem:[%s8551_s1 + $0x70] sm:$0xff]  ;;  %v4663_v4 = vld [vmem:[%s8551_s1 + $0x68] sm:$0xff] }
 0x2fc   : > { %4351 = vmatprep.subr.mxu0 %v8997_v8 }
 0x2fd   : > { %4352 = vmatpush3.msra.mxu0 %v4141_v31  ;;  %v4629_v31 = vld [vmem:[%s8551_s1 + $0x170] sm:$0xff] }
 0x2fe   : > { %4353 = vmatprep.subr.mxu0 %v8997_v8 }
 0x2ff   : > { %4354 = vmatpush3.msra.mxu0 %v4140_v32  ;;  %v4630_v32 = vld [vmem:[%s8551_s1 + $0x168] sm:$0xff] }
 0x300   : > { %v7860_v48 = vpop.f32.mrf.mxu0  ;;  %4355 = vmatprep.subr.mxu0 %v8997_v8 }
 0x301   : > { %4356 = vmatpush3.msra.mxu0 %v4139_v33  ;;  %v4631_v33 = vld [vmem:[%s8551_s1 + $0x160] sm:$0xff] }
 0x302   : > { %v4289_v15 = vpop.f32.mrf.mxu0  ;;  %3059 = vmatprep.subr.mxu0 %v4614_v34  ;;  %v4632_v34 = vld [vmem:[%s8551_s1 + $0x158] sm:$0xff] }
 0x320   : > { %v2235_v42 = vpop.f32.mrf.mxu0 }
 0x322   : > { %v2237_v46 = vpop.f32.mrf.mxu0 }
 0x340   : > { %v2377_v49 = vpop.f32.mrf.mxu0 }
 0x341   : > { %v2378_v35 = vadd.f32 %v2377_v49, %v2235_v42  ;;  %v4637_v42 = vld [vmem:[%s8551_s1 + $0x130] sm:$0xff] }
 0x342   : > { %v2379_v52 = vpop.f32.mrf.mxu0  ;;  %v4641_v49 = vld [vmem:[%s8551_s1 + $0x110] sm:$0xff] }
 0x343   : > { %v2380_v54 = vadd.f32 %v2379_v52, %v2237_v46  ;;  %v4639_v46 = vld [vmem:[%s8551_s1 + $0x120] sm:$0xff] }
 0x344   : > { %v4643_v52 = vld [vmem:[%s8551_s1 + $0x100] sm:$0xff] }
 0x360   : > { %v2519_v43 = vpop.f32.mrf.mxu0 }
 0x361   : > { %v2595_v60 = vadd.f32 %v2519_v43, %v2378_v35  ;;  %v4644_v43 = vld [vmem:[%s5095_s13 + $0x40] sm:$0xff]  ;;  %v4655_v35 = vld [vmem:[%s8551_s1 + $0xa8] sm:$0xff] }
 0x362   : > { %v2521_v38 = vpop.f32.mrf.mxu0 }
 0x363   : > { %v2596_v45 = vadd.f32 %v2521_v38, %v2380_v54  ;;  %v4648_v38 = vld [vmem:[%s8551_s1 + $0xe0] sm:$0xff] }
 0x364   : > { %v4656_v54 = vld [vmem:[%s8551_s1 + $0xa0] sm:$0xff] }
 0x380   : > { %v2665_v12 = vpop.f32.mrf.mxu0 }
 0x381   : > { %v2743_v5 = vadd.f32 %v2665_v12, %v2595_v60  ;;  %v4652_v12 = vld [vmem:[%s8551_s1 + $0xc0] sm:$0xff]  ;;  %v4659_v60 = vld [vmem:[%s8551_s1 + $0x88] sm:$0xff] }
 0x382   : > { %v2667_v14 = vpop.f32.mrf.mxu0 }
 0x383   : > { %v2744_v7 = vadd.f32 %v2667_v14, %v2596_v45  ;;  %v4658_v14 = vld [vmem:[%s8551_s1 + $0x90] sm:$0xff]  ;;  %v4660_v45 = vld [vmem:[%s8551_s1 + $0x80] sm:$0xff] }
 0x3a0   : > { %v2813_v1 = vpop.f32.mrf.mxu0 }
 0x3a1   : > { %v2891_v16 = vadd.f32 %v2813_v1, %v2743_v5  ;;  %v4661_v1 = vld [vmem:[%s8551_s1 + $0x78] sm:$0xff]  ;;  %v4664_v5 = vld [vmem:[%s8551_s1 + $0x60] sm:$0xff] }
 0x3a2   : > { %v2815_v10 = vpop.f32.mrf.mxu0 }
 0x3a3   : > { %v2892_v18 = vadd.f32 %v2815_v10, %v2744_v7  ;;  %v4665_v7 = vld [vmem:[%s8551_s1 + $0x58] sm:$0xff]  ;;  %v4666_v10 = vld [vmem:[%s8551_s1 + $0x50] sm:$0xff] }
 0x3a5   : > { %v2895_v21 = vmax.f32 %v2891_v16, %v2892_v18  ;;  %v4667_v16 = vld [vmem:[%s8551_s1 + $0x48] sm:$0xff]  ;;  %v4668_v18 = vld [vmem:[%s8551_s1 + $0x40] sm:$0xff] }
 0x3a7   : > { %v2897_v15 = vmax.f32 %v2895_v21, %v2896_v19  ;;  %v4669_v19 = vld [vmem:[%s8551_s1 + $0x38] sm:$0xff]  ;;  %v4670_v21 = vld [vmem:[%s8551_s1 + $0x30] sm:$0xff] }
 0x3a9   : > { %v2898_v53 = vadd.f32 %v7937_v11, %v2897_v15  ;;  %v4671_v15 = vld [vmem:[%s8551_s1 + $0x28] sm:$0xff] }
 0x3ab   : > { %v2899_v20 = vmax.f32 %v2898_v53, 0.0  ;;  %v4672_v53 = vld [vmem:[%s8551_s1 + $0x20] sm:$0xff] }
 0x3ad   : > { %4358 = vmatmul.mubr.f32.vlgmr.msra.gmra.mxu0 %v2899_v20  ;;  %v4673_v20 = vld [vmem:[%s8551_s1 + $0x18] sm:$0xff] }
 0x3ae   : > { %3060 = vmatpush1.msra.mxu0 %v7498_v6  ;;  %3123 = vmatprep.mubr.f32.mxu0 %v8997_v8  ;;  %v4618_v6 = vld [vmem:[%s8551_s1 + $0x1c8] sm:$0xff] }
 0x3af   : > { %3061 = vmatprep.subr.mxu0 %v7505_v58  ;;  %v4619_v58 = vld [vmem:[%s8551_s1 + $0x1c0] sm:$0xff] }
 0x3b0   : > { %3062 = vmatpush1.msra.mxu0 %v7511_v62  ;;  %v4620_v62 = vld [vmem:[%s8551_s1 + $0x1b8] sm:$0xff] }
 0x3b1   : > { %3063 = vmatprep.subr.mxu0 %v4616_v51  ;;  %v4674_v51 = vld [vmem:[%s8551_s1 + $0x10] sm:$0xff] }
 0x3b2   : > { %3064 = vmatpush1.msra.mxu0 %v4617_v44  ;;  %v4675_v44 = vld [vmem:[%s8551_s1 + $0x8] sm:$0xff] }
 0x3b3   : > { %3065 = vmatprep.subr.mxu0 %v4618_v6  ;;  %v4676_v6 = vld [vmem:[%s8551_s1] sm:$0xff] }
 0x3b4   : > { %3066 = vmatpush1.msra.mxu0 %v4619_v58  ;;  %v4677_v58 = vld [vmem:[%s8551_s1 + $0x2f8] sm:$0xff] }
 0x3b5   : > { %3067 = vmatprep.subr.mxu0 %v4620_v62  ;;  %v4678_v62 = vld [vmem:[%s8551_s1 + $0x2f0] sm:$0xff] }
 0x3b6   : > { %3068 = vmatpush1.msra.mxu0 %v4621_v22  ;;  %v4679_v22 = vld [vmem:[%s8551_s1 + $0x2e8] sm:$0xff] }
 0x3b7   : > { %3069 = vmatprep.subr.mxu0 %v4622_v23  ;;  %v4681_v23 = vld [vmem:[%s8551_s1 + $0x2d8] sm:$0xff] }
 0x3b8   : > { %3070 = vmatpush1.msra.mxu0 %v4623_v24  ;;  %v4682_v24 = vld [vmem:[%s8551_s1 + $0x2d0] sm:$0xff] }
 0x3b9   : > { %3071 = vmatprep.subr.mxu0 %v4624_v25  ;;  %v4683_v25 = vld [vmem:[%s8551_s1 + $0x2c8] sm:$0xff] }
 0x3ba   : > { %3072 = vmatpush1.msra.mxu0 %v4625_v26  ;;  %v4684_v26 = vld [vmem:[%s8551_s1 + $0x2c0] sm:$0xff] }
 0x3bb   : > { %3073 = vmatprep.subr.mxu0 %v4626_v27  ;;  %v4685_v27 = vld [vmem:[%s8551_s1 + $0x2b8] sm:$0xff] }
 0x3bc   : > { %3074 = vmatpush1.msra.mxu0 %v4627_v29  ;;  %v4686_v29 = vld [vmem:[%s8551_s1 + $0x2b0] sm:$0xff] }
 0x3bd   : > { %3075 = vmatprep.subr.mxu0 %v4628_v30  ;;  %v4687_v30 = vld [vmem:[%s8551_s1 + $0x2a8] sm:$0xff] }
 0x3be   : > { %3076 = vmatpush1.msra.mxu0 %v4629_v31  ;;  %v4688_v31 = vld [vmem:[%s8551_s1 + $0x2a0] sm:$0xff] }
 0x3bf   : > { %3077 = vmatprep.subr.mxu0 %v4630_v32  ;;  %v4689_v32 = vld [vmem:[%s8551_s1 + $0x298] sm:$0xff] }
 0x3c0   : > { %3078 = vmatpush1.msra.mxu0 %v4631_v33  ;;  %v4690_v33 = vld [vmem:[%s8551_s1 + $0x290] sm:$0xff] }
 0x3c1   : > { %3079 = vmatprep.subr.mxu0 %v4632_v34  ;;  %v4691_v34 = vld [vmem:[%s8551_s1 + $0x288] sm:$0xff] }
 0x3c2   : > { %3080 = vmatpush1.msra.mxu0 %v4633_v36  ;;  %v4692_v36 = vld [vmem:[%s8551_s1 + $0x280] sm:$0xff] }
 0x3c3   : > { %3081 = vmatprep.subr.mxu0 %v4634_v37  ;;  %v4693_v37 = vld [vmem:[%s8551_s1 + $0x278] sm:$0xff] }
 0x3c4   : > { %3082 = vmatpush1.msra.mxu0 %v4635_v39  ;;  %v4694_v39 = vld [vmem:[%s8551_s1 + $0x270] sm:$0xff] }
 0x3c5   : > { %3083 = vmatprep.subr.mxu0 %v4636_v40  ;;  %v4695_v40 = vld [vmem:[%s8551_s1 + $0x268] sm:$0xff] }
 0x3c6   : > { %3084 = vmatpush1.msra.mxu0 %v4637_v42  ;;  %v4696_v42 = vld [vmem:[%s8551_s1 + $0x260] sm:$0xff] }
 0x3c7   : > { %3085 = vmatprep.subr.mxu0 %v4638_v28  ;;  %v4697_v28 = vld [vmem:[%s8551_s1 + $0x258] sm:$0xff] }
 0x3c8   : > { %3086 = vmatpush1.msra.mxu0 %v4639_v46  ;;  %v4698_v46 = vld [vmem:[%s8551_s1 + $0x250] sm:$0xff] }
 0x3c9   : > { %3087 = vmatprep.subr.mxu0 %v4640_v47  ;;  %v4699_v47 = vld [vmem:[%s8551_s1 + $0x248] sm:$0xff] }
 0x3ca   : > { %3088 = vmatpush1.msra.mxu0 %v4641_v49  ;;  %v4700_v49 = vld [vmem:[%s8551_s1 + $0x240] sm:$0xff] }
 0x3cb   : > { %3089 = vmatprep.subr.mxu0 %v4642_v50  ;;  %v4701_v50 = vld [vmem:[%s8551_s1 + $0x238] sm:$0xff] }
 0x3cc   : > { %3090 = vmatpush1.msra.mxu0 %v4643_v52  ;;  %v4702_v52 = vld [vmem:[%s8551_s1 + $0x230] sm:$0xff] }
 0x3cd   : > { %3124 = vmatmul.mubr.f32.vlgmr.msra.gmra.mxu0 %v4644_v43  ;;  %3201 = vmatprep.subr.mxu0 %v4645_v63  ;;  %v4703_v43 = vld [vmem:[%s8551_s1 + $0x228] sm:$0xff]  ;;  %v4704_v63 = vld [vmem:[%s8551_s1 + $0x220] sm:$0xff] }
 0x3ce   : > { %3202 = vmatpush1.msra.mxu0 %v4646_v61  ;;  %3265 = vmatprep.mubr.f32.mxu0 %v8997_v8  ;;  %v4705_v61 = vld [vmem:[%s8551_s1 + $0x218] sm:$0xff] }
 0x3cf   : > { %3203 = vmatprep.subr.mxu0 %v4647_v3  ;;  %v4706_v3 = vld [vmem:[%s8551_s1 + $0x210] sm:$0xff] }
 0x3d0   : > { %3204 = vmatpush1.msra.mxu0 %v4648_v38  ;;  %v4707_v38 = vld [vmem:[%s8551_s1 + $0x208] sm:$0xff] }
 0x3d1   : > { %3205 = vmatprep.subr.mxu0 %v4649_v59  ;;  %v4708_v59 = vld [vmem:[%s8551_s1 + $0x200] sm:$0xff] }
 0x3d2   : > { %3206 = vmatpush1.msra.mxu0 %v4650_v13  ;;  %v4709_v13 = vld [vmem:[%s5095_s13 + $0x48] sm:$0xff] }
 0x3d3   : > { %3207 = vmatprep.subr.mxu0 %v4651_v41  ;;  %v4710_v41 = vld [vmem:[%s8551_s1 + $0x3f8] sm:$0xff] }
 0x3d4   : > { %3208 = vmatpush1.msra.mxu0 %v4652_v12  ;;  %v4711_v12 = vld [vmem:[%s8551_s1 + $0x3f0] sm:$0xff] }
 0x3d5   : > { %3209 = vmatprep.subr.mxu0 %v4653_v17  ;;  %v4712_v17 = vld [vmem:[%s8551_s1 + $0x3e8] sm:$0xff] }
 0x3d6   : > { %3210 = vmatpush1.msra.mxu0 %v4654_v0  ;;  %v4713_v0 = vld [vmem:[%s8551_s1 + $0x3e0] sm:$0xff] }
 0x3d7   : > { %3211 = vmatprep.subr.mxu0 %v4655_v35  ;;  %v4714_v35 = vld [vmem:[%s8551_s1 + $0x3d8] sm:$0xff] }
 0x3d8   : > { %3212 = vmatpush1.msra.mxu0 %v4656_v54  ;;  %v4715_v54 = vld [vmem:[%s8551_s1 + $0x3d0] sm:$0xff] }
 0x3d9   : > { %3213 = vmatprep.subr.mxu0 %v4657_v57  ;;  %v4716_v57 = vld [vmem:[%s8551_s1 + $0x3c8] sm:$0xff] }
 0x3da   : > { %3214 = vmatpush1.msra.mxu0 %v4658_v14  ;;  %v4717_v14 = vld [vmem:[%s8551_s1 + $0x3c0] sm:$0xff] }
 0x3db   : > { %3215 = vmatprep.subr.mxu0 %v4659_v60  ;;  %v4718_v60 = vld [vmem:[%s8551_s1 + $0x3b8] sm:$0xff] }
 0x3dc   : > { %3216 = vmatpush1.msra.mxu0 %v4660_v45  ;;  %v4719_v45 = vld [vmem:[%s8551_s1 + $0x3b0] sm:$0xff] }
 0x3dd   : > { %3217 = vmatprep.subr.mxu0 %v4661_v1  ;;  %v4720_v1 = vld [vmem:[%s8551_s1 + $0x3a8] sm:$0xff] }
 0x3de   : > { %3218 = vmatpush1.msra.mxu0 %v4662_v2  ;;  %v4721_v2 = vld [vmem:[%s8551_s1 + $0x3a0] sm:$0xff] }
 0x3df   : > { %3219 = vmatprep.subr.mxu0 %v4663_v4  ;;  %v4722_v4 = vld [vmem:[%s8551_s1 + $0x398] sm:$0xff] }
 0x3e0   : > { %3220 = vmatpush1.msra.mxu0 %v4664_v5  ;;  %v4723_v5 = vld [vmem:[%s8551_s1 + $0x390] sm:$0xff] }
 0x3e1   : > { %3221 = vmatprep.subr.mxu0 %v4665_v7  ;;  %v4724_v7 = vld [vmem:[%s8551_s1 + $0x388] sm:$0xff] }
 0x3e2   : > { %3222 = vmatpush1.msra.mxu0 %v4666_v10  ;;  %v4725_v10 = vld [vmem:[%s8551_s1 + $0x380] sm:$0xff] }
 0x3e3   : > { %3223 = vmatprep.subr.mxu0 %v4667_v16  ;;  %v4726_v16 = vld [vmem:[%s8551_s1 + $0x378] sm:$0xff] }
 0x3e4   : > { %3224 = vmatpush1.msra.mxu0 %v4668_v18  ;;  %v4727_v18 = vld [vmem:[%s8551_s1 + $0x370] sm:$0xff] }
 0x3e5   : > { %3225 = vmatprep.subr.mxu0 %v4669_v19  ;;  %v4728_v19 = vld [vmem:[%s8551_s1 + $0x368] sm:$0xff] }
 0x3e6   : > { %3226 = vmatpush1.msra.mxu0 %v4670_v21  ;;  %v4729_v21 = vld [vmem:[%s8551_s1 + $0x360] sm:$0xff] }
 0x3e7   : > { %3227 = vmatprep.subr.mxu0 %v4671_v15  ;;  %v4730_v15 = vld [vmem:[%s8551_s1 + $0x358] sm:$0xff] }
 0x3e8   : > { %3228 = vmatpush1.msra.mxu0 %v4672_v53  ;;  %v4731_v53 = vld [vmem:[%s8551_s1 + $0x350] sm:$0xff] }
 0x3e9   : > { %3229 = vmatprep.subr.mxu0 %v4673_v20  ;;  %v4732_v20 = vld [vmem:[%s8551_s1 + $0x348] sm:$0xff] }
 0x3ea   : > { %3230 = vmatpush1.msra.mxu0 %v4674_v51  ;;  %v4733_v51 = vld [vmem:[%s8551_s1 + $0x340] sm:$0xff] }
 0x3eb   : > { %3231 = vmatprep.subr.mxu0 %v4675_v44  ;;  %v4734_v44 = vld [vmem:[%s8551_s1 + $0x338] sm:$0xff] }
 0x3ec   : > { %3232 = vmatpush1.msra.mxu0 %v4676_v6  ;;  %v4735_v6 = vld [vmem:[%s8551_s1 + $0x330] sm:$0xff] }
 0x3ed   : > { %3266 = vmatmul.mubr.f32.vlgmr.msra.gmra.mxu0 %v7782_v55  ;;  %3343 = vmatprep.subr.mxu0 %v4677_v58  ;;  %v4680_v55 = vld [vmem:[%s8551_s1 + $0x2e0] sm:$0xff]  ;;  %v4736_v58 = vld [vmem:[%s8551_s1 + $0x328] sm:$0xff] }
 0x3ee   : > { %3344 = vmatpush1.msra.mxu0 %v4678_v62  ;;  %3407 = vmatprep.mubr.f32.mxu0 %v8997_v8  ;;  %v4737_v62 = vld [vmem:[%s8551_s1 + $0x320] sm:$0xff] }
 0x3ef   : > { %3345 = vmatprep.subr.mxu0 %v4679_v22  ;;  %v4738_v22 = vld [vmem:[%s8551_s1 + $0x318] sm:$0xff] }
 0x3f0   : > { %3346 = vmatpush1.msra.mxu0 %v4680_v55  ;;  %v4739_v55 = vld [vmem:[%s8551_s1 + $0x310] sm:$0xff] }
 0x3f1   : > { %3347 = vmatprep.subr.mxu0 %v4681_v23  ;;  %v4740_v23 = vld [vmem:[%s8551_s1 + $0x308] sm:$0xff] }
 0x3f2   : > { %3348 = vmatpush1.msra.mxu0 %v4682_v24  ;;  %v4741_v24 = vld [vmem:[%s8551_s1 + $0x300] sm:$0xff] }
 0x3f3   : > { %3349 = vmatprep.subr.mxu0 %v4683_v25  ;;  %v4742_v25 = vld [vmem:[%s8551_s1 + $0x4f8] sm:$0xff] }
 0x3f4   : > { %3350 = vmatpush1.msra.mxu0 %v4684_v26  ;;  %v4743_v26 = vld [vmem:[%s8551_s1 + $0x4f0] sm:$0xff] }
 0x3f5   : > { %3351 = vmatprep.subr.mxu0 %v4685_v27  ;;  %v4744_v27 = vld [vmem:[%s8551_s1 + $0x4e8] sm:$0xff] }
 0x3f6   : > { %3352 = vmatpush1.msra.mxu0 %v4686_v29  ;;  %v4746_v29 = vld [vmem:[%s8551_s1 + $0x4d8] sm:$0xff] }
 0x3f7   : > { %3353 = vmatprep.subr.mxu0 %v4687_v30  ;;  %v4747_v30 = vld [vmem:[%s8551_s1 + $0x4d0] sm:$0xff] }
 0x3f8   : > { %3354 = vmatpush1.msra.mxu0 %v4688_v31  ;;  %v4748_v31 = vld [vmem:[%s8551_s1 + $0x4c8] sm:$0xff] }
 0x3f9   : > { %3355 = vmatprep.subr.mxu0 %v4689_v32  ;;  %v4749_v32 = vld [vmem:[%s8551_s1 + $0x4c0] sm:$0xff] }
 0x3fa   : > { %3356 = vmatpush1.msra.mxu0 %v4690_v33  ;;  %v4750_v33 = vld [vmem:[%s8551_s1 + $0x4b8] sm:$0xff] }
 0x3fb   : > { %3357 = vmatprep.subr.mxu0 %v4691_v34  ;;  %v4751_v34 = vld [vmem:[%s8551_s1 + $0x4b0] sm:$0xff] }
 0x3fc   : > { %3358 = vmatpush1.msra.mxu0 %v4692_v36  ;;  %v4752_v36 = vld [vmem:[%s8551_s1 + $0x4a8] sm:$0xff] }
 0x3fd   : > { %3359 = vmatprep.subr.mxu0 %v4693_v37  ;;  %v4753_v37 = vld [vmem:[%s8551_s1 + $0x4a0] sm:$0xff] }
 0x3fe   : > { %3360 = vmatpush1.msra.mxu0 %v4694_v39  ;;  %v4754_v39 = vld [vmem:[%s8551_s1 + $0x498] sm:$0xff] }
 0x3ff   : > { %3361 = vmatprep.subr.mxu0 %v4695_v40  ;;  %v4755_v40 = vld [vmem:[%s8551_s1 + $0x490] sm:$0xff] }
 0x400   : > { %3362 = vmatpush1.msra.mxu0 %v4696_v42  ;;  %v4756_v42 = vld [vmem:[%s8551_s1 + $0x488] sm:$0xff] }
 0x401   : > { %3363 = vmatprep.subr.mxu0 %v4697_v28  ;;  %v4757_v28 = vld [vmem:[%s8551_s1 + $0x480] sm:$0xff] }
 0x402   : > { %3364 = vmatpush1.msra.mxu0 %v4698_v46  ;;  %v4758_v46 = vld [vmem:[%s8551_s1 + $0x478] sm:$0xff] }
 0x403   : > { %3365 = vmatprep.subr.mxu0 %v4699_v47  ;;  %v4759_v47 = vld [vmem:[%s8551_s1 + $0x470] sm:$0xff] }
 0x404   : > { %3366 = vmatpush1.msra.mxu0 %v4700_v49  ;;  %v4760_v49 = vld [vmem:[%s8551_s1 + $0x468] sm:$0xff] }
 0x405   : > { %3367 = vmatprep.subr.mxu0 %v4701_v50  ;;  %v4761_v50 = vld [vmem:[%s8551_s1 + $0x460] sm:$0xff] }
 0x406   : > { %3368 = vmatpush1.msra.mxu0 %v4702_v52  ;;  %v4762_v52 = vld [vmem:[%s8551_s1 + $0x458] sm:$0xff] }
 0x407   : > { %3369 = vmatprep.subr.mxu0 %v4703_v43  ;;  %v4763_v43 = vld [vmem:[%s8551_s1 + $0x450] sm:$0xff] }
 0x408   : > { %3370 = vmatpush1.msra.mxu0 %v4704_v63  ;;  %v4764_v63 = vld [vmem:[%s8551_s1 + $0x448] sm:$0xff] }
 0x409   : > { %3371 = vmatprep.subr.mxu0 %v4705_v61  ;;  %v4765_v61 = vld [vmem:[%s8551_s1 + $0x440] sm:$0xff] }
 0x40a   : > { %3372 = vmatpush1.msra.mxu0 %v4706_v3  ;;  %v4766_v3 = vld [vmem:[%s8551_s1 + $0x438] sm:$0xff] }
 0x40b   : > { %3373 = vmatprep.subr.mxu0 %v4707_v38  ;;  %v4767_v38 = vld [vmem:[%s8551_s1 + $0x430] sm:$0xff] }
 0x40c   : > { %3374 = vmatpush1.msra.mxu0 %v4708_v59  ;;  %v4768_v59 = vld [vmem:[%s8551_s1 + $0x428] sm:$0xff] }
 0x40d   : > { %3408 = vmatmul.mubr.f32.vlgmr.msra.gmra.mxu0 %v4709_v13  ;;  %3491 = vmatprep.subr.mxu0 %v4710_v41  ;;  %v4769_v13 = vld [vmem:[%s8551_s1 + $0x420] sm:$0xff]  ;;  %v4770_v41 = vld [vmem:[%s8551_s1 + $0x418] sm:$0xff] }
 0x40e   : > { %3492 = vmatpush1.msra.mxu0 %v4711_v12  ;;  %3555 = vmatprep.mubr.f32.mxu0 %v8997_v8  ;;  %v4771_v12 = vld [vmem:[%s8551_s1 + $0x410] sm:$0xff] }
 0x40f   : > { %3493 = vmatprep.subr.mxu0 %v4712_v17  ;;  %v4156_v17 = vld [vmem:[%s5095_s13 + $0x58] sm:$0xff] }
 0x410   : > { %3494 = vmatpush1.msra.mxu0 %v4713_v0  ;;  %v4772_v0 = vld [vmem:[%s8551_s1 + $0x408] sm:$0xff] }
 0x411   : > { %3495 = vmatprep.subr.mxu0 %v4714_v35  ;;  %v4773_v35 = vld [vmem:[%s8551_s1 + $0x400] sm:$0xff] }
 0x412   : > { %3496 = vmatpush1.msra.mxu0 %v4715_v54  ;;  %v2166_v54 = vadd.f32 %v7565_v56, %v7860_v48  ;;  %v4169_v56 = vld [vmem:[%s8553_s3 + $0x1e0] sm:$0xff]  ;;  %v4168_v48 = vld [vmem:[%s8553_s3 + $0x1d8] sm:$0xff] }
 0x413   : > { %3497 = vmatprep.subr.mxu0 %v4716_v57 }
 0x414   : > { %3498 = vmatpush1.msra.mxu0 %v4717_v14 }
 0x415   : > { %3499 = vmatprep.subr.mxu0 %v4718_v60 }
 0x416   : > { %3500 = vmatpush1.msra.mxu0 %v4719_v45  ;;  %v4172_v45 = vld [vmem:[%s8553_s3 + $0x1f8] sm:$0xff] }
 0x417   : > { %3501 = vmatprep.subr.mxu0 %v4720_v1  ;;  %v4171_v1 = vld [vmem:[%s8553_s3 + $0x1f0] sm:$0xff]  ;;  %4361 = vmatpush3.msra.mxu1 %v4172_v45  ;;  %v3819_v45 = vld [vmem:[%s8555_s5 + $0x18] sm:$0xff] }
 0x418   : > { %3502 = vmatpush1.msra.mxu0 %v4721_v2  ;;  %4362 = vmatprep.subr.mxu1 %v8997_v8  ;;  %v4170_v2 = vld [vmem:[%s8553_s3 + $0x1e8] sm:$0xff] }
 0x419   : > { %3503 = vmatprep.subr.mxu0 %v4722_v4  ;;  %4363 = vmatpush3.msra.mxu1 %v4171_v1  ;;  %v4167_v4 = vld [vmem:[%s8553_s3 + $0x1d0] sm:$0xff] }
 0x41a   : > { %3504 = vmatpush1.msra.mxu0 %v4723_v5  ;;  %4364 = vmatprep.subr.mxu1 %v8997_v8  ;;  %v4166_v5 = vld [vmem:[%s8553_s3 + $0x1c8] sm:$0xff]  ;;  %v3818_v1 = vld [vmem:[%s8555_s5 + $0x10] sm:$0xff] }
 0x41b   : > { %3505 = vmatprep.subr.mxu0 %v4724_v7  ;;  %4365 = vmatpush3.msra.mxu1 %v4170_v2  ;;  %v4165_v7 = vld [vmem:[%s8553_s3 + $0x1c0] sm:$0xff] }
 0x41c   : > { %3506 = vmatpush1.msra.mxu0 %v4725_v10  ;;  %4366 = vmatprep.subr.mxu1 %v8997_v8  ;;  %v4164_v10 = vld [vmem:[%s8553_s3 + $0x1b8] sm:$0xff]  ;;  %v3816_v2 = vld [vmem:[%s8555_s5] sm:$0xff] }
 0x41d   : > { %3507 = vmatprep.subr.mxu0 %v4726_v16  ;;  %4367 = vmatpush3.msra.mxu1 %v4169_v56  ;;  %v4163_v16 = vld [vmem:[%s8553_s3 + $0x1b0] sm:$0xff] }
 0x41e   : > { %3508 = vmatpush1.msra.mxu0 %v4727_v18  ;;  %4368 = vmatprep.subr.mxu1 %v8997_v8  ;;  %v4162_v18 = vld [vmem:[%s8553_s3 + $0x1a8] sm:$0xff] }
 0x41f   : > { %3509 = vmatprep.subr.mxu0 %v4728_v19  ;;  %4369 = vmatpush3.msra.mxu1 %v4168_v48  ;;  %v4161_v19 = vld [vmem:[%s8553_s3 + $0x1a0] sm:$0xff] }
 0x420   : > { %3510 = vmatpush1.msra.mxu0 %v4729_v21  ;;  %4370 = vmatprep.subr.mxu1 %v8997_v8  ;;  %v4160_v21 = vld [vmem:[%s8553_s3 + $0x198] sm:$0xff]  ;;  %v4173_v48 = vld [vmem:[%s8554_s4] ss:$0 sm:$0xff] }
 0x421   : > { %3511 = vmatprep.subr.mxu0 %v4730_v15  ;;  %4371 = vmatpush3.msra.mxu1 %v4167_v4  ;;  %v4159_v15 = vld [vmem:[%s8553_s3 + $0x190] sm:$0xff] }
 0x422   : > { %3512 = vmatpush1.msra.mxu0 %v4731_v53  ;;  %4372 = vmatprep.subr.mxu1 %v8997_v8  ;;  %v4158_v53 = vld [vmem:[%s8553_s3 + $0x188] sm:$0xff] }
 0x423   : > { %3513 = vmatprep.subr.mxu0 %v4732_v20  ;;  %4373 = vmatpush3.msra.mxu1 %v4166_v5  ;;  %v4157_v20 = vld [vmem:[%s8553_s3 + $0x180] sm:$0xff] }
 0x424   : > { %3514 = vmatpush1.msra.mxu0 %v4733_v51  ;;  %4374 = vmatprep.subr.mxu1 %v8997_v8  ;;  %v3823_v51 = vld [vmem:[%s8555_s5 + $0x38] sm:$0xff] }
 0x425   : > { %3515 = vmatprep.subr.mxu0 %v4734_v44  ;;  %4375 = vmatpush3.msra.mxu1 %v4165_v7  ;;  %v3822_v44 = vld [vmem:[%s8555_s5 + $0x30] sm:$0xff] }
 0x426   : > { %3516 = vmatpush1.msra.mxu0 %v4735_v6  ;;  %4376 = vmatprep.subr.mxu1 %v8997_v8  ;;  %v3821_v6 = vld [vmem:[%s8555_s5 + $0x28] sm:$0xff] }
 0x427   : > { %3517 = vmatprep.subr.mxu0 %v4736_v58  ;;  %4377 = vmatpush3.msra.mxu1 %v4164_v10  ;;  %v3820_v58 = vld [vmem:[%s8555_s5 + $0x20] sm:$0xff] }
 0x428   : > { %3518 = vmatpush1.msra.mxu0 %v4737_v62  ;;  %4378 = vmatprep.subr.mxu1 %v8997_v8  ;;  %v3054_v62 = vpop.f32.mrf.mxu1 }
 0x429   : > { %3519 = vmatprep.subr.mxu0 %v4738_v22  ;;  %4379 = vmatpush3.msra.mxu1 %v4163_v16 }
 0x42a   : > { %3520 = vmatpush1.msra.mxu0 %v4739_v55  ;;  %4380 = vmatprep.subr.mxu1 %v8997_v8  ;;  %v3056_v22 = vpop.f32.mrf.mxu1 }
 0x42b   : > { %3521 = vmatprep.subr.mxu0 %v4740_v23  ;;  %4381 = vmatpush3.msra.mxu1 %v4162_v18 }
 0x42c   : > { %3522 = vmatpush1.msra.mxu0 %v4741_v24  ;;  %4382 = vmatprep.subr.mxu1 %v8997_v8  ;;  %v3196_v55 = vpop.f32.mrf.mxu1 }
 0x42d   : > { %3556 = vmatmul.mubr.f32.vlgmr.msra.gmra.mxu0 %v7929_v9  ;;  %3639 = vmatprep.subr.mxu0 %v4742_v25  ;;  %v4745_v9 = vld [vmem:[%s8551_s1 + $0x4e0] sm:$0xff] }
 0x42e   : > { %3640 = vmatpush1.msra.mxu0 %v4743_v26  ;;  %3703 = vmatprep.mubr.f32.mxu0 %v8997_v8  ;;  %v3198_v23 = vpop.f32.mrf.mxu1 }
 0x42f   : > { %3641 = vmatprep.subr.mxu0 %v4744_v27  ;;  %4383 = vmatpush3.msra.mxu1 %v4161_v19 }
 0x430   : > { %3642 = vmatpush1.msra.mxu0 %v4745_v9  ;;  %4384 = vmatprep.subr.mxu1 %v8997_v8  ;;  %v3338_v25 = vpop.f32.mrf.mxu1 }
 0x431   : > { %3643 = vmatprep.subr.mxu0 %v4746_v29  ;;  %4385 = vmatpush3.msra.mxu1 %v4160_v21 }
 0x432   : > { %3644 = vmatpush1.msra.mxu0 %v4747_v30  ;;  %4386 = vmatprep.subr.mxu1 %v8997_v8  ;;  %v3340_v27 = vpop.f32.mrf.mxu1 }
 0x433   : > { %3645 = vmatprep.subr.mxu0 %v4748_v31  ;;  %4387 = vmatpush3.msra.mxu1 %v4159_v15 }
 0x434   : > { %3646 = vmatpush1.msra.mxu0 %v4749_v32  ;;  %4388 = vmatprep.subr.mxu1 %v8997_v8  ;;  %v3484_v29 = vpop.f32.mrf.mxu1  ;;  %v3197_v32 = vadd.f32 %v3196_v55, %v3054_v62 }
 0x435   : > { %3647 = vmatprep.subr.mxu0 %v4750_v33  ;;  %4389 = vmatpush3.msra.mxu1 %v4158_v53  ;;  %v3199_v33 = vadd.f32 %v3198_v23, %v3056_v22 }
 0x436   : > { %3648 = vmatpush1.msra.mxu0 %v4751_v34  ;;  %4390 = vmatprep.subr.mxu1 %v8997_v8  ;;  %v3486_v34 = vpop.f32.mrf.mxu1 }
 0x437   : > { %3649 = vmatprep.subr.mxu0 %v4752_v36  ;;  %4391 = vmatpush3.msra.mxu1 %v4157_v20 }
 0x438   : > { %3650 = vmatpush1.msra.mxu0 %v4753_v37  ;;  %v3414_v37 = vadd.f32 %v3338_v25, %v3197_v32 }
 0x439   : > { %3651 = vmatprep.subr.mxu0 %v4754_v39  ;;  %v3415_v39 = vadd.f32 %v3340_v27, %v3199_v33 }
 0x43a   : > { %3652 = vmatpush1.msra.mxu0 %v4755_v40  ;;  %v3632_v40 = vpop.f32.mrf.mxu1 }
 0x43b   : > { %3653 = vmatprep.subr.mxu0 %v4756_v42 }
 0x43c   : > { %3654 = vmatpush1.msra.mxu0 %v4757_v28  ;;  %v3562_v28 = vadd.f32 %v3484_v29, %v3414_v37 }
 0x43d   : > { %3655 = vmatprep.subr.mxu0 %v4758_v46  ;;  %v3563_v46 = vadd.f32 %v3486_v34, %v3415_v39 }
 0x43e   : > { %3656 = vmatpush1.msra.mxu0 %v4759_v47 }
 0x43f   : > { %3657 = vmatprep.subr.mxu0 %v4760_v49 }
 0x440   : > { %3658 = vmatpush1.msra.mxu0 %v4761_v50  ;;  %v3634_v50 = vpop.f32.mrf.mxu1 }
 0x441   : > { %3659 = vmatprep.subr.mxu0 %v4762_v52 }
 0x442   : > { %3660 = vmatpush1.msra.mxu0 %v4763_v43 }
 0x443   : > { %3661 = vmatprep.subr.mxu0 %v4764_v63 }
 0x444   : > { %3662 = vmatpush1.msra.mxu0 %v4765_v61 }
 0x445   : > { %3663 = vmatprep.subr.mxu0 %v4766_v3  ;;  %v3710_v3 = vadd.f32 %v3632_v40, %v3562_v28 }
 0x446   : > { %3664 = vmatpush1.msra.mxu0 %v4767_v38  ;;  %v3711_v38 = vadd.f32 %v3634_v50, %v3563_v46 }
 0x447   : > { %3665 = vmatprep.subr.mxu0 %v4768_v59 }
 0x448   : > { %3666 = vmatpush1.msra.mxu0 %v4769_v13 }
 0x449   : > { %3667 = vmatprep.subr.mxu0 %v4770_v41 }
 0x44a   : > { %3668 = vmatpush1.msra.mxu0 %v4771_v12 }
 0x44b   : > { %3669 = vmatprep.subr.mxu0 %v4772_v0  ;;  %v3714_v0 = vmax.f32 %v3710_v3, %v3711_v38 }
 0x44c   : > { %3670 = vmatpush1.msra.mxu0 %v4773_v35 }
 0x44d   : > { %3704 = vmatmul.mubr.f32.vlgmr.msra.gmra.mxu0 %v4156_v17  ;;  %4395 = vmatprep.subr.mxu0 %v8997_v8 }
 0x44e   : > { %4411 = vmatprep.mubr.msk.f32.mxu0 %vm4799_vm0, %v8997_v8  ;;  %4396 = vmatpush3.msra.mxu0 %v3823_v51 }
 0x44f   : > { %4397 = vmatprep.subr.mxu0 %v8997_v8 }
 0x450   : > { %4398 = vmatpush3.msra.mxu0 %v3822_v44 }
 0x451   : > { %4399 = vmatprep.subr.mxu0 %v8997_v8 }
 0x452   : > { %4400 = vmatpush3.msra.mxu0 %v3821_v6 }
 0x453   : > { %4401 = vmatprep.subr.mxu0 %v8997_v8 }
 0x454   : > { %4402 = vmatpush3.msra.mxu0 %v3820_v58 }
 0x455   : > { %4403 = vmatprep.subr.mxu0 %v8997_v8 }
 0x456   : > { %4404 = vmatpush3.msra.mxu0 %v3819_v45 }
 0x457   : > { %4405 = vmatprep.subr.mxu0 %v8997_v8 }
 0x458   : > { %4406 = vmatpush3.msra.mxu0 %v3818_v1 }
 0x459   : > { %4407 = vmatprep.subr.mxu0 %v8997_v8 }
 0x46d   : > { %v2983_v57 = vpop.f32.mrf.mxu0 }
 0x46e   : > { %v8426_v14 = vadd.f32 %v2983_v57, %v2166_v54 }
 0x46f   : > { %v4359_v60 = vpop.f32.mrf.mxu0 }
 0x48d   : > { %v3125_v24 = vpop.f32.mrf.mxu0 }
 0x48f   : > { %v3127_v26 = vpop.f32.mrf.mxu0 }
 0x4ad   : > { %v3267_v9 = vpop.f32.mrf.mxu0 }
 0x4ae   : > { %v3268_v47 = vadd.f32 %v3267_v9, %v3125_v24 }
 0x4af   : > { %v3269_v30 = vpop.f32.mrf.mxu0 }
 0x4b0   : > { %v3270_v49 = vadd.f32 %v3269_v30, %v3127_v26 }
 0x4cd   : > { %v3409_v31 = vpop.f32.mrf.mxu0 }
 0x4ce   : > { %v3416_v43 = vadd.f32 %v3409_v31, %v3268_v47 }
 0x4cf   : > { %v3411_v36 = vpop.f32.mrf.mxu0 }
 0x4d0   : > { %v3417_v63 = vadd.f32 %v3411_v36, %v3270_v49 }
 0x4ed   : > { %v3557_v42 = vpop.f32.mrf.mxu0 }
 0x4ee   : > { %v3564_v59 = vadd.f32 %v3557_v42, %v3416_v43 }
 0x4ef   : > { %v3559_v52 = vpop.f32.mrf.mxu0 }
 0x4f0   : > { %v3565_v13 = vadd.f32 %v3559_v52, %v3417_v63 }
 0x50d   : > { %v3705_v61 = vpop.f32.mrf.mxu0 }
 0x50e   : > { %v3712_v12 = vadd.f32 %v3705_v61, %v3564_v59 }
 0x50f   : > { %v3707_v41 = vpop.f32.mrf.mxu0 }
 0x510   : > { %v3713_v17 = vadd.f32 %v3707_v41, %v3565_v13 }
 0x512   : > { %v3715_v35 = vmax.f32 %v3712_v12, %v3713_v17 }
 0x514   : > { %v3716_v54 = vmax.f32 %v3714_v0, %v3715_v35 }
 0x516   : > { %v3717_v57 = vadd.f32 %v7937_v11, %v3716_v54  ;;  %v3817_v11 = vld [vmem:[%s8555_s5 + $0x8] sm:$0xff] }
 0x517   : > { %4408 = vmatpush3.msra.mxu0 %v3817_v11 }
 0x518   : > { %v3718_v60 = vmax.f32 %v3717_v57, 0.0  ;;  %4409 = vmatprep.subr.mxu0 %v8997_v8  ;;  %v4174_v8 = vld [vmem:[%s8556_s6] ss:$0 sm:$0xff] }
 0x519   : > { %4410 = vmatpush3.msra.mxu0 %v3816_v2 }
 0x51a   : > { %4393 = vmatmul.mubr.f32.vlgmr.msra.gmra.mxu1 %v3718_v60 }
 0x5da   : > { %v3802_v56 = vpop.f32.mrf.mxu1 }
 0x5db   : > { %v3806_v4 = vadd.f32 %v3802_v56, %v8426_v14 }
 0x5dc   : > { %v4394_v5 = vpop.f32.mrf.mxu1 }
 0x5dd   : > { %v3814_v7 = vadd.f32 %v4173_v48, %v3806_v4 }
 0x5df   : > { %v3815_v10 = vmax.f32 %v3814_v7, 0.0 }
 0x5e1   : > { %4412 = vmatmul.mubr.msk.f32.vlgmr.msra.gmra.mxu0 %vm3831_vm1, %v3815_v10 }
 0x6a1   : > { %v3901_v16 = vpop.f32.mrf.mxu0 }
 0x6a2   : > { %v3902_v18 = vadd.f32 %v4174_v8, %v3901_v16 }
 0x6a3   : > { %v4413_v19 = vpop.f32.mrf.mxu0 }
 0x6a4   : > { %v3906_v21 = vsel %vm3905_vm2, %v3902_v18, -inf }
 0x6a5   : > { %3907 = vmax.xlane.f32.xlu0 %v3906_v21 }
 0x72e   : > { %v3908_v15 = vpop.xlane.xlu0 %3907 }
 0x72f   : > { %v3909_v14 = vsub.f32 %v3902_v18, %v3908_v15 }
 0x731   : > { %v3910_v53 = vmul.f32 1.442695, %v3909_v14 }
 0x733   : > { %4442 = vpow2.f32 %v3910_v53 }
 0x740   : > { %v4443_v20 = vpop.eup %4442 }
 0x741   : > { %v3912_v51 = vsel %vm3905_vm2, %v4443_v20, 0.0 }
 0x742   : > { %3913 = vadd.xlane.f32.xlu0 %v3912_v51 }
 0x7cb   : > { %v3914_v44 = vpop.xlane.xlu0 %3913 }
 0x7cc   : > { %4444 = vlog2.f32 %v3914_v44 }
 0x7d9   : > { %v4445_v6 = vpop.eup %4444 }
 0x7da   : > { %v3916_v58 = vmul.f32 0.6931472, %v4445_v6 }
 0x7dc   : > { %v3917_v62 = vsub.f32 %v3909_v14, %v3916_v58 }
 0x7de   : > { %3918 = vst.msk [vmem:[%s355_s23] sm:$0xff] %vm3905_vm2, %v3917_v62 }
 0x7df PF: > { %p14_p9 = scmp.ge.s32.totalorder %s4857_s28, 4   ;;  %s9421_s24 = smov %s4792_s25 }
 0x7e0   : > { %s9422_s25 = smov %s4866_s8  ;;  %s9423_s26 = smov %s4857_s28 }
 0x7e1   :  { %16 = sbr.rel (!%p14_p9) target bundleno = 2 (0x2), region = 139 }

// kernel: forward.2
= control target key start
LH: loop header
LB: loop body
LE: loop exit
PB: predicated region body
PF: predicated region fallthrough
CT: control target
= control target key end

     0   :  { %s10675_s12 = smov 0   ;;  %s10677_s13 = smov 0   ;;  %s13062_s0 = inlined_call_operand.vmem [shape: f32[28,16,32], index: 0, kind: input, shape index: {}]   ;;  %s13063_s1 = inlined_call_operand.vmem [shape: f32[5,32,256], index: 1, kind: input, shape index: {}]   ;;  %s13064_s2 = inlined_call_operand.vmem [shape: f32[1,128], index: 2, kind: input, shape index: {}]   ;;  %s13065_s3 = inlined_call_operand.vmem [shape: f32[12,16,128], index: 3, kind: output, shape index: {}]  }
   0x1   :  { %s10679_s14 = smov 0  }
   0x2 LB: > { %s10004_s15 = sadd.s32 4294967295, %s10652_s14   ;;  %s10692_s16 = sadd.s32 1, %s10652_s14   ;;  %s10652_s14 = sphi %s10679_s14, %s13089_s14   ;;  %s10648_s13 = sphi %s10677_s13, %s13088_s13   ;;  %s10644_s12 = sphi %s10675_s12, %s13087_s12  }
   0x3   : > { %s17_s17 = ssub.s32 %s10652_s14, %s10692_s16  ;;  %s20_s18 = sadd.s32 1, %s10648_s13 }
   0x4   : > { %p18_p0 = scmp.eq.s32.totalorder %s17_s17, 0  ;;  %p27_p1 = scmp.ne.s32.totalorder %s10648_s13, %s10644_s12 }
   0x5   : > { %p28_p2 = scmp.eq.s32.totalorder %s10652_s14, 0  ;;  %p99_p3 = scmp.eq.s32.totalorder %s10004_s15, 1 }
   0x6   : > { %s10703_s19 = scalar_select %p18_p0, %s10648_s13, %s20_s18  }
   0x7   : > { %p29_p4 = por %p28_p2, %p27_p1  ;;  %p10705_p5 = por %p99_p3, %p27_p1 }
   0x8   : > { %p10007_p6 = scmp.ge.s32.totalorder %s10652_s14, 2 }
   0xa   : > { %127 = sbr.rel (%p10007_p6) target bundleno = 33 (0x21), region = 24 }
   0xf   : > { %130 = sbr.rel (!%p29_p4) target bundleno = 33 (0x21), region = 28  ;;  %s132_s21 = sand.u32 (%p29_p4), 1, %s10648_s13  }
  0x10   : > { %s10008_s22 = sshll.u32 (%p29_p4), %s10652_s14, 3  ;;  %s10600_s23 = smul.u32 (%p29_p4), 224, %s132_s21 }
  0x11   : > { %s10715_s26 = scalar_lea.vmem (%p29_p4), %s13062_s0, %s10008_s22 }
  0x12   : > { %v219_v0 = vld [vmem:[%s10715_s26] sm:$0xff] (%p29_p4)  ;;  %v221_v1 = vld [vmem:[%s10715_s26 + $0x10] sm:$0xff] (%p29_p4)  ;;  %s10723_s27 = scalar_lea.vmem (%p29_p4), [#allocation2], %s10600_s23 }
  0x13   : > { %v223_v2 = vld [vmem:[%s10715_s26 + $0x20] sm:$0xff] (%p29_p4)  ;;  %v225_v3 = vld [vmem:[%s10715_s26 + $0x30] sm:$0xff] (%p29_p4)  ;;  %220 = vst [vmem:[%s10723_s27] sm:$0xff] (%p29_p4), %v219_v0  ;;  %222 = vst [vmem:[%s10723_s27 + $0x8] sm:$0xff] (%p29_p4), %v221_v1 }
  0x14   : > { %v227_v4 = vld [vmem:[%s10715_s26 + $0x40] sm:$0xff]  ;;  %v229_v5 = vld [vmem:[%s10715_s26 + $0x50] sm:$0xff]  ;;  %224 = vst [vmem:[%s10723_s27 + $0x10] sm:$0xff] %v223_v2  ;;  %226 = vst [vmem:[%s10723_s27 + $0x18] sm:$0xff] %v225_v3 }
  0x15   : > { %228 = vst [vmem:[%s10723_s27 + $0x20] sm:$0xff] %v227_v4  ;;  %230 = vst [vmem:[%s10723_s27 + $0x28] sm:$0xff] %v229_v5  ;;  %v231_v6 = vld [vmem:[%s10715_s26 + $0x60] sm:$0xff]  ;;  %v233_v7 = vld [vmem:[%s10715_s26 + $0x70] sm:$0xff] }
  0x16   : > { %v235_v8 = vld [vmem:[%s10715_s26 + $0x80] sm:$0xff]  ;;  %232 = vst [vmem:[%s10723_s27 + $0x30] sm:$0xff] %v231_v6  ;;  %234 = vst [vmem:[%s10723_s27 + $0x38] sm:$0xff] %v233_v7  ;;  %v237_v9 = vld [vmem:[%s10715_s26 + $0x90] sm:$0xff] }
  0x17   : > { %236 = vst [vmem:[%s10723_s27 + $0x40] sm:$0xff] %v235_v8  ;;  %v239_v10 = vld [vmem:[%s10715_s26 + $0xa0] sm:$0xff]  ;;  %v241_v11 = vld [vmem:[%s10715_s26 + $0xb0] sm:$0xff]  ;;  %238 = vst [vmem:[%s10723_s27 + $0x48] sm:$0xff] %v237_v9 }
  0x18   : > { %240 = vst [vmem:[%s10723_s27 + $0x50] sm:$0xff] %v239_v10  ;;  %242 = vst [vmem:[%s10723_s27 + $0x58] sm:$0xff] %v241_v11  ;;  %v243_v12 = vld [vmem:[%s10715_s26 + $0xc0] sm:$0xff]  ;;  %v245_v13 = vld [vmem:[%s10715_s26 + $0xd0] sm:$0xff] }
  0x19   : > { %v247_v14 = vld [vmem:[%s10715_s26 + $0xe0] sm:$0xff]  ;;  %244 = vst [vmem:[%s10723_s27 + $0x60] sm:$0xff] %v243_v12  ;;  %246 = vst [vmem:[%s10723_s27 + $0x68] sm:$0xff] %v245_v13  ;;  %v249_v15 = vld [vmem:[%s10715_s26 + $0xf0] sm:$0xff] }
  0x1a   : > { %248 = vst [vmem:[%s10723_s27 + $0x70] sm:$0xff] %v247_v14  ;;  %v251_v16 = vld [vmem:[%s10715_s26 + $0x100] sm:$0xff]  ;;  %v253_v17 = vld [vmem:[%s10715_s26 + $0x110] sm:$0xff]  ;;  %250 = vst [vmem:[%s10723_s27 + $0x78] sm:$0xff] %v249_v15 }
  0x1b   : > { %252 = vst [vmem:[%s10723_s27 + $0x80] sm:$0xff] %v251_v16  ;;  %254 = vst [vmem:[%s10723_s27 + $0x88] sm:$0xff] %v253_v17  ;;  %v255_v18 = vld [vmem:[%s10715_s26 + $0x120] sm:$0xff]  ;;  %v257_v19 = vld [vmem:[%s10715_s26 + $0x130] sm:$0xff] }
  0x1c   : > { %v259_v20 = vld [vmem:[%s10715_s26 + $0x140] sm:$0xff]  ;;  %256 = vst [vmem:[%s10723_s27 + $0x90] sm:$0xff] %v255_v18  ;;  %258 = vst [vmem:[%s10723_s27 + $0x98] sm:$0xff] %v257_v19  ;;  %v261_v21 = vld [vmem:[%s10715_s26 + $0x150] sm:$0xff] }
  0x1d   : > { %260 = vst [vmem:[%s10723_s27 + $0xa0] sm:$0xff] %v259_v20  ;;  %v263_v22 = vld [vmem:[%s10715_s26 + $0x160] sm:$0xff]  ;;  %v265_v23 = vld [vmem:[%s10715_s26 + $0x170] sm:$0xff]  ;;  %262 = vst [vmem:[%s10723_s27 + $0xa8] sm:$0xff] %v261_v21 }
  0x1e   : > { %264 = vst [vmem:[%s10723_s27 + $0xb0] sm:$0xff] %v263_v22  ;;  %266 = vst [vmem:[%s10723_s27 + $0xb8] sm:$0xff] %v265_v23  ;;  %v267_v24 = vld [vmem:[%s10715_s26 + $0x180] sm:$0xff]  ;;  %v269_v25 = vld [vmem:[%s10715_s26 + $0x190] sm:$0xff] }
  0x1f   : > { %v271_v26 = vld [vmem:[%s10715_s26 + $0x1a0] sm:$0xff]  ;;  %268 = vst [vmem:[%s10723_s27 + $0xc0] sm:$0xff] %v267_v24  ;;  %270 = vst [vmem:[%s10723_s27 + $0xc8] sm:$0xff] %v269_v25  ;;  %v273_v27 = vld [vmem:[%s10715_s26 + $0x1b0] sm:$0xff] }
  0x20   : > { %272 = vst [vmem:[%s10723_s27 + $0xd0] sm:$0xff] %v271_v26  ;;  %274 = vst [vmem:[%s10723_s27 + $0xd8] sm:$0xff] %v273_v27 }
  0x21 PF: > { %p10009_p7 = scmp.ge.s32.totalorder %s10652_s14, 1  ;;  %p279_p8 = scmp.lt.s32.totalorder %s10652_s14, 3 }
  0x23   : > { %p280_p9 = pnand %p10009_p7, %p279_p8 }
  0x25   : > { %283 = sbr.rel (%p280_p9) target bundleno = 856 (0x358), region = 66 }
  0x2a   : > { %v10780_v28 = vld [vmem:[%s13063_s1 + $0x78] sm:$0xff]  ;;  %v10785_v29 = vld [vmem:[%s13063_s1 + $0x70] sm:$0xff]  ;;  %v10790_v30 = vld [vmem:[%s13063_s1 + $0x68] sm:$0xff]  ;;  %s286_s7 = sand.u32 1, %s10644_s12   ;;  %vm329_vm0 = vcmask 261120   ;;  %v10654_v38 = vmov 0.0  }
  0x2b   : > { %357 = vmatprep.subr.mxu0 %v10780_v28  ;;  %433 = vmatprep.subr.mxu1 %v10780_v28  ;;  %v10798_v31 = vld [vmem:[%s13063_s1 + $0x60] sm:$0xff]  ;;  %s10601_s10 = smul.u32 224, %s286_s7  ;;  %v10807_v32 = vld [vmem:[%s13063_s1 + $0x58] sm:$0xff]  ;;  %v10814_v33 = vld [vmem:[%s13063_s1 + $0x50] sm:$0xff]  ;;  %s10597_s21 = sshll.u32 (%p10705_p5), %s10004_s15, 3 }
  0x2c   : > { %358 = vmatpush1.msra.mxu0 %v10785_v29  ;;  %434 = vmatpush1.msra.mxu1 %v10785_v29  ;;  %v10821_v34 = vld [vmem:[%s13063_s1 + $0x48] sm:$0xff]  ;;  %v10828_v35 = vld [vmem:[%s13063_s1 + $0x40] sm:$0xff]  ;;  %v10845_v39 = vld [vmem:[%s13063_s1 + $0x38] sm:$0xff]  ;;  %s10602_s27 = smul.u32 96, %s286_s7  ;;  %s9870_s20 = scalar_lea.vmem (%p10705_p5), %s13065_s3, %s10597_s21 }
  0x2d   : > { %359 = vmatprep.subr.mxu0 %v10790_v30  ;;  %435 = vmatprep.subr.mxu1 %v10790_v30  ;;  %s10834_s26 = scalar_lea.vmem [#allocation2], %s10601_s10  ;;  %v10852_v40 = vld [vmem:[%s13063_s1 + $0x30] sm:$0xff]  ;;  %v10860_v41 = vld [vmem:[%s13063_s1 + $0x28] sm:$0xff]  ;;  %v10867_v42 = vld [vmem:[%s13063_s1 + $0x20] sm:$0xff] }
  0x2e   : > { %360 = vmatpush1.msra.mxu0 %v10798_v31  ;;  %436 = vmatpush1.msra.mxu1 %v10798_v31  ;;  %v10010_v36 = vld [vmem:[%s10834_s26 + $0x8] sm:$0xff]  ;;  %v10838_v37 = vld [vmem:[%s10834_s26 + $0x10] sm:$0xff]  ;;  %v10874_v43 = vld [vmem:[%s13063_s1 + $0x18] sm:$0xff]  ;;  %s11791_s12 = scalar_lea.vmem [#allocation3], %s10602_s27 }
  0x2f   : > { %361 = vmatprep.subr.mxu0 %v10807_v32  ;;  %437 = vmatprep.subr.mxu1 %v10807_v32  ;;  %v10881_v44 = vld [vmem:[%s13063_s1 + $0x10] sm:$0xff]  ;;  %v10888_v45 = vld [vmem:[%s13063_s1 + $0x8] sm:$0xff]  ;;  %v10895_v46 = vld [vmem:[%s13063_s1] sm:$0xff] }
  0x30   : > { %362 = vmatpush1.msra.mxu0 %v10814_v33  ;;  %438 = vmatpush1.msra.mxu1 %v10814_v33  ;;  %v317_v47 = vld [vmem:[%s10834_s26] sm:$0xff]  ;;  %v10907_v48 = vld [vmem:[%s13063_s1 + $0xb8] sm:$0xff]  ;;  %v10914_v49 = vld [vmem:[%s13063_s1 + $0xb0] sm:$0xff] }
  0x31   : > { %363 = vmatprep.subr.mxu0 %v10821_v34  ;;  %439 = vmatprep.subr.mxu1 %v10821_v34  ;;  %v10921_v50 = vld [vmem:[%s13063_s1 + $0xa8] sm:$0xff]  ;;  %v10928_v51 = vld [vmem:[%s13063_s1 + $0xa0] sm:$0xff]  ;;  %v10935_v52 = vld [vmem:[%s13063_s1 + $0x98] sm:$0xff] }
  0x32   : > { %364 = vmatpush1.msra.mxu0 %v10828_v35  ;;  %397 = vmatprep.mubr.f32.mxu0 %v10654_v38  ;;  %v10942_v53 = vld [vmem:[%s13063_s1 + $0x90] sm:$0xff]  ;;  %v10949_v54 = vld [vmem:[%s13063_s1 + $0x88] sm:$0xff]  ;;  %v10956_v55 = vld [vmem:[%s13063_s1 + $0x80] sm:$0xff] }
  0x33   : > { %440 = vmatpush1.msra.mxu1 %v10828_v35  ;;  %473 = vmatprep.mubr.f32.mxu1 %v10654_v38  ;;  %v10963_v56 = vld [vmem:[%s10834_s26 + $0x18] sm:$0xff]  ;;  %v10977_v58 = vld [vmem:[%s13063_s1 + $0xf0] sm:$0xff]  ;;  %v10986_v59 = vld [vmem:[%s13063_s1 + $0xe8] sm:$0xff] }
  0x34   : > { %10019 = vmatmul.mubr.msk.f32.vlgmr.msra.gmra.mxu0 %vm329_vm0, %v10010_v36  ;;  %10021 = vmatmul.mubr.msk.f32.vlgmr.msra.gmra.mxu1 %vm329_vm0, %v10838_v37  ;;  %v10970_v57 = vld [vmem:[%s13063_s1 + $0xf8] sm:$0xff]  ;;  %v10993_v60 = vld [vmem:[%s13063_s1 + $0xe0] sm:$0xff]  ;;  %v11007_v62 = vld [vmem:[%s13063_s1 + $0xd0] sm:$0xff] }
  0x35   : > { %507 = vmatprep.subr.mxu0 %v10845_v39  ;;  %578 = vmatprep.subr.mxu1 %v10845_v39  ;;  %v11000_v61 = vld [vmem:[%s13063_s1 + $0xd8] sm:$0xff]  ;;  %v11014_v63 = vld [vmem:[%s13063_s1 + $0xc8] sm:$0xff]  ;;  %v11021_v0 = vld [vmem:[%s13063_s1 + $0xc0] sm:$0xff] }
  0x36   : > { %508 = vmatpush1.msra.mxu0 %v10852_v40  ;;  %579 = vmatpush1.msra.mxu1 %v10852_v40  ;;  %v11028_v1 = vld [vmem:[%s10834_s26 + $0x20] sm:$0xff]  ;;  %v11035_v2 = vld [vmem:[%s13063_s1 + $0x138] sm:$0xff]  ;;  %v11042_v3 = vld [vmem:[%s13063_s1 + $0x130] sm:$0xff] }
  0x37   : > { %509 = vmatprep.subr.mxu0 %v10860_v41  ;;  %580 = vmatprep.subr.mxu1 %v10860_v41  ;;  %v11051_v4 = vld [vmem:[%s13063_s1 + $0x128] sm:$0xff]  ;;  %v11058_v5 = vld [vmem:[%s13063_s1 + $0x120] sm:$0xff]  ;;  %v11065_v6 = vld [vmem:[%s13063_s1 + $0x118] sm:$0xff] }
  0x38   : > { %510 = vmatpush1.msra.mxu0 %v10867_v42  ;;  %581 = vmatpush1.msra.mxu1 %v10867_v42  ;;  %v11072_v7 = vld [vmem:[%s13063_s1 + $0x110] sm:$0xff]  ;;  %v11079_v8 = vld [vmem:[%s13063_s1 + $0x108] sm:$0xff]  ;;  %v11086_v9 = vld [vmem:[%s13063_s1 + $0x100] sm:$0xff] }
  0x39   : > { %511 = vmatprep.subr.mxu0 %v10874_v43  ;;  %582 = vmatprep.subr.mxu1 %v10874_v43  ;;  %v11093_v10 = vld [vmem:[%s10834_s26 + $0x28] sm:$0xff]  ;;  %v11184_v11 = vld [vmem:[%s10834_s26 + $0x30] sm:$0xff]  ;;  %v11209_v12 = vld [vmem:[%s10834_s26 + $0x38] sm:$0xff] }
  0x3a   : > { %512 = vmatpush1.msra.mxu0 %v10881_v44  ;;  %583 = vmatpush1.msra.mxu1 %v10881_v44  ;;  %v11300_v13 = vld [vmem:[%s10834_s26 + $0x40] sm:$0xff]  ;;  %v11325_v14 = vld [vmem:[%s10834_s26 + $0x48] sm:$0xff]  ;;  %v11416_v15 = vld [vmem:[%s10834_s26 + $0x50] sm:$0xff] }
  0x3b   : > { %513 = vmatprep.subr.mxu0 %v10888_v45  ;;  %584 = vmatprep.subr.mxu1 %v10888_v45  ;;  %v11441_v16 = vld [vmem:[%s10834_s26 + $0x58] sm:$0xff]  ;;  %v11455_v18 = vld [vmem:[%s13063_s1 + $0x70] sm:$0xff]  ;;  %v11464_v19 = vld [vmem:[%s13063_s1 + $0x68] sm:$0xff] }
  0x3c   : > { %514 = vmatpush1.msra.mxu0 %v10895_v46  ;;  %547 = vmatprep.mubr.f32.mxu0 %v10654_v38  ;;  %v11448_v17 = vld [vmem:[%s13063_s1 + $0x78] sm:$0xff]  ;;  %v11471_v20 = vld [vmem:[%s13063_s1 + $0x60] sm:$0xff]  ;;  %v11485_v22 = vld [vmem:[%s13063_s1 + $0x50] sm:$0xff] }
  0x3d   : > { %585 = vmatpush1.msra.mxu1 %v10895_v46  ;;  %618 = vmatprep.mubr.f32.mxu1 %v10654_v38  ;;  %v11478_v21 = vld [vmem:[%s13063_s1 + $0x58] sm:$0xff]  ;;  %v11492_v23 = vld [vmem:[%s13063_s1 + $0x48] sm:$0xff]  ;;  %v11499_v24 = vld [vmem:[%s13063_s1 + $0x40] sm:$0xff] }
  0x3e   : > { %10022 = vmatmul.mubr.msk.f32.vlgmr.msra.gmra.mxu0 %vm329_vm0, %v317_v47  ;;  %10023 = vmatmul.mubr.msk.f32.vlgmr.msra.gmra.mxu1 %vm329_vm0, %v10010_v36  ;;  %v11510_v25 = vld [vmem:[%s13063_s1 + $0x38] sm:$0xff]  ;;  %v11517_v26 = vld [vmem:[%s13063_s1 + $0x30] sm:$0xff]  ;;  %v11526_v27 = vld [vmem:[%s13063_s1 + $0x28] sm:$0xff] }
  0x3f   : > { %658 = vmatprep.subr.mxu0 %v10907_v48  ;;  %734 = vmatprep.subr.mxu1 %v10907_v48  ;;  %v11583_v36 = vld [vmem:[%s13063_s1 + $0xb0] sm:$0xff]  ;;  %v11627_v47 = vld [vmem:[%s13063_s1 + $0x80] sm:$0xff] }
  0x40   : > { %659 = vmatpush1.msra.mxu0 %v10914_v49  ;;  %735 = vmatpush1.msra.mxu1 %v10914_v49 }
  0x41   : > { %660 = vmatprep.subr.mxu0 %v10921_v50  ;;  %736 = vmatprep.subr.mxu1 %v10921_v50 }
  0x42   : > { %661 = vmatpush1.msra.mxu0 %v10928_v51  ;;  %737 = vmatpush1.msra.mxu1 %v10928_v51 }
  0x43   : > { %662 = vmatprep.subr.mxu0 %v10935_v52  ;;  %738 = vmatprep.subr.mxu1 %v10935_v52 }
  0x44   : > { %663 = vmatpush1.msra.mxu0 %v10942_v53  ;;  %739 = vmatpush1.msra.mxu1 %v10942_v53 }
  0x45   : > { %664 = vmatprep.subr.mxu0 %v10949_v54  ;;  %740 = vmatprep.subr.mxu1 %v10949_v54 }
  0x46   : > { %665 = vmatpush1.msra.mxu0 %v10956_v55  ;;  %698 = vmatprep.mubr.f32.mxu0 %v10654_v38 }
  0x47   : > { %741 = vmatpush1.msra.mxu1 %v10956_v55  ;;  %774 = vmatprep.mubr.f32.mxu1 %v10654_v38 }
  0x48   : > { %10032 = vmatmul.mubr.msk.f32.vlgmr.msra.gmra.mxu0 %vm329_vm0, %v10838_v37  ;;  %10034 = vmatmul.mubr.msk.f32.vlgmr.msra.gmra.mxu1 %vm329_vm0, %v10963_v56 }
  0x49   : > { %818 = vmatprep.subr.mxu0 %v10970_v57  ;;  %894 = vmatprep.subr.mxu1 %v10970_v57 }
  0x4a   : > { %819 = vmatpush1.msra.mxu0 %v10977_v58  ;;  %895 = vmatpush1.msra.mxu1 %v10977_v58 }
  0x4b   : > { %820 = vmatprep.subr.mxu0 %v10986_v59  ;;  %896 = vmatprep.subr.mxu1 %v10986_v59 }
  0x4c   : > { %821 = vmatpush1.msra.mxu0 %v10993_v60  ;;  %897 = vmatpush1.msra.mxu1 %v10993_v60 }
  0x4d   : > { %822 = vmatprep.subr.mxu0 %v11000_v61  ;;  %898 = vmatprep.subr.mxu1 %v11000_v61 }
  0x4e   : > { %823 = vmatpush1.msra.mxu0 %v11007_v62  ;;  %899 = vmatpush1.msra.mxu1 %v11007_v62 }
  0x4f   : > { %824 = vmatprep.subr.mxu0 %v11014_v63  ;;  %900 = vmatprep.subr.mxu1 %v11014_v63 }
  0x50   : > { %825 = vmatpush1.msra.mxu0 %v11021_v0  ;;  %858 = vmatprep.mubr.f32.mxu0 %v10654_v38 }
  0x51   : > { %901 = vmatpush1.msra.mxu1 %v11021_v0  ;;  %934 = vmatprep.mubr.f32.mxu1 %v10654_v38 }
  0x52   : > { %10043 = vmatmul.mubr.msk.f32.vlgmr.msra.gmra.mxu0 %vm329_vm0, %v10963_v56  ;;  %10045 = vmatmul.mubr.msk.f32.vlgmr.msra.gmra.mxu1 %vm329_vm0, %v11028_v1 }
  0x53   : > { %978 = vmatprep.subr.mxu0 %v11035_v2  ;;  %1054 = vmatprep.subr.mxu1 %v11035_v2 }
  0x54   : > { %979 = vmatpush1.msra.mxu0 %v11042_v3  ;;  %1055 = vmatpush1.msra.mxu1 %v11042_v3 }
  0x55   : > { %980 = vmatprep.subr.mxu0 %v11051_v4  ;;  %1056 = vmatprep.subr.mxu1 %v11051_v4 }
  0x56   : > { %981 = vmatpush1.msra.mxu0 %v11058_v5  ;;  %1057 = vmatpush1.msra.mxu1 %v11058_v5 }
  0x57   : > { %982 = vmatprep.subr.mxu0 %v11065_v6  ;;  %1058 = vmatprep.subr.mxu1 %v11065_v6 }
  0x58   : > { %983 = vmatpush1.msra.mxu0 %v11072_v7  ;;  %1059 = vmatpush1.msra.mxu1 %v11072_v7 }
  0x59   : > { %984 = vmatprep.subr.mxu0 %v11079_v8  ;;  %1060 = vmatprep.subr.mxu1 %v11079_v8 }
  0x5a   : > { %985 = vmatpush1.msra.mxu0 %v11086_v9  ;;  %1018 = vmatprep.mubr.f32.mxu0 %v10654_v38 }
  0x5b   : > { %1061 = vmatpush1.msra.mxu1 %v11086_v9  ;;  %1094 = vmatprep.mubr.f32.mxu1 %v10654_v38 }
  0x5c   : > { %10054 = vmatmul.mubr.msk.f32.vlgmr.msra.gmra.mxu0 %vm329_vm0, %v11028_v1  ;;  %10056 = vmatmul.mubr.msk.f32.vlgmr.msra.gmra.mxu1 %vm329_vm0, %v11093_v10 }
  0x5d   : > { %1162 = vmatprep.subr.mxu0 %v10780_v28  ;;  %1237 = vmatprep.subr.mxu1 %v10780_v28 }
  0x5e   : > { %1163 = vmatpush1.msra.mxu0 %v10785_v29  ;;  %1238 = vmatpush1.msra.mxu1 %v10785_v29 }
  0x5f   : > { %1164 = vmatprep.subr.mxu0 %v10790_v30  ;;  %1239 = vmatprep.subr.mxu1 %v10790_v30 }
  0x60   : > { %1165 = vmatpush1.msra.mxu0 %v10798_v31  ;;  %1240 = vmatpush1.msra.mxu1 %v10798_v31 }
  0x61   : > { %1166 = vmatprep.subr.mxu0 %v10807_v32  ;;  %1241 = vmatprep.subr.mxu1 %v10807_v32 }
  0x62   : > { %1167 = vmatpush1.msra.mxu0 %v10814_v33  ;;  %1242 = vmatpush1.msra.mxu1 %v10814_v33 }
  0x63   : > { %1168 = vmatprep.subr.mxu0 %v10821_v34  ;;  %1243 = vmatprep.subr.mxu1 %v10821_v34 }
  0x64   : > { %1169 = vmatpush1.msra.mxu0 %v10828_v35  ;;  %1202 = vmatprep.mubr.f32.mxu0 %v10654_v38 }
  0x65   : > { %1244 = vmatpush1.msra.mxu1 %v10828_v35  ;;  %1277 = vmatprep.mubr.f32.mxu1 %v10654_v38 }
  0x66   : > { %10068 = vmatmul.mubr.msk.f32.vlgmr.msra.gmra.mxu0 %vm329_vm0, %v10963_v56  ;;  %10070 = vmatmul.mubr.msk.f32.vlgmr.msra.gmra.mxu1 %vm329_vm0, %v11028_v1 }
  0x67   : > { %1311 = vmatprep.subr.mxu0 %v10845_v39  ;;  %1382 = vmatprep.subr.mxu1 %v10845_v39 }
  0x68   : > { %1312 = vmatpush1.msra.mxu0 %v10852_v40  ;;  %1383 = vmatpush1.msra.mxu1 %v10852_v40 }
  0x69   : > { %1313 = vmatprep.subr.mxu0 %v10860_v41  ;;  %1384 = vmatprep.subr.mxu1 %v10860_v41 }
  0x6a   : > { %1314 = vmatpush1.msra.mxu0 %v10867_v42  ;;  %1385 = vmatpush1.msra.mxu1 %v10867_v42 }
  0x6b   : > { %1315 = vmatprep.subr.mxu0 %v10874_v43  ;;  %1386 = vmatprep.subr.mxu1 %v10874_v43 }
  0x6c   : > { %1316 = vmatpush1.msra.mxu0 %v10881_v44  ;;  %1387 = vmatpush1.msra.mxu1 %v10881_v44 }
  0x6d   : > { %1317 = vmatprep.subr.mxu0 %v10888_v45  ;;  %1388 = vmatprep.subr.mxu1 %v10888_v45 }
  0x6e   : > { %1318 = vmatpush1.msra.mxu0 %v10895_v46  ;;  %1351 = vmatprep.mubr.f32.mxu0 %v10654_v38 }
  0x6f   : > { %1389 = vmatpush1.msra.mxu1 %v10895_v46  ;;  %1422 = vmatprep.mubr.f32.mxu1 %v10654_v38 }
  0x70   : > { %10071 = vmatmul.mubr.msk.f32.vlgmr.msra.gmra.mxu0 %vm329_vm0, %v10838_v37  ;;  %10072 = vmatmul.mubr.msk.f32.vlgmr.msra.gmra.mxu1 %vm329_vm0, %v10963_v56  ;;  %v11592_v37 = vld [vmem:[%s13063_s1 + $0xa8] sm:$0xff]  ;;  %v11668_v56 = vld [vmem:[%s13063_s1 + $0xd8] sm:$0xff] }
  0x71   : > { %1461 = vmatprep.subr.mxu0 %v10907_v48  ;;  %1536 = vmatprep.subr.mxu1 %v10907_v48 }
  0x72   : > { %1462 = vmatpush1.msra.mxu0 %v10914_v49  ;;  %1537 = vmatpush1.msra.mxu1 %v10914_v49 }
  0x73   : > { %1463 = vmatprep.subr.mxu0 %v10921_v50  ;;  %1538 = vmatprep.subr.mxu1 %v10921_v50 }
  0x74   : > { %1464 = vmatpush1.msra.mxu0 %v10928_v51  ;;  %1539 = vmatpush1.msra.mxu1 %v10928_v51 }
  0x75   : > { %1465 = vmatprep.subr.mxu0 %v10935_v52  ;;  %1540 = vmatprep.subr.mxu1 %v10935_v52 }
  0x76   : > { %1466 = vmatpush1.msra.mxu0 %v10942_v53  ;;  %1541 = vmatpush1.msra.mxu1 %v10942_v53 }
  0x77   : > { %1467 = vmatprep.subr.mxu0 %v10949_v54  ;;  %1542 = vmatprep.subr.mxu1 %v10949_v54 }
  0x78   : > { %1468 = vmatpush1.msra.mxu0 %v10956_v55  ;;  %1501 = vmatprep.mubr.f32.mxu0 %v10654_v38 }
  0x79   : > { %1543 = vmatpush1.msra.mxu1 %v10956_v55  ;;  %1576 = vmatprep.mubr.f32.mxu1 %v10654_v38 }
  0x7a   : > { %10081 = vmatmul.mubr.msk.f32.vlgmr.msra.gmra.mxu0 %vm329_vm0, %v11028_v1  ;;  %10083 = vmatmul.mubr.msk.f32.vlgmr.msra.gmra.mxu1 %vm329_vm0, %v11093_v10 }
  0x7b   : > { %1619 = vmatprep.subr.mxu0 %v10970_v57  ;;  %1695 = vmatprep.subr.mxu1 %v10970_v57 }
  0x7c   : > { %1620 = vmatpush1.msra.mxu0 %v10977_v58  ;;  %1696 = vmatpush1.msra.mxu1 %v10977_v58 }
  0x7d   : > { %1621 = vmatprep.subr.mxu0 %v10986_v59  ;;  %1697 = vmatprep.subr.mxu1 %v10986_v59 }
  0x7e   : > { %1622 = vmatpush1.msra.mxu0 %v10993_v60  ;;  %1698 = vmatpush1.msra.mxu1 %v10993_v60 }
  0x7f   : > { %1623 = vmatprep.subr.mxu0 %v11000_v61  ;;  %1699 = vmatprep.subr.mxu1 %v11000_v61 }
  0x80   : > { %1624 = vmatpush1.msra.mxu0 %v11007_v62  ;;  %1700 = vmatpush1.msra.mxu1 %v11007_v62 }
  0x81   : > { %1625 = vmatprep.subr.mxu0 %v11014_v63  ;;  %1701 = vmatprep.subr.mxu1 %v11014_v63 }
  0x82   : > { %1626 = vmatpush1.msra.mxu0 %v11021_v0  ;;  %1659 = vmatprep.mubr.f32.mxu0 %v10654_v38 }
  0x83   : > { %1702 = vmatpush1.msra.mxu1 %v11021_v0  ;;  %1735 = vmatprep.mubr.f32.mxu1 %v10654_v38 }
  0x84   : > { %10092 = vmatmul.mubr.msk.f32.vlgmr.msra.gmra.mxu0 %vm329_vm0, %v11093_v10  ;;  %10094 = vmatmul.mubr.msk.f32.vlgmr.msra.gmra.mxu1 %vm329_vm0, %v11184_v11 }
  0x85   : > { %1778 = vmatprep.subr.mxu0 %v11035_v2  ;;  %1854 = vmatprep.subr.mxu1 %v11035_v2 }
  0x86   : > { %1779 = vmatpush1.msra.mxu0 %v11042_v3  ;;  %1855 = vmatpush1.msra.mxu1 %v11042_v3 }
  0x87   : > { %1780 = vmatprep.subr.mxu0 %v11051_v4  ;;  %1856 = vmatprep.subr.mxu1 %v11051_v4 }
  0x88   : > { %1781 = vmatpush1.msra.mxu0 %v11058_v5  ;;  %1857 = vmatpush1.msra.mxu1 %v11058_v5 }
  0x89   : > { %1782 = vmatprep.subr.mxu0 %v11065_v6  ;;  %1858 = vmatprep.subr.mxu1 %v11065_v6 }
  0x8a   : > { %1783 = vmatpush1.msra.mxu0 %v11072_v7  ;;  %1859 = vmatpush1.msra.mxu1 %v11072_v7 }
  0x8b   : > { %1784 = vmatprep.subr.mxu0 %v11079_v8  ;;  %1860 = vmatprep.subr.mxu1 %v11079_v8 }
  0x8c   : > { %1785 = vmatpush1.msra.mxu0 %v11086_v9  ;;  %1818 = vmatprep.mubr.f32.mxu0 %v10654_v38 }
  0x8d   : > { %1861 = vmatpush1.msra.mxu1 %v11086_v9  ;;  %1894 = vmatprep.mubr.f32.mxu1 %v10654_v38 }
  0x8e   : > { %10103 = vmatmul.mubr.msk.f32.vlgmr.msra.gmra.mxu0 %vm329_vm0, %v11184_v11  ;;  %10105 = vmatmul.mubr.msk.f32.vlgmr.msra.gmra.mxu1 %vm329_vm0, %v11209_v12 }
  0x8f   : > { %1957 = vmatprep.subr.mxu0 %v10780_v28  ;;  %2032 = vmatprep.subr.mxu1 %v10780_v28 }
  0x90   : > { %1958 = vmatpush1.msra.mxu0 %v10785_v29  ;;  %2033 = vmatpush1.msra.mxu1 %v10785_v29 }
  0x91   : > { %1959 = vmatprep.subr.mxu0 %v10790_v30  ;;  %2034 = vmatprep.subr.mxu1 %v10790_v30 }
  0x92   : > { %1960 = vmatpush1.msra.mxu0 %v10798_v31  ;;  %2035 = vmatpush1.msra.mxu1 %v10798_v31 }
  0x93   : > { %1961 = vmatprep.subr.mxu0 %v10807_v32  ;;  %2036 = vmatprep.subr.mxu1 %v10807_v32 }
  0x94   : > { %1962 = vmatpush1.msra.mxu0 %v10814_v33  ;;  %2037 = vmatpush1.msra.mxu1 %v10814_v33 }
  0x95   : > { %1963 = vmatprep.subr.mxu0 %v10821_v34  ;;  %2038 = vmatprep.subr.mxu1 %v10821_v34 }
  0x96   : > { %1964 = vmatpush1.msra.mxu0 %v10828_v35  ;;  %1997 = vmatprep.mubr.f32.mxu0 %v10654_v38 }
  0x97   : > { %2039 = vmatpush1.msra.mxu1 %v10828_v35  ;;  %2072 = vmatprep.mubr.f32.mxu1 %v10654_v38 }
  0x98   : > { %10117 = vmatmul.mubr.msk.f32.vlgmr.msra.gmra.mxu0 %vm329_vm0, %v11093_v10  ;;  %10119 = vmatmul.mubr.msk.f32.vlgmr.msra.gmra.mxu1 %vm329_vm0, %v11184_v11 }
  0x99   : > { %2106 = vmatprep.subr.mxu0 %v10845_v39  ;;  %2177 = vmatprep.subr.mxu1 %v10845_v39 }
  0x9a   : > { %2107 = vmatpush1.msra.mxu0 %v10852_v40  ;;  %2178 = vmatpush1.msra.mxu1 %v10852_v40 }
  0x9b   : > { %2108 = vmatprep.subr.mxu0 %v10860_v41  ;;  %2179 = vmatprep.subr.mxu1 %v10860_v41 }
  0x9c   : > { %2109 = vmatpush1.msra.mxu0 %v10867_v42  ;;  %2180 = vmatpush1.msra.mxu1 %v10867_v42 }
  0x9d   : > { %2110 = vmatprep.subr.mxu0 %v10874_v43  ;;  %2181 = vmatprep.subr.mxu1 %v10874_v43 }
  0x9e   : > { %2111 = vmatpush1.msra.mxu0 %v10881_v44  ;;  %2182 = vmatpush1.msra.mxu1 %v10881_v44 }
  0x9f   : > { %2112 = vmatprep.subr.mxu0 %v10888_v45  ;;  %2183 = vmatprep.subr.mxu1 %v10888_v45 }
  0xa0   : > { %2113 = vmatpush1.msra.mxu0 %v10895_v46  ;;  %2146 = vmatprep.mubr.f32.mxu0 %v10654_v38 }
  0xa1   : > { %2184 = vmatpush1.msra.mxu1 %v10895_v46  ;;  %2217 = vmatprep.mubr.f32.mxu1 %v10654_v38 }
  0xa2   : > { %10120 = vmatmul.mubr.msk.f32.vlgmr.msra.gmra.mxu0 %vm329_vm0, %v11028_v1  ;;  %10121 = vmatmul.mubr.msk.f32.vlgmr.msra.gmra.mxu1 %vm329_vm0, %v11093_v10  ;;  %v11703_v1 = vld [vmem:[%s13063_s1 + $0x138] sm:$0xff] }
  0xa3   : > { %2256 = vmatprep.subr.mxu0 %v10907_v48  ;;  %2331 = vmatprep.subr.mxu1 %v10907_v48 }
  0xa4   : > { %2257 = vmatpush1.msra.mxu0 %v10914_v49  ;;  %2332 = vmatpush1.msra.mxu1 %v10914_v49 }
  0xa5   : > { %2258 = vmatprep.subr.mxu0 %v10921_v50  ;;  %2333 = vmatprep.subr.mxu1 %v10921_v50 }
  0xa6   : > { %2259 = vmatpush1.msra.mxu0 %v10928_v51  ;;  %2334 = vmatpush1.msra.mxu1 %v10928_v51 }
  0xa7   : > { %2260 = vmatprep.subr.mxu0 %v10935_v52  ;;  %2335 = vmatprep.subr.mxu1 %v10935_v52 }
  0xa8   : > { %2261 = vmatpush1.msra.mxu0 %v10942_v53  ;;  %2336 = vmatpush1.msra.mxu1 %v10942_v53 }
  0xa9   : > { %2262 = vmatprep.subr.mxu0 %v10949_v54  ;;  %2337 = vmatprep.subr.mxu1 %v10949_v54 }
  0xaa   : > { %2263 = vmatpush1.msra.mxu0 %v10956_v55  ;;  %2296 = vmatprep.mubr.f32.mxu0 %v10654_v38 }
  0xab   : > { %2338 = vmatpush1.msra.mxu1 %v10956_v55  ;;  %2371 = vmatprep.mubr.f32.mxu1 %v10654_v38 }
  0xac   : > { %10130 = vmatmul.mubr.msk.f32.vlgmr.msra.gmra.mxu0 %vm329_vm0, %v11184_v11  ;;  %10132 = vmatmul.mubr.msk.f32.vlgmr.msra.gmra.mxu1 %vm329_vm0, %v11209_v12 }
  0xad   : > { %2414 = vmatprep.subr.mxu0 %v10970_v57  ;;  %2490 = vmatprep.subr.mxu1 %v10970_v57 }
  0xae   : > { %2415 = vmatpush1.msra.mxu0 %v10977_v58  ;;  %2491 = vmatpush1.msra.mxu1 %v10977_v58 }
  0xaf   : > { %2416 = vmatprep.subr.mxu0 %v10986_v59  ;;  %2492 = vmatprep.subr.mxu1 %v10986_v59 }
  0xb0   : > { %2417 = vmatpush1.msra.mxu0 %v10993_v60  ;;  %2493 = vmatpush1.msra.mxu1 %v10993_v60 }
  0xb1   : > { %2418 = vmatprep.subr.mxu0 %v11000_v61  ;;  %2494 = vmatprep.subr.mxu1 %v11000_v61 }
  0xb2   : > { %2419 = vmatpush1.msra.mxu0 %v11007_v62  ;;  %2495 = vmatpush1.msra.mxu1 %v11007_v62 }
  0xb3   : > { %2420 = vmatprep.subr.mxu0 %v11014_v63  ;;  %2496 = vmatprep.subr.mxu1 %v11014_v63 }
  0xb4   : > { %2421 = vmatpush1.msra.mxu0 %v11021_v0  ;;  %2454 = vmatprep.mubr.f32.mxu0 %v10654_v38 }
  0xb5   : > { %2497 = vmatpush1.msra.mxu1 %v11021_v0  ;;  %2530 = vmatprep.mubr.f32.mxu1 %v10654_v38 }
  0xb6   : > { %10141 = vmatmul.mubr.msk.f32.vlgmr.msra.gmra.mxu0 %vm329_vm0, %v11209_v12  ;;  %10143 = vmatmul.mubr.msk.f32.vlgmr.msra.gmra.mxu1 %vm329_vm0, %v11300_v13 }
  0xb7   : > { %2573 = vmatprep.subr.mxu0 %v11035_v2  ;;  %2649 = vmatprep.subr.mxu1 %v11035_v2 }
  0xb8   : > { %2574 = vmatpush1.msra.mxu0 %v11042_v3  ;;  %2650 = vmatpush1.msra.mxu1 %v11042_v3 }
  0xb9   : > { %2575 = vmatprep.subr.mxu0 %v11051_v4  ;;  %2651 = vmatprep.subr.mxu1 %v11051_v4 }
  0xba   : > { %2576 = vmatpush1.msra.mxu0 %v11058_v5  ;;  %2652 = vmatpush1.msra.mxu1 %v11058_v5 }
  0xbb   : > { %2577 = vmatprep.subr.mxu0 %v11065_v6  ;;  %2653 = vmatprep.subr.mxu1 %v11065_v6 }
  0xbc   : > { %2578 = vmatpush1.msra.mxu0 %v11072_v7  ;;  %2654 = vmatpush1.msra.mxu1 %v11072_v7 }
  0xbd   : > { %2579 = vmatprep.subr.mxu0 %v11079_v8  ;;  %2655 = vmatprep.subr.mxu1 %v11079_v8 }
  0xbe   : > { %2580 = vmatpush1.msra.mxu0 %v11086_v9  ;;  %2613 = vmatprep.mubr.f32.mxu0 %v10654_v38 }
  0xbf   : > { %2656 = vmatpush1.msra.mxu1 %v11086_v9  ;;  %2689 = vmatprep.mubr.f32.mxu1 %v10654_v38 }
  0xc0   : > { %10152 = vmatmul.mubr.msk.f32.vlgmr.msra.gmra.mxu0 %vm329_vm0, %v11300_v13  ;;  %10154 = vmatmul.mubr.msk.f32.vlgmr.msra.gmra.mxu1 %vm329_vm0, %v11325_v14 }
  0xc1   : > { %2752 = vmatprep.subr.mxu0 %v10780_v28  ;;  %2827 = vmatprep.subr.mxu1 %v10780_v28  ;;  %v11533_v28 = vld [vmem:[%s13063_s1 + $0x20] sm:$0xff] }
  0xc2   : > { %2753 = vmatpush1.msra.mxu0 %v10785_v29  ;;  %2828 = vmatpush1.msra.mxu1 %v10785_v29  ;;  %v11540_v29 = vld [vmem:[%s13063_s1 + $0x18] sm:$0xff] }
  0xc3   : > { %2754 = vmatprep.subr.mxu0 %v10790_v30  ;;  %2829 = vmatprep.subr.mxu1 %v10790_v30  ;;  %v11547_v30 = vld [vmem:[%s13063_s1 + $0x10] sm:$0xff] }
  0xc4   : > { %2755 = vmatpush1.msra.mxu0 %v10798_v31  ;;  %2830 = vmatpush1.msra.mxu1 %v10798_v31  ;;  %v11554_v31 = vld [vmem:[%s13063_s1 + $0x8] sm:$0xff] }
  0xc5   : > { %2756 = vmatprep.subr.mxu0 %v10807_v32  ;;  %2831 = vmatprep.subr.mxu1 %v10807_v32  ;;  %v11561_v32 = vld [vmem:[%s13063_s1] sm:$0xff] }
  0xc6   : > { %2757 = vmatpush1.msra.mxu0 %v10814_v33  ;;  %2832 = vmatpush1.msra.mxu1 %v10814_v33  ;;  %v11572_v33 = vld [vmem:[%s13063_s1 + $0xb8] sm:$0xff] }
  0xc7   : > { %2758 = vmatprep.subr.mxu0 %v10821_v34  ;;  %2833 = vmatprep.subr.mxu1 %v10821_v34 }
  0xc8   : > { %2759 = vmatpush1.msra.mxu0 %v10828_v35  ;;  %2792 = vmatprep.mubr.f32.mxu0 %v10654_v38 }
  0xc9   : > { %2834 = vmatpush1.msra.mxu1 %v10828_v35  ;;  %2867 = vmatprep.mubr.f32.mxu1 %v10654_v38 }
  0xca   : > { %10166 = vmatmul.mubr.msk.f32.vlgmr.msra.gmra.mxu0 %vm329_vm0, %v11209_v12  ;;  %10168 = vmatmul.mubr.msk.f32.vlgmr.msra.gmra.mxu1 %vm329_vm0, %v11300_v13 }
  0xcb   : > { %2901 = vmatprep.subr.mxu0 %v10845_v39  ;;  %2972 = vmatprep.subr.mxu1 %v10845_v39  ;;  %v11599_v39 = vld [vmem:[%s13063_s1 + $0xa0] sm:$0xff] }
  0xcc   : > { %2902 = vmatpush1.msra.mxu0 %v10852_v40  ;;  %2973 = vmatpush1.msra.mxu1 %v10852_v40  ;;  %v11606_v40 = vld [vmem:[%s13063_s1 + $0x98] sm:$0xff] }
  0xcd   : > { %2903 = vmatprep.subr.mxu0 %v10860_v41  ;;  %2974 = vmatprep.subr.mxu1 %v10860_v41 }
  0xce   : > { %2904 = vmatpush1.msra.mxu0 %v10867_v42  ;;  %2975 = vmatpush1.msra.mxu1 %v10867_v42 }
  0xcf   : > { %2905 = vmatprep.subr.mxu0 %v10874_v43  ;;  %2976 = vmatprep.subr.mxu1 %v10874_v43  ;;  %v11613_v43 = vld [vmem:[%s13063_s1 + $0x90] sm:$0xff] }
  0xd0   : > { %2906 = vmatpush1.msra.mxu0 %v10881_v44  ;;  %2977 = vmatpush1.msra.mxu1 %v10881_v44  ;;  %v11620_v44 = vld [vmem:[%s13063_s1 + $0x88] sm:$0xff] }
  0xd1   : > { %2907 = vmatprep.subr.mxu0 %v10888_v45  ;;  %2978 = vmatprep.subr.mxu1 %v10888_v45 }
  0xd2   : > { %2908 = vmatpush1.msra.mxu0 %v10895_v46  ;;  %2941 = vmatprep.mubr.f32.mxu0 %v10654_v38 }
  0xd3   : > { %2979 = vmatpush1.msra.mxu1 %v10895_v46  ;;  %3012 = vmatprep.mubr.f32.mxu1 %v10654_v38 }
  0xd4   : > { %10169 = vmatmul.mubr.msk.f32.vlgmr.msra.gmra.mxu0 %vm329_vm0, %v11184_v11  ;;  %10170 = vmatmul.mubr.msk.f32.vlgmr.msra.gmra.mxu1 %vm329_vm0, %v11209_v12  ;;  %v11728_v11 = vld [vmem:[%s13063_s1 + $0x120] sm:$0xff] }
  0xd5   : > { %3051 = vmatprep.subr.mxu0 %v10907_v48  ;;  %3126 = vmatprep.subr.mxu1 %v10907_v48  ;;  %v11638_v48 = vld [vmem:[%s13063_s1 + $0xf8] sm:$0xff] }
  0xd6   : > { %3052 = vmatpush1.msra.mxu0 %v10914_v49  ;;  %3127 = vmatpush1.msra.mxu1 %v10914_v49 }
  0xd7   : > { %3053 = vmatprep.subr.mxu0 %v10921_v50  ;;  %3128 = vmatprep.subr.mxu1 %v10921_v50 }
  0xd8   : > { %3054 = vmatpush1.msra.mxu0 %v10928_v51  ;;  %3129 = vmatpush1.msra.mxu1 %v10928_v51  ;;  %v11645_v51 = vld [vmem:[%s13063_s1 + $0xf0] sm:$0xff] }
  0xd9   : > { %3055 = vmatprep.subr.mxu0 %v10935_v52  ;;  %3130 = vmatprep.subr.mxu1 %v10935_v52  ;;  %v11654_v52 = vld [vmem:[%s13063_s1 + $0xe8] sm:$0xff] }
  0xda   : > { %3056 = vmatpush1.msra.mxu0 %v10942_v53  ;;  %3131 = vmatpush1.msra.mxu1 %v10942_v53 }
  0xdb   : > { %3057 = vmatprep.subr.mxu0 %v10949_v54  ;;  %3132 = vmatprep.subr.mxu1 %v10949_v54 }
  0xdc   : > { %3058 = vmatpush1.msra.mxu0 %v10956_v55  ;;  %3091 = vmatprep.mubr.f32.mxu0 %v10654_v38 }
  0xdd   : > { %3133 = vmatpush1.msra.mxu1 %v10956_v55  ;;  %3166 = vmatprep.mubr.f32.mxu1 %v10654_v38  ;;  %v11661_v55 = vld [vmem:[%s13063_s1 + $0xe0] sm:$0xff] }
  0xde   : > { %10179 = vmatmul.mubr.msk.f32.vlgmr.msra.gmra.mxu0 %vm329_vm0, %v11300_v13  ;;  %10181 = vmatmul.mubr.msk.f32.vlgmr.msra.gmra.mxu1 %vm329_vm0, %v11325_v14 }
  0xdf   : > { %3209 = vmatprep.subr.mxu0 %v10970_v57  ;;  %3285 = vmatprep.subr.mxu1 %v10970_v57  ;;  %v11675_v57 = vld [vmem:[%s13063_s1 + $0xd0] sm:$0xff] }
  0xe0   : > { %3210 = vmatpush1.msra.mxu0 %v10977_v58  ;;  %3286 = vmatpush1.msra.mxu1 %v10977_v58  ;;  %13077 = vst [vmem:[#allocation4_spill] sm:$0xff] %v11675_v57  ;;  %v11682_v58 = vld [vmem:[%s13063_s1 + $0xc8] sm:$0xff] }
  0xe1   : > { %3211 = vmatprep.subr.mxu0 %v10986_v59  ;;  %3287 = vmatprep.subr.mxu1 %v10986_v59  ;;  %13078 = vst [vmem:[#allocation5_spill] sm:$0xff] %v11682_v58 }
  0xe2   : > { %3212 = vmatpush1.msra.mxu0 %v10993_v60  ;;  %3288 = vmatpush1.msra.mxu1 %v10993_v60 }
  0xe3   : > { %3213 = vmatprep.subr.mxu0 %v11000_v61  ;;  %3289 = vmatprep.subr.mxu1 %v11000_v61  ;;  %v11689_v61 = vld [vmem:[%s13063_s1 + $0xc0] sm:$0xff] }
  0xe4   : > { %3214 = vmatpush1.msra.mxu0 %v11007_v62  ;;  %3290 = vmatpush1.msra.mxu1 %v11007_v62  ;;  %13079 = vst [vmem:[#allocation6_spill] sm:$0xff] %v11689_v61 }
  0xe5   : > { %3215 = vmatprep.subr.mxu0 %v11014_v63  ;;  %3291 = vmatprep.subr.mxu1 %v11014_v63 }
  0xe6   : > { %3216 = vmatpush1.msra.mxu0 %v11021_v0  ;;  %3249 = vmatprep.mubr.f32.mxu0 %v10654_v38 }
  0xe7   : > { %3292 = vmatpush1.msra.mxu1 %v11021_v0  ;;  %3325 = vmatprep.mubr.f32.mxu1 %v10654_v38  ;;  %v11696_v0 = vld [vmem:[%s10834_s26 + $0x60] sm:$0xff] }
  0xe8   : > { %10190 = vmatmul.mubr.msk.f32.vlgmr.msra.gmra.mxu0 %vm329_vm0, %v11325_v14  ;;  %10192 = vmatmul.mubr.msk.f32.vlgmr.msra.gmra.mxu1 %vm329_vm0, %v11416_v15 }
  0xe9   : > { %3368 = vmatprep.subr.mxu0 %v11035_v2  ;;  %3444 = vmatprep.subr.mxu1 %v11035_v2 }
  0xea   : > { %3369 = vmatpush1.msra.mxu0 %v11042_v3  ;;  %3445 = vmatpush1.msra.mxu1 %v11042_v3  ;;  %v11711_v3 = vld [vmem:[%s13063_s1 + $0x130] sm:$0xff] }
  0xeb   : > { %3370 = vmatprep.subr.mxu0 %v11051_v4  ;;  %3446 = vmatprep.subr.mxu1 %v11051_v4 }
  0xec   : > { %3371 = vmatpush1.msra.mxu0 %v11058_v5  ;;  %3447 = vmatpush1.msra.mxu1 %v11058_v5 }
  0xed   : > { %3372 = vmatprep.subr.mxu0 %v11065_v6  ;;  %3448 = vmatprep.subr.mxu1 %v11065_v6 }
  0xee   : > { %3373 = vmatpush1.msra.mxu0 %v11072_v7  ;;  %3449 = vmatpush1.msra.mxu1 %v11072_v7  ;;  %v11721_v7 = vld [vmem:[%s13063_s1 + $0x128] sm:$0xff] }
  0xef   : > { %3374 = vmatprep.subr.mxu0 %v11079_v8  ;;  %3450 = vmatprep.subr.mxu1 %v11079_v8 }
  0xf0   : > { %3375 = vmatpush1.msra.mxu0 %v11086_v9  ;;  %3408 = vmatprep.mubr.f32.mxu0 %v10654_v38 }
  0xf1   : > { %3451 = vmatpush1.msra.mxu1 %v11086_v9  ;;  %3484 = vmatprep.mubr.f32.mxu1 %v10654_v38 }
  0xf2   : > { %10201 = vmatmul.mubr.msk.f32.vlgmr.msra.gmra.mxu0 %vm329_vm0, %v11416_v15  ;;  %10203 = vmatmul.mubr.msk.f32.vlgmr.msra.gmra.mxu1 %vm329_vm0, %v11441_v16 }
  0xf3   : > { %3547 = vmatprep.subr.mxu0 %v11448_v17  ;;  %3622 = vmatprep.subr.mxu1 %v11448_v17 }
  0xf4   : > { %3548 = vmatpush1.msra.mxu0 %v11455_v18  ;;  %3623 = vmatpush1.msra.mxu1 %v11455_v18  ;;  %v11574_v34 = vpop.f32.mrf.mxu0  ;;  %v11576_v35 = vpop.f32.mrf.mxu1 }
  0xf5   : > { %3549 = vmatprep.subr.mxu0 %v11464_v19  ;;  %3624 = vmatprep.subr.mxu1 %v11464_v19 }
  0xf6   : > { %3550 = vmatpush1.msra.mxu0 %v11471_v20  ;;  %3625 = vmatpush1.msra.mxu1 %v11471_v20  ;;  %v401_v41 = vpop.f32.mrf.mxu0  ;;  %v477_v42 = vpop.f32.mrf.mxu1 }
  0xf7   : > { %3551 = vmatprep.subr.mxu0 %v11478_v21  ;;  %3626 = vmatprep.subr.mxu1 %v11478_v21 }
  0xf8   : > { %3552 = vmatpush1.msra.mxu0 %v11485_v22  ;;  %3627 = vmatpush1.msra.mxu1 %v11485_v22 }
  0xf9   : > { %3553 = vmatprep.subr.mxu0 %v11492_v23  ;;  %3628 = vmatprep.subr.mxu1 %v11492_v23 }
  0xfa   : > { %3554 = vmatpush1.msra.mxu0 %v11499_v24  ;;  %3587 = vmatprep.mubr.f32.mxu0 %v10654_v38 }
  0xfb   : > { %3629 = vmatpush1.msra.mxu1 %v11499_v24  ;;  %3662 = vmatprep.mubr.f32.mxu1 %v10654_v38 }
  0xfc   : > { %10215 = vmatmul.mubr.msk.f32.vlgmr.msra.gmra.mxu0 %vm329_vm0, %v11325_v14  ;;  %10217 = vmatmul.mubr.msk.f32.vlgmr.msra.gmra.mxu1 %vm329_vm0, %v11416_v15 }
  0xfd   : > { %3696 = vmatprep.subr.mxu0 %v11510_v25  ;;  %3767 = vmatprep.subr.mxu1 %v11510_v25 }
  0xfe   : > { %3697 = vmatpush1.msra.mxu0 %v11517_v26  ;;  %3768 = vmatpush1.msra.mxu1 %v11517_v26  ;;  %v549_v45 = vpop.f32.mrf.mxu0  ;;  %v620_v46 = vpop.f32.mrf.mxu1 }
  0xff   : > { %3698 = vmatprep.subr.mxu0 %v11526_v27  ;;  %3769 = vmatprep.subr.mxu1 %v11526_v27  ;;  %v550_v2 = vadd.f32 %v549_v45, %v11574_v34  ;;  %v621_v4 = vadd.f32 %v620_v46, %v11576_v35  ;;  %v11735_v34 = vld [vmem:[%s13063_s1 + $0x118] sm:$0xff]  ;;  %v11742_v45 = vld [vmem:[%s13063_s1 + $0x110] sm:$0xff] }
 0x100   : > { %3699 = vmatpush1.msra.mxu0 %v11533_v28  ;;  %3770 = vmatpush1.msra.mxu1 %v11533_v28  ;;  %v551_v49 = vpop.f32.mrf.mxu0  ;;  %v622_v50 = vpop.f32.mrf.mxu1 }
 0x101   : > { %3700 = vmatprep.subr.mxu0 %v11540_v29  ;;  %3771 = vmatprep.subr.mxu1 %v11540_v29  ;;  %v552_v5 = vadd.f32 %v551_v49, %v401_v41  ;;  %v623_v6 = vadd.f32 %v622_v50, %v477_v42 }
 0x102   : > { %3701 = vmatpush1.msra.mxu0 %v11547_v30  ;;  %3772 = vmatpush1.msra.mxu1 %v11547_v30 }
 0x103   : > { %3702 = vmatprep.subr.mxu0 %v11554_v31  ;;  %3773 = vmatprep.subr.mxu1 %v11554_v31 }
 0x104   : > { %3703 = vmatpush1.msra.mxu0 %v11561_v32  ;;  %3736 = vmatprep.mubr.f32.mxu0 %v10654_v38 }
 0x105   : > { %3774 = vmatpush1.msra.mxu1 %v11561_v32  ;;  %3807 = vmatprep.mubr.f32.mxu1 %v10654_v38 }
 0x106   : > { %10218 = vmatmul.mubr.msk.f32.vlgmr.msra.gmra.mxu0 %vm329_vm0, %v11300_v13  ;;  %10219 = vmatmul.mubr.msk.f32.vlgmr.msra.gmra.mxu1 %vm329_vm0, %v11325_v14 }
 0x107   : > { %3846 = vmatprep.subr.mxu0 %v11572_v33  ;;  %3921 = vmatprep.subr.mxu1 %v11572_v33 }
 0x108   : > { %3847 = vmatpush1.msra.mxu0 %v11583_v36  ;;  %3922 = vmatpush1.msra.mxu1 %v11583_v36  ;;  %v700_v53 = vpop.f32.mrf.mxu0  ;;  %v776_v54 = vpop.f32.mrf.mxu1 }
 0x109   : > { %3848 = vmatprep.subr.mxu0 %v11592_v37  ;;  %3923 = vmatprep.subr.mxu1 %v11592_v37  ;;  %v781_v8 = vadd.f32 %v700_v53, %v550_v2  ;;  %v783_v12 = vadd.f32 %v776_v54, %v621_v4  ;;  %v11749_v53 = vld [vmem:[%s13063_s1 + $0x108] sm:$0xff] }
 0x10a   : > { %3849 = vmatpush1.msra.mxu0 %v11599_v39  ;;  %3924 = vmatpush1.msra.mxu1 %v11599_v39  ;;  %v702_v59 = vpop.f32.mrf.mxu0  ;;  %v778_v60 = vpop.f32.mrf.mxu1 }
 0x10b   : > { %3850 = vmatprep.subr.mxu0 %v11606_v40  ;;  %3925 = vmatprep.subr.mxu1 %v11606_v40  ;;  %v782_v13 = vadd.f32 %v702_v59, %v552_v5  ;;  %v784_v14 = vadd.f32 %v778_v60, %v623_v6  ;;  %v11763_v5 = vld [vmem:[%s10834_s26 + $0x68] sm:$0xff] }
 0x10c   : > { %3851 = vmatpush1.msra.mxu0 %v11613_v43  ;;  %3926 = vmatpush1.msra.mxu1 %v11613_v43 }
 0x10d   : > { %3852 = vmatprep.subr.mxu0 %v11620_v44  ;;  %3927 = vmatprep.subr.mxu1 %v11620_v44 }
 0x10e   : > { %3853 = vmatpush1.msra.mxu0 %v11627_v47  ;;  %3886 = vmatprep.mubr.f32.mxu0 %v10654_v38 }
 0x10f   : > { %3928 = vmatpush1.msra.mxu1 %v11627_v47  ;;  %3961 = vmatprep.mubr.f32.mxu1 %v10654_v38 }
 0x110   : > { %10228 = vmatmul.mubr.msk.f32.vlgmr.msra.gmra.mxu0 %vm329_vm0, %v11416_v15  ;;  %10230 = vmatmul.mubr.msk.f32.vlgmr.msra.gmra.mxu1 %vm329_vm0, %v11441_v16 }
 0x111   : > { %4004 = vmatprep.subr.mxu0 %v11638_v48  ;;  %4080 = vmatprep.subr.mxu1 %v11638_v48 }
 0x112   : > { %4005 = vmatpush1.msra.mxu0 %v11645_v51  ;;  %4081 = vmatpush1.msra.mxu1 %v11645_v51  ;;  %v860_v62 = vpop.f32.mrf.mxu0  ;;  %v936_v63 = vpop.f32.mrf.mxu1 }
 0x113   : > { %4006 = vmatprep.subr.mxu0 %v11654_v52  ;;  %4082 = vmatprep.subr.mxu1 %v11654_v52  ;;  %v941_v35 = vadd.f32 %v860_v62, %v781_v8  ;;  %v943_v46 = vadd.f32 %v936_v63, %v783_v12  ;;  %v11756_v62 = vld [vmem:[%s13063_s1 + $0x100] sm:$0xff] }
 0x114   : > { %4007 = vmatpush1.msra.mxu0 %v11661_v55  ;;  %4083 = vmatpush1.msra.mxu1 %v11661_v55  ;;  %v862_v9 = vpop.f32.mrf.mxu0  ;;  %v938_v10 = vpop.f32.mrf.mxu1 }
 0x115   : > { %4008 = vmatprep.subr.mxu0 %v11668_v56  ;;  %4084 = vmatprep.subr.mxu1 %v11668_v56  ;;  %v942_v49 = vadd.f32 %v862_v9, %v782_v13  ;;  %v944_v50 = vadd.f32 %v938_v10, %v784_v14  ;;  %v11772_v9 = vld [vmem:[%s13064_s2] ss:$0 sm:$0xff] }
 0x116   : > { %4009 = vmatpush1.msra.mxu0 %v11675_v57  ;;  %4085 = vmatpush1.msra.mxu1 %v11675_v57 }
 0x117   : > { %4010 = vmatprep.subr.mxu0 %v11682_v58  ;;  %4086 = vmatprep.subr.mxu1 %v11682_v58 }
 0x118   : > { %4011 = vmatpush1.msra.mxu0 %v11689_v61  ;;  %4044 = vmatprep.mubr.f32.mxu0 %v10654_v38 }
 0x119   : > { %4087 = vmatpush1.msra.mxu1 %v11689_v61  ;;  %4120 = vmatprep.mubr.f32.mxu1 %v10654_v38 }
 0x11a   : > { %10239 = vmatmul.mubr.msk.f32.vlgmr.msra.gmra.mxu0 %vm329_vm0, %v11441_v16  ;;  %10241 = vmatmul.mubr.msk.f32.vlgmr.msra.gmra.mxu1 %vm329_vm0, %v11696_v0 }
 0x11b   : > { %4163 = vmatprep.subr.mxu0 %v11703_v1  ;;  %4239 = vmatprep.subr.mxu1 %v11703_v1 }
 0x11c   : > { %4164 = vmatpush1.msra.mxu0 %v11711_v3  ;;  %4240 = vmatpush1.msra.mxu1 %v11711_v3  ;;  %v1020_v41 = vpop.f32.mrf.mxu0  ;;  %v1096_v42 = vpop.f32.mrf.mxu1 }
 0x11d   : > { %4165 = vmatprep.subr.mxu0 %v11721_v7  ;;  %4241 = vmatprep.subr.mxu1 %v11721_v7  ;;  %v1101_v54 = vadd.f32 %v1020_v41, %v941_v35  ;;  %v1103_v63 = vadd.f32 %v1096_v42, %v943_v46 }
 0x11e   : > { %4166 = vmatpush1.msra.mxu0 %v11728_v11  ;;  %4242 = vmatpush1.msra.mxu1 %v11728_v11  ;;  %v1022_v59 = vpop.f32.mrf.mxu0  ;;  %v1098_v60 = vpop.f32.mrf.mxu1 }
 0x11f   : > { %4167 = vmatprep.subr.mxu0 %v11735_v34  ;;  %4243 = vmatprep.subr.mxu1 %v11735_v34  ;;  %v1102_v2 = vadd.f32 %v1022_v59, %v942_v49  ;;  %v1104_v4 = vadd.f32 %v1098_v60, %v944_v50 }
 0x120   : > { %4168 = vmatpush1.msra.mxu0 %v11742_v45  ;;  %4244 = vmatpush1.msra.mxu1 %v11742_v45 }
 0x121   : > { %4169 = vmatprep.subr.mxu0 %v11749_v53  ;;  %4245 = vmatprep.subr.mxu1 %v11749_v53  ;;  %v1105_v6 = vmax.f32 %v1101_v54, %v1102_v2  ;;  %v1106_v8 = vmax.f32 %v1103_v63, %v1104_v4  ;;  %v11865_v4 = vld [vmem:[%s10834_s26 + $0x70] sm:$0xff] }
 0x122   : > { %4170 = vmatpush1.msra.mxu0 %v11756_v62  ;;  %4203 = vmatprep.mubr.f32.mxu0 %v10654_v38 }
 0x123   : > { %4246 = vmatpush1.msra.mxu1 %v11756_v62  ;;  %4279 = vmatprep.mubr.f32.mxu1 %v10654_v38  ;;  %v1107_v10 = vmax.f32 %v1105_v6, %v1106_v8 }
 0x124   : > { %10250 = vmatmul.mubr.msk.f32.vlgmr.msra.gmra.mxu0 %vm329_vm0, %v11696_v0  ;;  %10252 = vmatmul.mubr.msk.f32.vlgmr.msra.gmra.mxu1 %vm329_vm0, %v11763_v5 }
 0x125   : > { %4342 = vmatprep.subr.mxu0 %v11448_v17  ;;  %4417 = vmatprep.subr.mxu1 %v11448_v17  ;;  %v1114_v12 = vadd.f32 %v11772_v9, %v1107_v10 }
 0x126   : > { %4343 = vmatpush1.msra.mxu0 %v11455_v18  ;;  %4418 = vmatpush1.msra.mxu1 %v11455_v18  ;;  %v1204_v14 = vpop.f32.mrf.mxu0  ;;  %v1279_v35 = vpop.f32.mrf.mxu1 }
 0x127   : > { %4344 = vmatprep.subr.mxu0 %v11464_v19  ;;  %4419 = vmatprep.subr.mxu1 %v11464_v19  ;;  %v1115_v13 = vmax.f32 %v1114_v12, 0.0 }
 0x128   : > { %4345 = vmatpush1.msra.mxu0 %v11471_v20  ;;  %4420 = vmatpush1.msra.mxu1 %v11471_v20  ;;  %v1206_v41 = vpop.f32.mrf.mxu0  ;;  %v1281_v42 = vpop.f32.mrf.mxu1 }
 0x129   : > { %4346 = vmatprep.subr.mxu0 %v11478_v21  ;;  %4421 = vmatprep.subr.mxu1 %v11478_v21  ;;  %1116 = vst [vmem:[%s11791_s12] sm:$0xff] %v1115_v13 }
 0x12a   : > { %4347 = vmatpush1.msra.mxu0 %v11485_v22  ;;  %4422 = vmatpush1.msra.mxu1 %v11485_v22 }
 0x12b   : > { %4348 = vmatprep.subr.mxu0 %v11492_v23  ;;  %4423 = vmatprep.subr.mxu1 %v11492_v23 }
 0x12c   : > { %4349 = vmatpush1.msra.mxu0 %v11499_v24  ;;  %4382 = vmatprep.mubr.f32.mxu0 %v10654_v38 }
 0x12d   : > { %4424 = vmatpush1.msra.mxu1 %v11499_v24  ;;  %4457 = vmatprep.mubr.f32.mxu1 %v10654_v38 }
 0x12e   : > { %10264 = vmatmul.mubr.msk.f32.vlgmr.msra.gmra.mxu0 %vm329_vm0, %v11441_v16  ;;  %10266 = vmatmul.mubr.msk.f32.vlgmr.msra.gmra.mxu1 %vm329_vm0, %v11696_v0 }
 0x12f   : > { %4491 = vmatprep.subr.mxu0 %v11510_v25  ;;  %4562 = vmatprep.subr.mxu1 %v11510_v25 }
 0x130   : > { %4492 = vmatpush1.msra.mxu0 %v11517_v26  ;;  %4563 = vmatpush1.msra.mxu1 %v11517_v26 }
 0x131   : > { %4493 = vmatprep.subr.mxu0 %v11526_v27  ;;  %4564 = vmatprep.subr.mxu1 %v11526_v27 }
 0x132   : > { %4494 = vmatpush1.msra.mxu0 %v11533_v28  ;;  %4565 = vmatpush1.msra.mxu1 %v11533_v28 }
 0x133   : > { %4495 = vmatprep.subr.mxu0 %v11540_v29  ;;  %4566 = vmatprep.subr.mxu1 %v11540_v29 }
 0x134   : > { %4496 = vmatpush1.msra.mxu0 %v11547_v30  ;;  %4567 = vmatpush1.msra.mxu1 %v11547_v30 }
 0x135   : > { %4497 = vmatprep.subr.mxu0 %v11554_v31  ;;  %4568 = vmatprep.subr.mxu1 %v11554_v31 }
 0x136   : > { %4498 = vmatpush1.msra.mxu0 %v11561_v32  ;;  %4531 = vmatprep.mubr.f32.mxu0 %v10654_v38 }
 0x137   : > { %4569 = vmatpush1.msra.mxu1 %v11561_v32  ;;  %4602 = vmatprep.mubr.f32.mxu1 %v10654_v38 }
 0x138   : > { %10267 = vmatmul.mubr.msk.f32.vlgmr.msra.gmra.mxu0 %vm329_vm0, %v11416_v15  ;;  %10268 = vmatmul.mubr.msk.f32.vlgmr.msra.gmra.mxu1 %vm329_vm0, %v11441_v16  ;;  %v1353_v15 = vpop.f32.mrf.mxu0  ;;  %v1424_v16 = vpop.f32.mrf.mxu1 }
 0x139   : > { %4641 = vmatprep.subr.mxu0 %v11572_v33  ;;  %4716 = vmatprep.subr.mxu1 %v11572_v33  ;;  %v1354_v6 = vadd.f32 %v1353_v15, %v1204_v14  ;;  %v1425_v8 = vadd.f32 %v1424_v16, %v1279_v35 }
 0x13a   : > { %4642 = vmatpush1.msra.mxu0 %v11583_v36  ;;  %4717 = vmatpush1.msra.mxu1 %v11583_v36  ;;  %v1355_v46 = vpop.f32.mrf.mxu0  ;;  %v1426_v49 = vpop.f32.mrf.mxu1 }
 0x13b   : > { %4643 = vmatprep.subr.mxu0 %v11592_v37  ;;  %4718 = vmatprep.subr.mxu1 %v11592_v37  ;;  %v1356_v10 = vadd.f32 %v1355_v46, %v1206_v41  ;;  %v1427_v12 = vadd.f32 %v1426_v49, %v1281_v42 }
 0x13c   : > { %4644 = vmatpush1.msra.mxu0 %v11599_v39  ;;  %4719 = vmatpush1.msra.mxu1 %v11599_v39  ;;  %v1503_v50 = vpop.f32.mrf.mxu0  ;;  %v1578_v54 = vpop.f32.mrf.mxu1 }
 0x13d   : > { %4645 = vmatprep.subr.mxu0 %v11606_v40  ;;  %4720 = vmatprep.subr.mxu1 %v11606_v40  ;;  %v1583_v13 = vadd.f32 %v1503_v50, %v1354_v6  ;;  %v1585_v14 = vadd.f32 %v1578_v54, %v1425_v8 }
 0x13e   : > { %4646 = vmatpush1.msra.mxu0 %v11613_v43  ;;  %4721 = vmatpush1.msra.mxu1 %v11613_v43  ;;  %v1505_v59 = vpop.f32.mrf.mxu0  ;;  %v1580_v60 = vpop.f32.mrf.mxu1 }
 0x13f   : > { %4647 = vmatprep.subr.mxu0 %v11620_v44  ;;  %4722 = vmatprep.subr.mxu1 %v11620_v44  ;;  %v1584_v15 = vadd.f32 %v1505_v59, %v1356_v10 }
 0x140   : > { %4648 = vmatpush1.msra.mxu0 %v11627_v47  ;;  %4681 = vmatprep.mubr.f32.mxu0 %v10654_v38 }
 0x141   : > { %4723 = vmatpush1.msra.mxu1 %v11627_v47  ;;  %4756 = vmatprep.mubr.f32.mxu1 %v10654_v38 }
 0x142   : > { %10277 = vmatmul.mubr.msk.f32.vlgmr.msra.gmra.mxu0 %vm329_vm0, %v11696_v0  ;;  %10279 = vmatmul.mubr.msk.f32.vlgmr.msra.gmra.mxu1 %vm329_vm0, %v11763_v5 }
 0x143   : > { %4799 = vmatprep.subr.mxu0 %v11638_v48  ;;  %4875 = vmatprep.subr.mxu1 %v11638_v48 }
 0x144   : > { %4800 = vmatpush1.msra.mxu0 %v11645_v51  ;;  %4876 = vmatpush1.msra.mxu1 %v11645_v51  ;;  %v1661_v63 = vpop.f32.mrf.mxu0  ;;  %v1737_v2 = vpop.f32.mrf.mxu1 }
 0x145   : > { %4801 = vmatprep.subr.mxu0 %v11654_v52  ;;  %4877 = vmatprep.subr.mxu1 %v11654_v52  ;;  %v1742_v35 = vadd.f32 %v1661_v63, %v1583_v13  ;;  %v1744_v16 = vadd.f32 %v1737_v2, %v1585_v14 }
 0x146   : > { %4802 = vmatpush1.msra.mxu0 %v11661_v55  ;;  %4878 = vmatpush1.msra.mxu1 %v11661_v55 }
 0x147   : > { %4803 = vmatprep.subr.mxu0 %v11668_v56  ;;  %4879 = vmatprep.subr.mxu1 %v11668_v56 }
 0x148   : > { %4804 = vmatpush1.msra.mxu0 %v11675_v57  ;;  %4880 = vmatpush1.msra.mxu1 %v11675_v57  ;;  %v1739_v57 = vpop.f32.mrf.mxu1 }
 0x149   : > { %4805 = vmatprep.subr.mxu0 %v11682_v58  ;;  %4881 = vmatprep.subr.mxu1 %v11682_v58  ;;  %v1663_v58 = vpop.f32.mrf.mxu0 }
 0x14a   : > { %4806 = vmatpush1.msra.mxu0 %v11689_v61  ;;  %4839 = vmatprep.mubr.f32.mxu0 %v10654_v38  ;;  %v1743_v46 = vadd.f32 %v1663_v58, %v1584_v15 }
 0x14b   : > { %4882 = vmatpush1.msra.mxu1 %v11689_v61  ;;  %4915 = vmatprep.mubr.f32.mxu1 %v10654_v38  ;;  %v1586_v61 = vadd.f32 %v1580_v60, %v1427_v12 }
 0x14c   : > { %10288 = vmatmul.mubr.msk.f32.vlgmr.msra.gmra.mxu0 %vm329_vm0, %v11763_v5  ;;  %10290 = vmatmul.mubr.msk.f32.vlgmr.msra.gmra.mxu1 %vm329_vm0, %v11865_v4 }
 0x14d   : > { %4958 = vmatprep.subr.mxu0 %v11703_v1  ;;  %5034 = vmatprep.subr.mxu1 %v11703_v1  ;;  %v1745_v49 = vadd.f32 %v1739_v57, %v1586_v61  ;;  %v11890_v57 = vld [vmem:[%s10834_s26 + $0x78] sm:$0xff] }
 0x14e   : > { %4959 = vmatpush1.msra.mxu0 %v11711_v3  ;;  %5035 = vmatpush1.msra.mxu1 %v11711_v3  ;;  %v1820_v41 = vpop.f32.mrf.mxu0  ;;  %v1896_v42 = vpop.f32.mrf.mxu1 }
 0x14f   : > { %4960 = vmatprep.subr.mxu0 %v11721_v7  ;;  %5036 = vmatprep.subr.mxu1 %v11721_v7  ;;  %v1901_v50 = vadd.f32 %v1820_v41, %v1742_v35  ;;  %v1903_v60 = vadd.f32 %v1896_v42, %v1744_v16 }
 0x150   : > { %4961 = vmatpush1.msra.mxu0 %v11728_v11  ;;  %5037 = vmatpush1.msra.mxu1 %v11728_v11  ;;  %v1822_v54 = vpop.f32.mrf.mxu0  ;;  %v1898_v59 = vpop.f32.mrf.mxu1 }
 0x151   : > { %4962 = vmatprep.subr.mxu0 %v11735_v34  ;;  %5038 = vmatprep.subr.mxu1 %v11735_v34  ;;  %v1902_v63 = vadd.f32 %v1822_v54, %v1743_v46  ;;  %v1904_v6 = vadd.f32 %v1898_v59, %v1745_v49  ;;  %v12031_v46 = vld [vmem:[%s13063_s1 + $0x68] sm:$0xff]  ;;  %v12053_v54 = vld [vmem:[%s13063_s1 + $0x50] sm:$0xff] }
 0x152   : > { %4963 = vmatpush1.msra.mxu0 %v11742_v45  ;;  %5039 = vmatpush1.msra.mxu1 %v11742_v45 }
 0x153   : > { %4964 = vmatprep.subr.mxu0 %v11749_v53  ;;  %5040 = vmatprep.subr.mxu1 %v11749_v53  ;;  %v1905_v58 = vmax.f32 %v1901_v50, %v1902_v63  ;;  %v1906_v61 = vmax.f32 %v1903_v60, %v1904_v6  ;;  %v12046_v50 = vld [vmem:[%s13063_s1 + $0x58] sm:$0xff]  ;;  %v12060_v60 = vld [vmem:[%s13063_s1 + $0x48] sm:$0xff]  ;;  %v12067_v63 = vld [vmem:[%s13063_s1 + $0x40] sm:$0xff] }
 0x154   : > { %4965 = vmatpush1.msra.mxu0 %v11756_v62  ;;  %4998 = vmatprep.mubr.f32.mxu0 %v10654_v38  ;;  %v12079_v6 = vld [vmem:[%s13063_s1 + $0x38] sm:$0xff] }
 0x155   : > { %5041 = vmatpush1.msra.mxu1 %v11756_v62  ;;  %5074 = vmatprep.mubr.f32.mxu1 %v10654_v38  ;;  %v1907_v2 = vmax.f32 %v1905_v58, %v1906_v61  ;;  %v12086_v58 = vld [vmem:[%s13063_s1 + $0x30] sm:$0xff]  ;;  %v12095_v61 = vld [vmem:[%s13063_s1 + $0x28] sm:$0xff] }
 0x156   : > { %10299 = vmatmul.mubr.msk.f32.vlgmr.msra.gmra.mxu0 %vm329_vm0, %v11865_v4  ;;  %10301 = vmatmul.mubr.msk.f32.vlgmr.msra.gmra.mxu1 %vm329_vm0, %v11890_v57 }
 0x157   : > { %5137 = vmatprep.subr.mxu0 %v11448_v17  ;;  %5212 = vmatprep.subr.mxu1 %v11448_v17  ;;  %v1908_v8 = vadd.f32 %v11772_v9, %v1907_v2  ;;  %v12102_v2 = vld [vmem:[%s13063_s1 + $0x20] sm:$0xff] }
 0x158   : > { %5138 = vmatpush1.msra.mxu0 %v11455_v18  ;;  %5213 = vmatpush1.msra.mxu1 %v11455_v18  ;;  %v1999_v17 = vpop.f32.mrf.mxu0  ;;  %v2074_v18 = vpop.f32.mrf.mxu1 }
 0x159   : > { %5139 = vmatprep.subr.mxu0 %v11464_v19  ;;  %5214 = vmatprep.subr.mxu1 %v11464_v19  ;;  %v1909_v10 = vmax.f32 %v1908_v8, 0.0  ;;  %v12109_v8 = vld [vmem:[%s13063_s1 + $0x18] sm:$0xff] }
 0x15a   : > { %5140 = vmatpush1.msra.mxu0 %v11471_v20  ;;  %5215 = vmatpush1.msra.mxu1 %v11471_v20  ;;  %v2001_v19 = vpop.f32.mrf.mxu0  ;;  %v2076_v20 = vpop.f32.mrf.mxu1 }
 0x15b   : > { %5141 = vmatprep.subr.mxu0 %v11478_v21  ;;  %5216 = vmatprep.subr.mxu1 %v11478_v21  ;;  %10106 = vst [vmem:[%s11791_s12 + $0x8] sm:$0xff] %v1909_v10  ;;  %v12116_v10 = vld [vmem:[%s13063_s1 + $0x10] sm:$0xff] }
 0x15c   : > { %5142 = vmatpush1.msra.mxu0 %v11485_v22  ;;  %5217 = vmatpush1.msra.mxu1 %v11485_v22 }
 0x15d   : > { %5143 = vmatprep.subr.mxu0 %v11492_v23  ;;  %5218 = vmatprep.subr.mxu1 %v11492_v23 }
 0x15e   : > { %5144 = vmatpush1.msra.mxu0 %v11499_v24  ;;  %5177 = vmatprep.mubr.f32.mxu0 %v10654_v38 }
 0x15f   : > { %5219 = vmatpush1.msra.mxu1 %v11499_v24  ;;  %5252 = vmatprep.mubr.f32.mxu1 %v10654_v38 }
 0x160   : > { %10313 = vmatmul.mubr.msk.f32.vlgmr.msra.gmra.mxu0 %vm329_vm0, %v11763_v5  ;;  %10315 = vmatmul.mubr.msk.f32.vlgmr.msra.gmra.mxu1 %vm329_vm0, %v11865_v4 }
 0x161   : > { %5286 = vmatprep.subr.mxu0 %v11510_v25  ;;  %5357 = vmatprep.subr.mxu1 %v11510_v25 }
 0x162   : > { %5287 = vmatpush1.msra.mxu0 %v11517_v26  ;;  %5358 = vmatpush1.msra.mxu1 %v11517_v26  ;;  %v2148_v21 = vpop.f32.mrf.mxu0  ;;  %v2219_v22 = vpop.f32.mrf.mxu1 }
 0x163   : > { %5288 = vmatprep.subr.mxu0 %v11526_v27  ;;  %5359 = vmatprep.subr.mxu1 %v11526_v27 }
 0x164   : > { %5289 = vmatpush1.msra.mxu0 %v11533_v28  ;;  %5360 = vmatpush1.msra.mxu1 %v11533_v28  ;;  %v2150_v23 = vpop.f32.mrf.mxu0  ;;  %v2221_v24 = vpop.f32.mrf.mxu1 }
 0x165   : > { %5290 = vmatprep.subr.mxu0 %v11540_v29  ;;  %5361 = vmatprep.subr.mxu1 %v11540_v29  ;;  %v13080_v29 = vld [vmem:[#allocation4_spill] sm:$0xff] }
 0x166   : > { %5291 = vmatpush1.msra.mxu0 %v11547_v30  ;;  %5362 = vmatpush1.msra.mxu1 %v11547_v30 }
 0x167   : > { %5292 = vmatprep.subr.mxu0 %v11554_v31  ;;  %5363 = vmatprep.subr.mxu1 %v11554_v31 }
 0x168   : > { %5293 = vmatpush1.msra.mxu0 %v11561_v32  ;;  %5326 = vmatprep.mubr.f32.mxu0 %v10654_v38 }
 0x169   : > { %5364 = vmatpush1.msra.mxu1 %v11561_v32  ;;  %5397 = vmatprep.mubr.f32.mxu1 %v10654_v38  ;;  %v13081_v32 = vld [vmem:[#allocation5_spill] sm:$0xff] }
 0x16a   : > { %10316 = vmatmul.mubr.msk.f32.vlgmr.msra.gmra.mxu0 %vm329_vm0, %v11696_v0  ;;  %10317 = vmatmul.mubr.msk.f32.vlgmr.msra.gmra.mxu1 %vm329_vm0, %v11763_v5 }
 0x16b   : > { %5436 = vmatprep.subr.mxu0 %v11572_v33  ;;  %5511 = vmatprep.subr.mxu1 %v11572_v33  ;;  %v11983_v33 = vld [vmem:[%s10834_s26 + $0x80] sm:$0xff] }
 0x16c   : > { %5437 = vmatpush1.msra.mxu0 %v11583_v36  ;;  %5512 = vmatpush1.msra.mxu1 %v11583_v36  ;;  %v2298_v25 = vpop.f32.mrf.mxu0  ;;  %v2373_v26 = vpop.f32.mrf.mxu1  ;;  %v13082_v36 = vld [vmem:[#allocation6_spill] sm:$0xff] }
 0x16d   : > { %5438 = vmatprep.subr.mxu0 %v11592_v37  ;;  %5513 = vmatprep.subr.mxu1 %v11592_v37  ;;  %v2149_v37 = vadd.f32 %v2148_v21, %v1999_v17  ;;  %v12123_v17 = vld [vmem:[%s13063_s1 + $0x8] sm:$0xff] }
 0x16e   : > { %5439 = vmatpush1.msra.mxu0 %v11599_v39  ;;  %5514 = vmatpush1.msra.mxu1 %v11599_v39  ;;  %v2300_v27 = vpop.f32.mrf.mxu0  ;;  %v2375_v28 = vpop.f32.mrf.mxu1  ;;  %v2220_v39 = vadd.f32 %v2219_v22, %v2074_v18  ;;  %v12130_v18 = vld [vmem:[%s13063_s1] sm:$0xff]  ;;  %v12152_v22 = vld [vmem:[%s13063_s1 + $0xb0] sm:$0xff] }
 0x16f   : > { %5440 = vmatprep.subr.mxu0 %v11606_v40  ;;  %5515 = vmatprep.subr.mxu1 %v11606_v40  ;;  %v2151_v40 = vadd.f32 %v2150_v23, %v2001_v19  ;;  %v12141_v19 = vld [vmem:[%s13063_s1 + $0xb8] sm:$0xff]  ;;  %v12161_v23 = vld [vmem:[%s13063_s1 + $0xa8] sm:$0xff] }
 0x170   : > { %5441 = vmatpush1.msra.mxu0 %v11613_v43  ;;  %5516 = vmatpush1.msra.mxu1 %v11613_v43  ;;  %v2222_v43 = vadd.f32 %v2221_v24, %v2076_v20  ;;  %v12168_v24 = vld [vmem:[%s13063_s1 + $0xa0] sm:$0xff] }
 0x171   : > { %5442 = vmatprep.subr.mxu0 %v11620_v44  ;;  %5517 = vmatprep.subr.mxu1 %v11620_v44  ;;  %v2378_v44 = vadd.f32 %v2298_v25, %v2149_v37  ;;  %v12214_v37 = vld [vmem:[%s13063_s1 + $0xf0] sm:$0xff] }
 0x172   : > { %5443 = vmatpush1.msra.mxu0 %v11627_v47  ;;  %5476 = vmatprep.mubr.f32.mxu0 %v10654_v38 }
 0x173   : > { %5518 = vmatpush1.msra.mxu1 %v11627_v47  ;;  %5551 = vmatprep.mubr.f32.mxu1 %v10654_v38 }
 0x174   : > { %10326 = vmatmul.mubr.msk.f32.vlgmr.msra.gmra.mxu0 %vm329_vm0, %v11865_v4  ;;  %10328 = vmatmul.mubr.msk.f32.vlgmr.msra.gmra.mxu1 %vm329_vm0, %v11890_v57 }
 0x175   : > { %5594 = vmatprep.subr.mxu0 %v11638_v48  ;;  %5670 = vmatprep.subr.mxu1 %v11638_v48 }
 0x176   : > { %5595 = vmatpush1.msra.mxu0 %v11645_v51  ;;  %5671 = vmatpush1.msra.mxu1 %v11645_v51  ;;  %v2456_v30 = vpop.f32.mrf.mxu0  ;;  %v2532_v31 = vpop.f32.mrf.mxu1  ;;  %v2380_v51 = vadd.f32 %v2373_v26, %v2220_v39  ;;  %v12182_v26 = vld [vmem:[%s13063_s1 + $0x90] sm:$0xff]  ;;  %v12223_v39 = vld [vmem:[%s13063_s1 + $0xe8] sm:$0xff] }
 0x177   : > { %5596 = vmatprep.subr.mxu0 %v11654_v52  ;;  %5672 = vmatprep.subr.mxu1 %v11654_v52  ;;  %v2379_v52 = vadd.f32 %v2300_v27, %v2151_v40  ;;  %v12189_v27 = vld [vmem:[%s13063_s1 + $0x88] sm:$0xff] }
 0x178   : > { %5597 = vmatpush1.msra.mxu0 %v11661_v55  ;;  %5673 = vmatpush1.msra.mxu1 %v11661_v55  ;;  %v2458_v47 = vpop.f32.mrf.mxu0  ;;  %v2534_v48 = vpop.f32.mrf.mxu1  ;;  %v2381_v55 = vadd.f32 %v2375_v28, %v2222_v43  ;;  %v2539_v12 = vadd.f32 %v2532_v31, %v2380_v51  ;;  %v12207_v31 = vld [vmem:[%s13063_s1 + $0xf8] sm:$0xff]  ;;  %v12251_v51 = vld [vmem:[%s13063_s1 + $0xc8] sm:$0xff] }
 0x179   : > { %5598 = vmatprep.subr.mxu0 %v11668_v56  ;;  %5674 = vmatprep.subr.mxu1 %v11668_v56  ;;  %v2537_v56 = vadd.f32 %v2456_v30, %v2378_v44  ;;  %v2538_v13 = vadd.f32 %v2458_v47, %v2379_v52  ;;  %v12196_v30 = vld [vmem:[%s13063_s1 + $0x80] sm:$0xff]  ;;  %v12237_v47 = vld [vmem:[%s13063_s1 + $0xd8] sm:$0xff]  ;;  %13083 = vst [vmem:[#allocation4_spill] sm:$0xff] %v12251_v51 }
 0x17a   : > { %5599 = vmatpush1.msra.mxu0 %v13080_v29  ;;  %5675 = vmatpush1.msra.mxu1 %v13080_v29  ;;  %v2540_v14 = vadd.f32 %v2534_v48, %v2381_v55  ;;  %v12230_v44 = vld [vmem:[%s13063_s1 + $0xe0] sm:$0xff]  ;;  %v12244_v48 = vld [vmem:[%s13063_s1 + $0xd0] sm:$0xff] }
 0x17b   : > { %5600 = vmatprep.subr.mxu0 %v13081_v32  ;;  %5676 = vmatprep.subr.mxu1 %v13081_v32 }
 0x17c   : > { %5601 = vmatpush1.msra.mxu0 %v13082_v36  ;;  %5634 = vmatprep.mubr.f32.mxu0 %v10654_v38 }
 0x17d   : > { %5677 = vmatpush1.msra.mxu1 %v13082_v36  ;;  %5710 = vmatprep.mubr.f32.mxu1 %v10654_v38 }
 0x17e   : > { %10337 = vmatmul.mubr.msk.f32.vlgmr.msra.gmra.mxu0 %vm329_vm0, %v11890_v57  ;;  %10339 = vmatmul.mubr.msk.f32.vlgmr.msra.gmra.mxu1 %vm329_vm0, %v11983_v33 }
 0x17f   : > { %5753 = vmatprep.subr.mxu0 %v11703_v1  ;;  %5829 = vmatprep.subr.mxu1 %v11703_v1 }
 0x180   : > { %5754 = vmatpush1.msra.mxu0 %v11711_v3  ;;  %5830 = vmatpush1.msra.mxu1 %v11711_v3  ;;  %v2615_v0 = vpop.f32.mrf.mxu0  ;;  %v2691_v5 = vpop.f32.mrf.mxu1 }
 0x181   : > { %5755 = vmatprep.subr.mxu0 %v11721_v7  ;;  %5831 = vmatprep.subr.mxu1 %v11721_v7  ;;  %v2696_v1 = vadd.f32 %v2615_v0, %v2537_v56  ;;  %v2698_v3 = vadd.f32 %v2691_v5, %v2539_v12  ;;  %v12008_v7 = vld [vmem:[%s10834_s26 + $0x88] sm:$0xff]  ;;  %v12258_v56 = vld [vmem:[%s13063_s1 + $0xc0] sm:$0xff]  ;;  %v12265_v12 = vld [vmem:[%s10834_s26 + $0x90] sm:$0xff] }
 0x182   : > { %5756 = vmatpush1.msra.mxu0 %v11728_v11  ;;  %5832 = vmatpush1.msra.mxu1 %v11728_v11  ;;  %v2617_v15 = vpop.f32.mrf.mxu0  ;;  %v2693_v35 = vpop.f32.mrf.mxu1  ;;  %13084 = vst [vmem:[#allocation5_spill] sm:$0xff] %v12258_v56 }
 0x183   : > { %5757 = vmatprep.subr.mxu0 %v11735_v34  ;;  %5833 = vmatprep.subr.mxu1 %v11735_v34  ;;  %v2697_v41 = vadd.f32 %v2617_v15, %v2538_v13  ;;  %v2699_v42 = vadd.f32 %v2693_v35, %v2540_v14  ;;  %v12015_v34 = vld [vmem:[%s13063_s1 + $0x78] sm:$0xff] }
 0x184   : > { %5758 = vmatpush1.msra.mxu0 %v11742_v45  ;;  %5834 = vmatpush1.msra.mxu1 %v11742_v45  ;;  %v12022_v45 = vld [vmem:[%s13063_s1 + $0x70] sm:$0xff]  ;;  %v12272_v13 = vld [vmem:[%s13063_s1 + $0x138] sm:$0xff] }
 0x185   : > { %5759 = vmatprep.subr.mxu0 %v11749_v53  ;;  %5835 = vmatprep.subr.mxu1 %v11749_v53  ;;  %v2700_v11 = vmax.f32 %v2696_v1, %v2697_v41  ;;  %v2701_v16 = vmax.f32 %v2698_v3, %v2699_v42  ;;  %v12280_v1 = vld [vmem:[%s13063_s1 + $0x130] sm:$0xff]  ;;  %v12290_v41 = vld [vmem:[%s13063_s1 + $0x128] sm:$0xff] }
 0x186   : > { %5760 = vmatpush1.msra.mxu0 %v11756_v62  ;;  %5793 = vmatprep.mubr.f32.mxu0 %v10654_v38 }
 0x187   : > { %5836 = vmatpush1.msra.mxu1 %v11756_v62  ;;  %5869 = vmatprep.mubr.f32.mxu1 %v10654_v38  ;;  %v2702_v53 = vmax.f32 %v2700_v11, %v2701_v16  ;;  %v12038_v62 = vld [vmem:[%s13063_s1 + $0x60] sm:$0xff] }
 0x188   : > { %10348 = vmatmul.mubr.msk.f32.vlgmr.msra.gmra.mxu0 %vm329_vm0, %v11983_v33  ;;  %10350 = vmatmul.mubr.msk.f32.vlgmr.msra.gmra.mxu1 %vm329_vm0, %v12008_v7 }
 0x189   : > { %5932 = vmatprep.subr.mxu0 %v12015_v34  ;;  %6007 = vmatprep.subr.mxu1 %v12015_v34  ;;  %v2703_v49 = vadd.f32 %v11772_v9, %v2702_v53  ;;  %v12297_v53 = vld [vmem:[%s13063_s1 + $0x120] sm:$0xff] }
 0x18a   : > { %5933 = vmatpush1.msra.mxu0 %v12022_v45  ;;  %6008 = vmatpush1.msra.mxu1 %v12022_v45  ;;  %v12143_v20 = vpop.f32.mrf.mxu0  ;;  %v12145_v21 = vpop.f32.mrf.mxu1 }
 0x18b   : > { %5934 = vmatprep.subr.mxu0 %v12031_v46  ;;  %6009 = vmatprep.subr.mxu1 %v12031_v46  ;;  %v2704_v59 = vmax.f32 %v2703_v49, 0.0 }
 0x18c   : > { %5935 = vmatpush1.msra.mxu0 %v12038_v62  ;;  %6010 = vmatpush1.msra.mxu1 %v12038_v62  ;;  %v2871_v25 = vpop.f32.mrf.mxu1 }
 0x18d   : > { %5936 = vmatprep.subr.mxu0 %v12046_v50  ;;  %6011 = vmatprep.subr.mxu1 %v12046_v50  ;;  %10155 = vst [vmem:[%s11791_s12 + $0x10] sm:$0xff] %v2704_v59 }
 0x18e   : > { %5937 = vmatpush1.msra.mxu0 %v12053_v54  ;;  %6012 = vmatpush1.msra.mxu1 %v12053_v54 }
 0x18f   : > { %5938 = vmatprep.subr.mxu0 %v12060_v60  ;;  %6013 = vmatprep.subr.mxu1 %v12060_v60 }
 0x190   : > { %5939 = vmatpush1.msra.mxu0 %v12067_v63  ;;  %5972 = vmatprep.mubr.f32.mxu0 %v10654_v38 }
 0x191   : > { %6014 = vmatpush1.msra.mxu1 %v12067_v63  ;;  %6047 = vmatprep.mubr.f32.mxu1 %v10654_v38 }
 0x192   : > { %10362 = vmatmul.mubr.msk.f32.vlgmr.msra.gmra.mxu0 %vm329_vm0, %v11890_v57  ;;  %10364 = vmatmul.mubr.msk.f32.vlgmr.msra.gmra.mxu1 %vm329_vm0, %v11983_v33 }
 0x193   : > { %6081 = vmatprep.subr.mxu0 %v12079_v6  ;;  %6152 = vmatprep.subr.mxu1 %v12079_v6 }
 0x194   : > { %6082 = vmatpush1.msra.mxu0 %v12086_v58  ;;  %6153 = vmatpush1.msra.mxu1 %v12086_v58  ;;  %v3014_v29 = vpop.f32.mrf.mxu1 }
 0x195   : > { %6083 = vmatprep.subr.mxu0 %v12095_v61  ;;  %6154 = vmatprep.subr.mxu1 %v12095_v61  ;;  %v3015_v15 = vadd.f32 %v3014_v29, %v12145_v21  ;;  %v12304_v21 = vld [vmem:[%s13063_s1 + $0x118] sm:$0xff]  ;;  %v12311_v29 = vld [vmem:[%s13063_s1 + $0x110] sm:$0xff] }
 0x196   : > { %6084 = vmatpush1.msra.mxu0 %v12102_v2  ;;  %6155 = vmatpush1.msra.mxu1 %v12102_v2  ;;  %v3016_v36 = vpop.f32.mrf.mxu1 }
 0x197   : > { %6085 = vmatprep.subr.mxu0 %v12109_v8  ;;  %6156 = vmatprep.subr.mxu1 %v12109_v8  ;;  %v3017_v3 = vadd.f32 %v3016_v36, %v2871_v25 }
 0x198   : > { %6086 = vmatpush1.msra.mxu0 %v12116_v10  ;;  %6157 = vmatpush1.msra.mxu1 %v12116_v10 }
 0x199   : > { %6087 = vmatprep.subr.mxu0 %v12123_v17  ;;  %6158 = vmatprep.subr.mxu1 %v12123_v17 }
 0x19a   : > { %6088 = vmatpush1.msra.mxu0 %v12130_v18  ;;  %6121 = vmatprep.mubr.f32.mxu0 %v10654_v38 }
 0x19b   : > { %6159 = vmatpush1.msra.mxu1 %v12130_v18  ;;  %6192 = vmatprep.mubr.f32.mxu1 %v10654_v38 }
 0x19c   : > { %10365 = vmatmul.mubr.msk.f32.vlgmr.msra.gmra.mxu0 %vm329_vm0, %v11865_v4  ;;  %10366 = vmatmul.mubr.msk.f32.vlgmr.msra.gmra.mxu1 %vm329_vm0, %v11890_v57  ;;  %v12175_v4 = vld [vmem:[%s13063_s1 + $0x98] sm:$0xff]  ;;  %v2796_v57 = vpop.f32.mrf.mxu0 }
 0x19d   : > { %6231 = vmatprep.subr.mxu0 %v12141_v19  ;;  %6306 = vmatprep.subr.mxu1 %v12141_v19 }
 0x19e   : > { %6232 = vmatpush1.msra.mxu0 %v12152_v22  ;;  %6307 = vmatpush1.msra.mxu1 %v12152_v22  ;;  %v2943_v28 = vpop.f32.mrf.mxu0  ;;  %v3168_v43 = vpop.f32.mrf.mxu1 }
 0x19f   : > { %6233 = vmatprep.subr.mxu0 %v12161_v23  ;;  %6308 = vmatprep.subr.mxu1 %v12161_v23  ;;  %v2944_v14 = vadd.f32 %v2943_v28, %v12143_v20  ;;  %v3175_v49 = vadd.f32 %v3168_v43, %v3015_v15  ;;  %v12318_v43 = vld [vmem:[%s13063_s1 + $0x108] sm:$0xff] }
 0x1a0   : > { %6234 = vmatpush1.msra.mxu0 %v12168_v24  ;;  %6309 = vmatpush1.msra.mxu1 %v12168_v24  ;;  %v2945_v32 = vpop.f32.mrf.mxu0  ;;  %v3170_v55 = vpop.f32.mrf.mxu1 }
 0x1a1   : > { %6235 = vmatprep.subr.mxu0 %v12175_v4  ;;  %6310 = vmatprep.subr.mxu1 %v12175_v4  ;;  %v2946_v35 = vadd.f32 %v2945_v32, %v2796_v57  ;;  %v3176_v20 = vadd.f32 %v3170_v55, %v3017_v3  ;;  %v12332_v3 = vld [vmem:[%s10834_s26 + $0x98] sm:$0xff] }
 0x1a2   : > { %6236 = vmatpush1.msra.mxu0 %v12182_v26  ;;  %6311 = vmatpush1.msra.mxu1 %v12182_v26  ;;  %v3093_v40 = vpop.f32.mrf.mxu0 }
 0x1a3   : > { %6237 = vmatprep.subr.mxu0 %v12189_v27  ;;  %6312 = vmatprep.subr.mxu1 %v12189_v27  ;;  %v3173_v42 = vadd.f32 %v3093_v40, %v2944_v14 }
 0x1a4   : > { %6238 = vmatpush1.msra.mxu0 %v12196_v30  ;;  %6271 = vmatprep.mubr.f32.mxu0 %v10654_v38  ;;  %v3095_v52 = vpop.f32.mrf.mxu0 }
 0x1a5   : > { %6313 = vmatpush1.msra.mxu1 %v12196_v30  ;;  %6346 = vmatprep.mubr.f32.mxu1 %v10654_v38  ;;  %v3174_v59 = vadd.f32 %v3095_v52, %v2946_v35 }
 0x1a6   : > { %10375 = vmatmul.mubr.msk.f32.vlgmr.msra.gmra.mxu0 %vm329_vm0, %v11983_v33  ;;  %10377 = vmatmul.mubr.msk.f32.vlgmr.msra.gmra.mxu1 %vm329_vm0, %v12008_v7 }
 0x1a7   : > { %6389 = vmatprep.subr.mxu0 %v12207_v31  ;;  %6465 = vmatprep.subr.mxu1 %v12207_v31 }
 0x1a8   : > { %6390 = vmatpush1.msra.mxu0 %v12214_v37  ;;  %6466 = vmatpush1.msra.mxu1 %v12214_v37  ;;  %v3251_v0 = vpop.f32.mrf.mxu0  ;;  %v3327_v5 = vpop.f32.mrf.mxu1 }
 0x1a9   : > { %6391 = vmatprep.subr.mxu0 %v12223_v39  ;;  %6467 = vmatprep.subr.mxu1 %v12223_v39  ;;  %v3332_v57 = vadd.f32 %v3251_v0, %v3173_v42  ;;  %v3334_v32 = vadd.f32 %v3327_v5, %v3175_v49  ;;  %v12325_v5 = vld [vmem:[%s13063_s1 + $0x100] sm:$0xff] }
 0x1aa   : > { %6392 = vmatpush1.msra.mxu0 %v12230_v44  ;;  %6468 = vmatpush1.msra.mxu1 %v12230_v44  ;;  %v3253_v11 = vpop.f32.mrf.mxu0  ;;  %v3329_v16 = vpop.f32.mrf.mxu1 }
 0x1ab   : > { %6393 = vmatprep.subr.mxu0 %v12237_v47  ;;  %6469 = vmatprep.subr.mxu1 %v12237_v47  ;;  %v3333_v36 = vadd.f32 %v3253_v11, %v3174_v59  ;;  %v3335_v40 = vadd.f32 %v3329_v16, %v3176_v20 }
 0x1ac   : > { %6394 = vmatpush1.msra.mxu0 %v12244_v48  ;;  %6470 = vmatpush1.msra.mxu1 %v12244_v48 }
 0x1ad   : > { %6395 = vmatprep.subr.mxu0 %v12251_v51  ;;  %6471 = vmatprep.subr.mxu1 %v12251_v51 }
 0x1ae   : > { %6396 = vmatpush1.msra.mxu0 %v12258_v56  ;;  %6429 = vmatprep.mubr.f32.mxu0 %v10654_v38 }
 0x1af   : > { %6472 = vmatpush1.msra.mxu1 %v12258_v56  ;;  %6505 = vmatprep.mubr.f32.mxu1 %v10654_v38 }
 0x1b0   : > { %10386 = vmatmul.mubr.msk.f32.vlgmr.msra.gmra.mxu0 %vm329_vm0, %v12008_v7  ;;  %10388 = vmatmul.mubr.msk.f32.vlgmr.msra.gmra.mxu1 %vm329_vm0, %v12265_v12 }
 0x1b1   : > { %6548 = vmatprep.subr.mxu0 %v12272_v13  ;;  %6624 = vmatprep.subr.mxu1 %v12272_v13 }
 0x1b2   : > { %6549 = vmatpush1.msra.mxu0 %v12280_v1  ;;  %6625 = vmatpush1.msra.mxu1 %v12280_v1  ;;  %v3410_v25 = vpop.f32.mrf.mxu0  ;;  %v3486_v28 = vpop.f32.mrf.mxu1 }
 0x1b3   : > { %6550 = vmatprep.subr.mxu0 %v12290_v41  ;;  %6626 = vmatprep.subr.mxu1 %v12290_v41  ;;  %v3491_v52 = vadd.f32 %v3410_v25, %v3332_v57  ;;  %v3493_v14 = vadd.f32 %v3486_v28, %v3334_v32 }
 0x1b4   : > { %6551 = vmatpush1.msra.mxu0 %v12297_v53  ;;  %6627 = vmatpush1.msra.mxu1 %v12297_v53  ;;  %v3412_v55 = vpop.f32.mrf.mxu0  ;;  %v3488_v0 = vpop.f32.mrf.mxu1 }
 0x1b5   : > { %6552 = vmatprep.subr.mxu0 %v12304_v21  ;;  %6628 = vmatprep.subr.mxu1 %v12304_v21  ;;  %v3492_v15 = vadd.f32 %v3412_v55, %v3333_v36  ;;  %v3494_v35 = vadd.f32 %v3488_v0, %v3335_v40 }
 0x1b6   : > { %6553 = vmatpush1.msra.mxu0 %v12311_v29  ;;  %6629 = vmatpush1.msra.mxu1 %v12311_v29 }
 0x1b7   : > { %6554 = vmatprep.subr.mxu0 %v12318_v43  ;;  %6630 = vmatprep.subr.mxu1 %v12318_v43  ;;  %v3495_v42 = vmax.f32 %v3491_v52, %v3492_v15  ;;  %v3496_v11 = vmax.f32 %v3493_v14, %v3494_v35  ;;  %v12425_v15 = vld [vmem:[%s10834_s26 + $0xa0] sm:$0xff] }
 0x1b8   : > { %6555 = vmatpush1.msra.mxu0 %v12325_v5  ;;  %6588 = vmatprep.mubr.f32.mxu0 %v10654_v38 }
 0x1b9   : > { %6631 = vmatpush1.msra.mxu1 %v12325_v5  ;;  %6664 = vmatprep.mubr.f32.mxu1 %v10654_v38  ;;  %v3497_v16 = vmax.f32 %v3495_v42, %v3496_v11 }
 0x1ba   : > { %10397 = vmatmul.mubr.msk.f32.vlgmr.msra.gmra.mxu0 %vm329_vm0, %v12265_v12  ;;  %10399 = vmatmul.mubr.msk.f32.vlgmr.msra.gmra.mxu1 %vm329_vm0, %v12332_v3 }
 0x1bb   : > { %6727 = vmatprep.subr.mxu0 %v12015_v34  ;;  %6802 = vmatprep.subr.mxu1 %v12015_v34  ;;  %v3498_v49 = vadd.f32 %v11772_v9, %v3497_v16 }
 0x1bc   : > { %6728 = vmatpush1.msra.mxu0 %v12022_v45  ;;  %6803 = vmatpush1.msra.mxu1 %v12022_v45  ;;  %v3589_v9 = vpop.f32.mrf.mxu0  ;;  %v3664_v20 = vpop.f32.mrf.mxu1 }
 0x1bd   : > { %6729 = vmatprep.subr.mxu0 %v12031_v46  ;;  %6804 = vmatprep.subr.mxu1 %v12031_v46  ;;  %v3499_v59 = vmax.f32 %v3498_v49, 0.0 }
 0x1be   : > { %6730 = vmatpush1.msra.mxu0 %v12038_v62  ;;  %6805 = vmatpush1.msra.mxu1 %v12038_v62  ;;  %v3591_v57 = vpop.f32.mrf.mxu0  ;;  %v3666_v25 = vpop.f32.mrf.mxu1 }
 0x1bf   : > { %6731 = vmatprep.subr.mxu0 %v12046_v50  ;;  %6806 = vmatprep.subr.mxu1 %v12046_v50  ;;  %10204 = vst [vmem:[%s11791_s12 + $0x18] sm:$0xff] %v3499_v59 }
 0x1c0   : > { %6732 = vmatpush1.msra.mxu0 %v12053_v54  ;;  %6807 = vmatpush1.msra.mxu1 %v12053_v54 }
 0x1c1   : > { %6733 = vmatprep.subr.mxu0 %v12060_v60  ;;  %6808 = vmatprep.subr.mxu1 %v12060_v60 }
 0x1c2   : > { %6734 = vmatpush1.msra.mxu0 %v12067_v63  ;;  %6767 = vmatprep.mubr.f32.mxu0 %v10654_v38 }
 0x1c3   : > { %6809 = vmatpush1.msra.mxu1 %v12067_v63  ;;  %6842 = vmatprep.mubr.f32.mxu1 %v10654_v38 }
 0x1c4   : > { %10411 = vmatmul.mubr.msk.f32.vlgmr.msra.gmra.mxu0 %vm329_vm0, %v12008_v7  ;;  %10413 = vmatmul.mubr.msk.f32.vlgmr.msra.gmra.mxu1 %vm329_vm0, %v12265_v12 }
 0x1c5   : > { %6876 = vmatprep.subr.mxu0 %v12079_v6  ;;  %6947 = vmatprep.subr.mxu1 %v12079_v6 }
 0x1c6   : > { %6877 = vmatpush1.msra.mxu0 %v12086_v58  ;;  %6948 = vmatpush1.msra.mxu1 %v12086_v58 }
 0x1c7   : > { %6878 = vmatprep.subr.mxu0 %v12095_v61  ;;  %6949 = vmatprep.subr.mxu1 %v12095_v61 }
 0x1c8   : > { %6879 = vmatpush1.msra.mxu0 %v12102_v2  ;;  %6950 = vmatpush1.msra.mxu1 %v12102_v2 }
 0x1c9   : > { %6880 = vmatprep.subr.mxu0 %v12109_v8  ;;  %6951 = vmatprep.subr.mxu1 %v12109_v8 }
 0x1ca   : > { %6881 = vmatpush1.msra.mxu0 %v12116_v10  ;;  %6952 = vmatpush1.msra.mxu1 %v12116_v10 }
 0x1cb   : > { %6882 = vmatprep.subr.mxu0 %v12123_v17  ;;  %6953 = vmatprep.subr.mxu1 %v12123_v17 }
 0x1cc   : > { %6883 = vmatpush1.msra.mxu0 %v12130_v18  ;;  %6916 = vmatprep.mubr.f32.mxu0 %v10654_v38 }
 0x1cd   : > { %6954 = vmatpush1.msra.mxu1 %v12130_v18  ;;  %6987 = vmatprep.mubr.f32.mxu1 %v10654_v38 }
 0x1ce   : > { %10414 = vmatmul.mubr.msk.f32.vlgmr.msra.gmra.mxu0 %vm329_vm0, %v11983_v33  ;;  %10415 = vmatmul.mubr.msk.f32.vlgmr.msra.gmra.mxu1 %vm329_vm0, %v12008_v7  ;;  %v3738_v33 = vpop.f32.mrf.mxu0  ;;  %v3809_v7 = vpop.f32.mrf.mxu1 }
 0x1cf   : > { %7026 = vmatprep.subr.mxu0 %v12141_v19  ;;  %7101 = vmatprep.subr.mxu1 %v12141_v19  ;;  %v3739_v35 = vadd.f32 %v3738_v33, %v3589_v9  ;;  %v3810_v42 = vadd.f32 %v3809_v7, %v3664_v20 }
 0x1d0   : > { %7027 = vmatpush1.msra.mxu0 %v12152_v22  ;;  %7102 = vmatpush1.msra.mxu1 %v12152_v22  ;;  %v3740_v28 = vpop.f32.mrf.mxu0  ;;  %v3811_v32 = vpop.f32.mrf.mxu1 }
 0x1d1   : > { %7028 = vmatprep.subr.mxu0 %v12161_v23  ;;  %7103 = vmatprep.subr.mxu1 %v12161_v23  ;;  %v3741_v11 = vadd.f32 %v3740_v28, %v3591_v57  ;;  %v3812_v16 = vadd.f32 %v3811_v32, %v3666_v25 }
 0x1d2   : > { %7029 = vmatpush1.msra.mxu0 %v12168_v24  ;;  %7104 = vmatpush1.msra.mxu1 %v12168_v24  ;;  %v3888_v36 = vpop.f32.mrf.mxu0  ;;  %v3963_v40 = vpop.f32.mrf.mxu1 }
 0x1d3   : > { %7030 = vmatprep.subr.mxu0 %v12175_v4  ;;  %7105 = vmatprep.subr.mxu1 %v12175_v4  ;;  %v3968_v49 = vadd.f32 %v3888_v36, %v3739_v35  ;;  %v3970_v9 = vadd.f32 %v3963_v40, %v3810_v42 }
 0x1d4   : > { %7031 = vmatpush1.msra.mxu0 %v12182_v26  ;;  %7106 = vmatpush1.msra.mxu1 %v12182_v26  ;;  %v3890_v52 = vpop.f32.mrf.mxu0  ;;  %v3965_v55 = vpop.f32.mrf.mxu1 }
 0x1d5   : > { %7032 = vmatprep.subr.mxu0 %v12189_v27  ;;  %7107 = vmatprep.subr.mxu1 %v12189_v27  ;;  %v3969_v33 = vadd.f32 %v3890_v52, %v3741_v11  ;;  %v12465_v11 = vld [vmem:[%s13064_s2] ss:$0 sm:$0xff] }
 0x1d6   : > { %7033 = vmatpush1.msra.mxu0 %v12196_v30  ;;  %7066 = vmatprep.mubr.f32.mxu0 %v10654_v38 }
 0x1d7   : > { %7108 = vmatpush1.msra.mxu1 %v12196_v30  ;;  %7141 = vmatprep.mubr.f32.mxu1 %v10654_v38 }
 0x1d8   : > { %10424 = vmatmul.mubr.msk.f32.vlgmr.msra.gmra.mxu0 %vm329_vm0, %v12265_v12  ;;  %10426 = vmatmul.mubr.msk.f32.vlgmr.msra.gmra.mxu1 %vm329_vm0, %v12332_v3 }
 0x1d9   : > { %7184 = vmatprep.subr.mxu0 %v12207_v31  ;;  %7260 = vmatprep.subr.mxu1 %v12207_v31 }
 0x1da   : > { %7185 = vmatpush1.msra.mxu0 %v12214_v37  ;;  %7261 = vmatpush1.msra.mxu1 %v12214_v37  ;;  %v4046_v0 = vpop.f32.mrf.mxu0  ;;  %v4122_v14 = vpop.f32.mrf.mxu1 }
 0x1db   : > { %7186 = vmatprep.subr.mxu0 %v12223_v39  ;;  %7262 = vmatprep.subr.mxu1 %v12223_v39  ;;  %v4127_v20 = vadd.f32 %v4046_v0, %v3968_v49  ;;  %v4129_v7 = vadd.f32 %v4122_v14, %v3970_v9 }
 0x1dc   : > { %7187 = vmatpush1.msra.mxu0 %v12230_v44  ;;  %7263 = vmatpush1.msra.mxu1 %v12230_v44  ;;  %v4048_v59 = vpop.f32.mrf.mxu0 }
 0x1dd   : > { %7188 = vmatprep.subr.mxu0 %v12237_v47  ;;  %7264 = vmatprep.subr.mxu1 %v12237_v47  ;;  %v4128_v28 = vadd.f32 %v4048_v59, %v3969_v33 }
 0x1de   : > { %7189 = vmatpush1.msra.mxu0 %v12244_v48  ;;  %7265 = vmatpush1.msra.mxu1 %v12244_v48 }
 0x1df   : > { %7190 = vmatprep.subr.mxu0 %v12251_v51  ;;  %7266 = vmatprep.subr.mxu1 %v12251_v51  ;;  %v4124_v51 = vpop.f32.mrf.mxu1 }
 0x1e0   : > { %7191 = vmatpush1.msra.mxu0 %v12258_v56  ;;  %7224 = vmatprep.mubr.f32.mxu0 %v10654_v38 }
 0x1e1   : > { %7267 = vmatpush1.msra.mxu1 %v12258_v56  ;;  %7300 = vmatprep.mubr.f32.mxu1 %v10654_v38  ;;  %v3971_v56 = vadd.f32 %v3965_v55, %v3812_v16 }
 0x1e2   : > { %10435 = vmatmul.mubr.msk.f32.vlgmr.msra.gmra.mxu0 %vm329_vm0, %v12332_v3  ;;  %10437 = vmatmul.mubr.msk.f32.vlgmr.msra.gmra.mxu1 %vm329_vm0, %v12425_v15 }
 0x1e3   : > { %7343 = vmatprep.subr.mxu0 %v12272_v13  ;;  %7419 = vmatprep.subr.mxu1 %v12272_v13  ;;  %v4130_v32 = vadd.f32 %v4124_v51, %v3971_v56  ;;  %v12450_v51 = vld [vmem:[%s10834_s26 + $0xa8] sm:$0xff] }
 0x1e4   : > { %7344 = vmatpush1.msra.mxu0 %v12280_v1  ;;  %7420 = vmatpush1.msra.mxu1 %v12280_v1  ;;  %v4205_v57 = vpop.f32.mrf.mxu0  ;;  %v4281_v25 = vpop.f32.mrf.mxu1 }
 0x1e5   : > { %7345 = vmatprep.subr.mxu0 %v12290_v41  ;;  %7421 = vmatprep.subr.mxu1 %v12290_v41  ;;  %v4286_v36 = vadd.f32 %v4205_v57, %v4127_v20  ;;  %v4288_v55 = vadd.f32 %v4281_v25, %v4129_v7  ;;  %v12596_v7 = vld [vmem:[%s13063_s1 + $0x68] sm:$0xff] }
 0x1e6   : > { %7346 = vmatpush1.msra.mxu0 %v12297_v53  ;;  %7422 = vmatpush1.msra.mxu1 %v12297_v53  ;;  %v4207_v40 = vpop.f32.mrf.mxu0  ;;  %v4283_v52 = vpop.f32.mrf.mxu1 }
 0x1e7   : > { %7347 = vmatprep.subr.mxu0 %v12304_v21  ;;  %7423 = vmatprep.subr.mxu1 %v12304_v21  ;;  %v4287_v0 = vadd.f32 %v4207_v40, %v4128_v28  ;;  %v4289_v35 = vadd.f32 %v4283_v52, %v4130_v32  ;;  %v12611_v32 = vld [vmem:[%s13063_s1 + $0x58] sm:$0xff]  ;;  %v12625_v52 = vld [vmem:[%s13063_s1 + $0x48] sm:$0xff] }
 0x1e8   : > { %7348 = vmatpush1.msra.mxu0 %v12311_v29  ;;  %7424 = vmatpush1.msra.mxu1 %v12311_v29 }
 0x1e9   : > { %7349 = vmatprep.subr.mxu0 %v12318_v43  ;;  %7425 = vmatprep.subr.mxu1 %v12318_v43  ;;  %v4290_v56 = vmax.f32 %v4286_v36, %v4287_v0  ;;  %v4291_v14 = vmax.f32 %v4288_v55, %v4289_v35  ;;  %v12618_v36 = vld [vmem:[%s13063_s1 + $0x50] sm:$0xff]  ;;  %v12632_v55 = vld [vmem:[%s13063_s1 + $0x40] sm:$0xff]  ;;  %v12644_v0 = vld [vmem:[%s13063_s1 + $0x38] sm:$0xff] }
 0x1ea   : > { %7350 = vmatpush1.msra.mxu0 %v12325_v5  ;;  %7383 = vmatprep.mubr.f32.mxu0 %v10654_v38  ;;  %v12651_v35 = vld [vmem:[%s13063_s1 + $0x30] sm:$0xff] }
 0x1eb   : > { %7426 = vmatpush1.msra.mxu1 %v12325_v5  ;;  %7459 = vmatprep.mubr.f32.mxu1 %v10654_v38  ;;  %v4292_v42 = vmax.f32 %v4290_v56, %v4291_v14  ;;  %v12660_v56 = vld [vmem:[%s13063_s1 + $0x28] sm:$0xff]  ;;  %v12667_v14 = vld [vmem:[%s13063_s1 + $0x20] sm:$0xff] }
 0x1ec   : > { %10446 = vmatmul.mubr.msk.f32.vlgmr.msra.gmra.mxu0 %vm329_vm0, %v12425_v15  ;;  %10448 = vmatmul.mubr.msk.f32.vlgmr.msra.gmra.mxu1 %vm329_vm0, %v12450_v51 }
 0x1ed   : > { %7522 = vmatprep.subr.mxu0 %v12015_v34  ;;  %7597 = vmatprep.subr.mxu1 %v12015_v34  ;;  %v4293_v16 = vadd.f32 %v12465_v11, %v4292_v42  ;;  %v12674_v42 = vld [vmem:[%s13063_s1 + $0x18] sm:$0xff] }
 0x1ee   : > { %7523 = vmatpush1.msra.mxu0 %v12022_v45  ;;  %7598 = vmatpush1.msra.mxu1 %v12022_v45  ;;  %v4384_v34 = vpop.f32.mrf.mxu0  ;;  %v4459_v45 = vpop.f32.mrf.mxu1 }
 0x1ef   : > { %7524 = vmatprep.subr.mxu0 %v12031_v46  ;;  %7599 = vmatprep.subr.mxu1 %v12031_v46  ;;  %v4294_v49 = vmax.f32 %v4293_v16, 0.0  ;;  %v12681_v16 = vld [vmem:[%s13063_s1 + $0x10] sm:$0xff] }
 0x1f0   : > { %7525 = vmatpush1.msra.mxu0 %v12038_v62  ;;  %7600 = vmatpush1.msra.mxu1 %v12038_v62  ;;  %v4386_v46 = vpop.f32.mrf.mxu0  ;;  %v4461_v62 = vpop.f32.mrf.mxu1 }
 0x1f1   : > { %7526 = vmatprep.subr.mxu0 %v12046_v50  ;;  %7601 = vmatprep.subr.mxu1 %v12046_v50  ;;  %10253 = vst [vmem:[%s11791_s12 + $0x20] sm:$0xff] %v4294_v49  ;;  %v12688_v49 = vld [vmem:[%s13063_s1 + $0x8] sm:$0xff] }
 0x1f2   : > { %7527 = vmatpush1.msra.mxu0 %v12053_v54  ;;  %7602 = vmatpush1.msra.mxu1 %v12053_v54 }
 0x1f3   : > { %7528 = vmatprep.subr.mxu0 %v12060_v60  ;;  %7603 = vmatprep.subr.mxu1 %v12060_v60 }
 0x1f4   : > { %7529 = vmatpush1.msra.mxu0 %v12067_v63  ;;  %7562 = vmatprep.mubr.f32.mxu0 %v10654_v38 }
 0x1f5   : > { %7604 = vmatpush1.msra.mxu1 %v12067_v63  ;;  %7637 = vmatprep.mubr.f32.mxu1 %v10654_v38 }
 0x1f6   : > { %10460 = vmatmul.mubr.msk.f32.vlgmr.msra.gmra.mxu0 %vm329_vm0, %v12332_v3  ;;  %10462 = vmatmul.mubr.msk.f32.vlgmr.msra.gmra.mxu1 %vm329_vm0, %v12425_v15 }
 0x1f7   : > { %7671 = vmatprep.subr.mxu0 %v12079_v6  ;;  %7742 = vmatprep.subr.mxu1 %v12079_v6 }
 0x1f8   : > { %7672 = vmatpush1.msra.mxu0 %v12086_v58  ;;  %7743 = vmatpush1.msra.mxu1 %v12086_v58  ;;  %v4533_v50 = vpop.f32.mrf.mxu0  ;;  %v4604_v54 = vpop.f32.mrf.mxu1 }
 0x1f9   : > { %7673 = vmatprep.subr.mxu0 %v12095_v61  ;;  %7744 = vmatprep.subr.mxu1 %v12095_v61 }
 0x1fa   : > { %7674 = vmatpush1.msra.mxu0 %v12102_v2  ;;  %7745 = vmatpush1.msra.mxu1 %v12102_v2  ;;  %v4535_v60 = vpop.f32.mrf.mxu0  ;;  %v4606_v63 = vpop.f32.mrf.mxu1 }
 0x1fb   : > { %7675 = vmatprep.subr.mxu0 %v12109_v8  ;;  %7746 = vmatprep.subr.mxu1 %v12109_v8 }
 0x1fc   : > { %7676 = vmatpush1.msra.mxu0 %v12116_v10  ;;  %7747 = vmatpush1.msra.mxu1 %v12116_v10 }
 0x1fd   : > { %7677 = vmatprep.subr.mxu0 %v12123_v17  ;;  %7748 = vmatprep.subr.mxu1 %v12123_v17  ;;  %v13085_v17 = vld [vmem:[#allocation4_spill] sm:$0xff] }
 0x1fe   : > { %7678 = vmatpush1.msra.mxu0 %v12130_v18  ;;  %7711 = vmatprep.mubr.f32.mxu0 %v10654_v38 }
 0x1ff   : > { %7749 = vmatpush1.msra.mxu1 %v12130_v18  ;;  %7782 = vmatprep.mubr.f32.mxu1 %v10654_v38  ;;  %v12548_v18 = vld [vmem:[%s10834_s26 + $0xb0] sm:$0xff] }
 0x200   : > { %10463 = vmatmul.mubr.msk.f32.vlgmr.msra.gmra.mxu0 %vm329_vm0, %v12265_v12  ;;  %10464 = vmatmul.mubr.msk.f32.vlgmr.msra.gmra.mxu1 %vm329_vm0, %v12332_v3 }
 0x201   : > { %7821 = vmatprep.subr.mxu0 %v12141_v19  ;;  %7896 = vmatprep.subr.mxu1 %v12141_v19  ;;  %v13086_v19 = vld [vmem:[#allocation5_spill] sm:$0xff] }
 0x202   : > { %7822 = vmatpush1.msra.mxu0 %v12152_v22  ;;  %7897 = vmatpush1.msra.mxu1 %v12152_v22  ;;  %v4683_v6 = vpop.f32.mrf.mxu0  ;;  %v4758_v58 = vpop.f32.mrf.mxu1  ;;  %v4534_v22 = vadd.f32 %v4533_v50, %v4384_v34  ;;  %v12695_v34 = vld [vmem:[%s13063_s1] sm:$0xff]  ;;  %v12717_v50 = vld [vmem:[%s13063_s1 + $0xb0] sm:$0xff] }
 0x203   : > { %7823 = vmatprep.subr.mxu0 %v12161_v23  ;;  %7898 = vmatprep.subr.mxu1 %v12161_v23  ;;  %v4605_v23 = vadd.f32 %v4604_v54, %v4459_v45  ;;  %v12706_v45 = vld [vmem:[%s13063_s1 + $0xb8] sm:$0xff]  ;;  %v12726_v54 = vld [vmem:[%s13063_s1 + $0xa8] sm:$0xff] }
 0x204   : > { %7824 = vmatpush1.msra.mxu0 %v12168_v24  ;;  %7899 = vmatpush1.msra.mxu1 %v12168_v24  ;;  %v4685_v61 = vpop.f32.mrf.mxu0  ;;  %v4760_v2 = vpop.f32.mrf.mxu1  ;;  %v4536_v24 = vadd.f32 %v4535_v60, %v4386_v46  ;;  %v12733_v60 = vld [vmem:[%s13063_s1 + $0xa0] sm:$0xff] }
 0x205   : > { %7825 = vmatprep.subr.mxu0 %v12175_v4  ;;  %7900 = vmatprep.subr.mxu1 %v12175_v4  ;;  %v4607_v4 = vadd.f32 %v4606_v63, %v4461_v62 }
 0x206   : > { %7826 = vmatpush1.msra.mxu0 %v12182_v26  ;;  %7901 = vmatpush1.msra.mxu1 %v12182_v26  ;;  %v4763_v26 = vadd.f32 %v4683_v6, %v4534_v22  ;;  %v12747_v6 = vld [vmem:[%s13063_s1 + $0x90] sm:$0xff] }
 0x207   : > { %7827 = vmatprep.subr.mxu0 %v12189_v27  ;;  %7902 = vmatprep.subr.mxu1 %v12189_v27  ;;  %v12779_v22 = vld [vmem:[%s13063_s1 + $0xf0] sm:$0xff] }
 0x208   : > { %7828 = vmatpush1.msra.mxu0 %v12196_v30  ;;  %7861 = vmatprep.mubr.f32.mxu0 %v10654_v38 }
 0x209   : > { %7903 = vmatpush1.msra.mxu1 %v12196_v30  ;;  %7936 = vmatprep.mubr.f32.mxu1 %v10654_v38 }
 0x20a   : > { %10473 = vmatmul.mubr.msk.f32.vlgmr.msra.gmra.mxu0 %vm329_vm0, %v12425_v15  ;;  %10475 = vmatmul.mubr.msk.f32.vlgmr.msra.gmra.mxu1 %vm329_vm0, %v12450_v51 }
 0x20b   : > { %7979 = vmatprep.subr.mxu0 %v12207_v31  ;;  %8055 = vmatprep.subr.mxu1 %v12207_v31  ;;  %v4765_v31 = vadd.f32 %v4758_v58, %v4605_v23  ;;  %v12754_v58 = vld [vmem:[%s13063_s1 + $0x88] sm:$0xff] }
 0x20c   : > { %7980 = vmatpush1.msra.mxu0 %v12214_v37  ;;  %8056 = vmatpush1.msra.mxu1 %v12214_v37  ;;  %v4841_v8 = vpop.f32.mrf.mxu0  ;;  %v4917_v10 = vpop.f32.mrf.mxu1  ;;  %v4764_v37 = vadd.f32 %v4685_v61, %v4536_v24  ;;  %v12788_v23 = vld [vmem:[%s13063_s1 + $0xe8] sm:$0xff] }
 0x20d   : > { %7981 = vmatprep.subr.mxu0 %v12223_v39  ;;  %8057 = vmatprep.subr.mxu1 %v12223_v39  ;;  %v4766_v39 = vadd.f32 %v4760_v2, %v4607_v4  ;;  %v4924_v12 = vadd.f32 %v4917_v10, %v4765_v31  ;;  %v12772_v10 = vld [vmem:[%s13063_s1 + $0xf8] sm:$0xff]  ;;  %v12816_v31 = vld [vmem:[%s13063_s1 + $0xc8] sm:$0xff] }
 0x20e   : > { %7982 = vmatpush1.msra.mxu0 %v12230_v44  ;;  %8058 = vmatpush1.msra.mxu1 %v12230_v44  ;;  %v4843_v27 = vpop.f32.mrf.mxu0  ;;  %v4919_v30 = vpop.f32.mrf.mxu1  ;;  %v4922_v44 = vadd.f32 %v4841_v8, %v4763_v26  ;;  %v12761_v8 = vld [vmem:[%s13063_s1 + $0x80] sm:$0xff] }
 0x20f   : > { %7983 = vmatprep.subr.mxu0 %v12237_v47  ;;  %8059 = vmatprep.subr.mxu1 %v12237_v47  ;;  %v4923_v3 = vadd.f32 %v4843_v27, %v4764_v37  ;;  %v4925_v59 = vadd.f32 %v4919_v30, %v4766_v39  ;;  %v12795_v26 = vld [vmem:[%s13063_s1 + $0xe0] sm:$0xff]  ;;  %v12802_v27 = vld [vmem:[%s13063_s1 + $0xd8] sm:$0xff]  ;;  %v12809_v30 = vld [vmem:[%s13063_s1 + $0xd0] sm:$0xff] }
 0x210   : > { %7984 = vmatpush1.msra.mxu0 %v12244_v48  ;;  %8060 = vmatpush1.msra.mxu1 %v12244_v48 }
 0x211   : > { %7985 = vmatprep.subr.mxu0 %v13085_v17  ;;  %8061 = vmatprep.subr.mxu1 %v13085_v17 }
 0x212   : > { %7986 = vmatpush1.msra.mxu0 %v13086_v19  ;;  %8019 = vmatprep.mubr.f32.mxu0 %v10654_v38 }
 0x213   : > { %8062 = vmatpush1.msra.mxu1 %v13086_v19  ;;  %8095 = vmatprep.mubr.f32.mxu1 %v10654_v38 }
 0x214   : > { %10484 = vmatmul.mubr.msk.f32.vlgmr.msra.gmra.mxu0 %vm329_vm0, %v12450_v51  ;;  %10486 = vmatmul.mubr.msk.f32.vlgmr.msra.gmra.mxu1 %vm329_vm0, %v12548_v18 }
 0x215   : > { %8138 = vmatprep.subr.mxu0 %v12272_v13  ;;  %8214 = vmatprep.subr.mxu1 %v12272_v13 }
 0x216   : > { %8139 = vmatpush1.msra.mxu0 %v12280_v1  ;;  %8215 = vmatpush1.msra.mxu1 %v12280_v1  ;;  %v5000_v47 = vpop.f32.mrf.mxu0  ;;  %v5076_v48 = vpop.f32.mrf.mxu1 }
 0x217   : > { %8140 = vmatprep.subr.mxu0 %v12290_v41  ;;  %8216 = vmatprep.subr.mxu1 %v12290_v41  ;;  %v5081_v13 = vadd.f32 %v5000_v47, %v4922_v44  ;;  %v5083_v1 = vadd.f32 %v5076_v48, %v4924_v12  ;;  %v12573_v41 = vld [vmem:[%s10834_s26 + $0xb8] sm:$0xff]  ;;  %v12823_v44 = vld [vmem:[%s13063_s1 + $0xc0] sm:$0xff] }
 0x218   : > { %8141 = vmatpush1.msra.mxu0 %v12297_v53  ;;  %8217 = vmatpush1.msra.mxu1 %v12297_v53  ;;  %v5002_v9 = vpop.f32.mrf.mxu0  ;;  %v5078_v33 = vpop.f32.mrf.mxu1  ;;  %v12830_v12 = vld [vmem:[%s10834_s26 + $0xc0] sm:$0xff] }
 0x219   : > { %8142 = vmatprep.subr.mxu0 %v12304_v21  ;;  %8218 = vmatprep.subr.mxu1 %v12304_v21  ;;  %v5082_v20 = vadd.f32 %v5002_v9, %v4923_v3  ;;  %v5084_v57 = vadd.f32 %v5078_v33, %v4925_v59  ;;  %v12580_v21 = vld [vmem:[%s13063_s1 + $0x78] sm:$0xff] }
 0x21a   : > { %8143 = vmatpush1.msra.mxu0 %v12311_v29  ;;  %8219 = vmatpush1.msra.mxu1 %v12311_v29  ;;  %v12587_v29 = vld [vmem:[%s13063_s1 + $0x70] sm:$0xff]  ;;  %v12837_v3 = vld [vmem:[%s13063_s1 + $0x138] sm:$0xff] }
 0x21b   : > { %8144 = vmatprep.subr.mxu0 %v12318_v43  ;;  %8220 = vmatprep.subr.mxu1 %v12318_v43  ;;  %v5085_v53 = vmax.f32 %v5081_v13, %v5082_v20  ;;  %v5086_v25 = vmax.f32 %v5083_v1, %v5084_v57  ;;  %v12845_v13 = vld [vmem:[%s13063_s1 + $0x130] sm:$0xff]  ;;  %v12855_v20 = vld [vmem:[%s13063_s1 + $0x128] sm:$0xff] }
 0x21c   : > { %8145 = vmatpush1.msra.mxu0 %v12325_v5  ;;  %8178 = vmatprep.mubr.f32.mxu0 %v10654_v38 }
 0x21d   : > { %8221 = vmatpush1.msra.mxu1 %v12325_v5  ;;  %8254 = vmatprep.mubr.f32.mxu1 %v10654_v38  ;;  %v5087_v43 = vmax.f32 %v5085_v53, %v5086_v25  ;;  %v12603_v5 = vld [vmem:[%s13063_s1 + $0x60] sm:$0xff] }
 0x21e   : > { %10495 = vmatmul.mubr.msk.f32.vlgmr.msra.gmra.mxu0 %vm329_vm0, %v12548_v18  ;;  %10497 = vmatmul.mubr.msk.f32.vlgmr.msra.gmra.mxu1 %vm329_vm0, %v12573_v41 }
 0x21f   : > { %8317 = vmatprep.subr.mxu0 %v12580_v21  ;;  %8392 = vmatprep.subr.mxu1 %v12580_v21  ;;  %v5088_v28 = vadd.f32 %v12465_v11, %v5087_v43  ;;  %v12862_v43 = vld [vmem:[%s13063_s1 + $0x120] sm:$0xff] }
 0x220   : > { %8318 = vmatpush1.msra.mxu0 %v12587_v29  ;;  %8393 = vmatpush1.msra.mxu1 %v12587_v29  ;;  %v12708_v46 = vpop.f32.mrf.mxu0  ;;  %v12710_v62 = vpop.f32.mrf.mxu1 }
 0x221   : > { %8319 = vmatprep.subr.mxu0 %v12596_v7  ;;  %8394 = vmatprep.subr.mxu1 %v12596_v7  ;;  %v5089_v40 = vmax.f32 %v5088_v28, 0.0 }
 0x222   : > { %8320 = vmatpush1.msra.mxu0 %v12603_v5  ;;  %8395 = vmatpush1.msra.mxu1 %v12603_v5  ;;  %v5256_v63 = vpop.f32.mrf.mxu1 }
 0x223   : > { %8321 = vmatprep.subr.mxu0 %v12611_v32  ;;  %8396 = vmatprep.subr.mxu1 %v12611_v32  ;;  %10302 = vst [vmem:[%s11791_s12 + $0x28] sm:$0xff] %v5089_v40 }
 0x224   : > { %8322 = vmatpush1.msra.mxu0 %v12618_v36  ;;  %8397 = vmatpush1.msra.mxu1 %v12618_v36 }
 0x225   : > { %8323 = vmatprep.subr.mxu0 %v12625_v52  ;;  %8398 = vmatprep.subr.mxu1 %v12625_v52 }
 0x226   : > { %8324 = vmatpush1.msra.mxu0 %v12632_v55  ;;  %8357 = vmatprep.mubr.f32.mxu0 %v10654_v38 }
 0x227   : > { %8399 = vmatpush1.msra.mxu1 %v12632_v55  ;;  %8432 = vmatprep.mubr.f32.mxu1 %v10654_v38 }
 0x228   : > { %10509 = vmatmul.mubr.msk.f32.vlgmr.msra.gmra.mxu0 %vm329_vm0, %v12450_v51  ;;  %10511 = vmatmul.mubr.msk.f32.vlgmr.msra.gmra.mxu1 %vm329_vm0, %v12548_v18 }
 0x229   : > { %8466 = vmatprep.subr.mxu0 %v12644_v0  ;;  %8537 = vmatprep.subr.mxu1 %v12644_v0 }
 0x22a   : > { %8467 = vmatpush1.msra.mxu0 %v12651_v35  ;;  %8538 = vmatpush1.msra.mxu1 %v12651_v35  ;;  %v5399_v2 = vpop.f32.mrf.mxu1 }
 0x22b   : > { %8468 = vmatprep.subr.mxu0 %v12660_v56  ;;  %8539 = vmatprep.subr.mxu1 %v12660_v56  ;;  %v5400_v9 = vadd.f32 %v5399_v2, %v12710_v62  ;;  %v12869_v62 = vld [vmem:[%s13063_s1 + $0x118] sm:$0xff]  ;;  %v12876_v2 = vld [vmem:[%s13063_s1 + $0x110] sm:$0xff] }
 0x22c   : > { %8469 = vmatpush1.msra.mxu0 %v12667_v14  ;;  %8540 = vmatpush1.msra.mxu1 %v12667_v14  ;;  %v5401_v19 = vpop.f32.mrf.mxu1 }
 0x22d   : > { %8470 = vmatprep.subr.mxu0 %v12674_v42  ;;  %8541 = vmatprep.subr.mxu1 %v12674_v42  ;;  %v5402_v1 = vadd.f32 %v5401_v19, %v5256_v63 }
 0x22e   : > { %8471 = vmatpush1.msra.mxu0 %v12681_v16  ;;  %8542 = vmatpush1.msra.mxu1 %v12681_v16 }
 0x22f   : > { %8472 = vmatprep.subr.mxu0 %v12688_v49  ;;  %8543 = vmatprep.subr.mxu1 %v12688_v49 }
 0x230   : > { %8473 = vmatpush1.msra.mxu0 %v12695_v34  ;;  %8506 = vmatprep.mubr.f32.mxu0 %v10654_v38 }
 0x231   : > { %8544 = vmatpush1.msra.mxu1 %v12695_v34  ;;  %8577 = vmatprep.mubr.f32.mxu1 %v10654_v38 }
 0x232   : > { %10512 = vmatmul.mubr.msk.f32.vlgmr.msra.gmra.mxu0 %vm329_vm0, %v12425_v15  ;;  %10513 = vmatmul.mubr.msk.f32.vlgmr.msra.gmra.mxu1 %vm329_vm0, %v12450_v51  ;;  %v12740_v15 = vld [vmem:[%s13063_s1 + $0x98] sm:$0xff]  ;;  %v5181_v51 = vpop.f32.mrf.mxu0 }
 0x233   : > { %8616 = vmatprep.subr.mxu0 %v12706_v45  ;;  %8691 = vmatprep.subr.mxu1 %v12706_v45 }
 0x234   : > { %8617 = vmatpush1.msra.mxu0 %v12717_v50  ;;  %8692 = vmatpush1.msra.mxu1 %v12717_v50  ;;  %v5328_v61 = vpop.f32.mrf.mxu0  ;;  %v5553_v4 = vpop.f32.mrf.mxu1 }
 0x235   : > { %8618 = vmatprep.subr.mxu0 %v12726_v54  ;;  %8693 = vmatprep.subr.mxu1 %v12726_v54  ;;  %v5329_v59 = vadd.f32 %v5328_v61, %v12708_v46  ;;  %v5560_v28 = vadd.f32 %v5553_v4, %v5400_v9  ;;  %v12883_v4 = vld [vmem:[%s13063_s1 + $0x108] sm:$0xff] }
 0x236   : > { %8619 = vmatpush1.msra.mxu0 %v12733_v60  ;;  %8694 = vmatpush1.msra.mxu1 %v12733_v60  ;;  %v5330_v17 = vpop.f32.mrf.mxu0  ;;  %v5555_v39 = vpop.f32.mrf.mxu1 }
 0x237   : > { %8620 = vmatprep.subr.mxu0 %v12740_v15  ;;  %8695 = vmatprep.subr.mxu1 %v12740_v15  ;;  %v5331_v33 = vadd.f32 %v5330_v17, %v5181_v51  ;;  %v5561_v46 = vadd.f32 %v5555_v39, %v5402_v1  ;;  %v12897_v1 = vld [vmem:[%s10834_s26 + $0xc8] sm:$0xff] }
 0x238   : > { %8621 = vmatpush1.msra.mxu0 %v12747_v6  ;;  %8696 = vmatpush1.msra.mxu1 %v12747_v6  ;;  %v5478_v24 = vpop.f32.mrf.mxu0 }
 0x239   : > { %8622 = vmatprep.subr.mxu0 %v12754_v58  ;;  %8697 = vmatprep.subr.mxu1 %v12754_v58  ;;  %v5558_v57 = vadd.f32 %v5478_v24, %v5329_v59 }
 0x23a   : > { %8623 = vmatpush1.msra.mxu0 %v12761_v8  ;;  %8656 = vmatprep.mubr.f32.mxu0 %v10654_v38  ;;  %v5480_v37 = vpop.f32.mrf.mxu0 }
 0x23b   : > { %8698 = vmatpush1.msra.mxu1 %v12761_v8  ;;  %8731 = vmatprep.mubr.f32.mxu1 %v10654_v38  ;;  %v5559_v40 = vadd.f32 %v5480_v37, %v5331_v33 }
 0x23c   : > { %10522 = vmatmul.mubr.msk.f32.vlgmr.msra.gmra.mxu0 %vm329_vm0, %v12548_v18  ;;  %10524 = vmatmul.mubr.msk.f32.vlgmr.msra.gmra.mxu1 %vm329_vm0, %v12573_v41 }
 0x23d   : > { %8774 = vmatprep.subr.mxu0 %v12772_v10  ;;  %8850 = vmatprep.subr.mxu1 %v12772_v10 }
 0x23e   : > { %8775 = vmatpush1.msra.mxu0 %v12779_v22  ;;  %8851 = vmatpush1.msra.mxu1 %v12779_v22  ;;  %v5636_v47 = vpop.f32.mrf.mxu0  ;;  %v5712_v48 = vpop.f32.mrf.mxu1 }
 0x23f   : > { %8776 = vmatprep.subr.mxu0 %v12788_v23  ;;  %8852 = vmatprep.subr.mxu1 %v12788_v23  ;;  %v5717_v51 = vadd.f32 %v5636_v47, %v5558_v57  ;;  %v5719_v17 = vadd.f32 %v5712_v48, %v5560_v28  ;;  %v12890_v48 = vld [vmem:[%s13063_s1 + $0x100] sm:$0xff] }
 0x240   : > { %8777 = vmatpush1.msra.mxu0 %v12795_v26  ;;  %8853 = vmatpush1.msra.mxu1 %v12795_v26  ;;  %v5638_v53 = vpop.f32.mrf.mxu0  ;;  %v5714_v25 = vpop.f32.mrf.mxu1 }
 0x241   : > { %8778 = vmatprep.subr.mxu0 %v12802_v27  ;;  %8854 = vmatprep.subr.mxu1 %v12802_v27  ;;  %v5718_v19 = vadd.f32 %v5638_v53, %v5559_v40  ;;  %v5720_v24 = vadd.f32 %v5714_v25, %v5561_v46 }
 0x242   : > { %8779 = vmatpush1.msra.mxu0 %v12809_v30  ;;  %8855 = vmatpush1.msra.mxu1 %v12809_v30 }
 0x243   : > { %8780 = vmatprep.subr.mxu0 %v12816_v31  ;;  %8856 = vmatprep.subr.mxu1 %v12816_v31 }
 0x244   : > { %8781 = vmatpush1.msra.mxu0 %v12823_v44  ;;  %8814 = vmatprep.mubr.f32.mxu0 %v10654_v38 }
 0x245   : > { %8857 = vmatpush1.msra.mxu1 %v12823_v44  ;;  %8890 = vmatprep.mubr.f32.mxu1 %v10654_v38 }
 0x246   : > { %10533 = vmatmul.mubr.msk.f32.vlgmr.msra.gmra.mxu0 %vm329_vm0, %v12573_v41  ;;  %10535 = vmatmul.mubr.msk.f32.vlgmr.msra.gmra.mxu1 %vm329_vm0, %v12830_v12 }
 0x247   : > { %8933 = vmatprep.subr.mxu0 %v12837_v3  ;;  %9009 = vmatprep.subr.mxu1 %v12837_v3 }
 0x248   : > { %8934 = vmatpush1.msra.mxu0 %v12845_v13  ;;  %9010 = vmatpush1.msra.mxu1 %v12845_v13  ;;  %v5795_v63 = vpop.f32.mrf.mxu0  ;;  %v5871_v61 = vpop.f32.mrf.mxu1 }
 0x249   : > { %8935 = vmatprep.subr.mxu0 %v12855_v20  ;;  %9011 = vmatprep.subr.mxu1 %v12855_v20  ;;  %v5876_v37 = vadd.f32 %v5795_v63, %v5717_v51  ;;  %v5878_v59 = vadd.f32 %v5871_v61, %v5719_v17 }
 0x24a   : > { %8936 = vmatpush1.msra.mxu0 %v12862_v43  ;;  %9012 = vmatpush1.msra.mxu1 %v12862_v43  ;;  %v5797_v39 = vpop.f32.mrf.mxu0  ;;  %v5873_v47 = vpop.f32.mrf.mxu1 }
 0x24b   : > { %8937 = vmatprep.subr.mxu0 %v12869_v62  ;;  %9013 = vmatprep.subr.mxu1 %v12869_v62  ;;  %v5877_v9 = vadd.f32 %v5797_v39, %v5718_v19  ;;  %v5879_v33 = vadd.f32 %v5873_v47, %v5720_v24 }
 0x24c   : > { %8938 = vmatpush1.msra.mxu0 %v12876_v2  ;;  %9014 = vmatpush1.msra.mxu1 %v12876_v2 }
 0x24d   : > { %8939 = vmatprep.subr.mxu0 %v12883_v4  ;;  %9015 = vmatprep.subr.mxu1 %v12883_v4  ;;  %v5880_v57 = vmax.f32 %v5876_v37, %v5877_v9  ;;  %v5881_v53 = vmax.f32 %v5878_v59, %v5879_v33 }
 0x24e   : > { %8940 = vmatpush1.msra.mxu0 %v12890_v48  ;;  %8973 = vmatprep.mubr.f32.mxu0 %v10654_v38 }
 0x24f   : > { %9016 = vmatpush1.msra.mxu1 %v12890_v48  ;;  %9049 = vmatprep.mubr.f32.mxu1 %v10654_v38  ;;  %v5882_v25 = vmax.f32 %v5880_v57, %v5881_v53 }
 0x250   : > { %10544 = vmatmul.mubr.msk.f32.vlgmr.msra.gmra.mxu0 %vm329_vm0, %v12830_v12  ;;  %10546 = vmatmul.mubr.msk.f32.vlgmr.msra.gmra.mxu1 %vm329_vm0, %v12897_v1 }
 0x251   : > { %9112 = vmatprep.subr.mxu0 %v12580_v21  ;;  %9187 = vmatprep.subr.mxu1 %v12580_v21  ;;  %v5883_v28 = vadd.f32 %v12465_v11, %v5882_v25 }
 0x252   : > { %9113 = vmatpush1.msra.mxu0 %v12587_v29  ;;  %9188 = vmatpush1.msra.mxu1 %v12587_v29  ;;  %v5974_v21 = vpop.f32.mrf.mxu0  ;;  %v6049_v29 = vpop.f32.mrf.mxu1 }
 0x253   : > { %9114 = vmatprep.subr.mxu0 %v12596_v7  ;;  %9189 = vmatprep.subr.mxu1 %v12596_v7  ;;  %v5884_v40 = vmax.f32 %v5883_v28, 0.0 }
 0x254   : > { %9115 = vmatpush1.msra.mxu0 %v12603_v5  ;;  %9190 = vmatpush1.msra.mxu1 %v12603_v5  ;;  %v5976_v7 = vpop.f32.mrf.mxu0  ;;  %v6051_v5 = vpop.f32.mrf.mxu1 }
 0x255   : > { %9116 = vmatprep.subr.mxu0 %v12611_v32  ;;  %9191 = vmatprep.subr.mxu1 %v12611_v32  ;;  %10351 = vst [vmem:[%s11791_s12 + $0x30] sm:$0xff] %v5884_v40 }
 0x256   : > { %9117 = vmatpush1.msra.mxu0 %v12618_v36  ;;  %9192 = vmatpush1.msra.mxu1 %v12618_v36 }
 0x257   : > { %9118 = vmatprep.subr.mxu0 %v12625_v52  ;;  %9193 = vmatprep.subr.mxu1 %v12625_v52 }
 0x258   : > { %9119 = vmatpush1.msra.mxu0 %v12632_v55  ;;  %9152 = vmatprep.mubr.f32.mxu0 %v10654_v38 }
 0x259   : > { %9194 = vmatpush1.msra.mxu1 %v12632_v55  ;;  %9227 = vmatprep.mubr.f32.mxu1 %v10654_v38 }
 0x25a   : > { %10558 = vmatmul.mubr.msk.f32.vlgmr.msra.gmra.mxu0 %vm329_vm0, %v12573_v41  ;;  %10560 = vmatmul.mubr.msk.f32.vlgmr.msra.gmra.mxu1 %vm329_vm0, %v12830_v12 }
 0x25b   : > { %9261 = vmatprep.subr.mxu0 %v12644_v0  ;;  %9332 = vmatprep.subr.mxu1 %v12644_v0 }
 0x25c   : > { %9262 = vmatpush1.msra.mxu0 %v12651_v35  ;;  %9333 = vmatpush1.msra.mxu1 %v12651_v35 }
 0x25d   : > { %9263 = vmatprep.subr.mxu0 %v12660_v56  ;;  %9334 = vmatprep.subr.mxu1 %v12660_v56 }
 0x25e   : > { %9264 = vmatpush1.msra.mxu0 %v12667_v14  ;;  %9335 = vmatpush1.msra.mxu1 %v12667_v14 }
 0x25f   : > { %9265 = vmatprep.subr.mxu0 %v12674_v42  ;;  %9336 = vmatprep.subr.mxu1 %v12674_v42  ;;  %v10583_v42 = vld [vmem:[%s10834_s26 + $0xd0] sm:$0xff] }
 0x260   : > { %9266 = vmatpush1.msra.mxu0 %v12681_v16  ;;  %9337 = vmatpush1.msra.mxu1 %v12681_v16 }
 0x261   : > { %9267 = vmatprep.subr.mxu0 %v12688_v49  ;;  %9338 = vmatprep.subr.mxu1 %v12688_v49 }
 0x262   : > { %9268 = vmatpush1.msra.mxu0 %v12695_v34  ;;  %9301 = vmatprep.mubr.f32.mxu0 %v10654_v38 }
 0x263   : > { %9339 = vmatpush1.msra.mxu1 %v12695_v34  ;;  %9372 = vmatprep.mubr.f32.mxu1 %v10654_v38 }
 0x264   : > { %10561 = vmatmul.mubr.msk.f32.vlgmr.msra.gmra.mxu0 %vm329_vm0, %v12548_v18  ;;  %10562 = vmatmul.mubr.msk.f32.vlgmr.msra.gmra.mxu1 %vm329_vm0, %v12573_v41  ;;  %v6123_v18 = vpop.f32.mrf.mxu0  ;;  %v6194_v41 = vpop.f32.mrf.mxu1 }
 0x265   : > { %9411 = vmatprep.subr.mxu0 %v12706_v45  ;;  %9486 = vmatprep.subr.mxu1 %v12706_v45  ;;  %v6124_v16 = vadd.f32 %v6123_v18, %v5974_v21  ;;  %v6195_v49 = vadd.f32 %v6194_v41, %v6049_v29 }
 0x266   : > { %9412 = vmatpush1.msra.mxu0 %v12717_v50  ;;  %9487 = vmatpush1.msra.mxu1 %v12717_v50  ;;  %v6125_v32 = vpop.f32.mrf.mxu0  ;;  %v6196_v36 = vpop.f32.mrf.mxu1 }
 0x267   : > { %9413 = vmatprep.subr.mxu0 %v12726_v54  ;;  %9488 = vmatprep.subr.mxu1 %v12726_v54  ;;  %v6126_v34 = vadd.f32 %v6125_v32, %v5976_v7  ;;  %v6197_v45 = vadd.f32 %v6196_v36, %v6051_v5 }
 0x268   : > { %9414 = vmatpush1.msra.mxu0 %v12733_v60  ;;  %9489 = vmatpush1.msra.mxu1 %v12733_v60  ;;  %v6273_v52 = vpop.f32.mrf.mxu0  ;;  %v6348_v55 = vpop.f32.mrf.mxu1 }
 0x269   : > { %9415 = vmatprep.subr.mxu0 %v12740_v15  ;;  %9490 = vmatprep.subr.mxu1 %v12740_v15  ;;  %v6353_v50 = vadd.f32 %v6273_v52, %v6124_v16  ;;  %v6355_v15 = vadd.f32 %v6348_v55, %v6195_v49 }
 0x26a   : > { %9416 = vmatpush1.msra.mxu0 %v12747_v6  ;;  %9491 = vmatpush1.msra.mxu1 %v12747_v6  ;;  %v6275_v0 = vpop.f32.mrf.mxu0  ;;  %v6350_v35 = vpop.f32.mrf.mxu1 }
 0x26b   : > { %9417 = vmatprep.subr.mxu0 %v12754_v58  ;;  %9492 = vmatprep.subr.mxu1 %v12754_v58  ;;  %v6354_v6 = vadd.f32 %v6275_v0, %v6126_v34  ;;  %v6356_v58 = vadd.f32 %v6350_v35, %v6197_v45  ;;  %v13023_v45 = vld [vmem:[%s13064_s2] ss:$0 sm:$0xff] }
 0x26c   : > { %9418 = vmatpush1.msra.mxu0 %v12761_v8  ;;  %9451 = vmatprep.mubr.f32.mxu0 %v10654_v38 }
 0x26d   : > { %9493 = vmatpush1.msra.mxu1 %v12761_v8  ;;  %9526 = vmatprep.mubr.f32.mxu1 %v10654_v38 }
 0x26e   : > { %10571 = vmatmul.mubr.msk.f32.vlgmr.msra.gmra.mxu0 %vm329_vm0, %v12830_v12  ;;  %10573 = vmatmul.mubr.msk.f32.vlgmr.msra.gmra.mxu1 %vm329_vm0, %v12897_v1 }
 0x26f   : > { %9569 = vmatprep.subr.mxu0 %v12772_v10  ;;  %9645 = vmatprep.subr.mxu1 %v12772_v10 }
 0x270   : > { %9570 = vmatpush1.msra.mxu0 %v12779_v22  ;;  %9646 = vmatpush1.msra.mxu1 %v12779_v22  ;;  %v6431_v56 = vpop.f32.mrf.mxu0  ;;  %v6507_v14 = vpop.f32.mrf.mxu1 }
 0x271   : > { %9571 = vmatprep.subr.mxu0 %v12788_v23  ;;  %9647 = vmatprep.subr.mxu1 %v12788_v23  ;;  %v6512_v8 = vadd.f32 %v6431_v56, %v6353_v50  ;;  %v6514_v23 = vadd.f32 %v6507_v14, %v6355_v15 }
 0x272   : > { %9572 = vmatpush1.msra.mxu0 %v12795_v26  ;;  %9648 = vmatpush1.msra.mxu1 %v12795_v26  ;;  %v6433_v54 = vpop.f32.mrf.mxu0  ;;  %v6509_v60 = vpop.f32.mrf.mxu1 }
 0x273   : > { %9573 = vmatprep.subr.mxu0 %v12802_v27  ;;  %9649 = vmatprep.subr.mxu1 %v12802_v27  ;;  %v6513_v26 = vadd.f32 %v6433_v54, %v6354_v6  ;;  %v6515_v27 = vadd.f32 %v6509_v60, %v6356_v58 }
 0x274   : > { %9574 = vmatpush1.msra.mxu0 %v12809_v30  ;;  %9650 = vmatpush1.msra.mxu1 %v12809_v30 }
 0x275   : > { %9575 = vmatprep.subr.mxu0 %v12816_v31  ;;  %9651 = vmatprep.subr.mxu1 %v12816_v31 }
 0x276   : > { %9576 = vmatpush1.msra.mxu0 %v12823_v44  ;;  %9609 = vmatprep.mubr.f32.mxu0 %v10654_v38 }
 0x277   : > { %9652 = vmatpush1.msra.mxu1 %v12823_v44  ;;  %9685 = vmatprep.mubr.f32.mxu1 %v10654_v38 }
 0x278   : > { %10582 = vmatmul.mubr.msk.f32.vlgmr.msra.gmra.mxu0 %vm329_vm0, %v12897_v1  ;;  %10584 = vmatmul.mubr.msk.f32.vlgmr.msra.gmra.mxu1 %vm329_vm0, %v10583_v42 }
 0x279   : > { %9728 = vmatprep.subr.mxu0 %v12837_v3  ;;  %9804 = vmatprep.subr.mxu1 %v12837_v3 }
 0x27a   : > { %9729 = vmatpush1.msra.mxu0 %v12845_v13  ;;  %9805 = vmatpush1.msra.mxu1 %v12845_v13  ;;  %v6590_v10 = vpop.f32.mrf.mxu0  ;;  %v6666_v22 = vpop.f32.mrf.mxu1 }
 0x27b   : > { %9730 = vmatprep.subr.mxu0 %v12855_v20  ;;  %9806 = vmatprep.subr.mxu1 %v12855_v20  ;;  %v6671_v30 = vadd.f32 %v6590_v10, %v6512_v8  ;;  %v6673_v12 = vadd.f32 %v6666_v22, %v6514_v23  ;;  %v10594_v20 = vld [vmem:[%s10834_s26 + $0xd8] sm:$0xff] }
 0x27c   : > { %9731 = vmatpush1.msra.mxu0 %v12862_v43  ;;  %9807 = vmatpush1.msra.mxu1 %v12862_v43  ;;  %v6592_v31 = vpop.f32.mrf.mxu0  ;;  %v6668_v44 = vpop.f32.mrf.mxu1 }
 0x27d   : > { %9732 = vmatprep.subr.mxu0 %v12869_v62  ;;  %9808 = vmatprep.subr.mxu1 %v12869_v62  ;;  %v6672_v3 = vadd.f32 %v6592_v31, %v6513_v26  ;;  %v6674_v13 = vadd.f32 %v6668_v44, %v6515_v27 }
 0x27e   : > { %9733 = vmatpush1.msra.mxu0 %v12876_v2  ;;  %9809 = vmatpush1.msra.mxu1 %v12876_v2 }
 0x27f   : > { %9734 = vmatprep.subr.mxu0 %v12883_v4  ;;  %9810 = vmatprep.subr.mxu1 %v12883_v4  ;;  %v6675_v43 = vmax.f32 %v6671_v30, %v6672_v3  ;;  %v6676_v46 = vmax.f32 %v6673_v12, %v6674_v13 }
 0x280   : > { %9735 = vmatpush1.msra.mxu0 %v12890_v48  ;;  %9768 = vmatprep.mubr.f32.mxu0 %v10654_v38 }
 0x281   : > { %9811 = vmatpush1.msra.mxu1 %v12890_v48  ;;  %9844 = vmatprep.mubr.f32.mxu1 %v10654_v38  ;;  %v6677_v62 = vmax.f32 %v6675_v43, %v6676_v46 }
 0x282   : > { %10593 = vmatmul.mubr.msk.f32.vlgmr.msra.gmra.mxu0 %vm329_vm0, %v10583_v42  ;;  %10595 = vmatmul.mubr.msk.f32.vlgmr.msra.gmra.mxu1 %vm329_vm0, %v10594_v20 }
 0x283   : > { %v6678_v51 = vadd.f32 %v12465_v11, %v6677_v62 }
 0x284   : > { %v6769_v61 = vpop.f32.mrf.mxu0  ;;  %v6844_v2 = vpop.f32.mrf.mxu1 }
 0x285   : > { %v6679_v63 = vmax.f32 %v6678_v51, 0.0 }
 0x286   : > { %v6771_v17 = vpop.f32.mrf.mxu0  ;;  %v6846_v19 = vpop.f32.mrf.mxu1 }
 0x287   : > { %10400 = vst [vmem:[%s11791_s12 + $0x38] sm:$0xff] %v6679_v63 }
 0x28e   : > { %v6918_v24 = vpop.f32.mrf.mxu0  ;;  %v6989_v4 = vpop.f32.mrf.mxu1 }
 0x28f   : > { %v6919_v1 = vadd.f32 %v6918_v24, %v6769_v61  ;;  %v6990_v57 = vadd.f32 %v6989_v4, %v6844_v2 }
 0x290   : > { %v6920_v37 = vpop.f32.mrf.mxu0  ;;  %v6991_v39 = vpop.f32.mrf.mxu1 }
 0x291   : > { %v6921_v53 = vadd.f32 %v6920_v37, %v6771_v17  ;;  %v6992_v11 = vadd.f32 %v6991_v39, %v6846_v19 }
 0x298   : > { %v7068_v47 = vpop.f32.mrf.mxu0  ;;  %v7143_v48 = vpop.f32.mrf.mxu1 }
 0x299   : > { %v7148_v40 = vadd.f32 %v7068_v47, %v6919_v1  ;;  %v7150_v21 = vadd.f32 %v7143_v48, %v6990_v57 }
 0x29a   : > { %v7070_v38 = vpop.f32.mrf.mxu0  ;;  %v7145_v59 = vpop.f32.mrf.mxu1 }
 0x29b   : > { %v7149_v29 = vadd.f32 %v7070_v38, %v6921_v53  ;;  %v7151_v7 = vadd.f32 %v7145_v59, %v6992_v11 }
 0x2a2   : > { %v7226_v9 = vpop.f32.mrf.mxu0  ;;  %v7302_v33 = vpop.f32.mrf.mxu1 }
 0x2a3   : > { %v7307_v41 = vadd.f32 %v7226_v9, %v7148_v40  ;;  %v7309_v32 = vadd.f32 %v7302_v33, %v7150_v21 }
 0x2a4   : > { %v7228_v25 = vpop.f32.mrf.mxu0  ;;  %v7304_v28 = vpop.f32.mrf.mxu1 }
 0x2a5   : > { %v7308_v36 = vadd.f32 %v7228_v25, %v7149_v29  ;;  %v7310_v52 = vadd.f32 %v7304_v28, %v7151_v7 }
 0x2ac   : > { %v7385_v5 = vpop.f32.mrf.mxu0  ;;  %v7461_v18 = vpop.f32.mrf.mxu1 }
 0x2ad   : > { %v7466_v35 = vadd.f32 %v7385_v5, %v7307_v41  ;;  %v7468_v56 = vadd.f32 %v7461_v18, %v7309_v32 }
 0x2ae   : > { %v7387_v55 = vpop.f32.mrf.mxu0  ;;  %v7463_v0 = vpop.f32.mrf.mxu1 }
 0x2af   : > { %v7467_v14 = vadd.f32 %v7387_v55, %v7308_v36  ;;  %v7469_v42 = vadd.f32 %v7463_v0, %v7310_v52 }
 0x2b1   : > { %v7470_v16 = vmax.f32 %v7466_v35, %v7467_v14  ;;  %v7471_v49 = vmax.f32 %v7468_v56, %v7469_v42 }
 0x2b3   : > { %v7472_v34 = vmax.f32 %v7470_v16, %v7471_v49 }
 0x2b5   : > { %v7473_v50 = vadd.f32 %v13023_v45, %v7472_v34 }
 0x2b6   : > { %v7564_v60 = vpop.f32.mrf.mxu0  ;;  %v7639_v15 = vpop.f32.mrf.mxu1 }
 0x2b7   : > { %v7474_v54 = vmax.f32 %v7473_v50, 0.0 }
 0x2b8   : > { %v7566_v6 = vpop.f32.mrf.mxu0  ;;  %v7641_v58 = vpop.f32.mrf.mxu1 }
 0x2b9   : > { %10449 = vst [vmem:[%s11791_s12 + $0x40] sm:$0xff] %v7474_v54 }
 0x2c0   : > { %v7713_v8 = vpop.f32.mrf.mxu0  ;;  %v7784_v10 = vpop.f32.mrf.mxu1 }
 0x2c1   : > { %v7714_v3 = vadd.f32 %v7713_v8, %v7564_v60  ;;  %v7785_v13 = vadd.f32 %v7784_v10, %v7639_v15 }
 0x2c2   : > { %v7715_v22 = vpop.f32.mrf.mxu0  ;;  %v7786_v23 = vpop.f32.mrf.mxu1 }
 0x2c3   : > { %v7716_v20 = vadd.f32 %v7715_v22, %v7566_v6  ;;  %v7787_v43 = vadd.f32 %v7786_v23, %v7641_v58 }
 0x2ca   : > { %v7863_v26 = vpop.f32.mrf.mxu0  ;;  %v7938_v27 = vpop.f32.mrf.mxu1 }
 0x2cb   : > { %v7943_v51 = vadd.f32 %v7863_v26, %v7714_v3  ;;  %v7945_v63 = vadd.f32 %v7938_v27, %v7785_v13 }
 0x2cc   : > { %v7865_v30 = vpop.f32.mrf.mxu0  ;;  %v7940_v31 = vpop.f32.mrf.mxu1 }
 0x2cd   : > { %v7944_v61 = vadd.f32 %v7865_v30, %v7716_v20  ;;  %v7946_v2 = vadd.f32 %v7940_v31, %v7787_v43 }
 0x2d4   : > { %v8021_v44 = vpop.f32.mrf.mxu0  ;;  %v8097_v12 = vpop.f32.mrf.mxu1 }
 0x2d5   : > { %v8102_v24 = vadd.f32 %v8021_v44, %v7943_v51  ;;  %v8104_v4 = vadd.f32 %v8097_v12, %v7945_v63 }
 0x2d6   : > { %v8023_v46 = vpop.f32.mrf.mxu0  ;;  %v8099_v62 = vpop.f32.mrf.mxu1 }
 0x2d7   : > { %v8103_v37 = vadd.f32 %v8023_v46, %v7944_v61  ;;  %v8105_v39 = vadd.f32 %v8099_v62, %v7946_v2 }
 0x2de   : > { %v8180_v17 = vpop.f32.mrf.mxu0  ;;  %v8256_v19 = vpop.f32.mrf.mxu1 }
 0x2df   : > { %v8261_v38 = vadd.f32 %v8180_v17, %v8102_v24  ;;  %v8263_v59 = vadd.f32 %v8256_v19, %v8104_v4 }
 0x2e0   : > { %v8182_v47 = vpop.f32.mrf.mxu0  ;;  %v8258_v48 = vpop.f32.mrf.mxu1 }
 0x2e1   : > { %v8262_v9 = vadd.f32 %v8182_v47, %v8103_v37  ;;  %v8264_v33 = vadd.f32 %v8258_v48, %v8105_v39 }
 0x2e3   : > { %v8265_v1 = vmax.f32 %v8261_v38, %v8262_v9  ;;  %v8266_v57 = vmax.f32 %v8263_v59, %v8264_v33 }
 0x2e5   : > { %v8267_v53 = vmax.f32 %v8265_v1, %v8266_v57 }
 0x2e7   : > { %v8268_v11 = vadd.f32 %v13023_v45, %v8267_v53 }
 0x2e8   : > { %v8359_v28 = vpop.f32.mrf.mxu0  ;;  %v8434_v40 = vpop.f32.mrf.mxu1 }
 0x2e9   : > { %v8269_v25 = vmax.f32 %v8268_v11, 0.0 }
 0x2ea   : > { %v8361_v21 = vpop.f32.mrf.mxu0  ;;  %v8436_v29 = vpop.f32.mrf.mxu1 }
 0x2eb   : > { %10498 = vst [vmem:[%s11791_s12 + $0x48] sm:$0xff] %v8269_v25 }
 0x2f2   : > { %v8508_v7 = vpop.f32.mrf.mxu0  ;;  %v8579_v5 = vpop.f32.mrf.mxu1 }
 0x2f3   : > { %v8509_v56 = vadd.f32 %v8508_v7, %v8359_v28  ;;  %v8580_v14 = vadd.f32 %v8579_v5, %v8434_v40 }
 0x2f4   : > { %v8510_v18 = vpop.f32.mrf.mxu0  ;;  %v8581_v41 = vpop.f32.mrf.mxu1 }
 0x2f5   : > { %v8511_v42 = vadd.f32 %v8510_v18, %v8361_v21  ;;  %v8582_v16 = vadd.f32 %v8581_v41, %v8436_v29 }
 0x2fc   : > { %v8658_v32 = vpop.f32.mrf.mxu0  ;;  %v8733_v36 = vpop.f32.mrf.mxu1 }
 0x2fd   : > { %v8738_v50 = vadd.f32 %v8658_v32, %v8509_v56  ;;  %v8740_v54 = vadd.f32 %v8733_v36, %v8580_v14 }
 0x2fe   : > { %v8660_v52 = vpop.f32.mrf.mxu0  ;;  %v8735_v55 = vpop.f32.mrf.mxu1 }
 0x2ff   : > { %v8739_v60 = vadd.f32 %v8660_v52, %v8511_v42  ;;  %v8741_v15 = vadd.f32 %v8735_v55, %v8582_v16 }
 0x306   : > { %v8816_v0 = vpop.f32.mrf.mxu0  ;;  %v8892_v35 = vpop.f32.mrf.mxu1 }
 0x307   : > { %v8897_v8 = vadd.f32 %v8816_v0, %v8738_v50  ;;  %v8899_v10 = vadd.f32 %v8892_v35, %v8740_v54  ;;  %v9923_v50 = vld [vmem:[%s11791_s12 + $0x8] sm:$0xff] (%p10705_p5)  ;;  %v9927_v54 = vld [vmem:[%s11791_s12 + $0x18] sm:$0xff] (%p10705_p5) }
 0x308   : > { %v8818_v49 = vpop.f32.mrf.mxu0  ;;  %v8894_v34 = vpop.f32.mrf.mxu1  ;;  %9924 = vst [vmem:[%s9870_s20 + $0x10] sm:$0xff] (%p10705_p5), %v9923_v50  ;;  %9928 = vst [vmem:[%s9870_s20 + $0x30] sm:$0xff] (%p10705_p5), %v9927_v54 }
 0x309   : > { %v8898_v22 = vadd.f32 %v8818_v49, %v8739_v60  ;;  %v8900_v23 = vadd.f32 %v8894_v34, %v8741_v15  ;;  %v9921_v34 = vld [vmem:[%s11791_s12] sm:$0xff] (%p10705_p5)  ;;  %v9931_v15 = vld [vmem:[%s11791_s12 + $0x28] sm:$0xff] (%p10705_p5) }
 0x30a   : > { %v9929_v60 = vld [vmem:[%s11791_s12 + $0x20] sm:$0xff] (%p10705_p5)  ;;  %9922 = vst [vmem:[%s9870_s20] sm:$0xff] (%p10705_p5), %v9921_v34  ;;  %9932 = vst [vmem:[%s9870_s20 + $0x50] sm:$0xff] (%p10705_p5), %v9931_v15 }
 0x30b   : > { %9930 = vst [vmem:[%s9870_s20 + $0x40] sm:$0xff] (%p10705_p5), %v9929_v60 }
 0x310   : > { %v8975_v6 = vpop.f32.mrf.mxu0  ;;  %v9051_v58 = vpop.f32.mrf.mxu1 }
 0x311   : > { %v9056_v30 = vadd.f32 %v8975_v6, %v8897_v8  ;;  %v9058_v31 = vadd.f32 %v9051_v58, %v8899_v10  ;;  %v9933_v6 = vld [vmem:[%s11791_s12 + $0x30] sm:$0xff] (%p10705_p5)  ;;  %v9935_v58 = vld [vmem:[%s11791_s12 + $0x38] sm:$0xff] (%p10705_p5)  ;;  %v9937_v8 = vld [vmem:[%s11791_s12 + $0x40] sm:$0xff] (%p10705_p5) }
 0x312   : > { %v8977_v26 = vpop.f32.mrf.mxu0  ;;  %v9053_v27 = vpop.f32.mrf.mxu1  ;;  %9934 = vst [vmem:[%s9870_s20 + $0x60] sm:$0xff] (%p10705_p5), %v9933_v6  ;;  %9936 = vst [vmem:[%s9870_s20 + $0x70] sm:$0xff] (%p10705_p5), %v9935_v58  ;;  %v9939_v10 = vld [vmem:[%s11791_s12 + $0x48] sm:$0xff] (%p10705_p5) }
 0x313   : > { %v9057_v44 = vadd.f32 %v8977_v26, %v8898_v22  ;;  %v9059_v12 = vadd.f32 %v9053_v27, %v8900_v23  ;;  %9938 = vst [vmem:[%s9870_s20 + $0x80] sm:$0xff] (%p10705_p5), %v9937_v8  ;;  %9940 = vst [vmem:[%s9870_s20 + $0x90] sm:$0xff] (%p10705_p5), %v9939_v10 }
 0x315   : > { %v9060_v3 = vmax.f32 %v9056_v30, %v9057_v44  ;;  %v9061_v13 = vmax.f32 %v9058_v31, %v9059_v12 }
 0x317   : > { %v9062_v20 = vmax.f32 %v9060_v3, %v9061_v13 }
 0x319   : > { %v9063_v43 = vadd.f32 %v13023_v45, %v9062_v20 }
 0x31a   : > { %v9154_v62 = vpop.f32.mrf.mxu0  ;;  %v9229_v51 = vpop.f32.mrf.mxu1 }
 0x31b   : > { %v9064_v46 = vmax.f32 %v9063_v43, 0.0 }
 0x31c   : > { %v9156_v63 = vpop.f32.mrf.mxu0  ;;  %v9231_v61 = vpop.f32.mrf.mxu1 }
 0x31d   : > { %10547 = vst [vmem:[%s11791_s12 + $0x50] sm:$0xff] %v9064_v46 }
 0x324   : > { %v9303_v2 = vpop.f32.mrf.mxu0  ;;  %v9374_v17 = vpop.f32.mrf.mxu1  ;;  %v9941_v22 = vld [vmem:[%s11791_s12 + $0x50] sm:$0xff] (%p10705_p5) }
 0x325   : > { %v9304_v59 = vadd.f32 %v9303_v2, %v9154_v62  ;;  %v9375_v9 = vadd.f32 %v9374_v17, %v9229_v51  ;;  %9942 = vst [vmem:[%s9870_s20 + $0xa0] sm:$0xff] (%p10705_p5), %v9941_v22 }
 0x326   : > { %v9305_v19 = vpop.f32.mrf.mxu0  ;;  %v9376_v24 = vpop.f32.mrf.mxu1 }
 0x327   : > { %v9306_v33 = vadd.f32 %v9305_v19, %v9156_v63  ;;  %v9377_v1 = vadd.f32 %v9376_v24, %v9231_v61 }
 0x32e   : > { %v9453_v4 = vpop.f32.mrf.mxu0  ;;  %v9528_v37 = vpop.f32.mrf.mxu1 }
 0x32f   : > { %v9533_v11 = vadd.f32 %v9453_v4, %v9304_v59  ;;  %v9535_v25 = vadd.f32 %v9528_v37, %v9375_v9 }
 0x330   : > { %v9455_v39 = vpop.f32.mrf.mxu0  ;;  %v9530_v47 = vpop.f32.mrf.mxu1 }
 0x331   : > { %v9534_v28 = vadd.f32 %v9455_v39, %v9306_v33  ;;  %v9536_v40 = vadd.f32 %v9530_v47, %v9377_v1 }
 0x338   : > { %v9611_v48 = vpop.f32.mrf.mxu0  ;;  %v9687_v38 = vpop.f32.mrf.mxu1 }
 0x339   : > { %v9692_v7 = vadd.f32 %v9611_v48, %v9533_v11  ;;  %v9694_v5 = vadd.f32 %v9687_v38, %v9535_v25 }
 0x33a   : > { %v9613_v57 = vpop.f32.mrf.mxu0  ;;  %v9689_v53 = vpop.f32.mrf.mxu1 }
 0x33b   : > { %v9693_v18 = vadd.f32 %v9613_v57, %v9534_v28  ;;  %v9695_v41 = vadd.f32 %v9689_v53, %v9536_v40 }
 0x342   : > { %v9770_v21 = vpop.f32.mrf.mxu0  ;;  %v9846_v29 = vpop.f32.mrf.mxu1 }
 0x343   : > { %v9851_v52 = vadd.f32 %v9770_v21, %v9692_v7  ;;  %v9853_v55 = vadd.f32 %v9846_v29, %v9694_v5 }
 0x344   : > { %v9772_v32 = vpop.f32.mrf.mxu0  ;;  %v9848_v36 = vpop.f32.mrf.mxu1 }
 0x345   : > { %v9852_v0 = vadd.f32 %v9772_v32, %v9693_v18  ;;  %v9854_v35 = vadd.f32 %v9848_v36, %v9695_v41 }
 0x347   : > { %v9855_v56 = vmax.f32 %v9851_v52, %v9852_v0  ;;  %v9856_v14 = vmax.f32 %v9853_v55, %v9854_v35 }
 0x349   : > { %v9857_v42 = vmax.f32 %v9855_v56, %v9856_v14 }
 0x34b   : > { %v9858_v16 = vadd.f32 %v13023_v45, %v9857_v42  ;;  %9868 = sbr.rel (!%p10705_p5) target bundleno = 856 (0x358), region = 74  ;;  %v9925_v45 = vld [vmem:[%s11791_s12 + $0x10] sm:$0xff] (%p10705_p5) }
 0x34c   : > { %9926 = vst [vmem:[%s9870_s20 + $0x20] sm:$0xff] (%p10705_p5), %v9925_v45 }
 0x34d   : > { %v9859_v49 = vmax.f32 %v9858_v16, 0.0 }
 0x34f   : > { %10596 = vst [vmem:[%s11791_s12 + $0x58] sm:$0xff] %v9859_v49 }
 0x356   : > { %v9943_v23 = vld [vmem:[%s11791_s12 + $0x58] sm:$0xff] }
 0x357   : > { %9944 = vst [vmem:[%s9870_s20 + $0xb0] sm:$0xff] %v9943_v23 }
 0x358 PF: > { %p10_p10 = scmp.ge.s32.totalorder %s10692_s16, 4   ;;  %s13087_s12 = smov %s10648_s13 }
 0x359   : > { %s13088_s13 = smov %s10703_s19  ;;  %s13089_s14 = smov %s10692_s16 }
 0x35a   :  { %12 = sbr.rel (!%p10_p10) target bundleno = 2 (0x2), region = 185 }

</bundles_post_ra>
